<compile_context>
chip_gen: v5e
topology: v5e:2x2
jax: 0.10.0
libtpu: 0.0.40
codegen_flags: <defaults>
</compile_context>

<pallas_src>
import functools

import jax
import jax.numpy as jnp
from jax.experimental import pallas as pl
from jax.experimental.pallas import tpu as pltpu


# ----------------------------------------------------------------------------
# helpers
# ----------------------------------------------------------------------------
def _round_up(x, m):
    return (x + m - 1) // m * m


def _pick_tile(dim, candidates):
    for c in candidates:
        if dim % c == 0:
            return c
    return candidates[-1]


# ----------------------------------------------------------------------------
# Tiled Pallas matmul with fused bias / residual / ReLU epilogue.
#   A:(M,K) bf16   B:(K,N) bf16   bias:(1,N) f32   res:(M,N) bf16 (optional)
#   out = relu(A @ B + bias [+ res]),  f32 accumulation on the MXU.
# ----------------------------------------------------------------------------
def _matmul_kernel(a_ref, b_ref, bias_ref, *rest, relu, has_res):
    if has_res:
        res_ref, o_ref, acc_ref = rest
    else:
        res_ref = None
        o_ref, acc_ref = rest

    k = pl.program_id(2)

    @pl.when(k == 0)
    def _init():
        acc_ref[...] = jnp.zeros_like(acc_ref)

    acc_ref[...] += jnp.dot(a_ref[...], b_ref[...],
                            preferred_element_type=jnp.float32)

    @pl.when(k == pl.num_programs(2) - 1)
    def _epilogue():
        y = acc_ref[...] + bias_ref[...]
        if has_res:
            y = y + res_ref[...].astype(jnp.float32)
        if relu:
            y = jnp.maximum(y, 0.0)
        o_ref[...] = y.astype(o_ref.dtype)


def matmul_bias(a, b, bias, residual=None, relu=True):
    """a (M,K) bf16, b (K,N) bf16 with K,N multiples of 128, bias (1,N) f32."""
    M, K = a.shape
    K2, N = b.shape
    assert K2 == K and K % 128 == 0 and N % 128 == 0

    # M tiling: big tiles for pipelining, pad M up so the grid divides evenly.
    if M >= 512:
        tm = 512
        m_pad = _round_up(M, tm)
    else:
        tm = _round_up(M, 16)      # bf16 sublane packing
        m_pad = tm
    if m_pad != M:
        a = jnp.pad(a, ((0, m_pad - M), (0, 0)))
        if residual is not None:
            residual = jnp.pad(residual, ((0, m_pad - M), (0, 0)))

    tn = _pick_tile(N, (256, 128))
    tk = _pick_tile(K, (512, 384, 256, 128))
    grid = (m_pad // tm, N // tn, K // tk)

    has_res = residual is not None
    kernel = functools.partial(_matmul_kernel, relu=relu, has_res=has_res)

    in_specs = [
        pl.BlockSpec((tm, tk), lambda i, j, k: (i, k)),
        pl.BlockSpec((tk, tn), lambda i, j, k: (k, j)),
        pl.BlockSpec((1, tn), lambda i, j, k: (0, j)),
    ]
    inputs = [a, b, bias]
    if has_res:
        in_specs.append(pl.BlockSpec((tm, tn), lambda i, j, k: (i, j)))
        inputs.append(residual)

    out = pl.pallas_call(
        kernel,
        out_shape=jax.ShapeDtypeStruct((m_pad, N), jnp.bfloat16),
        grid=grid,
        in_specs=in_specs,
        out_specs=pl.BlockSpec((tm, tn), lambda i, j, k: (i, j)),
        scratch_shapes=[pltpu.VMEM((tm, tn), jnp.float32)],
        compiler_params=pltpu.CompilerParams(
            dimension_semantics=("parallel", "parallel", "arbitrary")),
    )(*inputs)
    return out[:M] if m_pad != M else out


# ----------------------------------------------------------------------------
# Conv = im2col glue (XLA) + Pallas fused matmul
# ----------------------------------------------------------------------------
def _im2col(x, kh, kw, stride, pad):
    N, H, W, C = x.shape
    if kh == 1 and kw == 1 and pad == 0:
        if stride != 1:
            x = x[:, ::stride, ::stride, :]
        Ho, Wo = x.shape[1], x.shape[2]
        return x.reshape(N * Ho * Wo, C), Ho, Wo
    xp = jnp.pad(x, ((0, 0), (pad, pad), (pad, pad), (0, 0)))
    Ho = (H + 2 * pad - kh) // stride + 1
    Wo = (W + 2 * pad - kw) // stride + 1
    # TODO(synk): for 3x3 convs, stream these taps inside the Pallas kernel via
    # manual halo DMA instead of materializing the 9x patch matrix in HBM.
    cols = []
    for i in range(kh):
        for j in range(kw):
            cols.append(xp[:, i:i + stride * (Ho - 1) + 1:stride,
                           j:j + stride * (Wo - 1) + 1:stride, :])
    cols = jnp.stack(cols, axis=3)                    # (N, Ho, Wo, kh*kw, C)
    return cols.reshape(N * Ho * Wo, kh * kw * C), Ho, Wo


def conv_bn(x, w, bias, *, kh, kw, stride, pad, cout, relu=True, residual=None):
    """x NHWC bf16; w (Kp, Np) bf16 (BN scale folded, padded); bias (1, Np) f32."""
    n_batch = x.shape[0]
    a, ho, wo = _im2col(x, kh, kw, stride, pad)
    kp, npad = w.shape
    if a.shape[1] != kp:                              # lane-align K with zeros
        a = jnp.pad(a, ((0, 0), (0, kp - a.shape[1])))
    res = None
    if residual is not None:
        res = residual.reshape(-1, residual.shape[-1])
        if res.shape[1] != npad:
            res = jnp.pad(res, ((0, 0), (0, npad - res.shape[1])))
    out = matmul_bias(a, w, bias, residual=res, relu=relu)
    return out[:, :cout].reshape(n_batch, ho, wo, cout)


# ----------------------------------------------------------------------------
# MaxPool2d(kernel_size=3, stride=2, padding=1) — fused running-max tree.
# ----------------------------------------------------------------------------
def maxpool_3x3_s2(x):
    N, H, W, C = x.shape
    xp = jnp.pad(x, ((0, 0), (1, 1), (1, 1), (0, 0)),
                 constant_values=-jnp.inf)
    Ho = (H + 2 - 3) // 2 + 1
    Wo = (W + 2 - 3) // 2 + 1
    out = None
    for i in range(3):
        for j in range(3):
            sl = xp[:, i:i + 2 * (Ho - 1) + 1:2, j:j + 2 * (Wo - 1) + 1:2, :]
            out = sl if out is None else jnp.maximum(out, sl)
    return out


# ----------------------------------------------------------------------------
# ResNet50 backbone params (children[:7]); layer3 first block strides -> 1.
# ----------------------------------------------------------------------------
LAYER_CFG = [(64, 3, 1), (128, 4, 2), (256, 6, 1)]   # (planes, blocks, stride)
EXPANSION = 4


def _init_conv(key, cout, cin, kh, kw):
    fan_in = cin * kh * kw
    return (jax.random.normal(key, (cout, cin, kh, kw), jnp.float32)
            * (1.0 / jnp.sqrt(jnp.float32(fan_in))))


def _init_bn(key, c):
    k1, k2, k3, k4 = jax.random.split(key, 4)
    gamma = 1.0 + 0.1 * jax.random.normal(k1, (c,), jnp.float32)
    beta = 0.1 * jax.random.normal(k2, (c,), jnp.float32)
    mean = 0.1 * jax.random.normal(k3, (c,), jnp.float32)
    var = 0.5 + jax.random.uniform(k4, (c,), jnp.float32)
    return gamma, beta, mean, var


def _prep_conv(w, bn):
    """Fold BN into the weight, lay out as (KH*KW*Cin, Cout), pad to 128s, bf16."""
    gamma, beta, mean, var = bn
    eps = 1e-5
    scale = gamma / jnp.sqrt(var + eps)
    bias = beta - mean * scale
    cout, cin, kh, kw = w.shape
    k = kh * kw * cin
    wm = jnp.transpose(w, (2, 3, 1, 0)).reshape(k, cout) * scale[None, :]
    kp, npad = _round_up(k, 128), _round_up(cout, 128)
    wm = jnp.pad(wm, ((0, kp - k), (0, npad - cout))).astype(jnp.bfloat16)
    b = jnp.pad(bias, (0, npad - cout)).reshape(1, npad).astype(jnp.float32)
    return wm, b


def make_model(key):
    keys = iter(jax.random.split(key, 256))

    def conv(cout, cin, kh, kw):
        w = _init_conv(next(keys), cout, cin, kh, kw)
        bn = _init_bn(next(keys), cout)
        return _prep_conv(w, bn)

    params = {"conv1": conv(64, 3, 7, 7), "layers": []}
    inplanes = 64
    for planes, nblocks, _stride in LAYER_CFG:
        blocks = []
        for b in range(nblocks):
            in_ch = inplanes if b == 0 else planes * EXPANSION
            blk = {
                "conv1": conv(planes, in_ch, 1, 1),
                "conv2": conv(planes, planes, 3, 3),
                "conv3": conv(planes * EXPANSION, planes, 1, 1),
            }
            if b == 0:
                blk["down"] = conv(planes * EXPANSION, in_ch, 1, 1)
            blocks.append(blk)
        params["layers"].append(blocks)
        inplanes = planes * EXPANSION
    return params


# ----------------------------------------------------------------------------
# forward
# ----------------------------------------------------------------------------
def _bottleneck(x, blk, planes, stride):
    if "down" in blk:
        identity = conv_bn(x, *blk["down"], kh=1, kw=1, stride=stride, pad=0,
                           cout=planes * EXPANSION, relu=False)
    else:
        identity = x
    out = conv_bn(x, *blk["conv1"], kh=1, kw=1, stride=1, pad=0,
                  cout=planes, relu=True)
    out = conv_bn(out, *blk["conv2"], kh=3, kw=3, stride=stride, pad=1,
                  cout=planes, relu=True)
    # conv3 + folded-BN + residual add + final ReLU fused in one Pallas epilogue
    out = conv_bn(out, *blk["conv3"], kh=1, kw=1, stride=1, pad=0,
                  cout=planes * EXPANSION, relu=True, residual=identity)
    return out


@jax.jit
def resnet_forward(params, x_nchw):
    x = jnp.transpose(x_nchw, (0, 2, 3, 1)).astype(jnp.bfloat16)   # NCHW -> NHWC
    x = conv_bn(x, *params["conv1"], kh=7, kw=7, stride=2, pad=3,
                cout=64, relu=True)
    x = maxpool_3x3_s2(x)
    for blocks, (planes, _n, stride) in zip(params["layers"], LAYER_CFG):
        for bi, blk in enumerate(blocks):
            x = _bottleneck(x, blk, planes, stride if bi == 0 else 1)
    return jnp.transpose(x, (0, 3, 1, 2)).astype(jnp.float32)       # NHWC -> NCHW


if __name__ == "__main__":
    key = jax.random.PRNGKey(0)
    pkey, xkey = jax.random.split(key)
    params = make_model(pkey)
    # Small input consistent with the module: NCHW, 3 channels.
    x = jax.random.normal(xkey, (2, 3, 32, 32), jnp.float32)
    y = resnet_forward(params, x)
    y = jax.block_until_ready(y)
    # SSD300 backbone: 1024 output channels, spatial = input/8 (layer3 stride 1)
    assert y.shape == (2, 1024, 4, 4), y.shape
    assert bool(jnp.all(jnp.isfinite(y)))
    print("KERNEL_OK")
</pallas_src>

<mosaic_0001>
module attributes {stable_mosaic.version = 11 : i64} {
  func.func @_matmul_kernel(%arg0: i32, %arg1: i32, %arg2: i32, %arg3: memref<512x256xbf16, #tpu.memory_space<vmem>>, %arg4: memref<256x128xbf16, #tpu.memory_space<vmem>>, %arg5: memref<1x128xf32, #tpu.memory_space<vmem>>, %arg6: memref<512x128xbf16, #tpu.memory_space<vmem>>, %arg7: memref<512x128xf32, #tpu.memory_space<vmem>>) attributes {dimension_semantics = [#tpu.dimension_semantics<parallel>, #tpu.dimension_semantics<parallel>, #tpu.dimension_semantics<arbitrary>], iteration_bounds = array<i64: 1, 1, 1>, scalar_prefetch = 0 : i64, scratch_operands = 1 : i64, tpu.core_type = #tpu.core_type<tc>, window_params = [{transform_indices = @transform_0, window_bounds = array<i64: 512, 256>}, {transform_indices = @transform_1, window_bounds = array<i64: 256, 128>}, {transform_indices = @transform_2, window_bounds = array<i64: 1, 128>}, {transform_indices = @transform_3, window_bounds = array<i64: 512, 128>}]} {
    %c0_i32 = arith.constant 0 : i32
    %0 = arith.cmpi eq, %arg2, %c0_i32 : i32
    %1 = arith.extui %0 : i1 to i32
    %c0_i32_0 = arith.constant 0 : i32
    %2 = arith.cmpi ne, %1, %c0_i32_0 : i32
    scf.if %2 {
      %cst_10 = arith.constant 0.000000e+00 : f32
      %12 = vector.broadcast %cst_10 : f32 to vector<512x128xf32>
      %c0_11 = arith.constant 0 : index
      %c0_12 = arith.constant 0 : index
      %13 = vector.load %arg7[%c0_11, %c0_12] : memref<512x128xf32, #tpu.memory_space<vmem>>, vector<512x128xf32>
      tpu.vector_store %arg7[%c0_11, %c0_12], %12 {strides = array<i32>} : memref<512x128xf32, #tpu.memory_space<vmem>>, vector<512x128xf32>,
    } else {
    }
    %c0 = arith.constant 0 : index
    %c0_1 = arith.constant 0 : index
    %3 = vector.load %arg7[%c0, %c0_1] : memref<512x128xf32, #tpu.memory_space<vmem>>, vector<512x128xf32>
    %c0_2 = arith.constant 0 : index
    %c0_3 = arith.constant 0 : index
    %4 = vector.load %arg3[%c0_2, %c0_3] : memref<512x256xbf16, #tpu.memory_space<vmem>>, vector<512x256xbf16>
    %c0_4 = arith.constant 0 : index
    %c0_5 = arith.constant 0 : index
    %5 = vector.load %arg4[%c0_4, %c0_5] : memref<256x128xbf16, #tpu.memory_space<vmem>>, vector<256x128xbf16>
    %cst = arith.constant dense<0.000000e+00> : vector<512x128xf32>
    %6 = tpu.matmul %4, %5, %cst {dimension_numbers = #tpu.dot_dimension_numbers<[1], [0], [0], [1], [0, 0, 1, 1], [], []>} : vector<512x256xbf16>, vector<256x128xbf16>, vector<512x128xf32> -> vector<512x128xf32>
    %7 = arith.addf %3, %6 : vector<512x128xf32>
    %c0_6 = arith.constant 0 : index
    %c0_7 = arith.constant 0 : index
    %8 = vector.load %arg7[%c0_6, %c0_7] : memref<512x128xf32, #tpu.memory_space<vmem>>, vector<512x128xf32>
    tpu.vector_store %arg7[%c0_6, %c0_7], %7 {strides = array<i32>} : memref<512x128xf32, #tpu.memory_space<vmem>>, vector<512x128xf32>,
    %c0_i32_8 = arith.constant 0 : i32
    %9 = arith.cmpi eq, %arg2, %c0_i32_8 : i32
    %10 = arith.extui %9 : i1 to i32
    %c0_i32_9 = arith.constant 0 : i32
    %11 = arith.cmpi ne, %10, %c0_i32_9 : i32
    scf.if %11 {
      %c0_10 = arith.constant 0 : index
      %c0_11 = arith.constant 0 : index
      %12 = vector.load %arg7[%c0_10, %c0_11] : memref<512x128xf32, #tpu.memory_space<vmem>>, vector<512x128xf32>
      %c0_12 = arith.constant 0 : index
      %c0_13 = arith.constant 0 : index
      %13 = vector.load %arg5[%c0_12, %c0_13] : memref<1x128xf32, #tpu.memory_space<vmem>>, vector<1x128xf32>
      %14 = vector.broadcast %13 : vector<1x128xf32> to vector<512x128xf32>
      %15 = arith.addf %12, %14 : vector<512x128xf32>
      %cst_14 = arith.constant 0.000000e+00 : f32
      %16 = vector.broadcast %cst_14 : f32 to vector<512x128xf32>
      %17 = arith.maximumf %15, %16 : vector<512x128xf32>
      %18 = arith.truncf %17 : vector<512x128xf32> to vector<512x128xbf16>
      %c0_15 = arith.constant 0 : index
      %c0_16 = arith.constant 0 : index
      %19 = vector.load %arg6[%c0_15, %c0_16] : memref<512x128xbf16, #tpu.memory_space<vmem>>, vector<512x128xbf16>
      tpu.vector_store %arg6[%c0_15, %c0_16], %18 {strides = array<i32>} : memref<512x128xbf16, #tpu.memory_space<vmem>>, vector<512x128xbf16>,
    } else {
    }
    return
  }
  func.func @transform_0(%arg0: i32, %arg1: i32, %arg2: i32) -> (i32, i32) {
    %c0_i32 = arith.constant 0 : i32
    return %arg0, %arg2 : i32, i32
  }
  func.func @transform_1(%arg0: i32, %arg1: i32, %arg2: i32) -> (i32, i32) {
    %c0_i32 = arith.constant 0 : i32
    return %arg2, %arg1 : i32, i32
  }
  func.func @transform_2(%arg0: i32, %arg1: i32, %arg2: i32) -> (i32, i32) {
    %c0_i32 = arith.constant 0 : i32
    %c0_i32_0 = arith.constant 0 : i32
    return %c0_i32, %arg1 : i32, i32
  }
  func.func @transform_3(%arg0: i32, %arg1: i32, %arg2: i32) -> (i32, i32) {
    %c0_i32 = arith.constant 0 : i32
    return %arg0, %arg1 : i32, i32
  }
}

module attributes {stable_mosaic.version = 11 : i64} {
  func.func @_matmul_kernel(%arg0: i32, %arg1: i32, %arg2: i32, %arg3: memref<128x128xbf16, #tpu.memory_space<vmem>>, %arg4: memref<128x128xbf16, #tpu.memory_space<vmem>>, %arg5: memref<1x128xf32, #tpu.memory_space<vmem>>, %arg6: memref<128x128xbf16, #tpu.memory_space<vmem>>, %arg7: memref<128x128xf32, #tpu.memory_space<vmem>>) attributes {dimension_semantics = [#tpu.dimension_semantics<parallel>, #tpu.dimension_semantics<parallel>, #tpu.dimension_semantics<arbitrary>], iteration_bounds = array<i64: 1, 1, 1>, scalar_prefetch = 0 : i64, scratch_operands = 1 : i64, tpu.core_type = #tpu.core_type<tc>, window_params = [{transform_indices = @transform_0, window_bounds = array<i64: 128, 128>}, {transform_indices = @transform_1, window_bounds = array<i64: 128, 128>}, {transform_indices = @transform_2, window_bounds = array<i64: 1, 128>}, {transform_indices = @transform_3, window_bounds = array<i64: 128, 128>}]} {
    %c0_i32 = arith.constant 0 : i32
    %0 = arith.cmpi eq, %arg2, %c0_i32 : i32
    %1 = arith.extui %0 : i1 to i32
    %c0_i32_0 = arith.constant 0 : i32
    %2 = arith.cmpi ne, %1, %c0_i32_0 : i32
    scf.if %2 {
      %cst_10 = arith.constant 0.000000e+00 : f32
      %12 = vector.broadcast %cst_10 : f32 to vector<128x128xf32>
      %c0_11 = arith.constant 0 : index
      %c0_12 = arith.constant 0 : index
      %13 = vector.load %arg7[%c0_11, %c0_12] : memref<128x128xf32, #tpu.memory_space<vmem>>, vector<128x128xf32>
      tpu.vector_store %arg7[%c0_11, %c0_12], %12 {strides = array<i32>} : memref<128x128xf32, #tpu.memory_space<vmem>>, vector<128x128xf32>,
    } else {
    }
    %c0 = arith.constant 0 : index
    %c0_1 = arith.constant 0 : index
    %3 = vector.load %arg7[%c0, %c0_1] : memref<128x128xf32, #tpu.memory_space<vmem>>, vector<128x128xf32>
    %c0_2 = arith.constant 0 : index
    %c0_3 = arith.constant 0 : index
    %4 = vector.load %arg3[%c0_2, %c0_3] : memref<128x128xbf16, #tpu.memory_space<vmem>>, vector<128x128xbf16>
    %c0_4 = arith.constant 0 : index
    %c0_5 = arith.constant 0 : index
    %5 = vector.load %arg4[%c0_4, %c0_5] : memref<128x128xbf16, #tpu.memory_space<vmem>>, vector<128x128xbf16>
    %cst = arith.constant dense<0.000000e+00> : vector<128x128xf32>
    %6 = tpu.matmul %4, %5, %cst {dimension_numbers = #tpu.dot_dimension_numbers<[1], [0], [0], [1], [0, 0, 1, 1], [], []>} : vector<128x128xbf16>, vector<128x128xbf16>, vector<128x128xf32> -> vector<128x128xf32>
    %7 = arith.addf %3, %6 : vector<128x128xf32>
    %c0_6 = arith.constant 0 : index
    %c0_7 = arith.constant 0 : index
    %8 = vector.load %arg7[%c0_6, %c0_7] : memref<128x128xf32, #tpu.memory_space<vmem>>, vector<128x128xf32>
    tpu.vector_store %arg7[%c0_6, %c0_7], %7 {strides = array<i32>} : memref<128x128xf32, #tpu.memory_space<vmem>>, vector<128x128xf32>,
    %c0_i32_8 = arith.constant 0 : i32
    %9 = arith.cmpi eq, %arg2, %c0_i32_8 : i32
    %10 = arith.extui %9 : i1 to i32
    %c0_i32_9 = arith.constant 0 : i32
    %11 = arith.cmpi ne, %10, %c0_i32_9 : i32
    scf.if %11 {
      %c0_10 = arith.constant 0 : index
      %c0_11 = arith.constant 0 : index
      %12 = vector.load %arg7[%c0_10, %c0_11] : memref<128x128xf32, #tpu.memory_space<vmem>>, vector<128x128xf32>
      %c0_12 = arith.constant 0 : index
      %c0_13 = arith.constant 0 : index
      %13 = vector.load %arg5[%c0_12, %c0_13] : memref<1x128xf32, #tpu.memory_space<vmem>>, vector<1x128xf32>
      %14 = vector.broadcast %13 : vector<1x128xf32> to vector<128x128xf32>
      %15 = arith.addf %12, %14 : vector<128x128xf32>
      %cst_14 = arith.constant 0.000000e+00 : f32
      %16 = vector.broadcast %cst_14 : f32 to vector<128x128xf32>
      %17 = arith.maximumf %15, %16 : vector<128x128xf32>
      %18 = arith.truncf %17 : vector<128x128xf32> to vector<128x128xbf16>
      %c0_15 = arith.constant 0 : index
      %c0_16 = arith.constant 0 : index
      %19 = vector.load %arg6[%c0_15, %c0_16] : memref<128x128xbf16, #tpu.memory_space<vmem>>, vector<128x128xbf16>
      tpu.vector_store %arg6[%c0_15, %c0_16], %18 {strides = array<i32>} : memref<128x128xbf16, #tpu.memory_space<vmem>>, vector<128x128xbf16>,
    } else {
    }
    return
  }
  func.func @transform_0(%arg0: i32, %arg1: i32, %arg2: i32) -> (i32, i32) {
    %c0_i32 = arith.constant 0 : i32
    return %arg0, %arg2 : i32, i32
  }
  func.func @transform_1(%arg0: i32, %arg1: i32, %arg2: i32) -> (i32, i32) {
    %c0_i32 = arith.constant 0 : i32
    return %arg2, %arg1 : i32, i32
  }
  func.func @transform_2(%arg0: i32, %arg1: i32, %arg2: i32) -> (i32, i32) {
    %c0_i32 = arith.constant 0 : i32
    %c0_i32_0 = arith.constant 0 : i32
    return %c0_i32, %arg1 : i32, i32
  }
  func.func @transform_3(%arg0: i32, %arg1: i32, %arg2: i32) -> (i32, i32) {
    %c0_i32 = arith.constant 0 : i32
    return %arg0, %arg1 : i32, i32
  }
}

module attributes {stable_mosaic.version = 11 : i64} {
  func.func @_matmul_kernel(%arg0: i32, %arg1: i32, %arg2: i32, %arg3: memref<128x128xbf16, #tpu.memory_space<vmem>>, %arg4: memref<128x128xbf16, #tpu.memory_space<vmem>>, %arg5: memref<1x128xf32, #tpu.memory_space<vmem>>, %arg6: memref<128x128xbf16, #tpu.memory_space<vmem>>, %arg7: memref<128x128xf32, #tpu.memory_space<vmem>>) attributes {dimension_semantics = [#tpu.dimension_semantics<parallel>, #tpu.dimension_semantics<parallel>, #tpu.dimension_semantics<arbitrary>], iteration_bounds = array<i64: 1, 1, 5>, scalar_prefetch = 0 : i64, scratch_operands = 1 : i64, tpu.core_type = #tpu.core_type<tc>, window_params = [{transform_indices = @transform_0, window_bounds = array<i64: 128, 128>}, {transform_indices = @transform_1, window_bounds = array<i64: 128, 128>}, {transform_indices = @transform_2, window_bounds = array<i64: 1, 128>}, {transform_indices = @transform_3, window_bounds = array<i64: 128, 128>}]} {
    %c0_i32 = arith.constant 0 : i32
    %0 = arith.cmpi eq, %arg2, %c0_i32 : i32
    %1 = arith.extui %0 : i1 to i32
    %c0_i32_0 = arith.constant 0 : i32
    %2 = arith.cmpi ne, %1, %c0_i32_0 : i32
    scf.if %2 {
      %cst_9 = arith.constant 0.000000e+00 : f32
      %12 = vector.broadcast %cst_9 : f32 to vector<128x128xf32>
      %c0_10 = arith.constant 0 : index
      %c0_11 = arith.constant 0 : index
      %13 = vector.load %arg7[%c0_10, %c0_11] : memref<128x128xf32, #tpu.memory_space<vmem>>, vector<128x128xf32>
      tpu.vector_store %arg7[%c0_10, %c0_11], %12 {strides = array<i32>} : memref<128x128xf32, #tpu.memory_space<vmem>>, vector<128x128xf32>,
    } else {
    }
    %c0 = arith.constant 0 : index
    %c0_1 = arith.constant 0 : index
    %3 = vector.load %arg7[%c0, %c0_1] : memref<128x128xf32, #tpu.memory_space<vmem>>, vector<128x128xf32>
    %c0_2 = arith.constant 0 : index
    %c0_3 = arith.constant 0 : index
    %4 = vector.load %arg3[%c0_2, %c0_3] : memref<128x128xbf16, #tpu.memory_space<vmem>>, vector<128x128xbf16>
    %c0_4 = arith.constant 0 : index
    %c0_5 = arith.constant 0 : index
    %5 = vector.load %arg4[%c0_4, %c0_5] : memref<128x128xbf16, #tpu.memory_space<vmem>>, vector<128x128xbf16>
    %cst = arith.constant dense<0.000000e+00> : vector<128x128xf32>
    %6 = tpu.matmul %4, %5, %cst {dimension_numbers = #tpu.dot_dimension_numbers<[1], [0], [0], [1], [0, 0, 1, 1], [], []>} : vector<128x128xbf16>, vector<128x128xbf16>, vector<128x128xf32> -> vector<128x128xf32>
    %7 = arith.addf %3, %6 : vector<128x128xf32>
    %c0_6 = arith.constant 0 : index
    %c0_7 = arith.constant 0 : index
    %8 = vector.load %arg7[%c0_6, %c0_7] : memref<128x128xf32, #tpu.memory_space<vmem>>, vector<128x128xf32>
    tpu.vector_store %arg7[%c0_6, %c0_7], %7 {strides = array<i32>} : memref<128x128xf32, #tpu.memory_space<vmem>>, vector<128x128xf32>,
    %c4_i32 = arith.constant 4 : i32
    %9 = arith.cmpi eq, %arg2, %c4_i32 : i32
    %10 = arith.extui %9 : i1 to i32
    %c0_i32_8 = arith.constant 0 : i32
    %11 = arith.cmpi ne, %10, %c0_i32_8 : i32
    scf.if %11 {
      %c0_9 = arith.constant 0 : index
      %c0_10 = arith.constant 0 : index
      %12 = vector.load %arg7[%c0_9, %c0_10] : memref<128x128xf32, #tpu.memory_space<vmem>>, vector<128x128xf32>
      %c0_11 = arith.constant 0 : index
      %c0_12 = arith.constant 0 : index
      %13 = vector.load %arg5[%c0_11, %c0_12] : memref<1x128xf32, #tpu.memory_space<vmem>>, vector<1x128xf32>
      %14 = vector.broadcast %13 : vector<1x128xf32> to vector<128x128xf32>
      %15 = arith.addf %12, %14 : vector<128x128xf32>
      %cst_13 = arith.constant 0.000000e+00 : f32
      %16 = vector.broadcast %cst_13 : f32 to vector<128x128xf32>
      %17 = arith.maximumf %15, %16 : vector<128x128xf32>
      %18 = arith.truncf %17 : vector<128x128xf32> to vector<128x128xbf16>
      %c0_14 = arith.constant 0 : index
      %c0_15 = arith.constant 0 : index
      %19 = vector.load %arg6[%c0_14, %c0_15] : memref<128x128xbf16, #tpu.memory_space<vmem>>, vector<128x128xbf16>
      tpu.vector_store %arg6[%c0_14, %c0_15], %18 {strides = array<i32>} : memref<128x128xbf16, #tpu.memory_space<vmem>>, vector<128x128xbf16>,
    } else {
    }
    return
  }
  func.func @transform_0(%arg0: i32, %arg1: i32, %arg2: i32) -> (i32, i32) {
    %c0_i32 = arith.constant 0 : i32
    return %arg0, %arg2 : i32, i32
  }
  func.func @transform_1(%arg0: i32, %arg1: i32, %arg2: i32) -> (i32, i32) {
    %c0_i32 = arith.constant 0 : i32
    return %arg2, %arg1 : i32, i32
  }
  func.func @transform_2(%arg0: i32, %arg1: i32, %arg2: i32) -> (i32, i32) {
    %c0_i32 = arith.constant 0 : i32
    %c0_i32_0 = arith.constant 0 : i32
    return %c0_i32, %arg1 : i32, i32
  }
  func.func @transform_3(%arg0: i32, %arg1: i32, %arg2: i32) -> (i32, i32) {
    %c0_i32 = arith.constant 0 : i32
    return %arg0, %arg1 : i32, i32
  }
}

module attributes {stable_mosaic.version = 11 : i64} {
  func.func @_matmul_kernel(%arg0: i32, %arg1: i32, %arg2: i32, %arg3: memref<128x128xbf16, #tpu.memory_space<vmem>>, %arg4: memref<128x256xbf16, #tpu.memory_space<vmem>>, %arg5: memref<1x256xf32, #tpu.memory_space<vmem>>, %arg6: memref<128x256xbf16, #tpu.memory_space<vmem>>, %arg7: memref<128x256xf32, #tpu.memory_space<vmem>>) attributes {dimension_semantics = [#tpu.dimension_semantics<parallel>, #tpu.dimension_semantics<parallel>, #tpu.dimension_semantics<arbitrary>], iteration_bounds = array<i64: 1, 1, 1>, scalar_prefetch = 0 : i64, scratch_operands = 1 : i64, tpu.core_type = #tpu.core_type<tc>, window_params = [{transform_indices = @transform_0, window_bounds = array<i64: 128, 128>}, {transform_indices = @transform_1, window_bounds = array<i64: 128, 256>}, {transform_indices = @transform_2, window_bounds = array<i64: 1, 256>}, {transform_indices = @transform_3, window_bounds = array<i64: 128, 256>}]} {
    %c0_i32 = arith.constant 0 : i32
    %0 = arith.cmpi eq, %arg2, %c0_i32 : i32
    %1 = arith.extui %0 : i1 to i32
    %c0_i32_0 = arith.constant 0 : i32
    %2 = arith.cmpi ne, %1, %c0_i32_0 : i32
    scf.if %2 {
      %cst_10 = arith.constant 0.000000e+00 : f32
      %12 = vector.broadcast %cst_10 : f32 to vector<128x256xf32>
      %c0_11 = arith.constant 0 : index
      %c0_12 = arith.constant 0 : index
      %13 = vector.load %arg7[%c0_11, %c0_12] : memref<128x256xf32, #tpu.memory_space<vmem>>, vector<128x256xf32>
      tpu.vector_store %arg7[%c0_11, %c0_12], %12 {strides = array<i32>} : memref<128x256xf32, #tpu.memory_space<vmem>>, vector<128x256xf32>,
    } else {
    }
    %c0 = arith.constant 0 : index
    %c0_1 = arith.constant 0 : index
    %3 = vector.load %arg7[%c0, %c0_1] : memref<128x256xf32, #tpu.memory_space<vmem>>, vector<128x256xf32>
    %c0_2 = arith.constant 0 : index
    %c0_3 = arith.constant 0 : index
    %4 = vector.load %arg3[%c0_2, %c0_3] : memref<128x128xbf16, #tpu.memory_space<vmem>>, vector<128x128xbf16>
    %c0_4 = arith.constant 0 : index
    %c0_5 = arith.constant 0 : index
    %5 = vector.load %arg4[%c0_4, %c0_5] : memref<128x256xbf16, #tpu.memory_space<vmem>>, vector<128x256xbf16>
    %cst = arith.constant dense<0.000000e+00> : vector<128x256xf32>
    %6 = tpu.matmul %4, %5, %cst {dimension_numbers = #tpu.dot_dimension_numbers<[1], [0], [0], [1], [0, 0, 1, 1], [], []>} : vector<128x128xbf16>, vector<128x256xbf16>, vector<128x256xf32> -> vector<128x256xf32>
    %7 = arith.addf %3, %6 : vector<128x256xf32>
    %c0_6 = arith.constant 0 : index
    %c0_7 = arith.constant 0 : index
    %8 = vector.load %arg7[%c0_6, %c0_7] : memref<128x256xf32, #tpu.memory_space<vmem>>, vector<128x256xf32>
    tpu.vector_store %arg7[%c0_6, %c0_7], %7 {strides = array<i32>} : memref<128x256xf32, #tpu.memory_space<vmem>>, vector<128x256xf32>,
    %c0_i32_8 = arith.constant 0 : i32
    %9 = arith.cmpi eq, %arg2, %c0_i32_8 : i32
    %10 = arith.extui %9 : i1 to i32
    %c0_i32_9 = arith.constant 0 : i32
    %11 = arith.cmpi ne, %10, %c0_i32_9 : i32
    scf.if %11 {
      %c0_10 = arith.constant 0 : index
      %c0_11 = arith.constant 0 : index
      %12 = vector.load %arg7[%c0_10, %c0_11] : memref<128x256xf32, #tpu.memory_space<vmem>>, vector<128x256xf32>
      %c0_12 = arith.constant 0 : index
      %c0_13 = arith.constant 0 : index
      %13 = vector.load %arg5[%c0_12, %c0_13] : memref<1x256xf32, #tpu.memory_space<vmem>>, vector<1x256xf32>
      %14 = vector.broadcast %13 : vector<1x256xf32> to vector<128x256xf32>
      %15 = arith.addf %12, %14 : vector<128x256xf32>
      %16 = arith.truncf %15 : vector<128x256xf32> to vector<128x256xbf16>
      %c0_14 = arith.constant 0 : index
      %c0_15 = arith.constant 0 : index
      %17 = vector.load %arg6[%c0_14, %c0_15] : memref<128x256xbf16, #tpu.memory_space<vmem>>, vector<128x256xbf16>
      tpu.vector_store %arg6[%c0_14, %c0_15], %16 {strides = array<i32>} : memref<128x256xbf16, #tpu.memory_space<vmem>>, vector<128x256xbf16>,
    } else {
    }
    return
  }
  func.func @transform_0(%arg0: i32, %arg1: i32, %arg2: i32) -> (i32, i32) {
    %c0_i32 = arith.constant 0 : i32
    return %arg0, %arg2 : i32, i32
  }
  func.func @transform_1(%arg0: i32, %arg1: i32, %arg2: i32) -> (i32, i32) {
    %c0_i32 = arith.constant 0 : i32
    return %arg2, %arg1 : i32, i32
  }
  func.func @transform_2(%arg0: i32, %arg1: i32, %arg2: i32) -> (i32, i32) {
    %c0_i32 = arith.constant 0 : i32
    %c0_i32_0 = arith.constant 0 : i32
    return %c0_i32, %arg1 : i32, i32
  }
  func.func @transform_3(%arg0: i32, %arg1: i32, %arg2: i32) -> (i32, i32) {
    %c0_i32 = arith.constant 0 : i32
    return %arg0, %arg1 : i32, i32
  }
}

module attributes {stable_mosaic.version = 11 : i64} {
  func.func @_matmul_kernel(%arg0: i32, %arg1: i32, %arg2: i32, %arg3: memref<128x128xbf16, #tpu.memory_space<vmem>>, %arg4: memref<128x256xbf16, #tpu.memory_space<vmem>>, %arg5: memref<1x256xf32, #tpu.memory_space<vmem>>, %arg6: memref<128x256xbf16, #tpu.memory_space<vmem>>, %arg7: memref<128x256xbf16, #tpu.memory_space<vmem>>, %arg8: memref<128x256xf32, #tpu.memory_space<vmem>>) attributes {dimension_semantics = [#tpu.dimension_semantics<parallel>, #tpu.dimension_semantics<parallel>, #tpu.dimension_semantics<arbitrary>], iteration_bounds = array<i64: 1, 1, 1>, scalar_prefetch = 0 : i64, scratch_operands = 1 : i64, tpu.core_type = #tpu.core_type<tc>, window_params = [{transform_indices = @transform_0, window_bounds = array<i64: 128, 128>}, {transform_indices = @transform_1, window_bounds = array<i64: 128, 256>}, {transform_indices = @transform_2, window_bounds = array<i64: 1, 256>}, {transform_indices = @transform_3, window_bounds = array<i64: 128, 256>}, {transform_indices = @transform_4, window_bounds = array<i64: 128, 256>}]} {
    %c0_i32 = arith.constant 0 : i32
    %0 = arith.cmpi eq, %arg2, %c0_i32 : i32
    %1 = arith.extui %0 : i1 to i32
    %c0_i32_0 = arith.constant 0 : i32
    %2 = arith.cmpi ne, %1, %c0_i32_0 : i32
    scf.if %2 {
      %cst_10 = arith.constant 0.000000e+00 : f32
      %12 = vector.broadcast %cst_10 : f32 to vector<128x256xf32>
      %c0_11 = arith.constant 0 : index
      %c0_12 = arith.constant 0 : index
      %13 = vector.load %arg8[%c0_11, %c0_12] : memref<128x256xf32, #tpu.memory_space<vmem>>, vector<128x256xf32>
      tpu.vector_store %arg8[%c0_11, %c0_12], %12 {strides = array<i32>} : memref<128x256xf32, #tpu.memory_space<vmem>>, vector<128x256xf32>,
    } else {
    }
    %c0 = arith.constant 0 : index
    %c0_1 = arith.constant 0 : index
    %3 = vector.load %arg8[%c0, %c0_1] : memref<128x256xf32, #tpu.memory_space<vmem>>, vector<128x256xf32>
    %c0_2 = arith.constant 0 : index
    %c0_3 = arith.constant 0 : index
    %4 = vector.load %arg3[%c0_2, %c0_3] : memref<128x128xbf16, #tpu.memory_space<vmem>>, vector<128x128xbf16>
    %c0_4 = arith.constant 0 : index
    %c0_5 = arith.constant 0 : index
    %5 = vector.load %arg4[%c0_4, %c0_5] : memref<128x256xbf16, #tpu.memory_space<vmem>>, vector<128x256xbf16>
    %cst = arith.constant dense<0.000000e+00> : vector<128x256xf32>
    %6 = tpu.matmul %4, %5, %cst {dimension_numbers = #tpu.dot_dimension_numbers<[1], [0], [0], [1], [0, 0, 1, 1], [], []>} : vector<128x128xbf16>, vector<128x256xbf16>, vector<128x256xf32> -> vector<128x256xf32>
    %7 = arith.addf %3, %6 : vector<128x256xf32>
    %c0_6 = arith.constant 0 : index
    %c0_7 = arith.constant 0 : index
    %8 = vector.load %arg8[%c0_6, %c0_7] : memref<128x256xf32, #tpu.memory_space<vmem>>, vector<128x256xf32>
    tpu.vector_store %arg8[%c0_6, %c0_7], %7 {strides = array<i32>} : memref<128x256xf32, #tpu.memory_space<vmem>>, vector<128x256xf32>,
    %c0_i32_8 = arith.constant 0 : i32
    %9 = arith.cmpi eq, %arg2, %c0_i32_8 : i32
    %10 = arith.extui %9 : i1 to i32
    %c0_i32_9 = arith.constant 0 : i32
    %11 = arith.cmpi ne, %10, %c0_i32_9 : i32
    scf.if %11 {
      %c0_10 = arith.constant 0 : index
      %c0_11 = arith.constant 0 : index
      %12 = vector.load %arg8[%c0_10, %c0_11] : memref<128x256xf32, #tpu.memory_space<vmem>>, vector<128x256xf32>
      %c0_12 = arith.constant 0 : index
      %c0_13 = arith.constant 0 : index
      %13 = vector.load %arg5[%c0_12, %c0_13] : memref<1x256xf32, #tpu.memory_space<vmem>>, vector<1x256xf32>
      %14 = vector.broadcast %13 : vector<1x256xf32> to vector<128x256xf32>
      %15 = arith.addf %12, %14 : vector<128x256xf32>
      %c0_14 = arith.constant 0 : index
      %c0_15 = arith.constant 0 : index
      %16 = vector.load %arg6[%c0_14, %c0_15] : memref<128x256xbf16, #tpu.memory_space<vmem>>, vector<128x256xbf16>
      %17 = arith.extf %16 : vector<128x256xbf16> to vector<128x256xf32>
      %18 = arith.addf %15, %17 : vector<128x256xf32>
      %cst_16 = arith.constant 0.000000e+00 : f32
      %19 = vector.broadcast %cst_16 : f32 to vector<128x256xf32>
      %20 = arith.maximumf %18, %19 : vector<128x256xf32>
      %21 = arith.truncf %20 : vector<128x256xf32> to vector<128x256xbf16>
      %c0_17 = arith.constant 0 : index
      %c0_18 = arith.constant 0 : index
      %22 = vector.load %arg7[%c0_17, %c0_18] : memref<128x256xbf16, #tpu.memory_space<vmem>>, vector<128x256xbf16>
      tpu.vector_store %arg7[%c0_17, %c0_18], %21 {strides = array<i32>} : memref<128x256xbf16, #tpu.memory_space<vmem>>, vector<128x256xbf16>,
    } else {
    }
    return
  }
  func.func @transform_0(%arg0: i32, %arg1: i32, %arg2: i32) -> (i32, i32) {
    %c0_i32 = arith.constant 0 : i32
    return %arg0, %arg2 : i32, i32
  }
  func.func @transform_1(%arg0: i32, %arg1: i32, %arg2: i32) -> (i32, i32) {
    %c0_i32 = arith.constant 0 : i32
    return %arg2, %arg1 : i32, i32
  }
  func.func @transform_2(%arg0: i32, %arg1: i32, %arg2: i32) -> (i32, i32) {
    %c0_i32 = arith.constant 0 : i32
    %c0_i32_0 = arith.constant 0 : i32
    return %c0_i32, %arg1 : i32, i32
  }
  func.func @transform_3(%arg0: i32, %arg1: i32, %arg2: i32) -> (i32, i32) {
    %c0_i32 = arith.constant 0 : i32
    return %arg0, %arg1 : i32, i32
  }
  func.func @transform_4(%arg0: i32, %arg1: i32, %arg2: i32) -> (i32, i32) {
    %c0_i32 = arith.constant 0 : i32
    return %arg0, %arg1 : i32, i32
  }
}

module attributes {stable_mosaic.version = 11 : i64} {
  func.func @_matmul_kernel(%arg0: i32, %arg1: i32, %arg2: i32, %arg3: memref<128x256xbf16, #tpu.memory_space<vmem>>, %arg4: memref<256x128xbf16, #tpu.memory_space<vmem>>, %arg5: memref<1x128xf32, #tpu.memory_space<vmem>>, %arg6: memref<128x128xbf16, #tpu.memory_space<vmem>>, %arg7: memref<128x128xf32, #tpu.memory_space<vmem>>) attributes {dimension_semantics = [#tpu.dimension_semantics<parallel>, #tpu.dimension_semantics<parallel>, #tpu.dimension_semantics<arbitrary>], iteration_bounds = array<i64: 1, 1, 1>, scalar_prefetch = 0 : i64, scratch_operands = 1 : i64, tpu.core_type = #tpu.core_type<tc>, window_params = [{transform_indices = @transform_0, window_bounds = array<i64: 128, 256>}, {transform_indices = @transform_1, window_bounds = array<i64: 256, 128>}, {transform_indices = @transform_2, window_bounds = array<i64: 1, 128>}, {transform_indices = @transform_3, window_bounds = array<i64: 128, 128>}]} {
    %c0_i32 = arith.constant 0 : i32
    %0 = arith.cmpi eq, %arg2, %c0_i32 : i32
    %1 = arith.extui %0 : i1 to i32
    %c0_i32_0 = arith.constant 0 : i32
    %2 = arith.cmpi ne, %1, %c0_i32_0 : i32
    scf.if %2 {
      %cst_10 = arith.constant 0.000000e+00 : f32
      %12 = vector.broadcast %cst_10 : f32 to vector<128x128xf32>
      %c0_11 = arith.constant 0 : index
      %c0_12 = arith.constant 0 : index
      %13 = vector.load %arg7[%c0_11, %c0_12] : memref<128x128xf32, #tpu.memory_space<vmem>>, vector<128x128xf32>
      tpu.vector_store %arg7[%c0_11, %c0_12], %12 {strides = array<i32>} : memref<128x128xf32, #tpu.memory_space<vmem>>, vector<128x128xf32>,
    } else {
    }
    %c0 = arith.constant 0 : index
    %c0_1 = arith.constant 0 : index
    %3 = vector.load %arg7[%c0, %c0_1] : memref<128x128xf32, #tpu.memory_space<vmem>>, vector<128x128xf32>
    %c0_2 = arith.constant 0 : index
    %c0_3 = arith.constant 0 : index
    %4 = vector.load %arg3[%c0_2, %c0_3] : memref<128x256xbf16, #tpu.memory_space<vmem>>, vector<128x256xbf16>
    %c0_4 = arith.constant 0 : index
    %c0_5 = arith.constant 0 : index
    %5 = vector.load %arg4[%c0_4, %c0_5] : memref<256x128xbf16, #tpu.memory_space<vmem>>, vector<256x128xbf16>
    %cst = arith.constant dense<0.000000e+00> : vector<128x128xf32>
    %6 = tpu.matmul %4, %5, %cst {dimension_numbers = #tpu.dot_dimension_numbers<[1], [0], [0], [1], [0, 0, 1, 1], [], []>} : vector<128x256xbf16>, vector<256x128xbf16>, vector<128x128xf32> -> vector<128x128xf32>
    %7 = arith.addf %3, %6 : vector<128x128xf32>
    %c0_6 = arith.constant 0 : index
    %c0_7 = arith.constant 0 : index
    %8 = vector.load %arg7[%c0_6, %c0_7] : memref<128x128xf32, #tpu.memory_space<vmem>>, vector<128x128xf32>
    tpu.vector_store %arg7[%c0_6, %c0_7], %7 {strides = array<i32>} : memref<128x128xf32, #tpu.memory_space<vmem>>, vector<128x128xf32>,
    %c0_i32_8 = arith.constant 0 : i32
    %9 = arith.cmpi eq, %arg2, %c0_i32_8 : i32
    %10 = arith.extui %9 : i1 to i32
    %c0_i32_9 = arith.constant 0 : i32
    %11 = arith.cmpi ne, %10, %c0_i32_9 : i32
    scf.if %11 {
      %c0_10 = arith.constant 0 : index
      %c0_11 = arith.constant 0 : index
      %12 = vector.load %arg7[%c0_10, %c0_11] : memref<128x128xf32, #tpu.memory_space<vmem>>, vector<128x128xf32>
      %c0_12 = arith.constant 0 : index
      %c0_13 = arith.constant 0 : index
      %13 = vector.load %arg5[%c0_12, %c0_13] : memref<1x128xf32, #tpu.memory_space<vmem>>, vector<1x128xf32>
      %14 = vector.broadcast %13 : vector<1x128xf32> to vector<128x128xf32>
      %15 = arith.addf %12, %14 : vector<128x128xf32>
      %cst_14 = arith.constant 0.000000e+00 : f32
      %16 = vector.broadcast %cst_14 : f32 to vector<128x128xf32>
      %17 = arith.maximumf %15, %16 : vector<128x128xf32>
      %18 = arith.truncf %17 : vector<128x128xf32> to vector<128x128xbf16>
      %c0_15 = arith.constant 0 : index
      %c0_16 = arith.constant 0 : index
      %19 = vector.load %arg6[%c0_15, %c0_16] : memref<128x128xbf16, #tpu.memory_space<vmem>>, vector<128x128xbf16>
      tpu.vector_store %arg6[%c0_15, %c0_16], %18 {strides = array<i32>} : memref<128x128xbf16, #tpu.memory_space<vmem>>, vector<128x128xbf16>,
    } else {
    }
    return
  }
  func.func @transform_0(%arg0: i32, %arg1: i32, %arg2: i32) -> (i32, i32) {
    %c0_i32 = arith.constant 0 : i32
    return %arg0, %arg2 : i32, i32
  }
  func.func @transform_1(%arg0: i32, %arg1: i32, %arg2: i32) -> (i32, i32) {
    %c0_i32 = arith.constant 0 : i32
    return %arg2, %arg1 : i32, i32
  }
  func.func @transform_2(%arg0: i32, %arg1: i32, %arg2: i32) -> (i32, i32) {
    %c0_i32 = arith.constant 0 : i32
    %c0_i32_0 = arith.constant 0 : i32
    return %c0_i32, %arg1 : i32, i32
  }
  func.func @transform_3(%arg0: i32, %arg1: i32, %arg2: i32) -> (i32, i32) {
    %c0_i32 = arith.constant 0 : i32
    return %arg0, %arg1 : i32, i32
  }
}

module attributes {stable_mosaic.version = 11 : i64} {
  func.func @_matmul_kernel(%arg0: i32, %arg1: i32, %arg2: i32, %arg3: memref<32x384xbf16, #tpu.memory_space<vmem>>, %arg4: memref<384x128xbf16, #tpu.memory_space<vmem>>, %arg5: memref<1x128xf32, #tpu.memory_space<vmem>>, %arg6: memref<32x128xbf16, #tpu.memory_space<vmem>>, %arg7: memref<32x128xf32, #tpu.memory_space<vmem>>) attributes {dimension_semantics = [#tpu.dimension_semantics<parallel>, #tpu.dimension_semantics<parallel>, #tpu.dimension_semantics<arbitrary>], iteration_bounds = array<i64: 1, 1, 3>, scalar_prefetch = 0 : i64, scratch_operands = 1 : i64, tpu.core_type = #tpu.core_type<tc>, window_params = [{transform_indices = @transform_0, window_bounds = array<i64: 32, 384>}, {transform_indices = @transform_1, window_bounds = array<i64: 384, 128>}, {transform_indices = @transform_2, window_bounds = array<i64: 1, 128>}, {transform_indices = @transform_3, window_bounds = array<i64: 32, 128>}]} {
    %c0_i32 = arith.constant 0 : i32
    %0 = arith.cmpi eq, %arg2, %c0_i32 : i32
    %1 = arith.extui %0 : i1 to i32
    %c0_i32_0 = arith.constant 0 : i32
    %2 = arith.cmpi ne, %1, %c0_i32_0 : i32
    scf.if %2 {
      %cst_9 = arith.constant 0.000000e+00 : f32
      %12 = vector.broadcast %cst_9 : f32 to vector<32x128xf32>
      %c0_10 = arith.constant 0 : index
      %c0_11 = arith.constant 0 : index
      %13 = vector.load %arg7[%c0_10, %c0_11] : memref<32x128xf32, #tpu.memory_space<vmem>>, vector<32x128xf32>
      tpu.vector_store %arg7[%c0_10, %c0_11], %12 {strides = array<i32>} : memref<32x128xf32, #tpu.memory_space<vmem>>, vector<32x128xf32>,
    } else {
    }
    %c0 = arith.constant 0 : index
    %c0_1 = arith.constant 0 : index
    %3 = vector.load %arg7[%c0, %c0_1] : memref<32x128xf32, #tpu.memory_space<vmem>>, vector<32x128xf32>
    %c0_2 = arith.constant 0 : index
    %c0_3 = arith.constant 0 : index
    %4 = vector.load %arg3[%c0_2, %c0_3] : memref<32x384xbf16, #tpu.memory_space<vmem>>, vector<32x384xbf16>
    %c0_4 = arith.constant 0 : index
    %c0_5 = arith.constant 0 : index
    %5 = vector.load %arg4[%c0_4, %c0_5] : memref<384x128xbf16, #tpu.memory_space<vmem>>, vector<384x128xbf16>
    %cst = arith.constant dense<0.000000e+00> : vector<32x128xf32>
    %6 = tpu.matmul %4, %5, %cst {dimension_numbers = #tpu.dot_dimension_numbers<[1], [0], [0], [1], [0, 0, 1, 1], [], []>} : vector<32x384xbf16>, vector<384x128xbf16>, vector<32x128xf32> -> vector<32x128xf32>
    %7 = arith.addf %3, %6 : vector<32x128xf32>
    %c0_6 = arith.constant 0 : index
    %c0_7 = arith.constant 0 : index
    %8 = vector.load %arg7[%c0_6, %c0_7] : memref<32x128xf32, #tpu.memory_space<vmem>>, vector<32x128xf32>
    tpu.vector_store %arg7[%c0_6, %c0_7], %7 {strides = array<i32>} : memref<32x128xf32, #tpu.memory_space<vmem>>, vector<32x128xf32>,
    %c2_i32 = arith.constant 2 : i32
    %9 = arith.cmpi eq, %arg2, %c2_i32 : i32
    %10 = arith.extui %9 : i1 to i32
    %c0_i32_8 = arith.constant 0 : i32
    %11 = arith.cmpi ne, %10, %c0_i32_8 : i32
    scf.if %11 {
      %c0_9 = arith.constant 0 : index
      %c0_10 = arith.constant 0 : index
      %12 = vector.load %arg7[%c0_9, %c0_10] : memref<32x128xf32, #tpu.memory_space<vmem>>, vector<32x128xf32>
      %c0_11 = arith.constant 0 : index
      %c0_12 = arith.constant 0 : index
      %13 = vector.load %arg5[%c0_11, %c0_12] : memref<1x128xf32, #tpu.memory_space<vmem>>, vector<1x128xf32>
      %14 = vector.broadcast %13 : vector<1x128xf32> to vector<32x128xf32>
      %15 = arith.addf %12, %14 : vector<32x128xf32>
      %cst_13 = arith.constant 0.000000e+00 : f32
      %16 = vector.broadcast %cst_13 : f32 to vector<32x128xf32>
      %17 = arith.maximumf %15, %16 : vector<32x128xf32>
      %18 = arith.truncf %17 : vector<32x128xf32> to vector<32x128xbf16>
      %c0_14 = arith.constant 0 : index
      %c0_15 = arith.constant 0 : index
      %19 = vector.load %arg6[%c0_14, %c0_15] : memref<32x128xbf16, #tpu.memory_space<vmem>>, vector<32x128xbf16>
      tpu.vector_store %arg6[%c0_14, %c0_15], %18 {strides = array<i32>} : memref<32x128xbf16, #tpu.memory_space<vmem>>, vector<32x128xbf16>,
    } else {
    }
    return
  }
  func.func @transform_0(%arg0: i32, %arg1: i32, %arg2: i32) -> (i32, i32) {
    %c0_i32 = arith.constant 0 : i32
    return %arg0, %arg2 : i32, i32
  }
  func.func @transform_1(%arg0: i32, %arg1: i32, %arg2: i32) -> (i32, i32) {
    %c0_i32 = arith.constant 0 : i32
    return %arg2, %arg1 : i32, i32
  }
  func.func @transform_2(%arg0: i32, %arg1: i32, %arg2: i32) -> (i32, i32) {
    %c0_i32 = arith.constant 0 : i32
    %c0_i32_0 = arith.constant 0 : i32
    return %c0_i32, %arg1 : i32, i32
  }
  func.func @transform_3(%arg0: i32, %arg1: i32, %arg2: i32) -> (i32, i32) {
    %c0_i32 = arith.constant 0 : i32
    return %arg0, %arg1 : i32, i32
  }
}

module attributes {stable_mosaic.version = 11 : i64} {
  func.func @_matmul_kernel(%arg0: i32, %arg1: i32, %arg2: i32, %arg3: memref<32x128xbf16, #tpu.memory_space<vmem>>, %arg4: memref<128x256xbf16, #tpu.memory_space<vmem>>, %arg5: memref<1x256xf32, #tpu.memory_space<vmem>>, %arg6: memref<32x256xbf16, #tpu.memory_space<vmem>>, %arg7: memref<32x256xbf16, #tpu.memory_space<vmem>>, %arg8: memref<32x256xf32, #tpu.memory_space<vmem>>) attributes {dimension_semantics = [#tpu.dimension_semantics<parallel>, #tpu.dimension_semantics<parallel>, #tpu.dimension_semantics<arbitrary>], iteration_bounds = array<i64: 1, 2, 1>, scalar_prefetch = 0 : i64, scratch_operands = 1 : i64, tpu.core_type = #tpu.core_type<tc>, window_params = [{transform_indices = @transform_0, window_bounds = array<i64: 32, 128>}, {transform_indices = @transform_1, window_bounds = array<i64: 128, 256>}, {transform_indices = @transform_2, window_bounds = array<i64: 1, 256>}, {transform_indices = @transform_3, window_bounds = array<i64: 32, 256>}, {transform_indices = @transform_4, window_bounds = array<i64: 32, 256>}]} {
    %c0_i32 = arith.constant 0 : i32
    %0 = arith.cmpi eq, %arg2, %c0_i32 : i32
    %1 = arith.extui %0 : i1 to i32
    %c0_i32_0 = arith.constant 0 : i32
    %2 = arith.cmpi ne, %1, %c0_i32_0 : i32
    scf.if %2 {
      %cst_10 = arith.constant 0.000000e+00 : f32
      %12 = vector.broadcast %cst_10 : f32 to vector<32x256xf32>
      %c0_11 = arith.constant 0 : index
      %c0_12 = arith.constant 0 : index
      %13 = vector.load %arg8[%c0_11, %c0_12] : memref<32x256xf32, #tpu.memory_space<vmem>>, vector<32x256xf32>
      tpu.vector_store %arg8[%c0_11, %c0_12], %12 {strides = array<i32>} : memref<32x256xf32, #tpu.memory_space<vmem>>, vector<32x256xf32>,
    } else {
    }
    %c0 = arith.constant 0 : index
    %c0_1 = arith.constant 0 : index
    %3 = vector.load %arg8[%c0, %c0_1] : memref<32x256xf32, #tpu.memory_space<vmem>>, vector<32x256xf32>
    %c0_2 = arith.constant 0 : index
    %c0_3 = arith.constant 0 : index
    %4 = vector.load %arg3[%c0_2, %c0_3] : memref<32x128xbf16, #tpu.memory_space<vmem>>, vector<32x128xbf16>
    %c0_4 = arith.constant 0 : index
    %c0_5 = arith.constant 0 : index
    %5 = vector.load %arg4[%c0_4, %c0_5] : memref<128x256xbf16, #tpu.memory_space<vmem>>, vector<128x256xbf16>
    %cst = arith.constant dense<0.000000e+00> : vector<32x256xf32>
    %6 = tpu.matmul %4, %5, %cst {dimension_numbers = #tpu.dot_dimension_numbers<[1], [0], [0], [1], [0, 0, 1, 1], [], []>} : vector<32x128xbf16>, vector<128x256xbf16>, vector<32x256xf32> -> vector<32x256xf32>
    %7 = arith.addf %3, %6 : vector<32x256xf32>
    %c0_6 = arith.constant 0 : index
    %c0_7 = arith.constant 0 : index
    %8 = vector.load %arg8[%c0_6, %c0_7] : memref<32x256xf32, #tpu.memory_space<vmem>>, vector<32x256xf32>
    tpu.vector_store %arg8[%c0_6, %c0_7], %7 {strides = array<i32>} : memref<32x256xf32, #tpu.memory_space<vmem>>, vector<32x256xf32>,
    %c0_i32_8 = arith.constant 0 : i32
    %9 = arith.cmpi eq, %arg2, %c0_i32_8 : i32
    %10 = arith.extui %9 : i1 to i32
    %c0_i32_9 = arith.constant 0 : i32
    %11 = arith.cmpi ne, %10, %c0_i32_9 : i32
    scf.if %11 {
      %c0_10 = arith.constant 0 : index
      %c0_11 = arith.constant 0 : index
      %12 = vector.load %arg8[%c0_10, %c0_11] : memref<32x256xf32, #tpu.memory_space<vmem>>, vector<32x256xf32>
      %c0_12 = arith.constant 0 : index
      %c0_13 = arith.constant 0 : index
      %13 = vector.load %arg5[%c0_12, %c0_13] : memref<1x256xf32, #tpu.memory_space<vmem>>, vector<1x256xf32>
      %14 = vector.broadcast %13 : vector<1x256xf32> to vector<32x256xf32>
      %15 = arith.addf %12, %14 : vector<32x256xf32>
      %c0_14 = arith.constant 0 : index
      %c0_15 = arith.constant 0 : index
      %16 = vector.load %arg6[%c0_14, %c0_15] : memref<32x256xbf16, #tpu.memory_space<vmem>>, vector<32x256xbf16>
      %17 = arith.extf %16 : vector<32x256xbf16> to vector<32x256xf32>
      %18 = arith.addf %15, %17 : vector<32x256xf32>
      %cst_16 = arith.constant 0.000000e+00 : f32
      %19 = vector.broadcast %cst_16 : f32 to vector<32x256xf32>
      %20 = arith.maximumf %18, %19 : vector<32x256xf32>
      %21 = arith.truncf %20 : vector<32x256xf32> to vector<32x256xbf16>
      %c0_17 = arith.constant 0 : index
      %c0_18 = arith.constant 0 : index
      %22 = vector.load %arg7[%c0_17, %c0_18] : memref<32x256xbf16, #tpu.memory_space<vmem>>, vector<32x256xbf16>
      tpu.vector_store %arg7[%c0_17, %c0_18], %21 {strides = array<i32>} : memref<32x256xbf16, #tpu.memory_space<vmem>>, vector<32x256xbf16>,
    } else {
    }
    return
  }
  func.func @transform_0(%arg0: i32, %arg1: i32, %arg2: i32) -> (i32, i32) {
    %c0_i32 = arith.constant 0 : i32
    return %arg0, %arg2 : i32, i32
  }
  func.func @transform_1(%arg0: i32, %arg1: i32, %arg2: i32) -> (i32, i32) {
    %c0_i32 = arith.constant 0 : i32
    return %arg2, %arg1 : i32, i32
  }
  func.func @transform_2(%arg0: i32, %arg1: i32, %arg2: i32) -> (i32, i32) {
    %c0_i32 = arith.constant 0 : i32
    %c0_i32_0 = arith.constant 0 : i32
    return %c0_i32, %arg1 : i32, i32
  }
  func.func @transform_3(%arg0: i32, %arg1: i32, %arg2: i32) -> (i32, i32) {
    %c0_i32 = arith.constant 0 : i32
    return %arg0, %arg1 : i32, i32
  }
  func.func @transform_4(%arg0: i32, %arg1: i32, %arg2: i32) -> (i32, i32) {
    %c0_i32 = arith.constant 0 : i32
    return %arg0, %arg1 : i32, i32
  }
}

module attributes {stable_mosaic.version = 11 : i64} {
  func.func @_matmul_kernel(%arg0: i32, %arg1: i32, %arg2: i32, %arg3: memref<32x256xbf16, #tpu.memory_space<vmem>>, %arg4: memref<256x256xbf16, #tpu.memory_space<vmem>>, %arg5: memref<1x256xf32, #tpu.memory_space<vmem>>, %arg6: memref<32x256xbf16, #tpu.memory_space<vmem>>, %arg7: memref<32x256xf32, #tpu.memory_space<vmem>>) attributes {dimension_semantics = [#tpu.dimension_semantics<parallel>, #tpu.dimension_semantics<parallel>, #tpu.dimension_semantics<arbitrary>], iteration_bounds = array<i64: 1, 2, 1>, scalar_prefetch = 0 : i64, scratch_operands = 1 : i64, tpu.core_type = #tpu.core_type<tc>, window_params = [{transform_indices = @transform_0, window_bounds = array<i64: 32, 256>}, {transform_indices = @transform_1, window_bounds = array<i64: 256, 256>}, {transform_indices = @transform_2, window_bounds = array<i64: 1, 256>}, {transform_indices = @transform_3, window_bounds = array<i64: 32, 256>}]} {
    %c0_i32 = arith.constant 0 : i32
    %0 = arith.cmpi eq, %arg2, %c0_i32 : i32
    %1 = arith.extui %0 : i1 to i32
    %c0_i32_0 = arith.constant 0 : i32
    %2 = arith.cmpi ne, %1, %c0_i32_0 : i32
    scf.if %2 {
      %cst_10 = arith.constant 0.000000e+00 : f32
      %12 = vector.broadcast %cst_10 : f32 to vector<32x256xf32>
      %c0_11 = arith.constant 0 : index
      %c0_12 = arith.constant 0 : index
      %13 = vector.load %arg7[%c0_11, %c0_12] : memref<32x256xf32, #tpu.memory_space<vmem>>, vector<32x256xf32>
      tpu.vector_store %arg7[%c0_11, %c0_12], %12 {strides = array<i32>} : memref<32x256xf32, #tpu.memory_space<vmem>>, vector<32x256xf32>,
    } else {
    }
    %c0 = arith.constant 0 : index
    %c0_1 = arith.constant 0 : index
    %3 = vector.load %arg7[%c0, %c0_1] : memref<32x256xf32, #tpu.memory_space<vmem>>, vector<32x256xf32>
    %c0_2 = arith.constant 0 : index
    %c0_3 = arith.constant 0 : index
    %4 = vector.load %arg3[%c0_2, %c0_3] : memref<32x256xbf16, #tpu.memory_space<vmem>>, vector<32x256xbf16>
    %c0_4 = arith.constant 0 : index
    %c0_5 = arith.constant 0 : index
    %5 = vector.load %arg4[%c0_4, %c0_5] : memref<256x256xbf16, #tpu.memory_space<vmem>>, vector<256x256xbf16>
    %cst = arith.constant dense<0.000000e+00> : vector<32x256xf32>
    %6 = tpu.matmul %4, %5, %cst {dimension_numbers = #tpu.dot_dimension_numbers<[1], [0], [0], [1], [0, 0, 1, 1], [], []>} : vector<32x256xbf16>, vector<256x256xbf16>, vector<32x256xf32> -> vector<32x256xf32>
    %7 = arith.addf %3, %6 : vector<32x256xf32>
    %c0_6 = arith.constant 0 : index
    %c0_7 = arith.constant 0 : index
    %8 = vector.load %arg7[%c0_6, %c0_7] : memref<32x256xf32, #tpu.memory_space<vmem>>, vector<32x256xf32>
    tpu.vector_store %arg7[%c0_6, %c0_7], %7 {strides = array<i32>} : memref<32x256xf32, #tpu.memory_space<vmem>>, vector<32x256xf32>,
    %c0_i32_8 = arith.constant 0 : i32
    %9 = arith.cmpi eq, %arg2, %c0_i32_8 : i32
    %10 = arith.extui %9 : i1 to i32
    %c0_i32_9 = arith.constant 0 : i32
    %11 = arith.cmpi ne, %10, %c0_i32_9 : i32
    scf.if %11 {
      %c0_10 = arith.constant 0 : index
      %c0_11 = arith.constant 0 : index
      %12 = vector.load %arg7[%c0_10, %c0_11] : memref<32x256xf32, #tpu.memory_space<vmem>>, vector<32x256xf32>
      %c0_12 = arith.constant 0 : index
      %c0_13 = arith.constant 0 : index
      %13 = vector.load %arg5[%c0_12, %c0_13] : memref<1x256xf32, #tpu.memory_space<vmem>>, vector<1x256xf32>
      %14 = vector.broadcast %13 : vector<1x256xf32> to vector<32x256xf32>
      %15 = arith.addf %12, %14 : vector<32x256xf32>
      %16 = arith.truncf %15 : vector<32x256xf32> to vector<32x256xbf16>
      %c0_14 = arith.constant 0 : index
      %c0_15 = arith.constant 0 : index
      %17 = vector.load %arg6[%c0_14, %c0_15] : memref<32x256xbf16, #tpu.memory_space<vmem>>, vector<32x256xbf16>
      tpu.vector_store %arg6[%c0_14, %c0_15], %16 {strides = array<i32>} : memref<32x256xbf16, #tpu.memory_space<vmem>>, vector<32x256xbf16>,
    } else {
    }
    return
  }
  func.func @transform_0(%arg0: i32, %arg1: i32, %arg2: i32) -> (i32, i32) {
    %c0_i32 = arith.constant 0 : i32
    return %arg0, %arg2 : i32, i32
  }
  func.func @transform_1(%arg0: i32, %arg1: i32, %arg2: i32) -> (i32, i32) {
    %c0_i32 = arith.constant 0 : i32
    return %arg2, %arg1 : i32, i32
  }
  func.func @transform_2(%arg0: i32, %arg1: i32, %arg2: i32) -> (i32, i32) {
    %c0_i32 = arith.constant 0 : i32
    %c0_i32_0 = arith.constant 0 : i32
    return %c0_i32, %arg1 : i32, i32
  }
  func.func @transform_3(%arg0: i32, %arg1: i32, %arg2: i32) -> (i32, i32) {
    %c0_i32 = arith.constant 0 : i32
    return %arg0, %arg1 : i32, i32
  }
}

module attributes {stable_mosaic.version = 11 : i64} {
  func.func @_matmul_kernel(%arg0: i32, %arg1: i32, %arg2: i32, %arg3: memref<32x512xbf16, #tpu.memory_space<vmem>>, %arg4: memref<512x128xbf16, #tpu.memory_space<vmem>>, %arg5: memref<1x128xf32, #tpu.memory_space<vmem>>, %arg6: memref<32x128xbf16, #tpu.memory_space<vmem>>, %arg7: memref<32x128xf32, #tpu.memory_space<vmem>>) attributes {dimension_semantics = [#tpu.dimension_semantics<parallel>, #tpu.dimension_semantics<parallel>, #tpu.dimension_semantics<arbitrary>], iteration_bounds = array<i64: 1, 1, 1>, scalar_prefetch = 0 : i64, scratch_operands = 1 : i64, tpu.core_type = #tpu.core_type<tc>, window_params = [{transform_indices = @transform_0, window_bounds = array<i64: 32, 512>}, {transform_indices = @transform_1, window_bounds = array<i64: 512, 128>}, {transform_indices = @transform_2, window_bounds = array<i64: 1, 128>}, {transform_indices = @transform_3, window_bounds = array<i64: 32, 128>}]} {
    %c0_i32 = arith.constant 0 : i32
    %0 = arith.cmpi eq, %arg2, %c0_i32 : i32
    %1 = arith.extui %0 : i1 to i32
    %c0_i32_0 = arith.constant 0 : i32
    %2 = arith.cmpi ne, %1, %c0_i32_0 : i32
    scf.if %2 {
      %cst_10 = arith.constant 0.000000e+00 : f32
      %12 = vector.broadcast %cst_10 : f32 to vector<32x128xf32>
      %c0_11 = arith.constant 0 : index
      %c0_12 = arith.constant 0 : index
      %13 = vector.load %arg7[%c0_11, %c0_12] : memref<32x128xf32, #tpu.memory_space<vmem>>, vector<32x128xf32>
      tpu.vector_store %arg7[%c0_11, %c0_12], %12 {strides = array<i32>} : memref<32x128xf32, #tpu.memory_space<vmem>>, vector<32x128xf32>,
    } else {
    }
    %c0 = arith.constant 0 : index
    %c0_1 = arith.constant 0 : index
    %3 = vector.load %arg7[%c0, %c0_1] : memref<32x128xf32, #tpu.memory_space<vmem>>, vector<32x128xf32>
    %c0_2 = arith.constant 0 : index
    %c0_3 = arith.constant 0 : index
    %4 = vector.load %arg3[%c0_2, %c0_3] : memref<32x512xbf16, #tpu.memory_space<vmem>>, vector<32x512xbf16>
    %c0_4 = arith.constant 0 : index
    %c0_5 = arith.constant 0 : index
    %5 = vector.load %arg4[%c0_4, %c0_5] : memref<512x128xbf16, #tpu.memory_space<vmem>>, vector<512x128xbf16>
    %cst = arith.constant dense<0.000000e+00> : vector<32x128xf32>
    %6 = tpu.matmul %4, %5, %cst {dimension_numbers = #tpu.dot_dimension_numbers<[1], [0], [0], [1], [0, 0, 1, 1], [], []>} : vector<32x512xbf16>, vector<512x128xbf16>, vector<32x128xf32> -> vector<32x128xf32>
    %7 = arith.addf %3, %6 : vector<32x128xf32>
    %c0_6 = arith.constant 0 : index
    %c0_7 = arith.constant 0 : index
    %8 = vector.load %arg7[%c0_6, %c0_7] : memref<32x128xf32, #tpu.memory_space<vmem>>, vector<32x128xf32>
    tpu.vector_store %arg7[%c0_6, %c0_7], %7 {strides = array<i32>} : memref<32x128xf32, #tpu.memory_space<vmem>>, vector<32x128xf32>,
    %c0_i32_8 = arith.constant 0 : i32
    %9 = arith.cmpi eq, %arg2, %c0_i32_8 : i32
    %10 = arith.extui %9 : i1 to i32
    %c0_i32_9 = arith.constant 0 : i32
    %11 = arith.cmpi ne, %10, %c0_i32_9 : i32
    scf.if %11 {
      %c0_10 = arith.constant 0 : index
      %c0_11 = arith.constant 0 : index
      %12 = vector.load %arg7[%c0_10, %c0_11] : memref<32x128xf32, #tpu.memory_space<vmem>>, vector<32x128xf32>
      %c0_12 = arith.constant 0 : index
      %c0_13 = arith.constant 0 : index
      %13 = vector.load %arg5[%c0_12, %c0_13] : memref<1x128xf32, #tpu.memory_space<vmem>>, vector<1x128xf32>
      %14 = vector.broadcast %13 : vector<1x128xf32> to vector<32x128xf32>
      %15 = arith.addf %12, %14 : vector<32x128xf32>
      %cst_14 = arith.constant 0.000000e+00 : f32
      %16 = vector.broadcast %cst_14 : f32 to vector<32x128xf32>
      %17 = arith.maximumf %15, %16 : vector<32x128xf32>
      %18 = arith.truncf %17 : vector<32x128xf32> to vector<32x128xbf16>
      %c0_15 = arith.constant 0 : index
      %c0_16 = arith.constant 0 : index
      %19 = vector.load %arg6[%c0_15, %c0_16] : memref<32x128xbf16, #tpu.memory_space<vmem>>, vector<32x128xbf16>
      tpu.vector_store %arg6[%c0_15, %c0_16], %18 {strides = array<i32>} : memref<32x128xbf16, #tpu.memory_space<vmem>>, vector<32x128xbf16>,
    } else {
    }
    return
  }
  func.func @transform_0(%arg0: i32, %arg1: i32, %arg2: i32) -> (i32, i32) {
    %c0_i32 = arith.constant 0 : i32
    return %arg0, %arg2 : i32, i32
  }
  func.func @transform_1(%arg0: i32, %arg1: i32, %arg2: i32) -> (i32, i32) {
    %c0_i32 = arith.constant 0 : i32
    return %arg2, %arg1 : i32, i32
  }
  func.func @transform_2(%arg0: i32, %arg1: i32, %arg2: i32) -> (i32, i32) {
    %c0_i32 = arith.constant 0 : i32
    %c0_i32_0 = arith.constant 0 : i32
    return %c0_i32, %arg1 : i32, i32
  }
  func.func @transform_3(%arg0: i32, %arg1: i32, %arg2: i32) -> (i32, i32) {
    %c0_i32 = arith.constant 0 : i32
    return %arg0, %arg1 : i32, i32
  }
}

module attributes {stable_mosaic.version = 11 : i64} {
  func.func @_matmul_kernel(%arg0: i32, %arg1: i32, %arg2: i32, %arg3: memref<32x512xbf16, #tpu.memory_space<vmem>>, %arg4: memref<512x128xbf16, #tpu.memory_space<vmem>>, %arg5: memref<1x128xf32, #tpu.memory_space<vmem>>, %arg6: memref<32x128xbf16, #tpu.memory_space<vmem>>, %arg7: memref<32x128xf32, #tpu.memory_space<vmem>>) attributes {dimension_semantics = [#tpu.dimension_semantics<parallel>, #tpu.dimension_semantics<parallel>, #tpu.dimension_semantics<arbitrary>], iteration_bounds = array<i64: 1, 1, 1>, scalar_prefetch = 0 : i64, scratch_operands = 1 : i64, tpu.core_type = #tpu.core_type<tc>, window_params = [{transform_indices = @transform_0, window_bounds = array<i64: 32, 512>}, {transform_indices = @transform_1, window_bounds = array<i64: 512, 128>}, {transform_indices = @transform_2, window_bounds = array<i64: 1, 128>}, {transform_indices = @transform_3, window_bounds = array<i64: 32, 128>}]} {
    %c0_i32 = arith.constant 0 : i32
    %0 = arith.cmpi eq, %arg2, %c0_i32 : i32
    %1 = arith.extui %0 : i1 to i32
    %c0_i32_0 = arith.constant 0 : i32
    %2 = arith.cmpi ne, %1, %c0_i32_0 : i32
    scf.if %2 {
      %cst_10 = arith.constant 0.000000e+00 : f32
      %12 = vector.broadcast %cst_10 : f32 to vector<32x128xf32>
      %c0_11 = arith.constant 0 : index
      %c0_12 = arith.constant 0 : index
      %13 = vector.load %arg7[%c0_11, %c0_12] : memref<32x128xf32, #tpu.memory_space<vmem>>, vector<32x128xf32>
      tpu.vector_store %arg7[%c0_11, %c0_12], %12 {strides = array<i32>} : memref<32x128xf32, #tpu.memory_space<vmem>>, vector<32x128xf32>,
    } else {
    }
    %c0 = arith.constant 0 : index
    %c0_1 = arith.constant 0 : index
    %3 = vector.load %arg7[%c0, %c0_1] : memref<32x128xf32, #tpu.memory_space<vmem>>, vector<32x128xf32>
    %c0_2 = arith.constant 0 : index
    %c0_3 = arith.constant 0 : index
    %4 = vector.load %arg3[%c0_2, %c0_3] : memref<32x512xbf16, #tpu.memory_space<vmem>>, vector<32x512xbf16>
    %c0_4 = arith.constant 0 : index
    %c0_5 = arith.constant 0 : index
    %5 = vector.load %arg4[%c0_4, %c0_5] : memref<512x128xbf16, #tpu.memory_space<vmem>>, vector<512x128xbf16>
    %cst = arith.constant dense<0.000000e+00> : vector<32x128xf32>
    %6 = tpu.matmul %4, %5, %cst {dimension_numbers = #tpu.dot_dimension_numbers<[1], [0], [0], [1], [0, 0, 1, 1], [], []>} : vector<32x512xbf16>, vector<512x128xbf16>, vector<32x128xf32> -> vector<32x128xf32>
    %7 = arith.addf %3, %6 : vector<32x128xf32>
    %c0_6 = arith.constant 0 : index
    %c0_7 = arith.constant 0 : index
    %8 = vector.load %arg7[%c0_6, %c0_7] : memref<32x128xf32, #tpu.memory_space<vmem>>, vector<32x128xf32>
    tpu.vector_store %arg7[%c0_6, %c0_7], %7 {strides = array<i32>} : memref<32x128xf32, #tpu.memory_space<vmem>>, vector<32x128xf32>,
    %c0_i32_8 = arith.constant 0 : i32
    %9 = arith.cmpi eq, %arg2, %c0_i32_8 : i32
    %10 = arith.extui %9 : i1 to i32
    %c0_i32_9 = arith.constant 0 : i32
    %11 = arith.cmpi ne, %10, %c0_i32_9 : i32
    scf.if %11 {
      %c0_10 = arith.constant 0 : index
      %c0_11 = arith.constant 0 : index
      %12 = vector.load %arg7[%c0_10, %c0_11] : memref<32x128xf32, #tpu.memory_space<vmem>>, vector<32x128xf32>
      %c0_12 = arith.constant 0 : index
      %c0_13 = arith.constant 0 : index
      %13 = vector.load %arg5[%c0_12, %c0_13] : memref<1x128xf32, #tpu.memory_space<vmem>>, vector<1x128xf32>
      %14 = vector.broadcast %13 : vector<1x128xf32> to vector<32x128xf32>
      %15 = arith.addf %12, %14 : vector<32x128xf32>
      %cst_14 = arith.constant 0.000000e+00 : f32
      %16 = vector.broadcast %cst_14 : f32 to vector<32x128xf32>
      %17 = arith.maximumf %15, %16 : vector<32x128xf32>
      %18 = arith.truncf %17 : vector<32x128xf32> to vector<32x128xbf16>
      %c0_15 = arith.constant 0 : index
      %c0_16 = arith.constant 0 : index
      %19 = vector.load %arg6[%c0_15, %c0_16] : memref<32x128xbf16, #tpu.memory_space<vmem>>, vector<32x128xbf16>
      tpu.vector_store %arg6[%c0_15, %c0_16], %18 {strides = array<i32>} : memref<32x128xbf16, #tpu.memory_space<vmem>>, vector<32x128xbf16>,
    } else {
    }
    return
  }
  func.func @transform_0(%arg0: i32, %arg1: i32, %arg2: i32) -> (i32, i32) {
    %c0_i32 = arith.constant 0 : i32
    return %arg0, %arg2 : i32, i32
  }
  func.func @transform_1(%arg0: i32, %arg1: i32, %arg2: i32) -> (i32, i32) {
    %c0_i32 = arith.constant 0 : i32
    return %arg2, %arg1 : i32, i32
  }
  func.func @transform_2(%arg0: i32, %arg1: i32, %arg2: i32) -> (i32, i32) {
    %c0_i32 = arith.constant 0 : i32
    %c0_i32_0 = arith.constant 0 : i32
    return %c0_i32, %arg1 : i32, i32
  }
  func.func @transform_3(%arg0: i32, %arg1: i32, %arg2: i32) -> (i32, i32) {
    %c0_i32 = arith.constant 0 : i32
    return %arg0, %arg1 : i32, i32
  }
}

module attributes {stable_mosaic.version = 11 : i64} {
  func.func @_matmul_kernel(%arg0: i32, %arg1: i32, %arg2: i32, %arg3: memref<32x384xbf16, #tpu.memory_space<vmem>>, %arg4: memref<384x128xbf16, #tpu.memory_space<vmem>>, %arg5: memref<1x128xf32, #tpu.memory_space<vmem>>, %arg6: memref<32x128xbf16, #tpu.memory_space<vmem>>, %arg7: memref<32x128xf32, #tpu.memory_space<vmem>>) attributes {dimension_semantics = [#tpu.dimension_semantics<parallel>, #tpu.dimension_semantics<parallel>, #tpu.dimension_semantics<arbitrary>], iteration_bounds = array<i64: 1, 1, 3>, scalar_prefetch = 0 : i64, scratch_operands = 1 : i64, tpu.core_type = #tpu.core_type<tc>, window_params = [{transform_indices = @transform_0, window_bounds = array<i64: 32, 384>}, {transform_indices = @transform_1, window_bounds = array<i64: 384, 128>}, {transform_indices = @transform_2, window_bounds = array<i64: 1, 128>}, {transform_indices = @transform_3, window_bounds = array<i64: 32, 128>}]} {
    %c0_i32 = arith.constant 0 : i32
    %0 = arith.cmpi eq, %arg2, %c0_i32 : i32
    %1 = arith.extui %0 : i1 to i32
    %c0_i32_0 = arith.constant 0 : i32
    %2 = arith.cmpi ne, %1, %c0_i32_0 : i32
    scf.if %2 {
      %cst_9 = arith.constant 0.000000e+00 : f32
      %12 = vector.broadcast %cst_9 : f32 to vector<32x128xf32>
      %c0_10 = arith.constant 0 : index
      %c0_11 = arith.constant 0 : index
      %13 = vector.load %arg7[%c0_10, %c0_11] : memref<32x128xf32, #tpu.memory_space<vmem>>, vector<32x128xf32>
      tpu.vector_store %arg7[%c0_10, %c0_11], %12 {strides = array<i32>} : memref<32x128xf32, #tpu.memory_space<vmem>>, vector<32x128xf32>,
    } else {
    }
    %c0 = arith.constant 0 : index
    %c0_1 = arith.constant 0 : index
    %3 = vector.load %arg7[%c0, %c0_1] : memref<32x128xf32, #tpu.memory_space<vmem>>, vector<32x128xf32>
    %c0_2 = arith.constant 0 : index
    %c0_3 = arith.constant 0 : index
    %4 = vector.load %arg3[%c0_2, %c0_3] : memref<32x384xbf16, #tpu.memory_space<vmem>>, vector<32x384xbf16>
    %c0_4 = arith.constant 0 : index
    %c0_5 = arith.constant 0 : index
    %5 = vector.load %arg4[%c0_4, %c0_5] : memref<384x128xbf16, #tpu.memory_space<vmem>>, vector<384x128xbf16>
    %cst = arith.constant dense<0.000000e+00> : vector<32x128xf32>
    %6 = tpu.matmul %4, %5, %cst {dimension_numbers = #tpu.dot_dimension_numbers<[1], [0], [0], [1], [0, 0, 1, 1], [], []>} : vector<32x384xbf16>, vector<384x128xbf16>, vector<32x128xf32> -> vector<32x128xf32>
    %7 = arith.addf %3, %6 : vector<32x128xf32>
    %c0_6 = arith.constant 0 : index
    %c0_7 = arith.constant 0 : index
    %8 = vector.load %arg7[%c0_6, %c0_7] : memref<32x128xf32, #tpu.memory_space<vmem>>, vector<32x128xf32>
    tpu.vector_store %arg7[%c0_6, %c0_7], %7 {strides = array<i32>} : memref<32x128xf32, #tpu.memory_space<vmem>>, vector<32x128xf32>,
    %c2_i32 = arith.constant 2 : i32
    %9 = arith.cmpi eq, %arg2, %c2_i32 : i32
    %10 = arith.extui %9 : i1 to i32
    %c0_i32_8 = arith.constant 0 : i32
    %11 = arith.cmpi ne, %10, %c0_i32_8 : i32
    scf.if %11 {
      %c0_9 = arith.constant 0 : index
      %c0_10 = arith.constant 0 : index
      %12 = vector.load %arg7[%c0_9, %c0_10] : memref<32x128xf32, #tpu.memory_space<vmem>>, vector<32x128xf32>
      %c0_11 = arith.constant 0 : index
      %c0_12 = arith.constant 0 : index
      %13 = vector.load %arg5[%c0_11, %c0_12] : memref<1x128xf32, #tpu.memory_space<vmem>>, vector<1x128xf32>
      %14 = vector.broadcast %13 : vector<1x128xf32> to vector<32x128xf32>
      %15 = arith.addf %12, %14 : vector<32x128xf32>
      %cst_13 = arith.constant 0.000000e+00 : f32
      %16 = vector.broadcast %cst_13 : f32 to vector<32x128xf32>
      %17 = arith.maximumf %15, %16 : vector<32x128xf32>
      %18 = arith.truncf %17 : vector<32x128xf32> to vector<32x128xbf16>
      %c0_14 = arith.constant 0 : index
      %c0_15 = arith.constant 0 : index
      %19 = vector.load %arg6[%c0_14, %c0_15] : memref<32x128xbf16, #tpu.memory_space<vmem>>, vector<32x128xbf16>
      tpu.vector_store %arg6[%c0_14, %c0_15], %18 {strides = array<i32>} : memref<32x128xbf16, #tpu.memory_space<vmem>>, vector<32x128xbf16>,
    } else {
    }
    return
  }
  func.func @transform_0(%arg0: i32, %arg1: i32, %arg2: i32) -> (i32, i32) {
    %c0_i32 = arith.constant 0 : i32
    return %arg0, %arg2 : i32, i32
  }
  func.func @transform_1(%arg0: i32, %arg1: i32, %arg2: i32) -> (i32, i32) {
    %c0_i32 = arith.constant 0 : i32
    return %arg2, %arg1 : i32, i32
  }
  func.func @transform_2(%arg0: i32, %arg1: i32, %arg2: i32) -> (i32, i32) {
    %c0_i32 = arith.constant 0 : i32
    %c0_i32_0 = arith.constant 0 : i32
    return %c0_i32, %arg1 : i32, i32
  }
  func.func @transform_3(%arg0: i32, %arg1: i32, %arg2: i32) -> (i32, i32) {
    %c0_i32 = arith.constant 0 : i32
    return %arg0, %arg1 : i32, i32
  }
}

module attributes {stable_mosaic.version = 11 : i64} {
  func.func @_matmul_kernel(%arg0: i32, %arg1: i32, %arg2: i32, %arg3: memref<32x512xbf16, #tpu.memory_space<vmem>>, %arg4: memref<512x256xbf16, #tpu.memory_space<vmem>>, %arg5: memref<1x256xf32, #tpu.memory_space<vmem>>, %arg6: memref<32x256xbf16, #tpu.memory_space<vmem>>, %arg7: memref<32x256xf32, #tpu.memory_space<vmem>>) attributes {dimension_semantics = [#tpu.dimension_semantics<parallel>, #tpu.dimension_semantics<parallel>, #tpu.dimension_semantics<arbitrary>], iteration_bounds = array<i64: 1, 1, 1>, scalar_prefetch = 0 : i64, scratch_operands = 1 : i64, tpu.core_type = #tpu.core_type<tc>, window_params = [{transform_indices = @transform_0, window_bounds = array<i64: 32, 512>}, {transform_indices = @transform_1, window_bounds = array<i64: 512, 256>}, {transform_indices = @transform_2, window_bounds = array<i64: 1, 256>}, {transform_indices = @transform_3, window_bounds = array<i64: 32, 256>}]} {
    %c0_i32 = arith.constant 0 : i32
    %0 = arith.cmpi eq, %arg2, %c0_i32 : i32
    %1 = arith.extui %0 : i1 to i32
    %c0_i32_0 = arith.constant 0 : i32
    %2 = arith.cmpi ne, %1, %c0_i32_0 : i32
    scf.if %2 {
      %cst_10 = arith.constant 0.000000e+00 : f32
      %12 = vector.broadcast %cst_10 : f32 to vector<32x256xf32>
      %c0_11 = arith.constant 0 : index
      %c0_12 = arith.constant 0 : index
      %13 = vector.load %arg7[%c0_11, %c0_12] : memref<32x256xf32, #tpu.memory_space<vmem>>, vector<32x256xf32>
      tpu.vector_store %arg7[%c0_11, %c0_12], %12 {strides = array<i32>} : memref<32x256xf32, #tpu.memory_space<vmem>>, vector<32x256xf32>,
    } else {
    }
    %c0 = arith.constant 0 : index
    %c0_1 = arith.constant 0 : index
    %3 = vector.load %arg7[%c0, %c0_1] : memref<32x256xf32, #tpu.memory_space<vmem>>, vector<32x256xf32>
    %c0_2 = arith.constant 0 : index
    %c0_3 = arith.constant 0 : index
    %4 = vector.load %arg3[%c0_2, %c0_3] : memref<32x512xbf16, #tpu.memory_space<vmem>>, vector<32x512xbf16>
    %c0_4 = arith.constant 0 : index
    %c0_5 = arith.constant 0 : index
    %5 = vector.load %arg4[%c0_4, %c0_5] : memref<512x256xbf16, #tpu.memory_space<vmem>>, vector<512x256xbf16>
    %cst = arith.constant dense<0.000000e+00> : vector<32x256xf32>
    %6 = tpu.matmul %4, %5, %cst {dimension_numbers = #tpu.dot_dimension_numbers<[1], [0], [0], [1], [0, 0, 1, 1], [], []>} : vector<32x512xbf16>, vector<512x256xbf16>, vector<32x256xf32> -> vector<32x256xf32>
    %7 = arith.addf %3, %6 : vector<32x256xf32>
    %c0_6 = arith.constant 0 : index
    %c0_7 = arith.constant 0 : index
    %8 = vector.load %arg7[%c0_6, %c0_7] : memref<32x256xf32, #tpu.memory_space<vmem>>, vector<32x256xf32>
    tpu.vector_store %arg7[%c0_6, %c0_7], %7 {strides = array<i32>} : memref<32x256xf32, #tpu.memory_space<vmem>>, vector<32x256xf32>,
    %c0_i32_8 = arith.constant 0 : i32
    %9 = arith.cmpi eq, %arg2, %c0_i32_8 : i32
    %10 = arith.extui %9 : i1 to i32
    %c0_i32_9 = arith.constant 0 : i32
    %11 = arith.cmpi ne, %10, %c0_i32_9 : i32
    scf.if %11 {
      %c0_10 = arith.constant 0 : index
      %c0_11 = arith.constant 0 : index
      %12 = vector.load %arg7[%c0_10, %c0_11] : memref<32x256xf32, #tpu.memory_space<vmem>>, vector<32x256xf32>
      %c0_12 = arith.constant 0 : index
      %c0_13 = arith.constant 0 : index
      %13 = vector.load %arg5[%c0_12, %c0_13] : memref<1x256xf32, #tpu.memory_space<vmem>>, vector<1x256xf32>
      %14 = vector.broadcast %13 : vector<1x256xf32> to vector<32x256xf32>
      %15 = arith.addf %12, %14 : vector<32x256xf32>
      %cst_14 = arith.constant 0.000000e+00 : f32
      %16 = vector.broadcast %cst_14 : f32 to vector<32x256xf32>
      %17 = arith.maximumf %15, %16 : vector<32x256xf32>
      %18 = arith.truncf %17 : vector<32x256xf32> to vector<32x256xbf16>
      %c0_15 = arith.constant 0 : index
      %c0_16 = arith.constant 0 : index
      %19 = vector.load %arg6[%c0_15, %c0_16] : memref<32x256xbf16, #tpu.memory_space<vmem>>, vector<32x256xbf16>
      tpu.vector_store %arg6[%c0_15, %c0_16], %18 {strides = array<i32>} : memref<32x256xbf16, #tpu.memory_space<vmem>>, vector<32x256xbf16>,
    } else {
    }
    return
  }
  func.func @transform_0(%arg0: i32, %arg1: i32, %arg2: i32) -> (i32, i32) {
    %c0_i32 = arith.constant 0 : i32
    return %arg0, %arg2 : i32, i32
  }
  func.func @transform_1(%arg0: i32, %arg1: i32, %arg2: i32) -> (i32, i32) {
    %c0_i32 = arith.constant 0 : i32
    return %arg2, %arg1 : i32, i32
  }
  func.func @transform_2(%arg0: i32, %arg1: i32, %arg2: i32) -> (i32, i32) {
    %c0_i32 = arith.constant 0 : i32
    %c0_i32_0 = arith.constant 0 : i32
    return %c0_i32, %arg1 : i32, i32
  }
  func.func @transform_3(%arg0: i32, %arg1: i32, %arg2: i32) -> (i32, i32) {
    %c0_i32 = arith.constant 0 : i32
    return %arg0, %arg1 : i32, i32
  }
}

module attributes {stable_mosaic.version = 11 : i64} {
  func.func @_matmul_kernel(%arg0: i32, %arg1: i32, %arg2: i32, %arg3: memref<32x384xbf16, #tpu.memory_space<vmem>>, %arg4: memref<384x256xbf16, #tpu.memory_space<vmem>>, %arg5: memref<1x256xf32, #tpu.memory_space<vmem>>, %arg6: memref<32x256xbf16, #tpu.memory_space<vmem>>, %arg7: memref<32x256xf32, #tpu.memory_space<vmem>>) attributes {dimension_semantics = [#tpu.dimension_semantics<parallel>, #tpu.dimension_semantics<parallel>, #tpu.dimension_semantics<arbitrary>], iteration_bounds = array<i64: 1, 1, 6>, scalar_prefetch = 0 : i64, scratch_operands = 1 : i64, tpu.core_type = #tpu.core_type<tc>, window_params = [{transform_indices = @transform_0, window_bounds = array<i64: 32, 384>}, {transform_indices = @transform_1, window_bounds = array<i64: 384, 256>}, {transform_indices = @transform_2, window_bounds = array<i64: 1, 256>}, {transform_indices = @transform_3, window_bounds = array<i64: 32, 256>}]} {
    %c0_i32 = arith.constant 0 : i32
    %0 = arith.cmpi eq, %arg2, %c0_i32 : i32
    %1 = arith.extui %0 : i1 to i32
    %c0_i32_0 = arith.constant 0 : i32
    %2 = arith.cmpi ne, %1, %c0_i32_0 : i32
    scf.if %2 {
      %cst_9 = arith.constant 0.000000e+00 : f32
      %12 = vector.broadcast %cst_9 : f32 to vector<32x256xf32>
      %c0_10 = arith.constant 0 : index
      %c0_11 = arith.constant 0 : index
      %13 = vector.load %arg7[%c0_10, %c0_11] : memref<32x256xf32, #tpu.memory_space<vmem>>, vector<32x256xf32>
      tpu.vector_store %arg7[%c0_10, %c0_11], %12 {strides = array<i32>} : memref<32x256xf32, #tpu.memory_space<vmem>>, vector<32x256xf32>,
    } else {
    }
    %c0 = arith.constant 0 : index
    %c0_1 = arith.constant 0 : index
    %3 = vector.load %arg7[%c0, %c0_1] : memref<32x256xf32, #tpu.memory_space<vmem>>, vector<32x256xf32>
    %c0_2 = arith.constant 0 : index
    %c0_3 = arith.constant 0 : index
    %4 = vector.load %arg3[%c0_2, %c0_3] : memref<32x384xbf16, #tpu.memory_space<vmem>>, vector<32x384xbf16>
    %c0_4 = arith.constant 0 : index
    %c0_5 = arith.constant 0 : index
    %5 = vector.load %arg4[%c0_4, %c0_5] : memref<384x256xbf16, #tpu.memory_space<vmem>>, vector<384x256xbf16>
    %cst = arith.constant dense<0.000000e+00> : vector<32x256xf32>
    %6 = tpu.matmul %4, %5, %cst {dimension_numbers = #tpu.dot_dimension_numbers<[1], [0], [0], [1], [0, 0, 1, 1], [], []>} : vector<32x384xbf16>, vector<384x256xbf16>, vector<32x256xf32> -> vector<32x256xf32>
    %7 = arith.addf %3, %6 : vector<32x256xf32>
    %c0_6 = arith.constant 0 : index
    %c0_7 = arith.constant 0 : index
    %8 = vector.load %arg7[%c0_6, %c0_7] : memref<32x256xf32, #tpu.memory_space<vmem>>, vector<32x256xf32>
    tpu.vector_store %arg7[%c0_6, %c0_7], %7 {strides = array<i32>} : memref<32x256xf32, #tpu.memory_space<vmem>>, vector<32x256xf32>,
    %c5_i32 = arith.constant 5 : i32
    %9 = arith.cmpi eq, %arg2, %c5_i32 : i32
    %10 = arith.extui %9 : i1 to i32
    %c0_i32_8 = arith.constant 0 : i32
    %11 = arith.cmpi ne, %10, %c0_i32_8 : i32
    scf.if %11 {
      %c0_9 = arith.constant 0 : index
      %c0_10 = arith.constant 0 : index
      %12 = vector.load %arg7[%c0_9, %c0_10] : memref<32x256xf32, #tpu.memory_space<vmem>>, vector<32x256xf32>
      %c0_11 = arith.constant 0 : index
      %c0_12 = arith.constant 0 : index
      %13 = vector.load %arg5[%c0_11, %c0_12] : memref<1x256xf32, #tpu.memory_space<vmem>>, vector<1x256xf32>
      %14 = vector.broadcast %13 : vector<1x256xf32> to vector<32x256xf32>
      %15 = arith.addf %12, %14 : vector<32x256xf32>
      %cst_13 = arith.constant 0.000000e+00 : f32
      %16 = vector.broadcast %cst_13 : f32 to vector<32x256xf32>
      %17 = arith.maximumf %15, %16 : vector<32x256xf32>
      %18 = arith.truncf %17 : vector<32x256xf32> to vector<32x256xbf16>
      %c0_14 = arith.constant 0 : index
      %c0_15 = arith.constant 0 : index
      %19 = vector.load %arg6[%c0_14, %c0_15] : memref<32x256xbf16, #tpu.memory_space<vmem>>, vector<32x256xbf16>
      tpu.vector_store %arg6[%c0_14, %c0_15], %18 {strides = array<i32>} : memref<32x256xbf16, #tpu.memory_space<vmem>>, vector<32x256xbf16>,
    } else {
    }
    return
  }
  func.func @transform_0(%arg0: i32, %arg1: i32, %arg2: i32) -> (i32, i32) {
    %c0_i32 = arith.constant 0 : i32
    return %arg0, %arg2 : i32, i32
  }
  func.func @transform_1(%arg0: i32, %arg1: i32, %arg2: i32) -> (i32, i32) {
    %c0_i32 = arith.constant 0 : i32
    return %arg2, %arg1 : i32, i32
  }
  func.func @transform_2(%arg0: i32, %arg1: i32, %arg2: i32) -> (i32, i32) {
    %c0_i32 = arith.constant 0 : i32
    %c0_i32_0 = arith.constant 0 : i32
    return %c0_i32, %arg1 : i32, i32
  }
  func.func @transform_3(%arg0: i32, %arg1: i32, %arg2: i32) -> (i32, i32) {
    %c0_i32 = arith.constant 0 : i32
    return %arg0, %arg1 : i32, i32
  }
}

module attributes {stable_mosaic.version = 11 : i64} {
  func.func @_matmul_kernel(%arg0: i32, %arg1: i32, %arg2: i32, %arg3: memref<32x512xbf16, #tpu.memory_space<vmem>>, %arg4: memref<512x256xbf16, #tpu.memory_space<vmem>>, %arg5: memref<1x256xf32, #tpu.memory_space<vmem>>, %arg6: memref<32x256xbf16, #tpu.memory_space<vmem>>, %arg7: memref<32x256xf32, #tpu.memory_space<vmem>>) attributes {dimension_semantics = [#tpu.dimension_semantics<parallel>, #tpu.dimension_semantics<parallel>, #tpu.dimension_semantics<arbitrary>], iteration_bounds = array<i64: 1, 4, 1>, scalar_prefetch = 0 : i64, scratch_operands = 1 : i64, tpu.core_type = #tpu.core_type<tc>, window_params = [{transform_indices = @transform_0, window_bounds = array<i64: 32, 512>}, {transform_indices = @transform_1, window_bounds = array<i64: 512, 256>}, {transform_indices = @transform_2, window_bounds = array<i64: 1, 256>}, {transform_indices = @transform_3, window_bounds = array<i64: 32, 256>}]} {
    %c0_i32 = arith.constant 0 : i32
    %0 = arith.cmpi eq, %arg2, %c0_i32 : i32
    %1 = arith.extui %0 : i1 to i32
    %c0_i32_0 = arith.constant 0 : i32
    %2 = arith.cmpi ne, %1, %c0_i32_0 : i32
    scf.if %2 {
      %cst_10 = arith.constant 0.000000e+00 : f32
      %12 = vector.broadcast %cst_10 : f32 to vector<32x256xf32>
      %c0_11 = arith.constant 0 : index
      %c0_12 = arith.constant 0 : index
      %13 = vector.load %arg7[%c0_11, %c0_12] : memref<32x256xf32, #tpu.memory_space<vmem>>, vector<32x256xf32>
      tpu.vector_store %arg7[%c0_11, %c0_12], %12 {strides = array<i32>} : memref<32x256xf32, #tpu.memory_space<vmem>>, vector<32x256xf32>,
    } else {
    }
    %c0 = arith.constant 0 : index
    %c0_1 = arith.constant 0 : index
    %3 = vector.load %arg7[%c0, %c0_1] : memref<32x256xf32, #tpu.memory_space<vmem>>, vector<32x256xf32>
    %c0_2 = arith.constant 0 : index
    %c0_3 = arith.constant 0 : index
    %4 = vector.load %arg3[%c0_2, %c0_3] : memref<32x512xbf16, #tpu.memory_space<vmem>>, vector<32x512xbf16>
    %c0_4 = arith.constant 0 : index
    %c0_5 = arith.constant 0 : index
    %5 = vector.load %arg4[%c0_4, %c0_5] : memref<512x256xbf16, #tpu.memory_space<vmem>>, vector<512x256xbf16>
    %cst = arith.constant dense<0.000000e+00> : vector<32x256xf32>
    %6 = tpu.matmul %4, %5, %cst {dimension_numbers = #tpu.dot_dimension_numbers<[1], [0], [0], [1], [0, 0, 1, 1], [], []>} : vector<32x512xbf16>, vector<512x256xbf16>, vector<32x256xf32> -> vector<32x256xf32>
    %7 = arith.addf %3, %6 : vector<32x256xf32>
    %c0_6 = arith.constant 0 : index
    %c0_7 = arith.constant 0 : index
    %8 = vector.load %arg7[%c0_6, %c0_7] : memref<32x256xf32, #tpu.memory_space<vmem>>, vector<32x256xf32>
    tpu.vector_store %arg7[%c0_6, %c0_7], %7 {strides = array<i32>} : memref<32x256xf32, #tpu.memory_space<vmem>>, vector<32x256xf32>,
    %c0_i32_8 = arith.constant 0 : i32
    %9 = arith.cmpi eq, %arg2, %c0_i32_8 : i32
    %10 = arith.extui %9 : i1 to i32
    %c0_i32_9 = arith.constant 0 : i32
    %11 = arith.cmpi ne, %10, %c0_i32_9 : i32
    scf.if %11 {
      %c0_10 = arith.constant 0 : index
      %c0_11 = arith.constant 0 : index
      %12 = vector.load %arg7[%c0_10, %c0_11] : memref<32x256xf32, #tpu.memory_space<vmem>>, vector<32x256xf32>
      %c0_12 = arith.constant 0 : index
      %c0_13 = arith.constant 0 : index
      %13 = vector.load %arg5[%c0_12, %c0_13] : memref<1x256xf32, #tpu.memory_space<vmem>>, vector<1x256xf32>
      %14 = vector.broadcast %13 : vector<1x256xf32> to vector<32x256xf32>
      %15 = arith.addf %12, %14 : vector<32x256xf32>
      %16 = arith.truncf %15 : vector<32x256xf32> to vector<32x256xbf16>
      %c0_14 = arith.constant 0 : index
      %c0_15 = arith.constant 0 : index
      %17 = vector.load %arg6[%c0_14, %c0_15] : memref<32x256xbf16, #tpu.memory_space<vmem>>, vector<32x256xbf16>
      tpu.vector_store %arg6[%c0_14, %c0_15], %16 {strides = array<i32>} : memref<32x256xbf16, #tpu.memory_space<vmem>>, vector<32x256xbf16>,
    } else {
    }
    return
  }
  func.func @transform_0(%arg0: i32, %arg1: i32, %arg2: i32) -> (i32, i32) {
    %c0_i32 = arith.constant 0 : i32
    return %arg0, %arg2 : i32, i32
  }
  func.func @transform_1(%arg0: i32, %arg1: i32, %arg2: i32) -> (i32, i32) {
    %c0_i32 = arith.constant 0 : i32
    return %arg2, %arg1 : i32, i32
  }
  func.func @transform_2(%arg0: i32, %arg1: i32, %arg2: i32) -> (i32, i32) {
    %c0_i32 = arith.constant 0 : i32
    %c0_i32_0 = arith.constant 0 : i32
    return %c0_i32, %arg1 : i32, i32
  }
  func.func @transform_3(%arg0: i32, %arg1: i32, %arg2: i32) -> (i32, i32) {
    %c0_i32 = arith.constant 0 : i32
    return %arg0, %arg1 : i32, i32
  }
}

module attributes {stable_mosaic.version = 11 : i64} {
  func.func @_matmul_kernel(%arg0: i32, %arg1: i32, %arg2: i32, %arg3: memref<32x256xbf16, #tpu.memory_space<vmem>>, %arg4: memref<256x256xbf16, #tpu.memory_space<vmem>>, %arg5: memref<1x256xf32, #tpu.memory_space<vmem>>, %arg6: memref<32x256xbf16, #tpu.memory_space<vmem>>, %arg7: memref<32x256xbf16, #tpu.memory_space<vmem>>, %arg8: memref<32x256xf32, #tpu.memory_space<vmem>>) attributes {dimension_semantics = [#tpu.dimension_semantics<parallel>, #tpu.dimension_semantics<parallel>, #tpu.dimension_semantics<arbitrary>], iteration_bounds = array<i64: 1, 4, 1>, scalar_prefetch = 0 : i64, scratch_operands = 1 : i64, tpu.core_type = #tpu.core_type<tc>, window_params = [{transform_indices = @transform_0, window_bounds = array<i64: 32, 256>}, {transform_indices = @transform_1, window_bounds = array<i64: 256, 256>}, {transform_indices = @transform_2, window_bounds = array<i64: 1, 256>}, {transform_indices = @transform_3, window_bounds = array<i64: 32, 256>}, {transform_indices = @transform_4, window_bounds = array<i64: 32, 256>}]} {
    %c0_i32 = arith.constant 0 : i32
    %0 = arith.cmpi eq, %arg2, %c0_i32 : i32
    %1 = arith.extui %0 : i1 to i32
    %c0_i32_0 = arith.constant 0 : i32
    %2 = arith.cmpi ne, %1, %c0_i32_0 : i32
    scf.if %2 {
      %cst_10 = arith.constant 0.000000e+00 : f32
      %12 = vector.broadcast %cst_10 : f32 to vector<32x256xf32>
      %c0_11 = arith.constant 0 : index
      %c0_12 = arith.constant 0 : index
      %13 = vector.load %arg8[%c0_11, %c0_12] : memref<32x256xf32, #tpu.memory_space<vmem>>, vector<32x256xf32>
      tpu.vector_store %arg8[%c0_11, %c0_12], %12 {strides = array<i32>} : memref<32x256xf32, #tpu.memory_space<vmem>>, vector<32x256xf32>,
    } else {
    }
    %c0 = arith.constant 0 : index
    %c0_1 = arith.constant 0 : index
    %3 = vector.load %arg8[%c0, %c0_1] : memref<32x256xf32, #tpu.memory_space<vmem>>, vector<32x256xf32>
    %c0_2 = arith.constant 0 : index
    %c0_3 = arith.constant 0 : index
    %4 = vector.load %arg3[%c0_2, %c0_3] : memref<32x256xbf16, #tpu.memory_space<vmem>>, vector<32x256xbf16>
    %c0_4 = arith.constant 0 : index
    %c0_5 = arith.constant 0 : index
    %5 = vector.load %arg4[%c0_4, %c0_5] : memref<256x256xbf16, #tpu.memory_space<vmem>>, vector<256x256xbf16>
    %cst = arith.constant dense<0.000000e+00> : vector<32x256xf32>
    %6 = tpu.matmul %4, %5, %cst {dimension_numbers = #tpu.dot_dimension_numbers<[1], [0], [0], [1], [0, 0, 1, 1], [], []>} : vector<32x256xbf16>, vector<256x256xbf16>, vector<32x256xf32> -> vector<32x256xf32>
    %7 = arith.addf %3, %6 : vector<32x256xf32>
    %c0_6 = arith.constant 0 : index
    %c0_7 = arith.constant 0 : index
    %8 = vector.load %arg8[%c0_6, %c0_7] : memref<32x256xf32, #tpu.memory_space<vmem>>, vector<32x256xf32>
    tpu.vector_store %arg8[%c0_6, %c0_7], %7 {strides = array<i32>} : memref<32x256xf32, #tpu.memory_space<vmem>>, vector<32x256xf32>,
    %c0_i32_8 = arith.constant 0 : i32
    %9 = arith.cmpi eq, %arg2, %c0_i32_8 : i32
    %10 = arith.extui %9 : i1 to i32
    %c0_i32_9 = arith.constant 0 : i32
    %11 = arith.cmpi ne, %10, %c0_i32_9 : i32
    scf.if %11 {
      %c0_10 = arith.constant 0 : index
      %c0_11 = arith.constant 0 : index
      %12 = vector.load %arg8[%c0_10, %c0_11] : memref<32x256xf32, #tpu.memory_space<vmem>>, vector<32x256xf32>
      %c0_12 = arith.constant 0 : index
      %c0_13 = arith.constant 0 : index
      %13 = vector.load %arg5[%c0_12, %c0_13] : memref<1x256xf32, #tpu.memory_space<vmem>>, vector<1x256xf32>
      %14 = vector.broadcast %13 : vector<1x256xf32> to vector<32x256xf32>
      %15 = arith.addf %12, %14 : vector<32x256xf32>
      %c0_14 = arith.constant 0 : index
      %c0_15 = arith.constant 0 : index
      %16 = vector.load %arg6[%c0_14, %c0_15] : memref<32x256xbf16, #tpu.memory_space<vmem>>, vector<32x256xbf16>
      %17 = arith.extf %16 : vector<32x256xbf16> to vector<32x256xf32>
      %18 = arith.addf %15, %17 : vector<32x256xf32>
      %cst_16 = arith.constant 0.000000e+00 : f32
      %19 = vector.broadcast %cst_16 : f32 to vector<32x256xf32>
      %20 = arith.maximumf %18, %19 : vector<32x256xf32>
      %21 = arith.truncf %20 : vector<32x256xf32> to vector<32x256xbf16>
      %c0_17 = arith.constant 0 : index
      %c0_18 = arith.constant 0 : index
      %22 = vector.load %arg7[%c0_17, %c0_18] : memref<32x256xbf16, #tpu.memory_space<vmem>>, vector<32x256xbf16>
      tpu.vector_store %arg7[%c0_17, %c0_18], %21 {strides = array<i32>} : memref<32x256xbf16, #tpu.memory_space<vmem>>, vector<32x256xbf16>,
    } else {
    }
    return
  }
  func.func @transform_0(%arg0: i32, %arg1: i32, %arg2: i32) -> (i32, i32) {
    %c0_i32 = arith.constant 0 : i32
    return %arg0, %arg2 : i32, i32
  }
  func.func @transform_1(%arg0: i32, %arg1: i32, %arg2: i32) -> (i32, i32) {
    %c0_i32 = arith.constant 0 : i32
    return %arg2, %arg1 : i32, i32
  }
  func.func @transform_2(%arg0: i32, %arg1: i32, %arg2: i32) -> (i32, i32) {
    %c0_i32 = arith.constant 0 : i32
    %c0_i32_0 = arith.constant 0 : i32
    return %c0_i32, %arg1 : i32, i32
  }
  func.func @transform_3(%arg0: i32, %arg1: i32, %arg2: i32) -> (i32, i32) {
    %c0_i32 = arith.constant 0 : i32
    return %arg0, %arg1 : i32, i32
  }
  func.func @transform_4(%arg0: i32, %arg1: i32, %arg2: i32) -> (i32, i32) {
    %c0_i32 = arith.constant 0 : i32
    return %arg0, %arg1 : i32, i32
  }
}

module attributes {stable_mosaic.version = 11 : i64} {
  func.func @_matmul_kernel(%arg0: i32, %arg1: i32, %arg2: i32, %arg3: memref<32x512xbf16, #tpu.memory_space<vmem>>, %arg4: memref<512x256xbf16, #tpu.memory_space<vmem>>, %arg5: memref<1x256xf32, #tpu.memory_space<vmem>>, %arg6: memref<32x256xbf16, #tpu.memory_space<vmem>>, %arg7: memref<32x256xf32, #tpu.memory_space<vmem>>) attributes {dimension_semantics = [#tpu.dimension_semantics<parallel>, #tpu.dimension_semantics<parallel>, #tpu.dimension_semantics<arbitrary>], iteration_bounds = array<i64: 1, 1, 2>, scalar_prefetch = 0 : i64, scratch_operands = 1 : i64, tpu.core_type = #tpu.core_type<tc>, window_params = [{transform_indices = @transform_0, window_bounds = array<i64: 32, 512>}, {transform_indices = @transform_1, window_bounds = array<i64: 512, 256>}, {transform_indices = @transform_2, window_bounds = array<i64: 1, 256>}, {transform_indices = @transform_3, window_bounds = array<i64: 32, 256>}]} {
    %c0_i32 = arith.constant 0 : i32
    %0 = arith.cmpi eq, %arg2, %c0_i32 : i32
    %1 = arith.extui %0 : i1 to i32
    %c0_i32_0 = arith.constant 0 : i32
    %2 = arith.cmpi ne, %1, %c0_i32_0 : i32
    scf.if %2 {
      %cst_9 = arith.constant 0.000000e+00 : f32
      %12 = vector.broadcast %cst_9 : f32 to vector<32x256xf32>
      %c0_10 = arith.constant 0 : index
      %c0_11 = arith.constant 0 : index
      %13 = vector.load %arg7[%c0_10, %c0_11] : memref<32x256xf32, #tpu.memory_space<vmem>>, vector<32x256xf32>
      tpu.vector_store %arg7[%c0_10, %c0_11], %12 {strides = array<i32>} : memref<32x256xf32, #tpu.memory_space<vmem>>, vector<32x256xf32>,
    } else {
    }
    %c0 = arith.constant 0 : index
    %c0_1 = arith.constant 0 : index
    %3 = vector.load %arg7[%c0, %c0_1] : memref<32x256xf32, #tpu.memory_space<vmem>>, vector<32x256xf32>
    %c0_2 = arith.constant 0 : index
    %c0_3 = arith.constant 0 : index
    %4 = vector.load %arg3[%c0_2, %c0_3] : memref<32x512xbf16, #tpu.memory_space<vmem>>, vector<32x512xbf16>
    %c0_4 = arith.constant 0 : index
    %c0_5 = arith.constant 0 : index
    %5 = vector.load %arg4[%c0_4, %c0_5] : memref<512x256xbf16, #tpu.memory_space<vmem>>, vector<512x256xbf16>
    %cst = arith.constant dense<0.000000e+00> : vector<32x256xf32>
    %6 = tpu.matmul %4, %5, %cst {dimension_numbers = #tpu.dot_dimension_numbers<[1], [0], [0], [1], [0, 0, 1, 1], [], []>} : vector<32x512xbf16>, vector<512x256xbf16>, vector<32x256xf32> -> vector<32x256xf32>
    %7 = arith.addf %3, %6 : vector<32x256xf32>
    %c0_6 = arith.constant 0 : index
    %c0_7 = arith.constant 0 : index
    %8 = vector.load %arg7[%c0_6, %c0_7] : memref<32x256xf32, #tpu.memory_space<vmem>>, vector<32x256xf32>
    tpu.vector_store %arg7[%c0_6, %c0_7], %7 {strides = array<i32>} : memref<32x256xf32, #tpu.memory_space<vmem>>, vector<32x256xf32>,
    %c1_i32 = arith.constant 1 : i32
    %9 = arith.cmpi eq, %arg2, %c1_i32 : i32
    %10 = arith.extui %9 : i1 to i32
    %c0_i32_8 = arith.constant 0 : i32
    %11 = arith.cmpi ne, %10, %c0_i32_8 : i32
    scf.if %11 {
      %c0_9 = arith.constant 0 : index
      %c0_10 = arith.constant 0 : index
      %12 = vector.load %arg7[%c0_9, %c0_10] : memref<32x256xf32, #tpu.memory_space<vmem>>, vector<32x256xf32>
      %c0_11 = arith.constant 0 : index
      %c0_12 = arith.constant 0 : index
      %13 = vector.load %arg5[%c0_11, %c0_12] : memref<1x256xf32, #tpu.memory_space<vmem>>, vector<1x256xf32>
      %14 = vector.broadcast %13 : vector<1x256xf32> to vector<32x256xf32>
      %15 = arith.addf %12, %14 : vector<32x256xf32>
      %cst_13 = arith.constant 0.000000e+00 : f32
      %16 = vector.broadcast %cst_13 : f32 to vector<32x256xf32>
      %17 = arith.maximumf %15, %16 : vector<32x256xf32>
      %18 = arith.truncf %17 : vector<32x256xf32> to vector<32x256xbf16>
      %c0_14 = arith.constant 0 : index
      %c0_15 = arith.constant 0 : index
      %19 = vector.load %arg6[%c0_14, %c0_15] : memref<32x256xbf16, #tpu.memory_space<vmem>>, vector<32x256xbf16>
      tpu.vector_store %arg6[%c0_14, %c0_15], %18 {strides = array<i32>} : memref<32x256xbf16, #tpu.memory_space<vmem>>, vector<32x256xbf16>,
    } else {
    }
    return
  }
  func.func @transform_0(%arg0: i32, %arg1: i32, %arg2: i32) -> (i32, i32) {
    %c0_i32 = arith.constant 0 : i32
    return %arg0, %arg2 : i32, i32
  }
  func.func @transform_1(%arg0: i32, %arg1: i32, %arg2: i32) -> (i32, i32) {
    %c0_i32 = arith.constant 0 : i32
    return %arg2, %arg1 : i32, i32
  }
  func.func @transform_2(%arg0: i32, %arg1: i32, %arg2: i32) -> (i32, i32) {
    %c0_i32 = arith.constant 0 : i32
    %c0_i32_0 = arith.constant 0 : i32
    return %c0_i32, %arg1 : i32, i32
  }
  func.func @transform_3(%arg0: i32, %arg1: i32, %arg2: i32) -> (i32, i32) {
    %c0_i32 = arith.constant 0 : i32
    return %arg0, %arg1 : i32, i32
  }
}

module attributes {stable_mosaic.version = 11 : i64} {
  func.func @_matmul_kernel(%arg0: i32, %arg1: i32, %arg2: i32, %arg3: memref<32x512xbf16, #tpu.memory_space<vmem>>, %arg4: memref<512x256xbf16, #tpu.memory_space<vmem>>, %arg5: memref<1x256xf32, #tpu.memory_space<vmem>>, %arg6: memref<32x256xbf16, #tpu.memory_space<vmem>>, %arg7: memref<32x256xf32, #tpu.memory_space<vmem>>) attributes {dimension_semantics = [#tpu.dimension_semantics<parallel>, #tpu.dimension_semantics<parallel>, #tpu.dimension_semantics<arbitrary>], iteration_bounds = array<i64: 1, 1, 2>, scalar_prefetch = 0 : i64, scratch_operands = 1 : i64, tpu.core_type = #tpu.core_type<tc>, window_params = [{transform_indices = @transform_0, window_bounds = array<i64: 32, 512>}, {transform_indices = @transform_1, window_bounds = array<i64: 512, 256>}, {transform_indices = @transform_2, window_bounds = array<i64: 1, 256>}, {transform_indices = @transform_3, window_bounds = array<i64: 32, 256>}]} {
    %c0_i32 = arith.constant 0 : i32
    %0 = arith.cmpi eq, %arg2, %c0_i32 : i32
    %1 = arith.extui %0 : i1 to i32
    %c0_i32_0 = arith.constant 0 : i32
    %2 = arith.cmpi ne, %1, %c0_i32_0 : i32
    scf.if %2 {
      %cst_9 = arith.constant 0.000000e+00 : f32
      %12 = vector.broadcast %cst_9 : f32 to vector<32x256xf32>
      %c0_10 = arith.constant 0 : index
      %c0_11 = arith.constant 0 : index
      %13 = vector.load %arg7[%c0_10, %c0_11] : memref<32x256xf32, #tpu.memory_space<vmem>>, vector<32x256xf32>
      tpu.vector_store %arg7[%c0_10, %c0_11], %12 {strides = array<i32>} : memref<32x256xf32, #tpu.memory_space<vmem>>, vector<32x256xf32>,
    } else {
    }
    %c0 = arith.constant 0 : index
    %c0_1 = arith.constant 0 : index
    %3 = vector.load %arg7[%c0, %c0_1] : memref<32x256xf32, #tpu.memory_space<vmem>>, vector<32x256xf32>
    %c0_2 = arith.constant 0 : index
    %c0_3 = arith.constant 0 : index
    %4 = vector.load %arg3[%c0_2, %c0_3] : memref<32x512xbf16, #tpu.memory_space<vmem>>, vector<32x512xbf16>
    %c0_4 = arith.constant 0 : index
    %c0_5 = arith.constant 0 : index
    %5 = vector.load %arg4[%c0_4, %c0_5] : memref<512x256xbf16, #tpu.memory_space<vmem>>, vector<512x256xbf16>
    %cst = arith.constant dense<0.000000e+00> : vector<32x256xf32>
    %6 = tpu.matmul %4, %5, %cst {dimension_numbers = #tpu.dot_dimension_numbers<[1], [0], [0], [1], [0, 0, 1, 1], [], []>} : vector<32x512xbf16>, vector<512x256xbf16>, vector<32x256xf32> -> vector<32x256xf32>
    %7 = arith.addf %3, %6 : vector<32x256xf32>
    %c0_6 = arith.constant 0 : index
    %c0_7 = arith.constant 0 : index
    %8 = vector.load %arg7[%c0_6, %c0_7] : memref<32x256xf32, #tpu.memory_space<vmem>>, vector<32x256xf32>
    tpu.vector_store %arg7[%c0_6, %c0_7], %7 {strides = array<i32>} : memref<32x256xf32, #tpu.memory_space<vmem>>, vector<32x256xf32>,
    %c1_i32 = arith.constant 1 : i32
    %9 = arith.cmpi eq, %arg2, %c1_i32 : i32
    %10 = arith.extui %9 : i1 to i32
    %c0_i32_8 = arith.constant 0 : i32
    %11 = arith.cmpi ne, %10, %c0_i32_8 : i32
    scf.if %11 {
      %c0_9 = arith.constant 0 : index
      %c0_10 = arith.constant 0 : index
      %12 = vector.load %arg7[%c0_9, %c0_10] : memref<32x256xf32, #tpu.memory_space<vmem>>, vector<32x256xf32>
      %c0_11 = arith.constant 0 : index
      %c0_12 = arith.constant 0 : index
      %13 = vector.load %arg5[%c0_11, %c0_12] : memref<1x256xf32, #tpu.memory_space<vmem>>, vector<1x256xf32>
      %14 = vector.broadcast %13 : vector<1x256xf32> to vector<32x256xf32>
      %15 = arith.addf %12, %14 : vector<32x256xf32>
      %cst_13 = arith.constant 0.000000e+00 : f32
      %16 = vector.broadcast %cst_13 : f32 to vector<32x256xf32>
      %17 = arith.maximumf %15, %16 : vector<32x256xf32>
      %18 = arith.truncf %17 : vector<32x256xf32> to vector<32x256xbf16>
      %c0_14 = arith.constant 0 : index
      %c0_15 = arith.constant 0 : index
      %19 = vector.load %arg6[%c0_14, %c0_15] : memref<32x256xbf16, #tpu.memory_space<vmem>>, vector<32x256xbf16>
      tpu.vector_store %arg6[%c0_14, %c0_15], %18 {strides = array<i32>} : memref<32x256xbf16, #tpu.memory_space<vmem>>, vector<32x256xbf16>,
    } else {
    }
    return
  }
  func.func @transform_0(%arg0: i32, %arg1: i32, %arg2: i32) -> (i32, i32) {
    %c0_i32 = arith.constant 0 : i32
    return %arg0, %arg2 : i32, i32
  }
  func.func @transform_1(%arg0: i32, %arg1: i32, %arg2: i32) -> (i32, i32) {
    %c0_i32 = arith.constant 0 : i32
    return %arg2, %arg1 : i32, i32
  }
  func.func @transform_2(%arg0: i32, %arg1: i32, %arg2: i32) -> (i32, i32) {
    %c0_i32 = arith.constant 0 : i32
    %c0_i32_0 = arith.constant 0 : i32
    return %c0_i32, %arg1 : i32, i32
  }
  func.func @transform_3(%arg0: i32, %arg1: i32, %arg2: i32) -> (i32, i32) {
    %c0_i32 = arith.constant 0 : i32
    return %arg0, %arg1 : i32, i32
  }
}

</mosaic_0001>

<bundles_post_ra>
// kernel: resnet_forward.45
= control target key start
LH: loop header
LB: loop body
LE: loop exit
PB: predicated region body
PF: predicated region fallthrough
CT: control target
= control target key end

     0   :  { %s597_s1 = inlined_call_operand.vmem [shape: bf16[128,128], index: 1, kind: input, shape index: {}]   ;;  %s598_s2 = inlined_call_operand.vmem [shape: f32[1,128], index: 2, kind: input, shape index: {}]   ;;  %s599_s0 = inlined_call_operand.vmem [shape: bf16[128,128], index: 0, kind: input, shape index: {}]   ;;  %s600_s3 = inlined_call_operand.vmem [shape: bf16[128,128], index: 3, kind: output, shape index: {}]  }
   0x1   :  { %v429_v0 = vld [vmem:[%s597_s1 + $0x38] sm:$0xff]  ;;  %v428_v1 = vld [vmem:[%s597_s1 + $0x30] sm:$0xff]  ;;  %v427_v2 = vld [vmem:[%s597_s1 + $0x28] sm:$0xff] }
   0x2   :  { %178 = vmatpush.bf16.msra.mxu0 %v429_v0  ;;  %477 = vmatpush.bf16.msra.mxu1 %v429_v0  ;;  %v426_v3 = vld [vmem:[%s597_s1 + $0x20] sm:$0xff]  ;;  %v425_v4 = vld [vmem:[%s597_s1 + $0x18] sm:$0xff]  ;;  %v424_v5 = vld [vmem:[%s597_s1 + $0x10] sm:$0xff] }
   0x3   :  { %478 = vmatpush.bf16.msra.mxu2 %v429_v0  ;;  %479 = vmatpush.bf16.msra.mxu3 %v429_v0  ;;  %v423_v6 = vld [vmem:[%s597_s1 + $0x8] sm:$0xff]  ;;  %v422_v7 = vld [vmem:[%s597_s1] sm:$0xff]  ;;  %v416_v9 = vld [vmem:[%s599_s0 + $0x10] sm:$0xff] }
   0x4   :  { %v414_v8 = vld [vmem:[%s599_s0] sm:$0xff]  ;;  %v420_v11 = vld [vmem:[%s599_s0 + $0x30] sm:$0xff]  ;;  %v415_v12 = vld [vmem:[%s599_s0 + $0x8] sm:$0xff] }
   0x5   :  { %v418_v10 = vld [vmem:[%s599_s0 + $0x20] sm:$0xff]  ;;  %v417_v13 = vld [vmem:[%s599_s0 + $0x18] sm:$0xff]  ;;  %v419_v14 = vld [vmem:[%s599_s0 + $0x28] sm:$0xff] }
   0x6   :  { %179 = vmatpush.bf16.msra.mxu0 %v428_v1  ;;  %480 = vmatpush.bf16.msra.mxu1 %v428_v1  ;;  %v421_v15 = vld [vmem:[%s599_s0 + $0x38] sm:$0xff]  ;;  %v501_v18 = vld [vmem:[%s598_s2] ss:$0 sm:$0xff] }
   0x7   :  { %481 = vmatpush.bf16.msra.mxu2 %v428_v1  ;;  %482 = vmatpush.bf16.msra.mxu3 %v428_v1 }
   0xa   :  { %180 = vmatpush.bf16.msra.mxu0 %v427_v2  ;;  %483 = vmatpush.bf16.msra.mxu1 %v427_v2 }
   0xb   :  { %484 = vmatpush.bf16.msra.mxu2 %v427_v2  ;;  %485 = vmatpush.bf16.msra.mxu3 %v427_v2 }
   0xe   :  { %181 = vmatpush.bf16.msra.mxu0 %v426_v3  ;;  %486 = vmatpush.bf16.msra.mxu1 %v426_v3 }
   0xf   :  { %487 = vmatpush.bf16.msra.mxu2 %v426_v3  ;;  %488 = vmatpush.bf16.msra.mxu3 %v426_v3 }
  0x12   :  { %182 = vmatpush.bf16.msra.mxu0 %v425_v4  ;;  %489 = vmatpush.bf16.msra.mxu1 %v425_v4 }
  0x13   :  { %490 = vmatpush.bf16.msra.mxu2 %v425_v4  ;;  %491 = vmatpush.bf16.msra.mxu3 %v425_v4 }
  0x16   :  { %183 = vmatpush.bf16.msra.mxu0 %v424_v5  ;;  %492 = vmatpush.bf16.msra.mxu1 %v424_v5 }
  0x17   :  { %493 = vmatpush.bf16.msra.mxu2 %v424_v5  ;;  %494 = vmatpush.bf16.msra.mxu3 %v424_v5 }
  0x1a   :  { %184 = vmatpush.bf16.msra.mxu0 %v423_v6  ;;  %495 = vmatpush.bf16.msra.mxu1 %v423_v6 }
  0x1b   :  { %496 = vmatpush.bf16.msra.mxu2 %v423_v6  ;;  %497 = vmatpush.bf16.msra.mxu3 %v423_v6 }
  0x1e   :  { %185 = vmatpush.bf16.msra.mxu0 %v422_v7  ;;  %498 = vmatpush.bf16.msra.mxu1 %v422_v7 }
  0x1f   :  { %499 = vmatpush.bf16.msra.mxu2 %v422_v7  ;;  %500 = vmatpush.bf16.msra.mxu3 %v422_v7 }
  0x21   :  { %186 = vmatmul.bf16.vlgmr.msra.gmra.mxu0 %v414_v8  ;;  %196 = vmatmul.bf16.vlgmr.msra.gmra.mxu1 %v416_v9 }
  0x22   :  { %206 = vmatmul.bf16.vlgmr.msra.gmra.mxu2 %v418_v10  ;;  %216 = vmatmul.bf16.vlgmr.msra.gmra.mxu3 %v420_v11 }
  0x31   :  { %191 = vmatmul.bf16.gmra.mxu0 %v415_v12  ;;  %201 = vmatmul.bf16.gmra.mxu1 %v417_v13 }
  0x32   :  { %211 = vmatmul.bf16.gmra.mxu2 %v419_v14  ;;  %221 = vmatmul.bf16.gmra.mxu3 %v421_v15 }
  0x9e   :  { %v187_v16 = vpop.f32.mrf.mxu0  ;;  %v197_v17 = vpop.f32.mrf.mxu1 }
  0x9f   :  { %v282_v19 = vadd.f32 %v501_v18, %v187_v16  ;;  %v286_v20 = vadd.f32 %v501_v18, %v197_v17 }
  0xa1   :  { %v298_v27 = vmax.f32 %v282_v19, 0.0  ;;  %v302_v28 = vmax.f32 %v286_v20, 0.0 }
  0xa5   :  { %v207_v21 = vpop.f32.mrf.mxu2  ;;  %v217_v22 = vpop.f32.mrf.mxu3 }
  0xa6   :  { %v189_v23 = vpop.f32.mrf.mxu0  ;;  %v199_v24 = vpop.f32.mrf.mxu1  ;;  %v290_v33 = vadd.f32 %v501_v18, %v207_v21  ;;  %v294_v34 = vadd.f32 %v501_v18, %v217_v22 }
  0xa7   :  { %v283_v25 = vadd.f32 %v501_v18, %v189_v23  ;;  %v287_v26 = vadd.f32 %v501_v18, %v199_v24 }
  0xa8   :  { %v306_v41 = vmax.f32 %v290_v33, 0.0  ;;  %v310_v42 = vmax.f32 %v294_v34, 0.0 }
  0xa9   :  { %v299_v29 = vmax.f32 %v283_v25, 0.0  ;;  %v303_v30 = vmax.f32 %v287_v26, 0.0 }
  0xab   :  { %v433_v31 = vpack.c.bf16 %v299_v29, %v298_v27  ;;  %v443_v32 = vpack.c.bf16 %v303_v30, %v302_v28 }
  0xad   :  { %434 = vst [vmem:[%s600_s3] sm:$0xff] %v433_v31   ;;  %v209_v35 = vpop.f32.mrf.mxu2  ;;  %v219_v36 = vpop.f32.mrf.mxu3 }
  0xae   :  { %471 = vst [vmem:[%s600_s3 + $0x10] sm:$0xff] %v443_v32   ;;  %v291_v37 = vadd.f32 %v501_v18, %v209_v35  ;;  %v295_v38 = vadd.f32 %v501_v18, %v219_v36  ;;  %v192_v39 = vpop.f32.mrf.mxu0  ;;  %v202_v40 = vpop.f32.mrf.mxu1 }
  0xaf   :  { %v284_v47 = vadd.f32 %v501_v18, %v192_v39  ;;  %v288_v48 = vadd.f32 %v501_v18, %v202_v40 }
  0xb0   :  { %v307_v43 = vmax.f32 %v291_v37, 0.0  ;;  %v311_v44 = vmax.f32 %v295_v38, 0.0 }
  0xb1   :  { %v300_v55 = vmax.f32 %v284_v47, 0.0  ;;  %v304_v56 = vmax.f32 %v288_v48, 0.0 }
  0xb2   :  { %v453_v45 = vpack.c.bf16 %v307_v43, %v306_v41  ;;  %v463_v46 = vpack.c.bf16 %v311_v44, %v310_v42 }
  0xb4   :  { %473 = vst [vmem:[%s600_s3 + $0x20] sm:$0xff] %v453_v45  }
  0xb5   :  { %475 = vst [vmem:[%s600_s3 + $0x30] sm:$0xff] %v463_v46   ;;  %v212_v49 = vpop.f32.mrf.mxu2  ;;  %v222_v50 = vpop.f32.mrf.mxu3 }
  0xb6   :  { %v194_v51 = vpop.f32.mrf.mxu0  ;;  %v204_v52 = vpop.f32.mrf.mxu1  ;;  %v292_v61 = vadd.f32 %v501_v18, %v212_v49  ;;  %v296_v62 = vadd.f32 %v501_v18, %v222_v50 }
  0xb7   :  { %v285_v53 = vadd.f32 %v501_v18, %v194_v51  ;;  %v289_v54 = vadd.f32 %v501_v18, %v204_v52 }
  0xb8   :  { %v308_v3 = vmax.f32 %v292_v61, 0.0  ;;  %v312_v4 = vmax.f32 %v296_v62, 0.0 }
  0xb9   :  { %v301_v57 = vmax.f32 %v285_v53, 0.0  ;;  %v305_v58 = vmax.f32 %v289_v54, 0.0 }
  0xbb   :  { %v438_v59 = vpack.c.bf16 %v301_v57, %v300_v55  ;;  %v448_v60 = vpack.c.bf16 %v305_v58, %v304_v56 }
  0xbd   :  { %470 = vst [vmem:[%s600_s3 + $0x8] sm:$0xff] %v438_v59   ;;  %v214_v63 = vpop.f32.mrf.mxu2  ;;  %v224_v0 = vpop.f32.mrf.mxu3 }
  0xbe   :  { %472 = vst [vmem:[%s600_s3 + $0x18] sm:$0xff] %v448_v60   ;;  %v293_v1 = vadd.f32 %v501_v18, %v214_v63  ;;  %v297_v2 = vadd.f32 %v501_v18, %v224_v0 }
  0xc0   :  { %v309_v5 = vmax.f32 %v293_v1, 0.0  ;;  %v313_v6 = vmax.f32 %v297_v2, 0.0 }
  0xc2   :  { %v458_v7 = vpack.c.bf16 %v309_v5, %v308_v3  ;;  %v468_v8 = vpack.c.bf16 %v313_v6, %v312_v4 }
  0xc4   :  { %474 = vst [vmem:[%s600_s3 + $0x28] sm:$0xff] %v458_v7  }
  0xc5   :  { %476 = vst [vmem:[%s600_s3 + $0x38] sm:$0xff] %v468_v8  }

// kernel: resnet_forward.43
= control target key start
LH: loop header
LB: loop body
LE: loop exit
PB: predicated region body
PF: predicated region fallthrough
CT: control target
= control target key end

     0   :  { %s2680_s1 = inlined_call_operand.vmem [shape: bf16[256,128], index: 1, kind: input, shape index: {}]   ;;  %s2681_s0 = inlined_call_operand.vmem [shape: bf16[512,256], index: 0, kind: input, shape index: {}]   ;;  %s2682_s2 = inlined_call_operand.vmem [shape: f32[1,128], index: 2, kind: input, shape index: {}]   ;;  %s2683_s3 = inlined_call_operand.vmem [shape: bf16[512,128], index: 3, kind: output, shape index: {}]  }
   0x1   :  { %v1846_v0 = vld [vmem:[%s2680_s1 + $0x38] sm:$0xff]  ;;  %v1845_v2 = vld [vmem:[%s2680_s1 + $0x30] sm:$0xff]  ;;  %v1844_v4 = vld [vmem:[%s2680_s1 + $0x28] sm:$0xff] }
   0x2   :  { %v1854_v1 = vld [vmem:[%s2680_s1 + $0x78] sm:$0xff]  ;;  %658 = vmatpush.bf16.msra.mxu0 %v1846_v0  ;;  %2046 = vmatpush.bf16.msra.mxu2 %v1846_v0  ;;  %v1853_v3 = vld [vmem:[%s2680_s1 + $0x70] sm:$0xff]  ;;  %v1852_v5 = vld [vmem:[%s2680_s1 + $0x68] sm:$0xff] }
   0x3   :  { %827 = vmatpush.bf16.msra.mxu1 %v1854_v1  ;;  %2054 = vmatpush.bf16.msra.mxu3 %v1854_v1  ;;  %v1843_v6 = vld [vmem:[%s2680_s1 + $0x20] sm:$0xff]  ;;  %v1842_v8 = vld [vmem:[%s2680_s1 + $0x18] sm:$0xff]  ;;  %v1841_v10 = vld [vmem:[%s2680_s1 + $0x10] sm:$0xff] }
   0x4   :  { %v1851_v7 = vld [vmem:[%s2680_s1 + $0x60] sm:$0xff]  ;;  %v1850_v9 = vld [vmem:[%s2680_s1 + $0x58] sm:$0xff]  ;;  %v1849_v11 = vld [vmem:[%s2680_s1 + $0x50] sm:$0xff] }
   0x5   :  { %v1840_v12 = vld [vmem:[%s2680_s1 + $0x8] sm:$0xff]  ;;  %v1839_v14 = vld [vmem:[%s2680_s1] sm:$0xff]  ;;  %v1465_v28 = vld [vmem:[%s2681_s0 + $0x10] sm:$0xf] }
   0x6   :  { %659 = vmatpush.bf16.msra.mxu0 %v1845_v2  ;;  %2047 = vmatpush.bf16.msra.mxu2 %v1845_v2  ;;  %v1848_v13 = vld [vmem:[%s2680_s1 + $0x48] sm:$0xff]  ;;  %v1847_v15 = vld [vmem:[%s2680_s1 + $0x40] sm:$0xff]  ;;  %v1778_v29 = vld [vmem:[%s2681_s0 + $0x14] sm:$0xf0] }
   0x7   :  { %828 = vmatpush.bf16.msra.mxu1 %v1853_v3  ;;  %2055 = vmatpush.bf16.msra.mxu3 %v1853_v3  ;;  %v1457_v16 = vld [vmem:[%s2681_s0] sm:$0xf]  ;;  %v1776_v17 = vld [vmem:[%s2681_s0 + $0x4] sm:$0xf0]  ;;  %v1775_v20 = vld [vmem:[%s2681_s0 + $0x4] sm:$0xf]  ;;  %v1466_v36 = vor.u32 %v1778_v29, %v1465_v28 }
   0x8   :  { %v1585_v18 = vld [vmem:[%s2681_s0 + $0x100] sm:$0xf]  ;;  %v1808_v19 = vld [vmem:[%s2681_s0 + $0x104] sm:$0xf0]  ;;  %v1459_v21 = vld [vmem:[%s2681_s0 + $0x8] sm:$0xf0]  ;;  %v1458_v24 = vor.u32 %v1776_v17, %v1457_v16 }
   0x9   :  { %v1807_v22 = vld [vmem:[%s2681_s0 + $0x104] sm:$0xf]  ;;  %v1587_v23 = vld [vmem:[%s2681_s0 + $0x108] sm:$0xf0]  ;;  %v1586_v25 = vor.u32 %v1808_v19, %v1585_v18  ;;  %v1462_v26 = vor.u32 %v1775_v20, %v1459_v21  ;;  %v1593_v30 = vld [vmem:[%s2681_s0 + $0x110] sm:$0xf] }
   0xa   :  { %660 = vmatpush.bf16.msra.mxu0 %v1844_v4  ;;  %2048 = vmatpush.bf16.msra.mxu2 %v1844_v4  ;;  %v1590_v27 = vor.u32 %v1807_v22, %v1587_v23  ;;  %v1810_v31 = vld [vmem:[%s2681_s0 + $0x114] sm:$0xf0]  ;;  %v1777_v32 = vld [vmem:[%s2681_s0 + $0x14] sm:$0xf]  ;;  %v1467_v33 = vld [vmem:[%s2681_s0 + $0x18] sm:$0xf0] }
   0xb   :  { %829 = vmatpush.bf16.msra.mxu1 %v1852_v5  ;;  %2056 = vmatpush.bf16.msra.mxu3 %v1852_v5  ;;  %v1809_v34 = vld [vmem:[%s2681_s0 + $0x114] sm:$0xf]  ;;  %v1595_v35 = vld [vmem:[%s2681_s0 + $0x118] sm:$0xf0]  ;;  %v1594_v37 = vor.u32 %v1810_v31, %v1593_v30  ;;  %v1470_v38 = vor.u32 %v1777_v32, %v1467_v33  ;;  %v1473_v40 = vld [vmem:[%s2681_s0 + $0x20] sm:$0xf] }
   0xc   :  { %v1598_v39 = vor.u32 %v1809_v34, %v1595_v35  ;;  %v1780_v41 = vld [vmem:[%s2681_s0 + $0x24] sm:$0xf0]  ;;  %v1601_v42 = vld [vmem:[%s2681_s0 + $0x120] sm:$0xf]  ;;  %v1779_v44 = vld [vmem:[%s2681_s0 + $0x24] sm:$0xf] }
   0xd   :  { %v1812_v43 = vld [vmem:[%s2681_s0 + $0x124] sm:$0xf0]  ;;  %v1475_v45 = vld [vmem:[%s2681_s0 + $0x28] sm:$0xf0]  ;;  %v1811_v46 = vld [vmem:[%s2681_s0 + $0x124] sm:$0xf]  ;;  %v1474_v48 = vor.u32 %v1780_v41, %v1473_v40 }
   0xe   :  { %661 = vmatpush.bf16.msra.mxu0 %v1843_v6  ;;  %2049 = vmatpush.bf16.msra.mxu2 %v1843_v6  ;;  %v1603_v47 = vld [vmem:[%s2681_s0 + $0x128] sm:$0xf0]  ;;  %v1602_v49 = vor.u32 %v1812_v43, %v1601_v42  ;;  %v1478_v50 = vor.u32 %v1779_v44, %v1475_v45  ;;  %v1481_v52 = vld [vmem:[%s2681_s0 + $0x30] sm:$0xf]  ;;  %v1782_v53 = vld [vmem:[%s2681_s0 + $0x34] sm:$0xf0] }
   0xf   :  { %830 = vmatpush.bf16.msra.mxu1 %v1851_v7  ;;  %2057 = vmatpush.bf16.msra.mxu3 %v1851_v7  ;;  %v1606_v51 = vor.u32 %v1811_v46, %v1603_v47  ;;  %v1609_v54 = vld [vmem:[%s2681_s0 + $0x130] sm:$0xf]  ;;  %v1814_v55 = vld [vmem:[%s2681_s0 + $0x134] sm:$0xf0]  ;;  %v1781_v56 = vld [vmem:[%s2681_s0 + $0x34] sm:$0xf]  ;;  %v1482_v60 = vor.u32 %v1782_v53, %v1481_v52 }
  0x10   :  { %v1483_v57 = vld [vmem:[%s2681_s0 + $0x38] sm:$0xf0]  ;;  %v1813_v58 = vld [vmem:[%s2681_s0 + $0x134] sm:$0xf]  ;;  %v1610_v61 = vor.u32 %v1814_v55, %v1609_v54  ;;  %v1489_v0 = vld [vmem:[%s2681_s0 + $0x40] sm:$0xf] }
  0x11   :  { %v1611_v59 = vld [vmem:[%s2681_s0 + $0x138] sm:$0xf0]  ;;  %v1486_v62 = vor.u32 %v1781_v56, %v1483_v57  ;;  %v1784_v1 = vld [vmem:[%s2681_s0 + $0x44] sm:$0xf0]  ;;  %v1617_v2 = vld [vmem:[%s2681_s0 + $0x140] sm:$0xf] }
  0x12   :  { %662 = vmatpush.bf16.msra.mxu0 %v1842_v8  ;;  %2050 = vmatpush.bf16.msra.mxu2 %v1842_v8  ;;  %v1614_v63 = vor.u32 %v1813_v58, %v1611_v59  ;;  %v1816_v3 = vld [vmem:[%s2681_s0 + $0x144] sm:$0xf0]  ;;  %v1783_v4 = vld [vmem:[%s2681_s0 + $0x44] sm:$0xf]  ;;  %v1491_v5 = vld [vmem:[%s2681_s0 + $0x48] sm:$0xf0]  ;;  %v1490_v8 = vor.u32 %v1784_v1, %v1489_v0 }
  0x13   :  { %831 = vmatpush.bf16.msra.mxu1 %v1850_v9  ;;  %2058 = vmatpush.bf16.msra.mxu3 %v1850_v9  ;;  %v1815_v6 = vld [vmem:[%s2681_s0 + $0x144] sm:$0xf]  ;;  %v1619_v7 = vld [vmem:[%s2681_s0 + $0x148] sm:$0xf0]  ;;  %v1618_v9 = vor.u32 %v1816_v3, %v1617_v2  ;;  %v1785_v16 = vld [vmem:[%s2681_s0 + $0x54] sm:$0xf] }
  0x14   :  { %v1499_v17 = vld [vmem:[%s2681_s0 + $0x58] sm:$0xf0]  ;;  %v1817_v18 = vld [vmem:[%s2681_s0 + $0x154] sm:$0xf]  ;;  %v1787_v28 = vld [vmem:[%s2681_s0 + $0x64] sm:$0xf] }
  0x15   :  { %v1627_v19 = vld [vmem:[%s2681_s0 + $0x158] sm:$0xf0]  ;;  %v1502_v22 = vor.u32 %v1785_v16, %v1499_v17  ;;  %v1507_v29 = vld [vmem:[%s2681_s0 + $0x68] sm:$0xf0]  ;;  %v1819_v30 = vld [vmem:[%s2681_s0 + $0x164] sm:$0xf] }
  0x16   :  { %663 = vmatpush.bf16.msra.mxu0 %v1841_v10  ;;  %2051 = vmatpush.bf16.msra.mxu2 %v1841_v10  ;;  %v1494_v10 = vor.u32 %v1783_v4, %v1491_v5  ;;  %v1630_v23 = vor.u32 %v1817_v18, %v1627_v19  ;;  %v1635_v31 = vld [vmem:[%s2681_s0 + $0x168] sm:$0xf0]  ;;  %v1510_v34 = vor.u32 %v1787_v28, %v1507_v29  ;;  %v1789_v40 = vld [vmem:[%s2681_s0 + $0x74] sm:$0xf]  ;;  %v1515_v41 = vld [vmem:[%s2681_s0 + $0x78] sm:$0xf0] }
  0x17   :  { %832 = vmatpush.bf16.msra.mxu1 %v1849_v11  ;;  %2059 = vmatpush.bf16.msra.mxu3 %v1849_v11  ;;  %v1622_v11 = vor.u32 %v1815_v6, %v1619_v7  ;;  %v1638_v35 = vor.u32 %v1819_v30, %v1635_v31  ;;  %v1821_v42 = vld [vmem:[%s2681_s0 + $0x174] sm:$0xf]  ;;  %v1643_v43 = vld [vmem:[%s2681_s0 + $0x178] sm:$0xf0]  ;;  %v1518_v46 = vor.u32 %v1789_v40, %v1515_v41  ;;  %v1791_v52 = vld [vmem:[%s2681_s0 + $0x84] sm:$0xf] }
  0x18   :  { %v1646_v47 = vor.u32 %v1821_v42, %v1643_v43  ;;  %v1523_v53 = vld [vmem:[%s2681_s0 + $0x88] sm:$0xf0]  ;;  %v1823_v54 = vld [vmem:[%s2681_s0 + $0x184] sm:$0xf]  ;;  %v1529_v6 = vld [vmem:[%s2681_s0 + $0x90] sm:$0xf] }
  0x19   :  { %v1651_v55 = vld [vmem:[%s2681_s0 + $0x188] sm:$0xf0]  ;;  %v1526_v59 = vor.u32 %v1791_v52, %v1523_v53  ;;  %v1794_v7 = vld [vmem:[%s2681_s0 + $0x94] sm:$0xf0]  ;;  %v1537_v40 = vld [vmem:[%s2681_s0 + $0xa0] sm:$0xf] }
  0x1a   :  { %664 = vmatpush.bf16.msra.mxu0 %v1840_v12  ;;  %2052 = vmatpush.bf16.msra.mxu2 %v1840_v12  ;;  %v1497_v12 = vld [vmem:[%s2681_s0 + $0x50] sm:$0xf]  ;;  %v1796_v41 = vld [vmem:[%s2681_s0 + $0xa4] sm:$0xf0]  ;;  %v1665_v42 = vld [vmem:[%s2681_s0 + $0x1a0] sm:$0xf] }
  0x1b   :  { %833 = vmatpush.bf16.msra.mxu1 %v1848_v13  ;;  %2060 = vmatpush.bf16.msra.mxu3 %v1848_v13  ;;  %v1786_v13 = vld [vmem:[%s2681_s0 + $0x54] sm:$0xf0] }
  0x1c   :  { %v1498_v20 = vor.u32 %v1786_v13, %v1497_v12  ;;  %v1793_v12 = vld [vmem:[%s2681_s0 + $0x94] sm:$0xf]  ;;  %v1531_v13 = vld [vmem:[%s2681_s0 + $0x98] sm:$0xf0] }
  0x1e   :  { %665 = vmatpush.bf16.msra.mxu0 %v1839_v14  ;;  %2053 = vmatpush.bf16.msra.mxu2 %v1839_v14  ;;  %v1625_v14 = vld [vmem:[%s2681_s0 + $0x150] sm:$0xf] }
  0x1f   :  { %834 = vmatpush.bf16.msra.mxu1 %v1847_v15  ;;  %2061 = vmatpush.bf16.msra.mxu3 %v1847_v15  ;;  %v1818_v15 = vld [vmem:[%s2681_s0 + $0x154] sm:$0xf0] }
  0x20   :  { %v1626_v21 = vor.u32 %v1818_v15, %v1625_v14  ;;  %v1825_v14 = vld [vmem:[%s2681_s0 + $0x194] sm:$0xf]  ;;  %v1659_v15 = vld [vmem:[%s2681_s0 + $0x198] sm:$0xf0] }
  0x21   :  { %666 = vmatmul.bf16.vlgmr.msra.gmra.mxu0 %v1458_v24  ;;  %746 = vmatmul.bf16.vlgmr.msra.gmra.mxu2 %v1586_v25  ;;  %v1505_v24 = vld [vmem:[%s2681_s0 + $0x60] sm:$0xf]  ;;  %v1788_v25 = vld [vmem:[%s2681_s0 + $0x64] sm:$0xf0] }
  0x22   :  { %835 = vmatmul.bf16.vlgmr.msra.gmra.mxu1 %v1462_v26  ;;  %915 = vmatmul.bf16.vlgmr.msra.gmra.mxu3 %v1590_v27  ;;  %v1633_v26 = vld [vmem:[%s2681_s0 + $0x160] sm:$0xf]  ;;  %v1820_v27 = vld [vmem:[%s2681_s0 + $0x164] sm:$0xf0]  ;;  %v1506_v32 = vor.u32 %v1788_v25, %v1505_v24 }
  0x23   :  { %v1634_v33 = vor.u32 %v1820_v27, %v1633_v26  ;;  %v1662_v27 = vor.u32 %v1825_v14, %v1659_v15 }
  0x31   :  { %671 = vmatmul.bf16.gmra.mxu0 %v1466_v36  ;;  %751 = vmatmul.bf16.gmra.mxu2 %v1594_v37  ;;  %v1513_v36 = vld [vmem:[%s2681_s0 + $0x70] sm:$0xf]  ;;  %v1790_v37 = vld [vmem:[%s2681_s0 + $0x74] sm:$0xf0] }
  0x32   :  { %840 = vmatmul.bf16.gmra.mxu1 %v1470_v38  ;;  %920 = vmatmul.bf16.gmra.mxu3 %v1598_v39  ;;  %v1641_v38 = vld [vmem:[%s2681_s0 + $0x170] sm:$0xf]  ;;  %v1822_v39 = vld [vmem:[%s2681_s0 + $0x174] sm:$0xf0]  ;;  %v1514_v44 = vor.u32 %v1790_v37, %v1513_v36 }
  0x33   :  { %v1642_v45 = vor.u32 %v1822_v39, %v1641_v38 }
  0x41   :  { %676 = vmatmul.bf16.gmra.mxu0 %v1474_v48  ;;  %756 = vmatmul.bf16.gmra.mxu2 %v1602_v49  ;;  %v1521_v48 = vld [vmem:[%s2681_s0 + $0x80] sm:$0xf]  ;;  %v1792_v49 = vld [vmem:[%s2681_s0 + $0x84] sm:$0xf0] }
  0x42   :  { %845 = vmatmul.bf16.gmra.mxu1 %v1478_v50  ;;  %925 = vmatmul.bf16.gmra.mxu3 %v1606_v51  ;;  %v1649_v50 = vld [vmem:[%s2681_s0 + $0x180] sm:$0xf]  ;;  %v1824_v51 = vld [vmem:[%s2681_s0 + $0x184] sm:$0xf0]  ;;  %v1522_v56 = vor.u32 %v1792_v49, %v1521_v48  ;;  %v1827_v48 = vld [vmem:[%s2681_s0 + $0x1a4] sm:$0xf] }
  0x43   :  { %v1650_v57 = vor.u32 %v1824_v51, %v1649_v50  ;;  %v1667_v49 = vld [vmem:[%s2681_s0 + $0x1a8] sm:$0xf0] }
  0x51   :  { %681 = vmatmul.bf16.gmra.mxu0 %v1482_v60  ;;  %761 = vmatmul.bf16.gmra.mxu2 %v1610_v61  ;;  %v1654_v60 = vor.u32 %v1823_v54, %v1651_v55  ;;  %v1538_v54 = vor.u32 %v1796_v41, %v1537_v40 }
  0x52   :  { %850 = vmatmul.bf16.gmra.mxu1 %v1486_v62  ;;  %930 = vmatmul.bf16.gmra.mxu3 %v1614_v63  ;;  %v2350_v63 = vld [vmem:[%s2682_s2] ss:$0 sm:$0xff] }
  0x61   :  { %686 = vmatmul.bf16.gmra.mxu0 %v1490_v8  ;;  %766 = vmatmul.bf16.gmra.mxu2 %v1618_v9  ;;  %v1657_v8 = vld [vmem:[%s2681_s0 + $0x190] sm:$0xf] }
  0x62   :  { %855 = vmatmul.bf16.gmra.mxu1 %v1494_v10  ;;  %935 = vmatmul.bf16.gmra.mxu3 %v1622_v11  ;;  %v1826_v11 = vld [vmem:[%s2681_s0 + $0x194] sm:$0xf0] }
  0x71   :  { %691 = vmatmul.bf16.gmra.mxu0 %v1498_v20  ;;  %771 = vmatmul.bf16.gmra.mxu2 %v1626_v21  ;;  %v1530_v20 = vor.u32 %v1794_v7, %v1529_v6  ;;  %v1658_v21 = vor.u32 %v1826_v11, %v1657_v8  ;;  %v1545_v11 = vld [vmem:[%s2681_s0 + $0xb0] sm:$0xf] }
  0x72   :  { %860 = vmatmul.bf16.gmra.mxu1 %v1502_v22  ;;  %940 = vmatmul.bf16.gmra.mxu3 %v1630_v23  ;;  %v1534_v22 = vor.u32 %v1793_v12, %v1531_v13  ;;  %v1798_v12 = vld [vmem:[%s2681_s0 + $0xb4] sm:$0xf0]  ;;  %v1673_v13 = vld [vmem:[%s2681_s0 + $0x1b0] sm:$0xf] }
  0x81   :  { %696 = vmatmul.bf16.gmra.mxu0 %v1506_v32  ;;  %776 = vmatmul.bf16.gmra.mxu2 %v1634_v33 }
  0x82   :  { %865 = vmatmul.bf16.gmra.mxu1 %v1510_v34  ;;  %945 = vmatmul.bf16.gmra.mxu3 %v1638_v35 }
  0x91   :  { %701 = vmatmul.bf16.gmra.mxu0 %v1514_v44  ;;  %781 = vmatmul.bf16.gmra.mxu2 %v1642_v45  ;;  %v1828_v45 = vld [vmem:[%s2681_s0 + $0x1a4] sm:$0xf0] }
  0x92   :  { %870 = vmatmul.bf16.gmra.mxu1 %v1518_v46  ;;  %950 = vmatmul.bf16.gmra.mxu3 %v1646_v47  ;;  %v1795_v46 = vld [vmem:[%s2681_s0 + $0xa4] sm:$0xf]  ;;  %v1539_v47 = vld [vmem:[%s2681_s0 + $0xa8] sm:$0xf0]  ;;  %v1666_v55 = vor.u32 %v1828_v45, %v1665_v42  ;;  %v1553_v45 = vld [vmem:[%s2681_s0 + $0xc0] sm:$0xf] }
  0x9e   :  { %v667_v58 = vpop.f32.mrf.mxu0 }
  0x9f   :  { %v836_v61 = vpop.f32.mrf.mxu1 }
  0xa0   :  { %v837_v62 = vadd.f32 %v836_v61, %v667_v58  ;;  %v1670_v61 = vor.u32 %v1827_v48, %v1667_v49 }
  0xa1   :  { %706 = vmatmul.bf16.gmra.mxu0 %v1522_v56  ;;  %786 = vmatmul.bf16.gmra.mxu2 %v1650_v57  ;;  %v1542_v56 = vor.u32 %v1795_v46, %v1539_v47  ;;  %v1800_v46 = vld [vmem:[%s2681_s0 + $0xc4] sm:$0xf0]  ;;  %v1681_v47 = vld [vmem:[%s2681_s0 + $0x1c0] sm:$0xf] }
  0xa2   :  { %875 = vmatmul.bf16.gmra.mxu1 %v1526_v59  ;;  %955 = vmatmul.bf16.gmra.mxu3 %v1654_v60  ;;  %v1195_v4 = vadd.f32 %v2350_v63, %v837_v62 }
  0xa4   :  { %v747_v0 = vpop.f32.mrf.mxu2  ;;  %v1259_v16 = vmax.f32 %v1195_v4, 0.0 }
  0xa5   :  { %v916_v1 = vpop.f32.mrf.mxu3 }
  0xa6   :  { %v669_v2 = vpop.f32.mrf.mxu0  ;;  %v917_v9 = vadd.f32 %v916_v1, %v747_v0 }
  0xa7   :  { %v838_v3 = vpop.f32.mrf.mxu1 }
  0xa8   :  { %v839_v5 = vadd.f32 %v838_v3, %v669_v2  ;;  %v1227_v23 = vadd.f32 %v2350_v63, %v917_v9 }
  0xaa   :  { %v1196_v10 = vadd.f32 %v2350_v63, %v839_v5  ;;  %v1291_v30 = vmax.f32 %v1227_v23, 0.0 }
  0xac   :  { %v1260_v17 = vmax.f32 %v1196_v10, 0.0  ;;  %v749_v18 = vpop.f32.mrf.mxu2 }
  0xad   :  { %v918_v19 = vpop.f32.mrf.mxu3 }
  0xae   :  { %v1858_v24 = vpack.c.bf16 %v1260_v17, %v1259_v16  ;;  %v919_v25 = vadd.f32 %v918_v19, %v749_v18  ;;  %v672_v26 = vpop.f32.mrf.mxu0  ;;  %v1830_v16 = vld [vmem:[%s2681_s0 + $0x1b4] sm:$0xf0]  ;;  %v1797_v17 = vld [vmem:[%s2681_s0 + $0xb4] sm:$0xf]  ;;  %v1547_v18 = vld [vmem:[%s2681_s0 + $0xb8] sm:$0xf0] }
  0xaf   :  { %v841_v28 = vpop.f32.mrf.mxu1  ;;  %v1829_v19 = vld [vmem:[%s2681_s0 + $0x1b4] sm:$0xf] }
  0xb0   :  { %1859 = vst [vmem:[%s2683_s3] sm:$0xff] %v1858_v24   ;;  %v1228_v29 = vadd.f32 %v2350_v63, %v919_v25  ;;  %v842_v33 = vadd.f32 %v841_v28, %v672_v26  ;;  %v1546_v25 = vor.u32 %v1798_v12, %v1545_v11  ;;  %v1674_v26 = vor.u32 %v1830_v16, %v1673_v13  ;;  %v1561_v16 = vld [vmem:[%s2681_s0 + $0xd0] sm:$0xf] }
  0xb1   :  { %711 = vmatmul.bf16.gmra.mxu0 %v1530_v20  ;;  %791 = vmatmul.bf16.gmra.mxu2 %v1658_v21  ;;  %v1675_v20 = vld [vmem:[%s2681_s0 + $0x1b8] sm:$0xf0] }
  0xb2   :  { %v1292_v31 = vmax.f32 %v1228_v29, 0.0  ;;  %880 = vmatmul.bf16.gmra.mxu1 %v1534_v22  ;;  %960 = vmatmul.bf16.gmra.mxu3 %v1662_v27  ;;  %v1197_v38 = vadd.f32 %v2350_v63, %v842_v33  ;;  %v1550_v27 = vor.u32 %v1797_v17, %v1547_v18  ;;  %v1802_v17 = vld [vmem:[%s2681_s0 + $0xd4] sm:$0xf0]  ;;  %v1689_v18 = vld [vmem:[%s2681_s0 + $0x1d0] sm:$0xf] }
  0xb4   :  { %v1938_v32 = vpack.c.bf16 %v1292_v31, %v1291_v30  ;;  %v752_v34 = vpop.f32.mrf.mxu2  ;;  %v1261_v50 = vmax.f32 %v1197_v38, 0.0 }
  0xb5   :  { %v921_v35 = vpop.f32.mrf.mxu3 }
  0xb6   :  { %2030 = vst [vmem:[%s2683_s3 + $0x80] sm:$0xff] %v1938_v32   ;;  %v674_v36 = vpop.f32.mrf.mxu0  ;;  %v922_v43 = vadd.f32 %v921_v35, %v752_v34  ;;  %v1678_v32 = vor.u32 %v1829_v19, %v1675_v20 }
  0xb7   :  { %v843_v37 = vpop.f32.mrf.mxu1 }
  0xb8   :  { %v844_v39 = vadd.f32 %v843_v37, %v674_v36  ;;  %v1229_v57 = vadd.f32 %v2350_v63, %v922_v43 }
  0xba   :  { %v1198_v44 = vadd.f32 %v2350_v63, %v844_v39  ;;  %v1293_v1 = vmax.f32 %v1229_v57, 0.0 }
  0xbc   :  { %v1262_v51 = vmax.f32 %v1198_v44, 0.0  ;;  %v754_v52 = vpop.f32.mrf.mxu2 }
  0xbd   :  { %v923_v53 = vpop.f32.mrf.mxu3 }
  0xbe   :  { %v1863_v58 = vpack.c.bf16 %v1262_v51, %v1261_v50  ;;  %v924_v59 = vadd.f32 %v923_v53, %v754_v52  ;;  %v677_v60 = vpop.f32.mrf.mxu0  ;;  %v1832_v50 = vld [vmem:[%s2681_s0 + $0x1c4] sm:$0xf0]  ;;  %v1799_v51 = vld [vmem:[%s2681_s0 + $0xc4] sm:$0xf]  ;;  %v1555_v52 = vld [vmem:[%s2681_s0 + $0xc8] sm:$0xf0] }
  0xbf   :  { %v846_v62 = vpop.f32.mrf.mxu1  ;;  %v1831_v53 = vld [vmem:[%s2681_s0 + $0x1c4] sm:$0xf] }
  0xc0   :  { %2015 = vst [vmem:[%s2683_s3 + $0x8] sm:$0xff] %v1863_v58   ;;  %v1230_v0 = vadd.f32 %v2350_v63, %v924_v59  ;;  %v847_v4 = vadd.f32 %v846_v62, %v677_v60  ;;  %v1554_v59 = vor.u32 %v1800_v46, %v1553_v45  ;;  %v1682_v60 = vor.u32 %v1832_v50, %v1681_v47  ;;  %v1569_v50 = vld [vmem:[%s2681_s0 + $0xe0] sm:$0xf] }
  0xc1   :  { %716 = vmatmul.bf16.gmra.mxu0 %v1538_v54  ;;  %796 = vmatmul.bf16.gmra.mxu2 %v1666_v55  ;;  %v1683_v54 = vld [vmem:[%s2681_s0 + $0x1c8] sm:$0xf0] }
  0xc2   :  { %v1294_v2 = vmax.f32 %v1230_v0, 0.0  ;;  %885 = vmatmul.bf16.gmra.mxu1 %v1542_v56  ;;  %965 = vmatmul.bf16.gmra.mxu3 %v1670_v61  ;;  %v1199_v9 = vadd.f32 %v2350_v63, %v847_v4  ;;  %v1558_v61 = vor.u32 %v1799_v51, %v1555_v52  ;;  %v1804_v51 = vld [vmem:[%s2681_s0 + $0xe4] sm:$0xf0]  ;;  %v1697_v52 = vld [vmem:[%s2681_s0 + $0x1e0] sm:$0xf] }
  0xc4   :  { %v1943_v3 = vpack.c.bf16 %v1294_v2, %v1293_v1  ;;  %v757_v5 = vpop.f32.mrf.mxu2  ;;  %v1263_v21 = vmax.f32 %v1199_v9, 0.0 }
  0xc5   :  { %v926_v6 = vpop.f32.mrf.mxu3 }
  0xc6   :  { %2031 = vst [vmem:[%s2683_s3 + $0x88] sm:$0xff] %v1943_v3   ;;  %v679_v7 = vpop.f32.mrf.mxu0  ;;  %v927_v14 = vadd.f32 %v926_v6, %v757_v5  ;;  %v1686_v3 = vor.u32 %v1831_v53, %v1683_v54 }
  0xc7   :  { %v848_v8 = vpop.f32.mrf.mxu1 }
  0xc8   :  { %v849_v10 = vadd.f32 %v848_v8, %v679_v7  ;;  %v1231_v28 = vadd.f32 %v2350_v63, %v927_v14 }
  0xca   :  { %v1200_v15 = vadd.f32 %v2350_v63, %v849_v10  ;;  %v1295_v35 = vmax.f32 %v1231_v28, 0.0 }
  0xcc   :  { %v1264_v22 = vmax.f32 %v1200_v15, 0.0  ;;  %v759_v23 = vpop.f32.mrf.mxu2 }
  0xcd   :  { %v928_v24 = vpop.f32.mrf.mxu3 }
  0xce   :  { %v1868_v29 = vpack.c.bf16 %v1264_v22, %v1263_v21  ;;  %v929_v30 = vadd.f32 %v928_v24, %v759_v23  ;;  %v682_v31 = vpop.f32.mrf.mxu0  ;;  %v1834_v21 = vld [vmem:[%s2681_s0 + $0x1d4] sm:$0xf0]  ;;  %v1801_v22 = vld [vmem:[%s2681_s0 + $0xd4] sm:$0xf]  ;;  %v1563_v23 = vld [vmem:[%s2681_s0 + $0xd8] sm:$0xf0] }
  0xcf   :  { %v851_v33 = vpop.f32.mrf.mxu1  ;;  %v1833_v24 = vld [vmem:[%s2681_s0 + $0x1d4] sm:$0xf] }
  0xd0   :  { %2016 = vst [vmem:[%s2683_s3 + $0x10] sm:$0xff] %v1868_v29   ;;  %v1232_v34 = vadd.f32 %v2350_v63, %v929_v30  ;;  %v852_v38 = vadd.f32 %v851_v33, %v682_v31  ;;  %v1562_v30 = vor.u32 %v1802_v17, %v1561_v16  ;;  %v1690_v31 = vor.u32 %v1834_v21, %v1689_v18  ;;  %v1577_v21 = vld [vmem:[%s2681_s0 + $0xf0] sm:$0xf] }
  0xd1   :  { %721 = vmatmul.bf16.gmra.mxu0 %v1546_v25  ;;  %801 = vmatmul.bf16.gmra.mxu2 %v1674_v26  ;;  %v1691_v25 = vld [vmem:[%s2681_s0 + $0x1d8] sm:$0xf0] }
  0xd2   :  { %v1296_v36 = vmax.f32 %v1232_v34, 0.0  ;;  %890 = vmatmul.bf16.gmra.mxu1 %v1550_v27  ;;  %970 = vmatmul.bf16.gmra.mxu3 %v1678_v32  ;;  %v1201_v43 = vadd.f32 %v2350_v63, %v852_v38  ;;  %v1566_v32 = vor.u32 %v1801_v22, %v1563_v23  ;;  %v1806_v22 = vld [vmem:[%s2681_s0 + $0xf4] sm:$0xf0]  ;;  %v1705_v23 = vld [vmem:[%s2681_s0 + $0x1f0] sm:$0xf] }
  0xd4   :  { %v1948_v37 = vpack.c.bf16 %v1296_v36, %v1295_v35  ;;  %v762_v39 = vpop.f32.mrf.mxu2  ;;  %v1265_v55 = vmax.f32 %v1201_v43, 0.0 }
  0xd5   :  { %v931_v40 = vpop.f32.mrf.mxu3 }
  0xd6   :  { %2032 = vst [vmem:[%s2683_s3 + $0x90] sm:$0xff] %v1948_v37   ;;  %v684_v41 = vpop.f32.mrf.mxu0  ;;  %v932_v48 = vadd.f32 %v931_v40, %v762_v39  ;;  %v1694_v37 = vor.u32 %v1833_v24, %v1691_v25 }
  0xd7   :  { %v853_v42 = vpop.f32.mrf.mxu1 }
  0xd8   :  { %v854_v44 = vadd.f32 %v853_v42, %v684_v41  ;;  %v1233_v62 = vadd.f32 %v2350_v63, %v932_v48 }
  0xda   :  { %v1202_v49 = vadd.f32 %v2350_v63, %v854_v44  ;;  %v1297_v6 = vmax.f32 %v1233_v62, 0.0 }
  0xdc   :  { %v1266_v56 = vmax.f32 %v1202_v49, 0.0  ;;  %v764_v57 = vpop.f32.mrf.mxu2 }
  0xdd   :  { %v933_v58 = vpop.f32.mrf.mxu3 }
  0xde   :  { %v1873_v0 = vpack.c.bf16 %v1266_v56, %v1265_v55  ;;  %v934_v1 = vadd.f32 %v933_v58, %v764_v57  ;;  %v687_v2 = vpop.f32.mrf.mxu0  ;;  %v1836_v55 = vld [vmem:[%s2681_s0 + $0x1e4] sm:$0xf0]  ;;  %v1803_v56 = vld [vmem:[%s2681_s0 + $0xe4] sm:$0xf]  ;;  %v1571_v57 = vld [vmem:[%s2681_s0 + $0xe8] sm:$0xf0] }
  0xdf   :  { %v856_v4 = vpop.f32.mrf.mxu1  ;;  %v1835_v58 = vld [vmem:[%s2681_s0 + $0x1e4] sm:$0xf] }
  0xe0   :  { %2017 = vst [vmem:[%s2683_s3 + $0x18] sm:$0xff] %v1873_v0   ;;  %v1234_v5 = vadd.f32 %v2350_v63, %v934_v1  ;;  %v857_v9 = vadd.f32 %v856_v4, %v687_v2  ;;  %v1570_v1 = vor.u32 %v1804_v51, %v1569_v50  ;;  %v1698_v2 = vor.u32 %v1836_v55, %v1697_v52 }
  0xe1   :  { %726 = vmatmul.bf16.gmra.mxu0 %v1554_v59  ;;  %806 = vmatmul.bf16.gmra.mxu2 %v1682_v60  ;;  %v1699_v59 = vld [vmem:[%s2681_s0 + $0x1e8] sm:$0xf0] }
  0xe2   :  { %v1298_v7 = vmax.f32 %v1234_v5, 0.0  ;;  %895 = vmatmul.bf16.gmra.mxu1 %v1558_v61  ;;  %975 = vmatmul.bf16.gmra.mxu3 %v1686_v3  ;;  %v1203_v14 = vadd.f32 %v2350_v63, %v857_v9  ;;  %v1574_v3 = vor.u32 %v1803_v56, %v1571_v57 }
  0xe4   :  { %v1953_v8 = vpack.c.bf16 %v1298_v7, %v1297_v6  ;;  %v767_v10 = vpop.f32.mrf.mxu2  ;;  %v1267_v26 = vmax.f32 %v1203_v14, 0.0 }
  0xe5   :  { %v936_v11 = vpop.f32.mrf.mxu3 }
  0xe6   :  { %2033 = vst [vmem:[%s2683_s3 + $0x98] sm:$0xff] %v1953_v8   ;;  %v689_v12 = vpop.f32.mrf.mxu0  ;;  %v937_v19 = vadd.f32 %v936_v11, %v767_v10  ;;  %v1702_v8 = vor.u32 %v1835_v58, %v1699_v59 }
  0xe7   :  { %v858_v13 = vpop.f32.mrf.mxu1 }
  0xe8   :  { %v859_v15 = vadd.f32 %v858_v13, %v689_v12  ;;  %v1235_v33 = vadd.f32 %v2350_v63, %v937_v19 }
  0xea   :  { %v1204_v20 = vadd.f32 %v2350_v63, %v859_v15  ;;  %v1299_v40 = vmax.f32 %v1235_v33, 0.0 }
  0xec   :  { %v1268_v27 = vmax.f32 %v1204_v20, 0.0  ;;  %v769_v28 = vpop.f32.mrf.mxu2 }
  0xed   :  { %v938_v29 = vpop.f32.mrf.mxu3 }
  0xee   :  { %v1878_v34 = vpack.c.bf16 %v1268_v27, %v1267_v26  ;;  %v939_v35 = vadd.f32 %v938_v29, %v769_v28  ;;  %v692_v36 = vpop.f32.mrf.mxu0  ;;  %v1838_v26 = vld [vmem:[%s2681_s0 + $0x1f4] sm:$0xf0]  ;;  %v1805_v27 = vld [vmem:[%s2681_s0 + $0xf4] sm:$0xf]  ;;  %v1579_v28 = vld [vmem:[%s2681_s0 + $0xf8] sm:$0xf0] }
  0xef   :  { %v861_v38 = vpop.f32.mrf.mxu1  ;;  %v1837_v29 = vld [vmem:[%s2681_s0 + $0x1f4] sm:$0xf] }
  0xf0   :  { %2018 = vst [vmem:[%s2683_s3 + $0x20] sm:$0xff] %v1878_v34   ;;  %v1236_v39 = vadd.f32 %v2350_v63, %v939_v35  ;;  %v862_v43 = vadd.f32 %v861_v38, %v692_v36  ;;  %v1578_v35 = vor.u32 %v1806_v22, %v1577_v21  ;;  %v1706_v36 = vor.u32 %v1838_v26, %v1705_v23 }
  0xf1   :  { %731 = vmatmul.bf16.gmra.mxu0 %v1562_v30  ;;  %811 = vmatmul.bf16.gmra.mxu2 %v1690_v31  ;;  %v1707_v30 = vld [vmem:[%s2681_s0 + $0x1f8] sm:$0xf0] }
  0xf2   :  { %v1300_v41 = vmax.f32 %v1236_v39, 0.0  ;;  %900 = vmatmul.bf16.gmra.mxu1 %v1566_v32  ;;  %980 = vmatmul.bf16.gmra.mxu3 %v1694_v37  ;;  %v1205_v48 = vadd.f32 %v2350_v63, %v862_v43  ;;  %v1582_v37 = vor.u32 %v1805_v27, %v1579_v28 }
  0xf4   :  { %v1958_v42 = vpack.c.bf16 %v1300_v41, %v1299_v40  ;;  %v772_v44 = vpop.f32.mrf.mxu2  ;;  %v1269_v60 = vmax.f32 %v1205_v48, 0.0 }
  0xf5   :  { %v941_v45 = vpop.f32.mrf.mxu3 }
  0xf6   :  { %2034 = vst [vmem:[%s2683_s3 + $0xa0] sm:$0xff] %v1958_v42   ;;  %v694_v46 = vpop.f32.mrf.mxu0  ;;  %v942_v53 = vadd.f32 %v941_v45, %v772_v44  ;;  %v1710_v42 = vor.u32 %v1837_v29, %v1707_v30 }
  0xf7   :  { %v863_v47 = vpop.f32.mrf.mxu1 }
  0xf8   :  { %v864_v49 = vadd.f32 %v863_v47, %v694_v46  ;;  %v1237_v4 = vadd.f32 %v2350_v63, %v942_v53 }
  0xfa   :  { %v1206_v54 = vadd.f32 %v2350_v63, %v864_v49  ;;  %v1301_v11 = vmax.f32 %v1237_v4, 0.0 }
  0xfc   :  { %v1270_v61 = vmax.f32 %v1206_v54, 0.0  ;;  %v774_v62 = vpop.f32.mrf.mxu2 }
  0xfd   :  { %v943_v0 = vpop.f32.mrf.mxu3 }
  0xfe   :  { %v1883_v5 = vpack.c.bf16 %v1270_v61, %v1269_v60  ;;  %v944_v6 = vadd.f32 %v943_v0, %v774_v62  ;;  %v697_v7 = vpop.f32.mrf.mxu0 }
  0xff   :  { %v866_v9 = vpop.f32.mrf.mxu1 }
 0x100   :  { %2019 = vst [vmem:[%s2683_s3 + $0x28] sm:$0xff] %v1883_v5   ;;  %v1238_v10 = vadd.f32 %v2350_v63, %v944_v6  ;;  %v867_v14 = vadd.f32 %v866_v9, %v697_v7 }
 0x101   :  { %736 = vmatmul.bf16.gmra.mxu0 %v1570_v1  ;;  %816 = vmatmul.bf16.gmra.mxu2 %v1698_v2 }
 0x102   :  { %v1302_v12 = vmax.f32 %v1238_v10, 0.0  ;;  %905 = vmatmul.bf16.gmra.mxu1 %v1574_v3  ;;  %985 = vmatmul.bf16.gmra.mxu3 %v1702_v8  ;;  %v1207_v19 = vadd.f32 %v2350_v63, %v867_v14 }
 0x104   :  { %v1963_v13 = vpack.c.bf16 %v1302_v12, %v1301_v11  ;;  %v777_v15 = vpop.f32.mrf.mxu2  ;;  %v1271_v31 = vmax.f32 %v1207_v19, 0.0 }
 0x105   :  { %v946_v16 = vpop.f32.mrf.mxu3 }
 0x106   :  { %2035 = vst [vmem:[%s2683_s3 + $0xa8] sm:$0xff] %v1963_v13   ;;  %v699_v17 = vpop.f32.mrf.mxu0  ;;  %v947_v24 = vadd.f32 %v946_v16, %v777_v15 }
 0x107   :  { %v868_v18 = vpop.f32.mrf.mxu1 }
 0x108   :  { %v869_v20 = vadd.f32 %v868_v18, %v699_v17  ;;  %v1239_v38 = vadd.f32 %v2350_v63, %v947_v24 }
 0x10a   :  { %v1208_v25 = vadd.f32 %v2350_v63, %v869_v20  ;;  %v1303_v45 = vmax.f32 %v1239_v38, 0.0 }
 0x10c   :  { %v1272_v32 = vmax.f32 %v1208_v25, 0.0  ;;  %v779_v33 = vpop.f32.mrf.mxu2 }
 0x10d   :  { %v948_v34 = vpop.f32.mrf.mxu3 }
 0x10e   :  { %v1888_v39 = vpack.c.bf16 %v1272_v32, %v1271_v31  ;;  %v949_v40 = vadd.f32 %v948_v34, %v779_v33  ;;  %v702_v41 = vpop.f32.mrf.mxu0 }
 0x10f   :  { %v871_v43 = vpop.f32.mrf.mxu1 }
 0x110   :  { %2020 = vst [vmem:[%s2683_s3 + $0x30] sm:$0xff] %v1888_v39   ;;  %v1240_v44 = vadd.f32 %v2350_v63, %v949_v40  ;;  %v872_v48 = vadd.f32 %v871_v43, %v702_v41 }
 0x111   :  { %741 = vmatmul.bf16.gmra.mxu0 %v1578_v35  ;;  %821 = vmatmul.bf16.gmra.mxu2 %v1706_v36 }
 0x112   :  { %v1304_v46 = vmax.f32 %v1240_v44, 0.0  ;;  %910 = vmatmul.bf16.gmra.mxu1 %v1582_v37  ;;  %990 = vmatmul.bf16.gmra.mxu3 %v1710_v42  ;;  %v1209_v53 = vadd.f32 %v2350_v63, %v872_v48 }
 0x114   :  { %v1968_v47 = vpack.c.bf16 %v1304_v46, %v1303_v45  ;;  %v782_v49 = vpop.f32.mrf.mxu2  ;;  %v1273_v57 = vmax.f32 %v1209_v53, 0.0 }
 0x115   :  { %v951_v50 = vpop.f32.mrf.mxu3 }
 0x116   :  { %2036 = vst [vmem:[%s2683_s3 + $0xb0] sm:$0xff] %v1968_v47   ;;  %v704_v51 = vpop.f32.mrf.mxu0  ;;  %v952_v55 = vadd.f32 %v951_v50, %v782_v49 }
 0x117   :  { %v873_v52 = vpop.f32.mrf.mxu1 }
 0x118   :  { %v874_v54 = vadd.f32 %v873_v52, %v704_v51  ;;  %v1241_v61 = vadd.f32 %v2350_v63, %v952_v55 }
 0x11a   :  { %v1210_v56 = vadd.f32 %v2350_v63, %v874_v54  ;;  %v1305_v4 = vmax.f32 %v1241_v61, 0.0 }
 0x11c   :  { %v1274_v58 = vmax.f32 %v1210_v56, 0.0  ;;  %v784_v59 = vpop.f32.mrf.mxu2 }
 0x11d   :  { %v953_v60 = vpop.f32.mrf.mxu3 }
 0x11e   :  { %v1893_v62 = vpack.c.bf16 %v1274_v58, %v1273_v57  ;;  %v954_v0 = vadd.f32 %v953_v60, %v784_v59  ;;  %v707_v1 = vpop.f32.mrf.mxu0 }
 0x11f   :  { %v876_v2 = vpop.f32.mrf.mxu1 }
 0x120   :  { %2021 = vst [vmem:[%s2683_s3 + $0x38] sm:$0xff] %v1893_v62   ;;  %v1242_v3 = vadd.f32 %v2350_v63, %v954_v0  ;;  %v877_v7 = vadd.f32 %v876_v2, %v707_v1 }
 0x122   :  { %v1306_v5 = vmax.f32 %v1242_v3, 0.0  ;;  %v1211_v12 = vadd.f32 %v2350_v63, %v877_v7 }
 0x124   :  { %v1973_v6 = vpack.c.bf16 %v1306_v5, %v1305_v4  ;;  %v787_v8 = vpop.f32.mrf.mxu2  ;;  %v1275_v16 = vmax.f32 %v1211_v12, 0.0 }
 0x125   :  { %v956_v9 = vpop.f32.mrf.mxu3 }
 0x126   :  { %2037 = vst [vmem:[%s2683_s3 + $0xb8] sm:$0xff] %v1973_v6   ;;  %v709_v10 = vpop.f32.mrf.mxu0  ;;  %v957_v14 = vadd.f32 %v956_v9, %v787_v8 }
 0x127   :  { %v878_v11 = vpop.f32.mrf.mxu1 }
 0x128   :  { %v879_v13 = vadd.f32 %v878_v11, %v709_v10  ;;  %v1243_v20 = vadd.f32 %v2350_v63, %v957_v14 }
 0x12a   :  { %v1212_v15 = vadd.f32 %v2350_v63, %v879_v13  ;;  %v1307_v26 = vmax.f32 %v1243_v20, 0.0 }
 0x12c   :  { %v1276_v17 = vmax.f32 %v1212_v15, 0.0  ;;  %v789_v18 = vpop.f32.mrf.mxu2 }
 0x12d   :  { %v958_v19 = vpop.f32.mrf.mxu3 }
 0x12e   :  { %v1898_v21 = vpack.c.bf16 %v1276_v17, %v1275_v16  ;;  %v959_v22 = vadd.f32 %v958_v19, %v789_v18  ;;  %v712_v23 = vpop.f32.mrf.mxu0 }
 0x12f   :  { %v881_v24 = vpop.f32.mrf.mxu1 }
 0x130   :  { %2022 = vst [vmem:[%s2683_s3 + $0x40] sm:$0xff] %v1898_v21   ;;  %v1244_v25 = vadd.f32 %v2350_v63, %v959_v22  ;;  %v882_v29 = vadd.f32 %v881_v24, %v712_v23 }
 0x132   :  { %v1308_v27 = vmax.f32 %v1244_v25, 0.0  ;;  %v1213_v34 = vadd.f32 %v2350_v63, %v882_v29 }
 0x134   :  { %v1978_v28 = vpack.c.bf16 %v1308_v27, %v1307_v26  ;;  %v792_v30 = vpop.f32.mrf.mxu2  ;;  %v1277_v38 = vmax.f32 %v1213_v34, 0.0 }
 0x135   :  { %v961_v31 = vpop.f32.mrf.mxu3 }
 0x136   :  { %2038 = vst [vmem:[%s2683_s3 + $0xc0] sm:$0xff] %v1978_v28   ;;  %v714_v32 = vpop.f32.mrf.mxu0  ;;  %v962_v36 = vadd.f32 %v961_v31, %v792_v30 }
 0x137   :  { %v883_v33 = vpop.f32.mrf.mxu1 }
 0x138   :  { %v884_v35 = vadd.f32 %v883_v33, %v714_v32  ;;  %v1245_v42 = vadd.f32 %v2350_v63, %v962_v36 }
 0x13a   :  { %v1214_v37 = vadd.f32 %v2350_v63, %v884_v35  ;;  %v1309_v48 = vmax.f32 %v1245_v42, 0.0 }
 0x13c   :  { %v1278_v39 = vmax.f32 %v1214_v37, 0.0  ;;  %v794_v40 = vpop.f32.mrf.mxu2 }
 0x13d   :  { %v963_v41 = vpop.f32.mrf.mxu3 }
 0x13e   :  { %v1903_v43 = vpack.c.bf16 %v1278_v39, %v1277_v38  ;;  %v964_v44 = vadd.f32 %v963_v41, %v794_v40  ;;  %v717_v45 = vpop.f32.mrf.mxu0 }
 0x13f   :  { %v886_v46 = vpop.f32.mrf.mxu1 }
 0x140   :  { %2023 = vst [vmem:[%s2683_s3 + $0x48] sm:$0xff] %v1903_v43   ;;  %v1246_v47 = vadd.f32 %v2350_v63, %v964_v44  ;;  %v887_v51 = vadd.f32 %v886_v46, %v717_v45 }
 0x142   :  { %v1310_v49 = vmax.f32 %v1246_v47, 0.0  ;;  %v1215_v56 = vadd.f32 %v2350_v63, %v887_v51 }
 0x144   :  { %v1983_v50 = vpack.c.bf16 %v1310_v49, %v1309_v48  ;;  %v797_v52 = vpop.f32.mrf.mxu2  ;;  %v1279_v60 = vmax.f32 %v1215_v56, 0.0 }
 0x145   :  { %v966_v53 = vpop.f32.mrf.mxu3 }
 0x146   :  { %2039 = vst [vmem:[%s2683_s3 + $0xc8] sm:$0xff] %v1983_v50   ;;  %v719_v54 = vpop.f32.mrf.mxu0  ;;  %v967_v58 = vadd.f32 %v966_v53, %v797_v52 }
 0x147   :  { %v888_v55 = vpop.f32.mrf.mxu1 }
 0x148   :  { %v889_v57 = vadd.f32 %v888_v55, %v719_v54  ;;  %v1247_v1 = vadd.f32 %v2350_v63, %v967_v58 }
 0x14a   :  { %v1216_v59 = vadd.f32 %v2350_v63, %v889_v57  ;;  %v1311_v7 = vmax.f32 %v1247_v1, 0.0 }
 0x14c   :  { %v1280_v61 = vmax.f32 %v1216_v59, 0.0  ;;  %v799_v62 = vpop.f32.mrf.mxu2 }
 0x14d   :  { %v968_v0 = vpop.f32.mrf.mxu3 }
 0x14e   :  { %v1908_v2 = vpack.c.bf16 %v1280_v61, %v1279_v60  ;;  %v969_v3 = vadd.f32 %v968_v0, %v799_v62  ;;  %v722_v4 = vpop.f32.mrf.mxu0 }
 0x14f   :  { %v891_v5 = vpop.f32.mrf.mxu1 }
 0x150   :  { %2024 = vst [vmem:[%s2683_s3 + $0x50] sm:$0xff] %v1908_v2   ;;  %v1248_v6 = vadd.f32 %v2350_v63, %v969_v3  ;;  %v892_v10 = vadd.f32 %v891_v5, %v722_v4 }
 0x152   :  { %v1312_v8 = vmax.f32 %v1248_v6, 0.0  ;;  %v1217_v15 = vadd.f32 %v2350_v63, %v892_v10 }
 0x154   :  { %v1988_v9 = vpack.c.bf16 %v1312_v8, %v1311_v7  ;;  %v802_v11 = vpop.f32.mrf.mxu2  ;;  %v1281_v19 = vmax.f32 %v1217_v15, 0.0 }
 0x155   :  { %v971_v12 = vpop.f32.mrf.mxu3 }
 0x156   :  { %2040 = vst [vmem:[%s2683_s3 + $0xd0] sm:$0xff] %v1988_v9   ;;  %v724_v13 = vpop.f32.mrf.mxu0  ;;  %v972_v17 = vadd.f32 %v971_v12, %v802_v11 }
 0x157   :  { %v893_v14 = vpop.f32.mrf.mxu1 }
 0x158   :  { %v894_v16 = vadd.f32 %v893_v14, %v724_v13  ;;  %v1249_v23 = vadd.f32 %v2350_v63, %v972_v17 }
 0x15a   :  { %v1218_v18 = vadd.f32 %v2350_v63, %v894_v16  ;;  %v1313_v29 = vmax.f32 %v1249_v23, 0.0 }
 0x15c   :  { %v1282_v20 = vmax.f32 %v1218_v18, 0.0  ;;  %v804_v21 = vpop.f32.mrf.mxu2 }
 0x15d   :  { %v973_v22 = vpop.f32.mrf.mxu3 }
 0x15e   :  { %v1913_v24 = vpack.c.bf16 %v1282_v20, %v1281_v19  ;;  %v974_v25 = vadd.f32 %v973_v22, %v804_v21  ;;  %v727_v26 = vpop.f32.mrf.mxu0 }
 0x15f   :  { %v896_v27 = vpop.f32.mrf.mxu1 }
 0x160   :  { %2025 = vst [vmem:[%s2683_s3 + $0x58] sm:$0xff] %v1913_v24   ;;  %v1250_v28 = vadd.f32 %v2350_v63, %v974_v25  ;;  %v897_v32 = vadd.f32 %v896_v27, %v727_v26 }
 0x162   :  { %v1314_v30 = vmax.f32 %v1250_v28, 0.0  ;;  %v1219_v37 = vadd.f32 %v2350_v63, %v897_v32 }
 0x164   :  { %v1993_v31 = vpack.c.bf16 %v1314_v30, %v1313_v29  ;;  %v807_v33 = vpop.f32.mrf.mxu2  ;;  %v1283_v41 = vmax.f32 %v1219_v37, 0.0 }
 0x165   :  { %v976_v34 = vpop.f32.mrf.mxu3 }
 0x166   :  { %2041 = vst [vmem:[%s2683_s3 + $0xd8] sm:$0xff] %v1993_v31   ;;  %v729_v35 = vpop.f32.mrf.mxu0  ;;  %v977_v39 = vadd.f32 %v976_v34, %v807_v33 }
 0x167   :  { %v898_v36 = vpop.f32.mrf.mxu1 }
 0x168   :  { %v899_v38 = vadd.f32 %v898_v36, %v729_v35  ;;  %v1251_v45 = vadd.f32 %v2350_v63, %v977_v39 }
 0x16a   :  { %v1220_v40 = vadd.f32 %v2350_v63, %v899_v38  ;;  %v1315_v51 = vmax.f32 %v1251_v45, 0.0 }
 0x16c   :  { %v1284_v42 = vmax.f32 %v1220_v40, 0.0  ;;  %v809_v43 = vpop.f32.mrf.mxu2 }
 0x16d   :  { %v978_v44 = vpop.f32.mrf.mxu3 }
 0x16e   :  { %v1918_v46 = vpack.c.bf16 %v1284_v42, %v1283_v41  ;;  %v979_v47 = vadd.f32 %v978_v44, %v809_v43  ;;  %v732_v48 = vpop.f32.mrf.mxu0 }
 0x16f   :  { %v901_v49 = vpop.f32.mrf.mxu1 }
 0x170   :  { %2026 = vst [vmem:[%s2683_s3 + $0x60] sm:$0xff] %v1918_v46   ;;  %v1252_v50 = vadd.f32 %v2350_v63, %v979_v47  ;;  %v902_v54 = vadd.f32 %v901_v49, %v732_v48 }
 0x172   :  { %v1316_v52 = vmax.f32 %v1252_v50, 0.0  ;;  %v1221_v59 = vadd.f32 %v2350_v63, %v902_v54 }
 0x174   :  { %v1998_v53 = vpack.c.bf16 %v1316_v52, %v1315_v51  ;;  %v812_v55 = vpop.f32.mrf.mxu2  ;;  %v1285_v0 = vmax.f32 %v1221_v59, 0.0 }
 0x175   :  { %v981_v56 = vpop.f32.mrf.mxu3 }
 0x176   :  { %2042 = vst [vmem:[%s2683_s3 + $0xe0] sm:$0xff] %v1998_v53   ;;  %v734_v57 = vpop.f32.mrf.mxu0  ;;  %v982_v61 = vadd.f32 %v981_v56, %v812_v55 }
 0x177   :  { %v903_v58 = vpop.f32.mrf.mxu1 }
 0x178   :  { %v904_v60 = vadd.f32 %v903_v58, %v734_v57  ;;  %v1253_v4 = vadd.f32 %v2350_v63, %v982_v61 }
 0x17a   :  { %v1222_v62 = vadd.f32 %v2350_v63, %v904_v60  ;;  %v1317_v10 = vmax.f32 %v1253_v4, 0.0 }
 0x17c   :  { %v1286_v1 = vmax.f32 %v1222_v62, 0.0  ;;  %v814_v2 = vpop.f32.mrf.mxu2 }
 0x17d   :  { %v983_v3 = vpop.f32.mrf.mxu3 }
 0x17e   :  { %v1923_v5 = vpack.c.bf16 %v1286_v1, %v1285_v0  ;;  %v984_v6 = vadd.f32 %v983_v3, %v814_v2  ;;  %v737_v7 = vpop.f32.mrf.mxu0 }
 0x17f   :  { %v906_v8 = vpop.f32.mrf.mxu1 }
 0x180   :  { %2027 = vst [vmem:[%s2683_s3 + $0x68] sm:$0xff] %v1923_v5   ;;  %v1254_v9 = vadd.f32 %v2350_v63, %v984_v6  ;;  %v907_v13 = vadd.f32 %v906_v8, %v737_v7 }
 0x182   :  { %v1318_v11 = vmax.f32 %v1254_v9, 0.0  ;;  %v1223_v18 = vadd.f32 %v2350_v63, %v907_v13 }
 0x184   :  { %v2003_v12 = vpack.c.bf16 %v1318_v11, %v1317_v10  ;;  %v817_v14 = vpop.f32.mrf.mxu2  ;;  %v1287_v22 = vmax.f32 %v1223_v18, 0.0 }
 0x185   :  { %v986_v15 = vpop.f32.mrf.mxu3 }
 0x186   :  { %2043 = vst [vmem:[%s2683_s3 + $0xe8] sm:$0xff] %v2003_v12   ;;  %v739_v16 = vpop.f32.mrf.mxu0  ;;  %v987_v20 = vadd.f32 %v986_v15, %v817_v14 }
 0x187   :  { %v908_v17 = vpop.f32.mrf.mxu1 }
 0x188   :  { %v909_v19 = vadd.f32 %v908_v17, %v739_v16  ;;  %v1255_v26 = vadd.f32 %v2350_v63, %v987_v20 }
 0x18a   :  { %v1224_v21 = vadd.f32 %v2350_v63, %v909_v19  ;;  %v1319_v32 = vmax.f32 %v1255_v26, 0.0 }
 0x18c   :  { %v1288_v23 = vmax.f32 %v1224_v21, 0.0  ;;  %v819_v24 = vpop.f32.mrf.mxu2 }
 0x18d   :  { %v988_v25 = vpop.f32.mrf.mxu3 }
 0x18e   :  { %v1928_v27 = vpack.c.bf16 %v1288_v23, %v1287_v22  ;;  %v989_v28 = vadd.f32 %v988_v25, %v819_v24  ;;  %v742_v29 = vpop.f32.mrf.mxu0 }
 0x18f   :  { %v911_v30 = vpop.f32.mrf.mxu1 }
 0x190   :  { %2028 = vst [vmem:[%s2683_s3 + $0x70] sm:$0xff] %v1928_v27   ;;  %v1256_v31 = vadd.f32 %v2350_v63, %v989_v28  ;;  %v912_v35 = vadd.f32 %v911_v30, %v742_v29 }
 0x192   :  { %v1320_v33 = vmax.f32 %v1256_v31, 0.0  ;;  %v1225_v40 = vadd.f32 %v2350_v63, %v912_v35 }
 0x194   :  { %v2008_v34 = vpack.c.bf16 %v1320_v33, %v1319_v32  ;;  %v822_v36 = vpop.f32.mrf.mxu2  ;;  %v1289_v44 = vmax.f32 %v1225_v40, 0.0 }
 0x195   :  { %v991_v37 = vpop.f32.mrf.mxu3 }
 0x196   :  { %2044 = vst [vmem:[%s2683_s3 + $0xf0] sm:$0xff] %v2008_v34   ;;  %v744_v38 = vpop.f32.mrf.mxu0  ;;  %v992_v42 = vadd.f32 %v991_v37, %v822_v36 }
 0x197   :  { %v913_v39 = vpop.f32.mrf.mxu1 }
 0x198   :  { %v914_v41 = vadd.f32 %v913_v39, %v744_v38  ;;  %v1257_v48 = vadd.f32 %v2350_v63, %v992_v42 }
 0x19a   :  { %v1226_v43 = vadd.f32 %v2350_v63, %v914_v41  ;;  %v1321_v52 = vmax.f32 %v1257_v48, 0.0 }
 0x19c   :  { %v1290_v45 = vmax.f32 %v1226_v43, 0.0  ;;  %v824_v46 = vpop.f32.mrf.mxu2 }
 0x19d   :  { %v993_v47 = vpop.f32.mrf.mxu3 }
 0x19e   :  { %v1933_v49 = vpack.c.bf16 %v1290_v45, %v1289_v44  ;;  %v994_v50 = vadd.f32 %v993_v47, %v824_v46 }
 0x1a0   :  { %2029 = vst [vmem:[%s2683_s3 + $0x78] sm:$0xff] %v1933_v49   ;;  %v1258_v51 = vadd.f32 %v2350_v63, %v994_v50 }
 0x1a2   :  { %v1322_v53 = vmax.f32 %v1258_v51, 0.0 }
 0x1a4   :  { %v2013_v54 = vpack.c.bf16 %v1322_v53, %v1321_v52 }
 0x1a6   :  { %2045 = vst [vmem:[%s2683_s3 + $0xf8] sm:$0xff] %v2013_v54  }

// kernel: resnet_forward.46
= control target key start
LH: loop header
LB: loop body
LE: loop exit
PB: predicated region body
PF: predicated region fallthrough
CT: control target
= control target key end

     0   :  { %s1068_s12 = smov 0   ;;  %s1070_s13 = smov 0   ;;  %s1200_s0 = inlined_call_operand.vmem [shape: bf16[128,640], index: 0, kind: input, shape index: {}]   ;;  %s1201_s1 = inlined_call_operand.vmem [shape: bf16[640,128], index: 1, kind: input, shape index: {}]   ;;  %s1202_s2 = inlined_call_operand.vmem [shape: f32[1,128], index: 2, kind: input, shape index: {}]   ;;  %s1203_s3 = inlined_call_operand.vmem [shape: bf16[128,128], index: 3, kind: output, shape index: {}]  }
   0x1   :  { %s1072_s14 = smov 0   ;;  %s1074_s15 = smov 0  }
   0x2   :  { %s1076_s16 = smov 0  }
   0x3 LB: > { %s25_s17 = sadd.s32 1, %s1041_s15  ;;  %p48_p1 = scmp.ne.s32.totalorder %s1033_s13, %s1029_s12  ;;  %s1045_s16 = sphi %s1076_s16, %s13_s16   ;;  %s1041_s15 = sphi %s1074_s15, %s1207_s15   ;;  %s1037_s14 = sphi %s1072_s14, %s1206_s14   ;;  %s1033_s13 = sphi %s1070_s13, %s1205_s13   ;;  %s1029_s12 = sphi %s1068_s12, %s1204_s12  }
   0x4   : > { %p26_p0 = scmp.ge.s32.totalorder %s25_s17, 5  ;;  %p49_p2 = scmp.eq.s32.totalorder %s1045_s16, 0 }
   0x5   : > { %s41_s19 = sadd.s32 1, %s1033_s13  ;;  %p801_p5 = scmp.ge.s32.totalorder %s1045_s16, 5 }
   0x6   : > { %s1209_s17 = smov (%p26_p0, %s25_s17), 0  ;;  %p50_p3 = por %p49_p2, %p48_p1 }
   0x7   : > { %s37_s18 = ssub.s32 %s1041_s15, %s1209_s17  ;;  %162 = sbr.rel (%p801_p5) target bundleno = 32 (0x20), region = 20 }
   0x8   : > { %p39_p4 = scmp.eq.s32.totalorder %s37_s18, 0 }
   0xa   : > { %s1103_s20 = scalar_select %p39_p4, %s1033_s13, %s41_s19  }
   0xc   : > { %165 = sbr.rel (!%p50_p3) target bundleno = 32 (0x20), region = 24  ;;  %s167_s21 = sand.u32 (%p50_p3), 1, %s1033_s13  }
   0xd   : > { %s803_s22 = sshll.u32 (%p50_p3), %s1041_s15, 2  ;;  %s802_s23 = sshll.u32 (%p50_p3), %s167_s21, 6 }
   0xe   : > { %s1111_s26 = scalar_lea.vmem (%p50_p3), %s1200_s0, %s803_s22  ;;  %s169_s27 = scalar_lea.vmem (%p50_p3), [#allocation3], %s802_s23 }
   0xf   : > { %v191_v0 = vld [vmem:[%s1111_s26] sm:$0xf] (%p50_p3)  ;;  %v193_v1 = vld [vmem:[%s1111_s26 + $0x14] sm:$0xf] (%p50_p3)  ;;  %v195_v2 = vld [vmem:[%s1111_s26 + $0x28] sm:$0xf] (%p50_p3) }
  0x10   : > { %192 = vst [vmem:[%s169_s27] sm:$0xf] (%p50_p3), %v191_v0  ;;  %v197_v3 = vld [vmem:[%s1111_s26 + $0x3c] sm:$0xf] (%p50_p3)  ;;  %v199_v4 = vld [vmem:[%s1111_s26 + $0x50] sm:$0xf] (%p50_p3) }
  0x11   : > { %194 = vst [vmem:[%s169_s27 + $0x4] sm:$0xf] %v193_v1  ;;  %v201_v5 = vld [vmem:[%s1111_s26 + $0x64] sm:$0xf]  ;;  %v203_v6 = vld [vmem:[%s1111_s26 + $0x78] sm:$0xf] }
  0x12   : > { %196 = vst [vmem:[%s169_s27 + $0x8] sm:$0xf] %v195_v2  ;;  %v205_v7 = vld [vmem:[%s1111_s26 + $0x8c] sm:$0xf]  ;;  %v207_v8 = vld [vmem:[%s1111_s26 + $0xa0] sm:$0xf] }
  0x13   : > { %198 = vst [vmem:[%s169_s27 + $0xc] sm:$0xf] %v197_v3  ;;  %v209_v9 = vld [vmem:[%s1111_s26 + $0xb4] sm:$0xf]  ;;  %v211_v10 = vld [vmem:[%s1111_s26 + $0xc8] sm:$0xf] }
  0x14   : > { %200 = vst [vmem:[%s169_s27 + $0x10] sm:$0xf] %v199_v4  ;;  %v213_v11 = vld [vmem:[%s1111_s26 + $0xdc] sm:$0xf]  ;;  %v215_v12 = vld [vmem:[%s1111_s26 + $0xf0] sm:$0xf] }
  0x15   : > { %202 = vst [vmem:[%s169_s27 + $0x14] sm:$0xf] %v201_v5  ;;  %v217_v13 = vld [vmem:[%s1111_s26 + $0x104] sm:$0xf]  ;;  %v219_v14 = vld [vmem:[%s1111_s26 + $0x118] sm:$0xf] }
  0x16   : > { %204 = vst [vmem:[%s169_s27 + $0x18] sm:$0xf] %v203_v6  ;;  %v221_v15 = vld [vmem:[%s1111_s26 + $0x12c] sm:$0xf] }
  0x17   : > { %206 = vst [vmem:[%s169_s27 + $0x1c] sm:$0xf] %v205_v7 }
  0x18   : > { %208 = vst [vmem:[%s169_s27 + $0x20] sm:$0xf] %v207_v8 }
  0x19   : > { %210 = vst [vmem:[%s169_s27 + $0x24] sm:$0xf] %v209_v9 }
  0x1a   : > { %212 = vst [vmem:[%s169_s27 + $0x28] sm:$0xf] %v211_v10 }
  0x1b   : > { %214 = vst [vmem:[%s169_s27 + $0x2c] sm:$0xf] %v213_v11 }
  0x1c   : > { %216 = vst [vmem:[%s169_s27 + $0x30] sm:$0xf] %v215_v12 }
  0x1d   : > { %218 = vst [vmem:[%s169_s27 + $0x34] sm:$0xf] %v217_v13 }
  0x1e   : > { %220 = vst [vmem:[%s169_s27 + $0x38] sm:$0xf] %v219_v14 }
  0x1f   : > { %222 = vst [vmem:[%s169_s27 + $0x3c] sm:$0xf] %v221_v15 }
  0x20 PF: > { %p804_p6 = scmp.ge.s32.totalorder %s1045_s16, 1  ;;  %p289_p7 = scmp.lt.s32.totalorder %s1045_s16, 6 }
  0x22   : > { %p290_p8 = pnand %p804_p6, %p289_p7 }
  0x23   : > { %s296_s28 = sand.u32 (!%p290_p8), 1, %s1029_s12   ;;  %s806_s29 = sshll.u32 (!%p290_p8), %s1037_s14, 4 }
  0x24   : > { %293 = sbr.rel (%p290_p8) target bundleno = 272 (0x110), region = 69  ;;  %s805_s30 = sshll.u32 (!%p290_p8), %s296_s28, 6 }
  0x25   : > { %p335_p9 = scmp.lt.s32.totalorder (!%p290_p8), %s806_s29, 79  ;;  %s1138_s8 = scalar_lea.vmem (!%p290_p8), [#allocation3], %s805_s30 }
  0x26   : > { %p808_p10 = scmp.ne.s32.totalorder (!%p290_p8), %s1037_s14, 0 }
  0x29   : > { %s1211_s29 = smov (!%p335_p9, %s806_s29), 79  ;;  %358 = sbr.rel (%p808_p10) target bundleno = 63 (0x3f), region = 77 }
  0x2a   : > { %s807_s4 = sshll.u32 %s1211_s29, 2 }
  0x2b   : > { %s1136_s7 = scalar_lea.vmem %s1201_s1, %s807_s4 }
  0x2e   : > { %v1047_v16 = vmov 0.0  }
  0x2f   : > { %359 = vst [vmem:[#allocation2 + $0x30] sm:$0xff] %v1047_v16 }
  0x30   : > { %360 = vst [vmem:[#allocation2] sm:$0xff] %v1047_v16 }
  0x31   : > { %361 = vst [vmem:[#allocation2 + $0x58] sm:$0xff] %v1047_v16 }
  0x32   : > { %362 = vst [vmem:[#allocation2 + $0x18] sm:$0xff] %v1047_v16 }
  0x33   : > { %363 = vst [vmem:[#allocation2 + $0x50] sm:$0xff] %v1047_v16 }
  0x34   : > { %364 = vst [vmem:[#allocation2 + $0x68] sm:$0xff] %v1047_v16 }
  0x35   : > { %365 = vst [vmem:[#allocation2 + $0x8] sm:$0xff] %v1047_v16 }
  0x36   : > { %366 = vst [vmem:[#allocation2 + $0x48] sm:$0xff] %v1047_v16 }
  0x37   : > { %367 = vst [vmem:[#allocation2 + $0x40] sm:$0xff] %v1047_v16 }
  0x38   : > { %368 = vst [vmem:[#allocation2 + $0x20] sm:$0xff] %v1047_v16 }
  0x39   : > { %369 = vst [vmem:[#allocation2 + $0x10] sm:$0xff] %v1047_v16 }
  0x3a   : > { %370 = vst [vmem:[#allocation2 + $0x38] sm:$0xff] %v1047_v16 }
  0x3b   : > { %371 = vst [vmem:[#allocation2 + $0x60] sm:$0xff] %v1047_v16 }
  0x3c   : > { %372 = vst [vmem:[#allocation2 + $0x70] sm:$0xff] %v1047_v16 }
  0x3d   : > { %373 = vst [vmem:[#allocation2 + $0x78] sm:$0xff] %v1047_v16 }
  0x3e   : > { %374 = vst [vmem:[#allocation2 + $0x28] sm:$0xff] %v1047_v16 }
  0x3f PF: > { %v893_v17 = vld [vmem:[%s1136_s7 + $0x38] sm:$0xff]  ;;  %v892_v18 = vld [vmem:[%s1136_s7 + $0x30] sm:$0xff]  ;;  %v891_v19 = vld [vmem:[%s1136_s7 + $0x28] sm:$0xff]  ;;  %p873_p11 = scmp.ne.s32.totalorder %s1037_s14, 4 }
  0x40   : > { %519 = vmatpush.bf16.msra.mxu0 %v893_v17  ;;  %941 = vmatpush.bf16.msra.mxu1 %v893_v17  ;;  %v890_v20 = vld [vmem:[%s1136_s7 + $0x20] sm:$0xff]  ;;  %v889_v21 = vld [vmem:[%s1136_s7 + $0x18] sm:$0xff]  ;;  %v888_v22 = vld [vmem:[%s1136_s7 + $0x10] sm:$0xff] }
  0x41   : > { %942 = vmatpush.bf16.msra.mxu2 %v893_v17  ;;  %943 = vmatpush.bf16.msra.mxu3 %v893_v17  ;;  %v887_v23 = vld [vmem:[%s1136_s7 + $0x8] sm:$0xff]  ;;  %v886_v24 = vld [vmem:[%s1136_s7] sm:$0xff]  ;;  %v880_v26 = vld [vmem:[%s1138_s8 + $0x10] sm:$0xff] }
  0x42   : > { %v878_v25 = vld [vmem:[%s1138_s8] sm:$0xff]  ;;  %v884_v28 = vld [vmem:[%s1138_s8 + $0x30] sm:$0xff]  ;;  %v879_v29 = vld [vmem:[%s1138_s8 + $0x8] sm:$0xff] }
  0x43   : > { %v882_v27 = vld [vmem:[%s1138_s8 + $0x20] sm:$0xff]  ;;  %v881_v30 = vld [vmem:[%s1138_s8 + $0x18] sm:$0xff]  ;;  %v883_v31 = vld [vmem:[%s1138_s8 + $0x28] sm:$0xff] }
  0x44   : > { %520 = vmatpush.bf16.msra.mxu0 %v892_v18  ;;  %944 = vmatpush.bf16.msra.mxu1 %v892_v18  ;;  %v885_v32 = vld [vmem:[%s1138_s8 + $0x38] sm:$0xff]  ;;  %v375_v33 = vld [vmem:[#allocation2 + $0x30] sm:$0xff]  ;;  %v383_v39 = vld [vmem:[#allocation2 + $0x40] sm:$0xff] }
  0x45   : > { %945 = vmatpush.bf16.msra.mxu2 %v892_v18  ;;  %946 = vmatpush.bf16.msra.mxu3 %v892_v18  ;;  %v379_v34 = vld [vmem:[#allocation2 + $0x50] sm:$0xff]  ;;  %v387_v40 = vld [vmem:[#allocation2 + $0x60] sm:$0xff]  ;;  %v380_v42 = vld [vmem:[#allocation2 + $0x68] sm:$0xff] }
  0x46   : > { %v376_v41 = vld [vmem:[#allocation2] sm:$0xff]  ;;  %v388_v52 = vld [vmem:[#allocation2 + $0x70] sm:$0xff]  ;;  %v377_v53 = vld [vmem:[#allocation2 + $0x58] sm:$0xff] }
  0x47   : > { %v384_v51 = vld [vmem:[#allocation2 + $0x20] sm:$0xff]  ;;  %v381_v54 = vld [vmem:[#allocation2 + $0x8] sm:$0xff]  ;;  %v385_v63 = vld [vmem:[#allocation2 + $0x10] sm:$0xff] }
  0x48   : > { %521 = vmatpush.bf16.msra.mxu0 %v891_v19  ;;  %947 = vmatpush.bf16.msra.mxu1 %v891_v19  ;;  %v389_v0 = vld [vmem:[#allocation2 + $0x78] sm:$0xff]  ;;  %v382_v2 = vld [vmem:[#allocation2 + $0x48] sm:$0xff] }
  0x49   : > { %948 = vmatpush.bf16.msra.mxu2 %v891_v19  ;;  %949 = vmatpush.bf16.msra.mxu3 %v891_v19  ;;  %v378_v1 = vld [vmem:[#allocation2 + $0x18] sm:$0xff]  ;;  %v390_v12 = vld [vmem:[#allocation2 + $0x28] sm:$0xff] }
  0x4a   : > { %v386_v11 = vld [vmem:[#allocation2 + $0x38] sm:$0xff] }
  0x4c   : > { %522 = vmatpush.bf16.msra.mxu0 %v890_v20  ;;  %950 = vmatpush.bf16.msra.mxu1 %v890_v20 }
  0x4d   : > { %951 = vmatpush.bf16.msra.mxu2 %v890_v20  ;;  %952 = vmatpush.bf16.msra.mxu3 %v890_v20 }
  0x50   : > { %523 = vmatpush.bf16.msra.mxu0 %v889_v21  ;;  %953 = vmatpush.bf16.msra.mxu1 %v889_v21 }
  0x51   : > { %954 = vmatpush.bf16.msra.mxu2 %v889_v21  ;;  %955 = vmatpush.bf16.msra.mxu3 %v889_v21 }
  0x54   : > { %524 = vmatpush.bf16.msra.mxu0 %v888_v22  ;;  %956 = vmatpush.bf16.msra.mxu1 %v888_v22 }
  0x55   : > { %957 = vmatpush.bf16.msra.mxu2 %v888_v22  ;;  %958 = vmatpush.bf16.msra.mxu3 %v888_v22 }
  0x58   : > { %525 = vmatpush.bf16.msra.mxu0 %v887_v23  ;;  %959 = vmatpush.bf16.msra.mxu1 %v887_v23 }
  0x59   : > { %960 = vmatpush.bf16.msra.mxu2 %v887_v23  ;;  %961 = vmatpush.bf16.msra.mxu3 %v887_v23 }
  0x5c   : > { %526 = vmatpush.bf16.msra.mxu0 %v886_v24  ;;  %962 = vmatpush.bf16.msra.mxu1 %v886_v24 }
  0x5d   : > { %963 = vmatpush.bf16.msra.mxu2 %v886_v24  ;;  %964 = vmatpush.bf16.msra.mxu3 %v886_v24 }
  0x5f   : > { %527 = vmatmul.bf16.vlgmr.msra.gmra.mxu0 %v878_v25  ;;  %537 = vmatmul.bf16.vlgmr.msra.gmra.mxu1 %v880_v26 }
  0x60   : > { %547 = vmatmul.bf16.vlgmr.msra.gmra.mxu2 %v882_v27  ;;  %557 = vmatmul.bf16.vlgmr.msra.gmra.mxu3 %v884_v28 }
  0x6f   : > { %532 = vmatmul.bf16.gmra.mxu0 %v879_v29  ;;  %542 = vmatmul.bf16.gmra.mxu1 %v881_v30 }
  0x70   : > { %552 = vmatmul.bf16.gmra.mxu2 %v883_v31  ;;  %562 = vmatmul.bf16.gmra.mxu3 %v885_v32 }
  0xdc   : > { %v528_v35 = vpop.f32.mrf.mxu0  ;;  %v538_v36 = vpop.f32.mrf.mxu1 }
  0xdd   : > { %v568_v37 = vadd.f32 %v528_v35, %v375_v33  ;;  %v572_v38 = vadd.f32 %v538_v36, %v379_v34 }
  0xdf   : > { %584 = vst [vmem:[#allocation2 + $0x30] sm:$0xff] %v568_v37 }
  0xe0   : > { %588 = vst [vmem:[#allocation2 + $0x50] sm:$0xff] %v572_v38 }
  0xe3   : > { %v548_v43 = vpop.f32.mrf.mxu2  ;;  %v558_v44 = vpop.f32.mrf.mxu3 }
  0xe4   : > { %v576_v45 = vadd.f32 %v548_v43, %v383_v39  ;;  %v580_v46 = vadd.f32 %v558_v44, %v387_v40  ;;  %v530_v47 = vpop.f32.mrf.mxu0  ;;  %v540_v48 = vpop.f32.mrf.mxu1 }
  0xe5   : > { %v569_v49 = vadd.f32 %v530_v47, %v376_v41  ;;  %v573_v50 = vadd.f32 %v540_v48, %v380_v42 }
  0xe6   : > { %592 = vst [vmem:[#allocation2 + $0x40] sm:$0xff] %v576_v45 }
  0xe7   : > { %596 = vst [vmem:[#allocation2 + $0x60] sm:$0xff] %v580_v46 }
  0xe8   : > { %585 = vst [vmem:[#allocation2] sm:$0xff] %v569_v49 }
  0xe9   : > { %589 = vst [vmem:[#allocation2 + $0x68] sm:$0xff] %v573_v50 }
  0xeb   : > { %v550_v55 = vpop.f32.mrf.mxu2  ;;  %v560_v56 = vpop.f32.mrf.mxu3 }
  0xec   : > { %v577_v57 = vadd.f32 %v550_v55, %v384_v51  ;;  %v581_v58 = vadd.f32 %v560_v56, %v388_v52  ;;  %v533_v59 = vpop.f32.mrf.mxu0  ;;  %v543_v60 = vpop.f32.mrf.mxu1 }
  0xed   : > { %v570_v61 = vadd.f32 %v533_v59, %v377_v53  ;;  %v574_v62 = vadd.f32 %v543_v60, %v381_v54 }
  0xee   : > { %593 = vst [vmem:[#allocation2 + $0x20] sm:$0xff] %v577_v57 }
  0xef   : > { %597 = vst [vmem:[#allocation2 + $0x70] sm:$0xff] %v581_v58 }
  0xf0   : > { %586 = vst [vmem:[#allocation2 + $0x58] sm:$0xff] %v570_v61 }
  0xf1   : > { %590 = vst [vmem:[#allocation2 + $0x8] sm:$0xff] %v574_v62 }
  0xf3   : > { %v553_v3 = vpop.f32.mrf.mxu2  ;;  %v563_v4 = vpop.f32.mrf.mxu3 }
  0xf4   : > { %v578_v5 = vadd.f32 %v553_v3, %v385_v63  ;;  %v582_v6 = vadd.f32 %v563_v4, %v389_v0  ;;  %v535_v7 = vpop.f32.mrf.mxu0  ;;  %v545_v8 = vpop.f32.mrf.mxu1 }
  0xf5   : > { %v571_v9 = vadd.f32 %v535_v7, %v378_v1  ;;  %v575_v10 = vadd.f32 %v545_v8, %v382_v2 }
  0xf6   : > { %594 = vst [vmem:[#allocation2 + $0x10] sm:$0xff] %v578_v5 }
  0xf7   : > { %598 = vst [vmem:[#allocation2 + $0x78] sm:$0xff] %v582_v6 }
  0xf8   : > { %587 = vst [vmem:[#allocation2 + $0x18] sm:$0xff] %v571_v9 }
  0xf9   : > { %591 = vst [vmem:[#allocation2 + $0x48] sm:$0xff] %v575_v10 }
  0xfb   : > { %v555_v13 = vpop.f32.mrf.mxu2  ;;  %v565_v14 = vpop.f32.mrf.mxu3  ;;  %603 = sbr.rel (%p873_p11) target bundleno = 272 (0x110), region = 81 }
  0xfc   : > { %v579_v15 = vadd.f32 %v555_v13, %v386_v11  ;;  %v583_v16 = vadd.f32 %v565_v14, %v390_v12 }
  0xfe   : > { %595 = vst [vmem:[#allocation2 + $0x38] sm:$0xff] %v579_v15 }
  0xff   : > { %599 = vst [vmem:[#allocation2 + $0x28] sm:$0xff] %v583_v16 }
 0x100   : > { %v604_v17 = vld [vmem:[#allocation2 + $0x30] sm:$0xff]  ;;  %v605_v18 = vld [vmem:[#allocation2] sm:$0xff]  ;;  %v606_v20 = vld [vmem:[#allocation2 + $0x58] sm:$0xff] }
 0x101   : > { %v1006_v19 = vld [vmem:[%s1202_s2] ss:$0 sm:$0xff]  ;;  %v607_v21 = vld [vmem:[#allocation2 + $0x18] sm:$0xff]  ;;  %v608_v22 = vld [vmem:[#allocation2 + $0x50] sm:$0xff] }
 0x102   : > { %v609_v23 = vld [vmem:[#allocation2 + $0x68] sm:$0xff]  ;;  %v624_v25 = vadd.f32 %v1006_v19, %v604_v17  ;;  %v625_v26 = vadd.f32 %v1006_v19, %v605_v18  ;;  %v626_v27 = vadd.f32 %v1006_v19, %v606_v20  ;;  %v627_v28 = vadd.f32 %v1006_v19, %v607_v21  ;;  %v612_v34 = vld [vmem:[#allocation2 + $0x40] sm:$0xff]  ;;  %v614_v40 = vld [vmem:[#allocation2 + $0x10] sm:$0xff] }
 0x103   : > { %v610_v24 = vld [vmem:[#allocation2 + $0x8] sm:$0xff]  ;;  %v628_v30 = vadd.f32 %v1006_v19, %v608_v22  ;;  %v629_v31 = vadd.f32 %v1006_v19, %v609_v23  ;;  %v613_v35 = vld [vmem:[#allocation2 + $0x20] sm:$0xff]  ;;  %v617_v47 = vld [vmem:[#allocation2 + $0x70] sm:$0xff]  ;;  %v632_v50 = vadd.f32 %v1006_v19, %v612_v34  ;;  %v634_v56 = vadd.f32 %v1006_v19, %v614_v40 }
 0x104   : > { %v611_v29 = vld [vmem:[#allocation2 + $0x48] sm:$0xff]  ;;  %v630_v32 = vadd.f32 %v1006_v19, %v610_v24  ;;  %v640_v36 = vmax.f32 %v624_v25, 0.0  ;;  %v641_v37 = vmax.f32 %v625_v26, 0.0  ;;  %v642_v38 = vmax.f32 %v626_v27, 0.0  ;;  %v616_v46 = vld [vmem:[#allocation2 + $0x60] sm:$0xff]  ;;  %v618_v52 = vld [vmem:[#allocation2 + $0x78] sm:$0xff] }
 0x105   : > { %v631_v33 = vadd.f32 %v1006_v19, %v611_v29  ;;  %v643_v39 = vmax.f32 %v627_v28, 0.0  ;;  %v615_v41 = vld [vmem:[#allocation2 + $0x38] sm:$0xff]  ;;  %v644_v42 = vmax.f32 %v628_v30, 0.0  ;;  %v645_v43 = vmax.f32 %v629_v31, 0.0 }
 0x106   : > { %v646_v44 = vmax.f32 %v630_v32, 0.0  ;;  %v897_v48 = vpack.c.bf16 %v641_v37, %v640_v36  ;;  %v633_v51 = vadd.f32 %v1006_v19, %v613_v35  ;;  %v619_v53 = vld [vmem:[#allocation2 + $0x28] sm:$0xff]  ;;  %v635_v57 = vadd.f32 %v1006_v19, %v615_v41 }
 0x107   : > { %v647_v45 = vmax.f32 %v631_v33, 0.0  ;;  %v902_v49 = vpack.c.bf16 %v643_v39, %v642_v38  ;;  %v907_v54 = vpack.c.bf16 %v645_v43, %v644_v42  ;;  %v648_v58 = vmax.f32 %v632_v50, 0.0 }
 0x108   : > { %898 = vst [vmem:[%s1203_s3] sm:$0xff] %v897_v48   ;;  %v649_v59 = vmax.f32 %v633_v51, 0.0  ;;  %v636_v60 = vadd.f32 %v1006_v19, %v616_v46  ;;  %v637_v61 = vadd.f32 %v1006_v19, %v617_v47  ;;  %v650_v62 = vmax.f32 %v634_v56, 0.0 }
 0x109   : > { %v912_v55 = vpack.c.bf16 %v647_v45, %v646_v44  ;;  %934 = vst [vmem:[%s1203_s3 + $0x8] sm:$0xff] %v902_v49   ;;  %v651_v63 = vmax.f32 %v635_v57, 0.0  ;;  %v638_v0 = vadd.f32 %v1006_v19, %v618_v52  ;;  %v639_v1 = vadd.f32 %v1006_v19, %v619_v53 }
 0x10a   : > { %935 = vst [vmem:[%s1203_s3 + $0x10] sm:$0xff] %v907_v54   ;;  %v917_v2 = vpack.c.bf16 %v649_v59, %v648_v58  ;;  %v652_v3 = vmax.f32 %v636_v60, 0.0  ;;  %v653_v4 = vmax.f32 %v637_v61, 0.0 }
 0x10b   : > { %936 = vst [vmem:[%s1203_s3 + $0x18] sm:$0xff] %v912_v55   ;;  %v922_v5 = vpack.c.bf16 %v651_v63, %v650_v62  ;;  %v654_v6 = vmax.f32 %v638_v0, 0.0  ;;  %v655_v7 = vmax.f32 %v639_v1, 0.0 }
 0x10c   : > { %937 = vst [vmem:[%s1203_s3 + $0x20] sm:$0xff] %v917_v2   ;;  %v927_v8 = vpack.c.bf16 %v653_v4, %v652_v3 }
 0x10d   : > { %938 = vst [vmem:[%s1203_s3 + $0x28] sm:$0xff] %v922_v5   ;;  %v932_v9 = vpack.c.bf16 %v655_v7, %v654_v6 }
 0x10e   : > { %939 = vst [vmem:[%s1203_s3 + $0x30] sm:$0xff] %v927_v8  }
 0x10f   : > { %940 = vst [vmem:[%s1203_s3 + $0x38] sm:$0xff] %v932_v9  }
 0x110 PF: > { %s13_s16 = sadd.s32 1, %s1045_s16   ;;  %s1204_s12 = smov %s1033_s13 }
 0x111   : > { %p10_p12 = scmp.ge.s32.totalorder %s13_s16, 7   ;;  %s1205_s13 = smov %s1103_s20 }
 0x112   : > { %s1206_s14 = smov %s1041_s15  ;;  %s1207_s15 = smov %s1209_s17 }
 0x113   :  { %12 = sbr.rel (!%p10_p12) target bundleno = 3 (0x3), region = 122 }

// kernel: resnet_forward.44
= control target key start
LH: loop header
LB: loop body
LE: loop exit
PB: predicated region body
PF: predicated region fallthrough
CT: control target
= control target key end

     0   :  { %s876_s1 = inlined_call_operand.vmem [shape: bf16[128,256], index: 1, kind: input, shape index: {}]   ;;  %s877_s0 = inlined_call_operand.vmem [shape: bf16[128,128], index: 0, kind: input, shape index: {}]   ;;  %s878_s2 = inlined_call_operand.vmem [shape: f32[1,256], index: 2, kind: input, shape index: {}]   ;;  %s879_s3 = inlined_call_operand.vmem [shape: bf16[128,256], index: 3, kind: output, shape index: {}]  }
   0x1   :  { %v603_v0 = vld [vmem:[%s876_s1 + $0x70] sm:$0xf]  ;;  %v632_v1 = vld [vmem:[%s876_s1 + $0x74] sm:$0xf0]  ;;  %v631_v2 = vld [vmem:[%s876_s1 + $0x74] sm:$0xf] }
   0x2   :  { %v604_v3 = vor.u32 %v632_v1, %v603_v0  ;;  %v605_v4 = vld [vmem:[%s876_s1 + $0x78] sm:$0xf0]  ;;  %v595_v5 = vld [vmem:[%s876_s1 + $0x60] sm:$0xf]  ;;  %v630_v6 = vld [vmem:[%s876_s1 + $0x64] sm:$0xf0] }
   0x3   :  { %v608_v7 = vor.u32 %v631_v2, %v605_v4  ;;  %v629_v8 = vld [vmem:[%s876_s1 + $0x64] sm:$0xf]  ;;  %v597_v9 = vld [vmem:[%s876_s1 + $0x68] sm:$0xf0]  ;;  %v596_v10 = vor.u32 %v630_v6, %v595_v5  ;;  %v587_v12 = vld [vmem:[%s876_s1 + $0x50] sm:$0xf] }
   0x4   :  { %242 = vmatpush.bf16.msra.mxu0 %v604_v3  ;;  %633 = vmatpush.bf16.msra.mxu2 %v604_v3  ;;  %v600_v11 = vor.u32 %v629_v8, %v597_v9  ;;  %v628_v13 = vld [vmem:[%s876_s1 + $0x54] sm:$0xf0]  ;;  %v627_v14 = vld [vmem:[%s876_s1 + $0x54] sm:$0xf]  ;;  %v589_v15 = vld [vmem:[%s876_s1 + $0x58] sm:$0xf0] }
   0x5   :  { %291 = vmatpush.bf16.msra.mxu1 %v608_v7  ;;  %641 = vmatpush.bf16.msra.mxu3 %v608_v7  ;;  %v588_v16 = vor.u32 %v628_v13, %v587_v12  ;;  %v592_v17 = vor.u32 %v627_v14, %v589_v15  ;;  %v579_v18 = vld [vmem:[%s876_s1 + $0x40] sm:$0xf]  ;;  %v626_v19 = vld [vmem:[%s876_s1 + $0x44] sm:$0xf0]  ;;  %v625_v20 = vld [vmem:[%s876_s1 + $0x44] sm:$0xf] }
   0x6   :  { %v581_v21 = vld [vmem:[%s876_s1 + $0x48] sm:$0xf0]  ;;  %v580_v22 = vor.u32 %v626_v19, %v579_v18  ;;  %v571_v24 = vld [vmem:[%s876_s1 + $0x30] sm:$0xf]  ;;  %v624_v25 = vld [vmem:[%s876_s1 + $0x34] sm:$0xf0] }
   0x7   :  { %v584_v23 = vor.u32 %v625_v20, %v581_v21  ;;  %v623_v26 = vld [vmem:[%s876_s1 + $0x34] sm:$0xf]  ;;  %v573_v27 = vld [vmem:[%s876_s1 + $0x38] sm:$0xf0]  ;;  %v572_v28 = vor.u32 %v624_v25, %v571_v24  ;;  %v563_v30 = vld [vmem:[%s876_s1 + $0x20] sm:$0xf] }
   0x8   :  { %243 = vmatpush.bf16.msra.mxu0 %v596_v10  ;;  %634 = vmatpush.bf16.msra.mxu2 %v596_v10  ;;  %v576_v29 = vor.u32 %v623_v26, %v573_v27  ;;  %v622_v31 = vld [vmem:[%s876_s1 + $0x24] sm:$0xf0]  ;;  %v621_v32 = vld [vmem:[%s876_s1 + $0x24] sm:$0xf]  ;;  %v565_v33 = vld [vmem:[%s876_s1 + $0x28] sm:$0xf0] }
   0x9   :  { %292 = vmatpush.bf16.msra.mxu1 %v600_v11  ;;  %642 = vmatpush.bf16.msra.mxu3 %v600_v11  ;;  %v564_v34 = vor.u32 %v622_v31, %v563_v30  ;;  %v568_v35 = vor.u32 %v621_v32, %v565_v33  ;;  %v555_v36 = vld [vmem:[%s876_s1 + $0x10] sm:$0xf]  ;;  %v620_v37 = vld [vmem:[%s876_s1 + $0x14] sm:$0xf0]  ;;  %v619_v38 = vld [vmem:[%s876_s1 + $0x14] sm:$0xf] }
   0xa   :  { %v557_v39 = vld [vmem:[%s876_s1 + $0x18] sm:$0xf0]  ;;  %v556_v40 = vor.u32 %v620_v37, %v555_v36  ;;  %v547_v42 = vld [vmem:[%s876_s1] sm:$0xf]  ;;  %v618_v43 = vld [vmem:[%s876_s1 + $0x4] sm:$0xf0] }
   0xb   :  { %v560_v41 = vor.u32 %v619_v38, %v557_v39  ;;  %v617_v44 = vld [vmem:[%s876_s1 + $0x4] sm:$0xf]  ;;  %v549_v45 = vld [vmem:[%s876_s1 + $0x8] sm:$0xf0]  ;;  %v548_v46 = vor.u32 %v618_v43, %v547_v42  ;;  %v611_v52 = vld [vmem:[%s877_s0 + $0x10] sm:$0xff] }
   0xc   :  { %244 = vmatpush.bf16.msra.mxu0 %v588_v16  ;;  %635 = vmatpush.bf16.msra.mxu2 %v588_v16  ;;  %v552_v47 = vor.u32 %v617_v44, %v549_v45  ;;  %v609_v48 = vld [vmem:[%s877_s0] sm:$0xff]  ;;  %v610_v50 = vld [vmem:[%s877_s0 + $0x8] sm:$0xff]  ;;  %v615_v53 = vld [vmem:[%s877_s0 + $0x30] sm:$0xff] }
   0xd   :  { %293 = vmatpush.bf16.msra.mxu1 %v592_v17  ;;  %643 = vmatpush.bf16.msra.mxu3 %v592_v17  ;;  %v613_v49 = vld [vmem:[%s877_s0 + $0x20] sm:$0xff]  ;;  %v614_v51 = vld [vmem:[%s877_s0 + $0x28] sm:$0xff]  ;;  %v612_v54 = vld [vmem:[%s877_s0 + $0x18] sm:$0xff] }
   0xe   :  { %v616_v55 = vld [vmem:[%s877_s0 + $0x38] sm:$0xff]  ;;  %v439_v56 = vld [vmem:[%s878_s2] sm:$0x3] }
   0xf   :  { %v792_v57 = vperm.slane %v439_v56, 0  ;;  %v794_v58 = vperm.slane %v439_v56, 1 }
  0x10   :  { %245 = vmatpush.bf16.msra.mxu0 %v580_v22  ;;  %636 = vmatpush.bf16.msra.mxu2 %v580_v22 }
  0x11   :  { %294 = vmatpush.bf16.msra.mxu1 %v584_v23  ;;  %644 = vmatpush.bf16.msra.mxu3 %v584_v23 }
  0x14   :  { %246 = vmatpush.bf16.msra.mxu0 %v572_v28  ;;  %637 = vmatpush.bf16.msra.mxu2 %v572_v28 }
  0x15   :  { %295 = vmatpush.bf16.msra.mxu1 %v576_v29  ;;  %645 = vmatpush.bf16.msra.mxu3 %v576_v29 }
  0x18   :  { %247 = vmatpush.bf16.msra.mxu0 %v564_v34  ;;  %638 = vmatpush.bf16.msra.mxu2 %v564_v34 }
  0x19   :  { %296 = vmatpush.bf16.msra.mxu1 %v568_v35  ;;  %646 = vmatpush.bf16.msra.mxu3 %v568_v35 }
  0x1c   :  { %248 = vmatpush.bf16.msra.mxu0 %v556_v40  ;;  %639 = vmatpush.bf16.msra.mxu2 %v556_v40 }
  0x1d   :  { %297 = vmatpush.bf16.msra.mxu1 %v560_v41  ;;  %647 = vmatpush.bf16.msra.mxu3 %v560_v41 }
  0x20   :  { %249 = vmatpush.bf16.msra.mxu0 %v548_v46  ;;  %640 = vmatpush.bf16.msra.mxu2 %v548_v46 }
  0x21   :  { %298 = vmatpush.bf16.msra.mxu1 %v552_v47  ;;  %648 = vmatpush.bf16.msra.mxu3 %v552_v47 }
  0x23   :  { %250 = vmatmul.bf16.vlgmr.msra.gmra.mxu0 %v609_v48  ;;  %270 = vmatmul.bf16.vlgmr.msra.gmra.mxu2 %v613_v49 }
  0x24   :  { %299 = vmatmul.bf16.vlgmr.msra.gmra.mxu1 %v609_v48  ;;  %319 = vmatmul.bf16.vlgmr.msra.gmra.mxu3 %v613_v49 }
  0x33   :  { %255 = vmatmul.bf16.gmra.mxu0 %v610_v50  ;;  %275 = vmatmul.bf16.gmra.mxu2 %v614_v51 }
  0x34   :  { %304 = vmatmul.bf16.gmra.mxu1 %v610_v50  ;;  %324 = vmatmul.bf16.gmra.mxu3 %v614_v51 }
  0x43   :  { %260 = vmatmul.bf16.gmra.mxu0 %v611_v52  ;;  %280 = vmatmul.bf16.gmra.mxu2 %v615_v53 }
  0x44   :  { %309 = vmatmul.bf16.gmra.mxu1 %v611_v52  ;;  %329 = vmatmul.bf16.gmra.mxu3 %v615_v53 }
  0x53   :  { %265 = vmatmul.bf16.gmra.mxu0 %v612_v54  ;;  %285 = vmatmul.bf16.gmra.mxu2 %v616_v55 }
  0x54   :  { %314 = vmatmul.bf16.gmra.mxu1 %v612_v54  ;;  %334 = vmatmul.bf16.gmra.mxu3 %v616_v55 }
  0xa0   :  { %v251_v59 = vpop.f32.mrf.mxu0 }
  0xa1   :  { %v445_v60 = vadd.f32 %v792_v57, %v251_v59  ;;  %v300_v61 = vpop.f32.mrf.mxu1 }
  0xa2   :  { %v446_v62 = vadd.f32 %v794_v58, %v300_v61 }
  0xa4   :  { %v477_v63 = vpack.c.bf16 %v446_v62, %v445_v60 }
  0xa6   :  { %493 = vst [vmem:[%s879_s3] sm:$0xff] %v477_v63  ;;  %v271_v0 = vpop.f32.mrf.mxu2 }
  0xa7   :  { %v461_v1 = vadd.f32 %v792_v57, %v271_v0  ;;  %v320_v2 = vpop.f32.mrf.mxu3 }
  0xa8   :  { %v462_v3 = vadd.f32 %v794_v58, %v320_v2  ;;  %v253_v4 = vpop.f32.mrf.mxu0 }
  0xa9   :  { %v447_v5 = vadd.f32 %v792_v57, %v253_v4  ;;  %v302_v6 = vpop.f32.mrf.mxu1 }
  0xaa   :  { %v485_v7 = vpack.c.bf16 %v462_v3, %v461_v1  ;;  %v448_v8 = vadd.f32 %v794_v58, %v302_v6 }
  0xac   :  { %501 = vst [vmem:[%s879_s3 + $0x40] sm:$0xff] %v485_v7  ;;  %v478_v9 = vpack.c.bf16 %v448_v8, %v447_v5 }
  0xae   :  { %494 = vst [vmem:[%s879_s3 + $0x8] sm:$0xff] %v478_v9  ;;  %v273_v10 = vpop.f32.mrf.mxu2 }
  0xaf   :  { %v463_v11 = vadd.f32 %v792_v57, %v273_v10  ;;  %v322_v12 = vpop.f32.mrf.mxu3 }
  0xb0   :  { %v464_v13 = vadd.f32 %v794_v58, %v322_v12  ;;  %v256_v14 = vpop.f32.mrf.mxu0 }
  0xb1   :  { %v449_v15 = vadd.f32 %v792_v57, %v256_v14  ;;  %v305_v16 = vpop.f32.mrf.mxu1 }
  0xb2   :  { %v486_v17 = vpack.c.bf16 %v464_v13, %v463_v11  ;;  %v450_v18 = vadd.f32 %v794_v58, %v305_v16 }
  0xb4   :  { %502 = vst [vmem:[%s879_s3 + $0x48] sm:$0xff] %v486_v17  ;;  %v479_v19 = vpack.c.bf16 %v450_v18, %v449_v15 }
  0xb6   :  { %495 = vst [vmem:[%s879_s3 + $0x10] sm:$0xff] %v479_v19  ;;  %v276_v20 = vpop.f32.mrf.mxu2 }
  0xb7   :  { %v465_v21 = vadd.f32 %v792_v57, %v276_v20  ;;  %v325_v22 = vpop.f32.mrf.mxu3 }
  0xb8   :  { %v466_v23 = vadd.f32 %v794_v58, %v325_v22  ;;  %v258_v24 = vpop.f32.mrf.mxu0 }
  0xb9   :  { %v451_v25 = vadd.f32 %v792_v57, %v258_v24  ;;  %v307_v26 = vpop.f32.mrf.mxu1 }
  0xba   :  { %v487_v27 = vpack.c.bf16 %v466_v23, %v465_v21  ;;  %v452_v28 = vadd.f32 %v794_v58, %v307_v26 }
  0xbc   :  { %503 = vst [vmem:[%s879_s3 + $0x50] sm:$0xff] %v487_v27  ;;  %v480_v29 = vpack.c.bf16 %v452_v28, %v451_v25 }
  0xbe   :  { %496 = vst [vmem:[%s879_s3 + $0x18] sm:$0xff] %v480_v29  ;;  %v278_v30 = vpop.f32.mrf.mxu2 }
  0xbf   :  { %v467_v31 = vadd.f32 %v792_v57, %v278_v30  ;;  %v327_v32 = vpop.f32.mrf.mxu3 }
  0xc0   :  { %v468_v33 = vadd.f32 %v794_v58, %v327_v32  ;;  %v261_v34 = vpop.f32.mrf.mxu0 }
  0xc1   :  { %v453_v35 = vadd.f32 %v792_v57, %v261_v34  ;;  %v310_v36 = vpop.f32.mrf.mxu1 }
  0xc2   :  { %v488_v37 = vpack.c.bf16 %v468_v33, %v467_v31  ;;  %v454_v38 = vadd.f32 %v794_v58, %v310_v36 }
  0xc4   :  { %504 = vst [vmem:[%s879_s3 + $0x58] sm:$0xff] %v488_v37  ;;  %v481_v39 = vpack.c.bf16 %v454_v38, %v453_v35 }
  0xc6   :  { %497 = vst [vmem:[%s879_s3 + $0x20] sm:$0xff] %v481_v39  ;;  %v281_v40 = vpop.f32.mrf.mxu2 }
  0xc7   :  { %v469_v41 = vadd.f32 %v792_v57, %v281_v40  ;;  %v330_v42 = vpop.f32.mrf.mxu3 }
  0xc8   :  { %v470_v43 = vadd.f32 %v794_v58, %v330_v42  ;;  %v263_v44 = vpop.f32.mrf.mxu0 }
  0xc9   :  { %v455_v45 = vadd.f32 %v792_v57, %v263_v44  ;;  %v312_v46 = vpop.f32.mrf.mxu1 }
  0xca   :  { %v489_v47 = vpack.c.bf16 %v470_v43, %v469_v41  ;;  %v456_v48 = vadd.f32 %v794_v58, %v312_v46 }
  0xcc   :  { %505 = vst [vmem:[%s879_s3 + $0x60] sm:$0xff] %v489_v47  ;;  %v482_v49 = vpack.c.bf16 %v456_v48, %v455_v45 }
  0xce   :  { %498 = vst [vmem:[%s879_s3 + $0x28] sm:$0xff] %v482_v49  ;;  %v283_v50 = vpop.f32.mrf.mxu2 }
  0xcf   :  { %v471_v51 = vadd.f32 %v792_v57, %v283_v50  ;;  %v332_v52 = vpop.f32.mrf.mxu3 }
  0xd0   :  { %v472_v53 = vadd.f32 %v794_v58, %v332_v52  ;;  %v266_v54 = vpop.f32.mrf.mxu0 }
  0xd1   :  { %v457_v55 = vadd.f32 %v792_v57, %v266_v54  ;;  %v315_v56 = vpop.f32.mrf.mxu1 }
  0xd2   :  { %v490_v59 = vpack.c.bf16 %v472_v53, %v471_v51  ;;  %v458_v60 = vadd.f32 %v794_v58, %v315_v56 }
  0xd4   :  { %506 = vst [vmem:[%s879_s3 + $0x68] sm:$0xff] %v490_v59  ;;  %v483_v61 = vpack.c.bf16 %v458_v60, %v457_v55 }
  0xd6   :  { %499 = vst [vmem:[%s879_s3 + $0x30] sm:$0xff] %v483_v61  ;;  %v286_v62 = vpop.f32.mrf.mxu2 }
  0xd7   :  { %v473_v63 = vadd.f32 %v792_v57, %v286_v62  ;;  %v335_v0 = vpop.f32.mrf.mxu3 }
  0xd8   :  { %v474_v1 = vadd.f32 %v794_v58, %v335_v0  ;;  %v268_v2 = vpop.f32.mrf.mxu0 }
  0xd9   :  { %v459_v3 = vadd.f32 %v792_v57, %v268_v2  ;;  %v317_v4 = vpop.f32.mrf.mxu1 }
  0xda   :  { %v491_v5 = vpack.c.bf16 %v474_v1, %v473_v63  ;;  %v460_v6 = vadd.f32 %v794_v58, %v317_v4 }
  0xdc   :  { %507 = vst [vmem:[%s879_s3 + $0x70] sm:$0xff] %v491_v5  ;;  %v484_v7 = vpack.c.bf16 %v460_v6, %v459_v3 }
  0xde   :  { %500 = vst [vmem:[%s879_s3 + $0x38] sm:$0xff] %v484_v7  ;;  %v288_v8 = vpop.f32.mrf.mxu2 }
  0xdf   :  { %v475_v9 = vadd.f32 %v792_v57, %v288_v8  ;;  %v337_v10 = vpop.f32.mrf.mxu3 }
  0xe0   :  { %v476_v11 = vadd.f32 %v794_v58, %v337_v10 }
  0xe2   :  { %v492_v12 = vpack.c.bf16 %v476_v11, %v475_v9 }
  0xe4   :  { %508 = vst [vmem:[%s879_s3 + $0x78] sm:$0xff] %v492_v12 }

// kernel: resnet_forward.47
= control target key start
LH: loop header
LB: loop body
LE: loop exit
PB: predicated region body
PF: predicated region fallthrough
CT: control target
= control target key end

     0   :  { %s1044_s1 = inlined_call_operand.vmem [shape: bf16[128,256], index: 1, kind: input, shape index: {}]   ;;  %s1045_s0 = inlined_call_operand.vmem [shape: bf16[128,128], index: 0, kind: input, shape index: {}]   ;;  %s1046_s2 = inlined_call_operand.vmem [shape: f32[1,256], index: 2, kind: input, shape index: {}]   ;;  %s1047_s3 = inlined_call_operand.vmem [shape: bf16[128,256], index: 3, kind: input, shape index: {}]   ;;  %s1048_s4 = inlined_call_operand.vmem [shape: bf16[128,256], index: 4, kind: output, shape index: {}]  }
   0x1   :  { %v718_v0 = vld [vmem:[%s1044_s1 + $0x70] sm:$0xf]  ;;  %v747_v1 = vld [vmem:[%s1044_s1 + $0x74] sm:$0xf0]  ;;  %v746_v2 = vld [vmem:[%s1044_s1 + $0x74] sm:$0xf] }
   0x2   :  { %v719_v3 = vor.u32 %v747_v1, %v718_v0  ;;  %v720_v4 = vld [vmem:[%s1044_s1 + $0x78] sm:$0xf0]  ;;  %v710_v5 = vld [vmem:[%s1044_s1 + $0x60] sm:$0xf]  ;;  %v745_v6 = vld [vmem:[%s1044_s1 + $0x64] sm:$0xf0] }
   0x3   :  { %v723_v7 = vor.u32 %v746_v2, %v720_v4  ;;  %v744_v8 = vld [vmem:[%s1044_s1 + $0x64] sm:$0xf]  ;;  %v712_v9 = vld [vmem:[%s1044_s1 + $0x68] sm:$0xf0]  ;;  %v711_v10 = vor.u32 %v745_v6, %v710_v5  ;;  %v702_v12 = vld [vmem:[%s1044_s1 + $0x50] sm:$0xf] }
   0x4   :  { %245 = vmatpush.bf16.msra.mxu0 %v719_v3  ;;  %748 = vmatpush.bf16.msra.mxu2 %v719_v3  ;;  %v715_v11 = vor.u32 %v744_v8, %v712_v9  ;;  %v743_v13 = vld [vmem:[%s1044_s1 + $0x54] sm:$0xf0]  ;;  %v742_v14 = vld [vmem:[%s1044_s1 + $0x54] sm:$0xf]  ;;  %v704_v15 = vld [vmem:[%s1044_s1 + $0x58] sm:$0xf0] }
   0x5   :  { %294 = vmatpush.bf16.msra.mxu1 %v723_v7  ;;  %756 = vmatpush.bf16.msra.mxu3 %v723_v7  ;;  %v703_v16 = vor.u32 %v743_v13, %v702_v12  ;;  %v707_v17 = vor.u32 %v742_v14, %v704_v15  ;;  %v694_v18 = vld [vmem:[%s1044_s1 + $0x40] sm:$0xf]  ;;  %v741_v19 = vld [vmem:[%s1044_s1 + $0x44] sm:$0xf0]  ;;  %v740_v20 = vld [vmem:[%s1044_s1 + $0x44] sm:$0xf] }
   0x6   :  { %v696_v21 = vld [vmem:[%s1044_s1 + $0x48] sm:$0xf0]  ;;  %v695_v22 = vor.u32 %v741_v19, %v694_v18  ;;  %v686_v24 = vld [vmem:[%s1044_s1 + $0x30] sm:$0xf]  ;;  %v739_v25 = vld [vmem:[%s1044_s1 + $0x34] sm:$0xf0] }
   0x7   :  { %v699_v23 = vor.u32 %v740_v20, %v696_v21  ;;  %v738_v26 = vld [vmem:[%s1044_s1 + $0x34] sm:$0xf]  ;;  %v688_v27 = vld [vmem:[%s1044_s1 + $0x38] sm:$0xf0]  ;;  %v687_v28 = vor.u32 %v739_v25, %v686_v24  ;;  %v678_v30 = vld [vmem:[%s1044_s1 + $0x20] sm:$0xf] }
   0x8   :  { %246 = vmatpush.bf16.msra.mxu0 %v711_v10  ;;  %749 = vmatpush.bf16.msra.mxu2 %v711_v10  ;;  %v691_v29 = vor.u32 %v738_v26, %v688_v27  ;;  %v737_v31 = vld [vmem:[%s1044_s1 + $0x24] sm:$0xf0]  ;;  %v736_v32 = vld [vmem:[%s1044_s1 + $0x24] sm:$0xf]  ;;  %v680_v33 = vld [vmem:[%s1044_s1 + $0x28] sm:$0xf0] }
   0x9   :  { %295 = vmatpush.bf16.msra.mxu1 %v715_v11  ;;  %757 = vmatpush.bf16.msra.mxu3 %v715_v11  ;;  %v679_v34 = vor.u32 %v737_v31, %v678_v30  ;;  %v683_v35 = vor.u32 %v736_v32, %v680_v33  ;;  %v670_v36 = vld [vmem:[%s1044_s1 + $0x10] sm:$0xf]  ;;  %v735_v37 = vld [vmem:[%s1044_s1 + $0x14] sm:$0xf0]  ;;  %v734_v38 = vld [vmem:[%s1044_s1 + $0x14] sm:$0xf] }
   0xa   :  { %v672_v39 = vld [vmem:[%s1044_s1 + $0x18] sm:$0xf0]  ;;  %v671_v40 = vor.u32 %v735_v37, %v670_v36  ;;  %v662_v42 = vld [vmem:[%s1044_s1] sm:$0xf]  ;;  %v733_v43 = vld [vmem:[%s1044_s1 + $0x4] sm:$0xf0] }
   0xb   :  { %v675_v41 = vor.u32 %v734_v38, %v672_v39  ;;  %v732_v44 = vld [vmem:[%s1044_s1 + $0x4] sm:$0xf]  ;;  %v664_v45 = vld [vmem:[%s1044_s1 + $0x8] sm:$0xf0]  ;;  %v663_v46 = vor.u32 %v733_v43, %v662_v42  ;;  %v726_v52 = vld [vmem:[%s1045_s0 + $0x10] sm:$0xff] }
   0xc   :  { %247 = vmatpush.bf16.msra.mxu0 %v703_v16  ;;  %750 = vmatpush.bf16.msra.mxu2 %v703_v16  ;;  %v667_v47 = vor.u32 %v732_v44, %v664_v45  ;;  %v724_v48 = vld [vmem:[%s1045_s0] sm:$0xff]  ;;  %v725_v50 = vld [vmem:[%s1045_s0 + $0x8] sm:$0xff]  ;;  %v730_v53 = vld [vmem:[%s1045_s0 + $0x30] sm:$0xff] }
   0xd   :  { %296 = vmatpush.bf16.msra.mxu1 %v707_v17  ;;  %758 = vmatpush.bf16.msra.mxu3 %v707_v17  ;;  %v728_v49 = vld [vmem:[%s1045_s0 + $0x20] sm:$0xff]  ;;  %v729_v51 = vld [vmem:[%s1045_s0 + $0x28] sm:$0xff]  ;;  %v727_v54 = vld [vmem:[%s1045_s0 + $0x18] sm:$0xff] }
   0xe   :  { %v731_v55 = vld [vmem:[%s1045_s0 + $0x38] sm:$0xff]  ;;  %v442_v56 = vld [vmem:[%s1046_s2] sm:$0x3]  ;;  %v481_v5 = vld [vmem:[%s1047_s3 + $0x8] sm:$0xff] }
   0xf   :  { %v480_v57 = vld [vmem:[%s1047_s3] sm:$0xff]  ;;  %v915_v58 = vperm.slane %v442_v56, 0  ;;  %v917_v59 = vperm.slane %v442_v56, 1  ;;  %v498_v13 = vunpack.c.l.bf16 %v481_v5  ;;  %v499_v17 = vunpack.c.h.bf16 %v481_v5 }
  0x10   :  { %248 = vmatpush.bf16.msra.mxu0 %v695_v22  ;;  %751 = vmatpush.bf16.msra.mxu2 %v695_v22  ;;  %v496_v60 = vunpack.c.l.bf16 %v480_v57  ;;  %v497_v62 = vunpack.c.h.bf16 %v480_v57  ;;  %v488_v2 = vld [vmem:[%s1047_s3 + $0x40] sm:$0xff] }
  0x11   :  { %297 = vmatpush.bf16.msra.mxu1 %v699_v23  ;;  %759 = vmatpush.bf16.msra.mxu3 %v699_v23  ;;  %v512_v7 = vunpack.c.l.bf16 %v488_v2  ;;  %v513_v10 = vunpack.c.h.bf16 %v488_v2  ;;  %v489_v23 = vld [vmem:[%s1047_s3 + $0x48] sm:$0xff] }
  0x12   :  { %v514_v30 = vunpack.c.l.bf16 %v489_v23 }
  0x14   :  { %249 = vmatpush.bf16.msra.mxu0 %v687_v28  ;;  %752 = vmatpush.bf16.msra.mxu2 %v687_v28  ;;  %v482_v28 = vld [vmem:[%s1047_s3 + $0x10] sm:$0xff] }
  0x15   :  { %298 = vmatpush.bf16.msra.mxu1 %v691_v29  ;;  %760 = vmatpush.bf16.msra.mxu3 %v691_v29  ;;  %v500_v37 = vunpack.c.l.bf16 %v482_v28 }
  0x18   :  { %250 = vmatpush.bf16.msra.mxu0 %v679_v34  ;;  %753 = vmatpush.bf16.msra.mxu2 %v679_v34  ;;  %v515_v34 = vunpack.c.h.bf16 %v489_v23 }
  0x19   :  { %299 = vmatpush.bf16.msra.mxu1 %v683_v35  ;;  %761 = vmatpush.bf16.msra.mxu3 %v683_v35 }
  0x1c   :  { %251 = vmatpush.bf16.msra.mxu0 %v671_v40  ;;  %754 = vmatpush.bf16.msra.mxu2 %v671_v40 }
  0x1d   :  { %300 = vmatpush.bf16.msra.mxu1 %v675_v41  ;;  %762 = vmatpush.bf16.msra.mxu3 %v675_v41  ;;  %v501_v41 = vunpack.c.h.bf16 %v482_v28 }
  0x20   :  { %252 = vmatpush.bf16.msra.mxu0 %v663_v46  ;;  %755 = vmatpush.bf16.msra.mxu2 %v663_v46 }
  0x21   :  { %301 = vmatpush.bf16.msra.mxu1 %v667_v47  ;;  %763 = vmatpush.bf16.msra.mxu3 %v667_v47  ;;  %v490_v47 = vld [vmem:[%s1047_s3 + $0x50] sm:$0xff] }
  0x23   :  { %253 = vmatmul.bf16.vlgmr.msra.gmra.mxu0 %v724_v48  ;;  %273 = vmatmul.bf16.vlgmr.msra.gmra.mxu2 %v728_v49 }
  0x24   :  { %302 = vmatmul.bf16.vlgmr.msra.gmra.mxu1 %v724_v48  ;;  %322 = vmatmul.bf16.vlgmr.msra.gmra.mxu3 %v728_v49 }
  0x33   :  { %258 = vmatmul.bf16.gmra.mxu0 %v725_v50  ;;  %278 = vmatmul.bf16.gmra.mxu2 %v729_v51 }
  0x34   :  { %307 = vmatmul.bf16.gmra.mxu1 %v725_v50  ;;  %327 = vmatmul.bf16.gmra.mxu3 %v729_v51 }
  0x43   :  { %263 = vmatmul.bf16.gmra.mxu0 %v726_v52  ;;  %283 = vmatmul.bf16.gmra.mxu2 %v730_v53 }
  0x44   :  { %312 = vmatmul.bf16.gmra.mxu1 %v726_v52  ;;  %332 = vmatmul.bf16.gmra.mxu3 %v730_v53  ;;  %v483_v52 = vld [vmem:[%s1047_s3 + $0x18] sm:$0xff] }
  0x53   :  { %268 = vmatmul.bf16.gmra.mxu0 %v727_v54  ;;  %288 = vmatmul.bf16.gmra.mxu2 %v731_v55 }
  0x54   :  { %317 = vmatmul.bf16.gmra.mxu1 %v727_v54  ;;  %337 = vmatmul.bf16.gmra.mxu3 %v731_v55  ;;  %v516_v54 = vunpack.c.l.bf16 %v490_v47 }
  0xa0   :  { %v254_v61 = vpop.f32.mrf.mxu0 }
  0xa1   :  { %v448_v63 = vadd.f32 %v915_v58, %v254_v61  ;;  %v303_v0 = vpop.f32.mrf.mxu1 }
  0xa2   :  { %v449_v1 = vadd.f32 %v917_v59, %v303_v0 }
  0xa3   :  { %v528_v3 = vadd.f32 %v496_v60, %v448_v63  ;;  %v517_v60 = vunpack.c.h.bf16 %v490_v47  ;;  %v502_v63 = vunpack.c.l.bf16 %v483_v52 }
  0xa4   :  { %v529_v4 = vadd.f32 %v497_v62, %v449_v1 }
  0xa5   :  { %v560_v6 = vmax.f32 %v528_v3, 0.0  ;;  %v503_v3 = vunpack.c.h.bf16 %v483_v52 }
  0xa6   :  { %v561_v8 = vmax.f32 %v529_v4, 0.0  ;;  %v274_v9 = vpop.f32.mrf.mxu2 }
  0xa7   :  { %v464_v11 = vadd.f32 %v915_v58, %v274_v9  ;;  %v323_v12 = vpop.f32.mrf.mxu3  ;;  %v491_v9 = vld [vmem:[%s1047_s3 + $0x58] sm:$0xff] }
  0xa8   :  { %v592_v14 = vpack.c.bf16 %v561_v8, %v560_v6  ;;  %v465_v15 = vadd.f32 %v917_v59, %v323_v12  ;;  %v256_v16 = vpop.f32.mrf.mxu0 }
  0xa9   :  { %v544_v18 = vadd.f32 %v512_v7, %v464_v11  ;;  %v450_v19 = vadd.f32 %v915_v58, %v256_v16  ;;  %v305_v20 = vpop.f32.mrf.mxu1  ;;  %v518_v16 = vunpack.c.l.bf16 %v491_v9 }
  0xaa   :  { %608 = vst [vmem:[%s1048_s4] sm:$0xff] %v592_v14  ;;  %v545_v21 = vadd.f32 %v513_v10, %v465_v15  ;;  %v451_v22 = vadd.f32 %v917_v59, %v305_v20  ;;  %v484_v14 = vld [vmem:[%s1047_s3 + $0x20] sm:$0xff]  ;;  %v519_v20 = vunpack.c.h.bf16 %v491_v9 }
  0xab   :  { %v576_v24 = vmax.f32 %v544_v18, 0.0  ;;  %v530_v25 = vadd.f32 %v498_v13, %v450_v19  ;;  %v504_v23 = vunpack.c.l.bf16 %v484_v14 }
  0xac   :  { %v577_v26 = vmax.f32 %v545_v21, 0.0  ;;  %v531_v27 = vadd.f32 %v499_v17, %v451_v22 }
  0xad   :  { %v562_v29 = vmax.f32 %v530_v25, 0.0 }
  0xae   :  { %v600_v31 = vpack.c.bf16 %v577_v26, %v576_v24  ;;  %v563_v32 = vmax.f32 %v531_v27, 0.0  ;;  %v276_v33 = vpop.f32.mrf.mxu2  ;;  %v505_v27 = vunpack.c.h.bf16 %v484_v14 }
  0xaf   :  { %v466_v35 = vadd.f32 %v915_v58, %v276_v33  ;;  %v325_v36 = vpop.f32.mrf.mxu3  ;;  %v492_v33 = vld [vmem:[%s1047_s3 + $0x60] sm:$0xff] }
  0xb0   :  { %616 = vst [vmem:[%s1048_s4 + $0x40] sm:$0xff] %v600_v31  ;;  %v593_v38 = vpack.c.bf16 %v563_v32, %v562_v29  ;;  %v467_v39 = vadd.f32 %v917_v59, %v325_v36  ;;  %v259_v40 = vpop.f32.mrf.mxu0 }
  0xb1   :  { %v546_v42 = vadd.f32 %v514_v30, %v466_v35  ;;  %v452_v43 = vadd.f32 %v915_v58, %v259_v40  ;;  %v308_v44 = vpop.f32.mrf.mxu1  ;;  %v520_v40 = vunpack.c.l.bf16 %v492_v33 }
  0xb2   :  { %609 = vst [vmem:[%s1048_s4 + $0x8] sm:$0xff] %v593_v38  ;;  %v547_v45 = vadd.f32 %v515_v34, %v467_v39  ;;  %v453_v46 = vadd.f32 %v917_v59, %v308_v44  ;;  %v485_v38 = vld [vmem:[%s1047_s3 + $0x28] sm:$0xff]  ;;  %v521_v44 = vunpack.c.h.bf16 %v492_v33 }
  0xb3   :  { %v578_v48 = vmax.f32 %v546_v42, 0.0  ;;  %v532_v49 = vadd.f32 %v500_v37, %v452_v43  ;;  %v506_v47 = vunpack.c.l.bf16 %v485_v38 }
  0xb4   :  { %v579_v50 = vmax.f32 %v547_v45, 0.0  ;;  %v533_v51 = vadd.f32 %v501_v41, %v453_v46 }
  0xb5   :  { %v564_v53 = vmax.f32 %v532_v49, 0.0 }
  0xb6   :  { %v601_v55 = vpack.c.bf16 %v579_v50, %v578_v48  ;;  %v565_v56 = vmax.f32 %v533_v51, 0.0  ;;  %v279_v57 = vpop.f32.mrf.mxu2  ;;  %v507_v51 = vunpack.c.h.bf16 %v485_v38 }
  0xb7   :  { %v468_v61 = vadd.f32 %v915_v58, %v279_v57  ;;  %v328_v62 = vpop.f32.mrf.mxu3  ;;  %v493_v57 = vld [vmem:[%s1047_s3 + $0x68] sm:$0xff] }
  0xb8   :  { %617 = vst [vmem:[%s1048_s4 + $0x48] sm:$0xff] %v601_v55  ;;  %v594_v0 = vpack.c.bf16 %v565_v56, %v564_v53  ;;  %v469_v1 = vadd.f32 %v917_v59, %v328_v62  ;;  %v261_v2 = vpop.f32.mrf.mxu0 }
  0xb9   :  { %v548_v4 = vadd.f32 %v516_v54, %v468_v61  ;;  %v454_v5 = vadd.f32 %v915_v58, %v261_v2  ;;  %v310_v6 = vpop.f32.mrf.mxu1  ;;  %v522_v2 = vunpack.c.l.bf16 %v493_v57 }
  0xba   :  { %610 = vst [vmem:[%s1048_s4 + $0x10] sm:$0xff] %v594_v0  ;;  %v549_v7 = vadd.f32 %v517_v60, %v469_v1  ;;  %v455_v8 = vadd.f32 %v917_v59, %v310_v6  ;;  %v486_v0 = vld [vmem:[%s1047_s3 + $0x30] sm:$0xff]  ;;  %v523_v6 = vunpack.c.h.bf16 %v493_v57 }
  0xbb   :  { %v580_v10 = vmax.f32 %v548_v4, 0.0  ;;  %v534_v11 = vadd.f32 %v502_v63, %v454_v5  ;;  %v508_v9 = vunpack.c.l.bf16 %v486_v0 }
  0xbc   :  { %v581_v12 = vmax.f32 %v549_v7, 0.0  ;;  %v535_v13 = vadd.f32 %v503_v3, %v455_v8 }
  0xbd   :  { %v566_v15 = vmax.f32 %v534_v11, 0.0 }
  0xbe   :  { %v602_v17 = vpack.c.bf16 %v581_v12, %v580_v10  ;;  %v567_v18 = vmax.f32 %v535_v13, 0.0  ;;  %v281_v19 = vpop.f32.mrf.mxu2  ;;  %v509_v13 = vunpack.c.h.bf16 %v486_v0 }
  0xbf   :  { %v470_v21 = vadd.f32 %v915_v58, %v281_v19  ;;  %v330_v22 = vpop.f32.mrf.mxu3  ;;  %v494_v19 = vld [vmem:[%s1047_s3 + $0x70] sm:$0xff] }
  0xc0   :  { %618 = vst [vmem:[%s1048_s4 + $0x50] sm:$0xff] %v602_v17  ;;  %v595_v24 = vpack.c.bf16 %v567_v18, %v566_v15  ;;  %v471_v25 = vadd.f32 %v917_v59, %v330_v22  ;;  %v264_v26 = vpop.f32.mrf.mxu0 }
  0xc1   :  { %v550_v28 = vadd.f32 %v518_v16, %v470_v21  ;;  %v456_v29 = vadd.f32 %v915_v58, %v264_v26  ;;  %v313_v30 = vpop.f32.mrf.mxu1  ;;  %v524_v26 = vunpack.c.l.bf16 %v494_v19 }
  0xc2   :  { %611 = vst [vmem:[%s1048_s4 + $0x18] sm:$0xff] %v595_v24  ;;  %v551_v31 = vadd.f32 %v519_v20, %v471_v25  ;;  %v457_v32 = vadd.f32 %v917_v59, %v313_v30  ;;  %v487_v24 = vld [vmem:[%s1047_s3 + $0x38] sm:$0xff]  ;;  %v525_v30 = vunpack.c.h.bf16 %v494_v19 }
  0xc3   :  { %v582_v34 = vmax.f32 %v550_v28, 0.0  ;;  %v536_v35 = vadd.f32 %v504_v23, %v456_v29  ;;  %v510_v33 = vunpack.c.l.bf16 %v487_v24 }
  0xc4   :  { %v583_v36 = vmax.f32 %v551_v31, 0.0  ;;  %v537_v37 = vadd.f32 %v505_v27, %v457_v32 }
  0xc5   :  { %v568_v39 = vmax.f32 %v536_v35, 0.0 }
  0xc6   :  { %v603_v41 = vpack.c.bf16 %v583_v36, %v582_v34  ;;  %v569_v42 = vmax.f32 %v537_v37, 0.0  ;;  %v284_v43 = vpop.f32.mrf.mxu2  ;;  %v511_v37 = vunpack.c.h.bf16 %v487_v24 }
  0xc7   :  { %v472_v45 = vadd.f32 %v915_v58, %v284_v43  ;;  %v333_v46 = vpop.f32.mrf.mxu3  ;;  %v495_v43 = vld [vmem:[%s1047_s3 + $0x78] sm:$0xff] }
  0xc8   :  { %619 = vst [vmem:[%s1048_s4 + $0x58] sm:$0xff] %v603_v41  ;;  %v596_v48 = vpack.c.bf16 %v569_v42, %v568_v39  ;;  %v473_v49 = vadd.f32 %v917_v59, %v333_v46  ;;  %v266_v50 = vpop.f32.mrf.mxu0 }
  0xc9   :  { %v552_v52 = vadd.f32 %v520_v40, %v472_v45  ;;  %v458_v53 = vadd.f32 %v915_v58, %v266_v50  ;;  %v315_v54 = vpop.f32.mrf.mxu1 }
  0xca   :  { %612 = vst [vmem:[%s1048_s4 + $0x20] sm:$0xff] %v596_v48  ;;  %v553_v55 = vadd.f32 %v521_v44, %v473_v49  ;;  %v459_v56 = vadd.f32 %v917_v59, %v315_v54  ;;  %v526_v49 = vunpack.c.l.bf16 %v495_v43 }
  0xcb   :  { %v584_v60 = vmax.f32 %v552_v52, 0.0  ;;  %v538_v61 = vadd.f32 %v506_v47, %v458_v53  ;;  %v527_v53 = vunpack.c.h.bf16 %v495_v43 }
  0xcc   :  { %v585_v62 = vmax.f32 %v553_v55, 0.0  ;;  %v539_v63 = vadd.f32 %v507_v51, %v459_v56 }
  0xcd   :  { %v570_v1 = vmax.f32 %v538_v61, 0.0 }
  0xce   :  { %v604_v3 = vpack.c.bf16 %v585_v62, %v584_v60  ;;  %v571_v4 = vmax.f32 %v539_v63, 0.0  ;;  %v286_v5 = vpop.f32.mrf.mxu2 }
  0xcf   :  { %v474_v7 = vadd.f32 %v915_v58, %v286_v5  ;;  %v335_v8 = vpop.f32.mrf.mxu3 }
  0xd0   :  { %620 = vst [vmem:[%s1048_s4 + $0x60] sm:$0xff] %v604_v3  ;;  %v597_v10 = vpack.c.bf16 %v571_v4, %v570_v1  ;;  %v475_v11 = vadd.f32 %v917_v59, %v335_v8  ;;  %v269_v12 = vpop.f32.mrf.mxu0 }
  0xd1   :  { %v554_v14 = vadd.f32 %v522_v2, %v474_v7  ;;  %v460_v15 = vadd.f32 %v915_v58, %v269_v12  ;;  %v318_v16 = vpop.f32.mrf.mxu1 }
  0xd2   :  { %613 = vst [vmem:[%s1048_s4 + $0x28] sm:$0xff] %v597_v10  ;;  %v555_v17 = vadd.f32 %v523_v6, %v475_v11  ;;  %v461_v18 = vadd.f32 %v917_v59, %v318_v16 }
  0xd3   :  { %v586_v20 = vmax.f32 %v554_v14, 0.0  ;;  %v540_v21 = vadd.f32 %v508_v9, %v460_v15 }
  0xd4   :  { %v587_v22 = vmax.f32 %v555_v17, 0.0  ;;  %v541_v23 = vadd.f32 %v509_v13, %v461_v18 }
  0xd5   :  { %v572_v25 = vmax.f32 %v540_v21, 0.0 }
  0xd6   :  { %v605_v27 = vpack.c.bf16 %v587_v22, %v586_v20  ;;  %v573_v28 = vmax.f32 %v541_v23, 0.0  ;;  %v289_v29 = vpop.f32.mrf.mxu2 }
  0xd7   :  { %v476_v31 = vadd.f32 %v915_v58, %v289_v29  ;;  %v338_v32 = vpop.f32.mrf.mxu3 }
  0xd8   :  { %621 = vst [vmem:[%s1048_s4 + $0x68] sm:$0xff] %v605_v27  ;;  %v598_v34 = vpack.c.bf16 %v573_v28, %v572_v25  ;;  %v477_v35 = vadd.f32 %v917_v59, %v338_v32  ;;  %v271_v36 = vpop.f32.mrf.mxu0 }
  0xd9   :  { %v556_v38 = vadd.f32 %v524_v26, %v476_v31  ;;  %v462_v39 = vadd.f32 %v915_v58, %v271_v36  ;;  %v320_v40 = vpop.f32.mrf.mxu1 }
  0xda   :  { %614 = vst [vmem:[%s1048_s4 + $0x30] sm:$0xff] %v598_v34  ;;  %v557_v41 = vadd.f32 %v525_v30, %v477_v35  ;;  %v463_v42 = vadd.f32 %v917_v59, %v320_v40 }
  0xdb   :  { %v588_v44 = vmax.f32 %v556_v38, 0.0  ;;  %v542_v45 = vadd.f32 %v510_v33, %v462_v39 }
  0xdc   :  { %v589_v46 = vmax.f32 %v557_v41, 0.0  ;;  %v543_v47 = vadd.f32 %v511_v37, %v463_v42 }
  0xdd   :  { %v574_v48 = vmax.f32 %v542_v45, 0.0 }
  0xde   :  { %v606_v50 = vpack.c.bf16 %v589_v46, %v588_v44  ;;  %v575_v51 = vmax.f32 %v543_v47, 0.0  ;;  %v291_v52 = vpop.f32.mrf.mxu2 }
  0xdf   :  { %v478_v54 = vadd.f32 %v915_v58, %v291_v52  ;;  %v340_v55 = vpop.f32.mrf.mxu3 }
  0xe0   :  { %622 = vst [vmem:[%s1048_s4 + $0x70] sm:$0xff] %v606_v50  ;;  %v599_v56 = vpack.c.bf16 %v575_v51, %v574_v48  ;;  %v479_v57 = vadd.f32 %v917_v59, %v340_v55 }
  0xe1   :  { %v558_v60 = vadd.f32 %v526_v49, %v478_v54 }
  0xe2   :  { %615 = vst [vmem:[%s1048_s4 + $0x38] sm:$0xff] %v599_v56  ;;  %v559_v61 = vadd.f32 %v527_v53, %v479_v57 }
  0xe3   :  { %v590_v62 = vmax.f32 %v558_v60, 0.0 }
  0xe4   :  { %v591_v63 = vmax.f32 %v559_v61, 0.0 }
  0xe6   :  { %v607_v0 = vpack.c.bf16 %v591_v63, %v590_v62 }
  0xe8   :  { %623 = vst [vmem:[%s1048_s4 + $0x78] sm:$0xff] %v607_v0 }

// kernel: resnet_forward.48
= control target key start
LH: loop header
LB: loop body
LE: loop exit
PB: predicated region body
PF: predicated region fallthrough
CT: control target
= control target key end

     0   :  { %s928_s1 = inlined_call_operand.vmem [shape: bf16[256,128], index: 1, kind: input, shape index: {}]   ;;  %s929_s0 = inlined_call_operand.vmem [shape: bf16[128,256], index: 0, kind: input, shape index: {}]   ;;  %s930_s2 = inlined_call_operand.vmem [shape: f32[1,128], index: 2, kind: input, shape index: {}]   ;;  %s931_s3 = inlined_call_operand.vmem [shape: bf16[128,128], index: 3, kind: output, shape index: {}]  }
   0x1   :  { %v646_v0 = vld [vmem:[%s928_s1 + $0x38] sm:$0xff]  ;;  %v645_v2 = vld [vmem:[%s928_s1 + $0x30] sm:$0xff]  ;;  %v644_v4 = vld [vmem:[%s928_s1 + $0x28] sm:$0xff] }
   0x2   :  { %v654_v1 = vld [vmem:[%s928_s1 + $0x78] sm:$0xff]  ;;  %274 = vmatpush.bf16.msra.mxu0 %v646_v0  ;;  %702 = vmatpush.bf16.msra.mxu2 %v646_v0  ;;  %v653_v3 = vld [vmem:[%s928_s1 + $0x70] sm:$0xff]  ;;  %v652_v5 = vld [vmem:[%s928_s1 + $0x68] sm:$0xff] }
   0x3   :  { %323 = vmatpush.bf16.msra.mxu1 %v654_v1  ;;  %710 = vmatpush.bf16.msra.mxu3 %v654_v1  ;;  %v643_v6 = vld [vmem:[%s928_s1 + $0x20] sm:$0xff]  ;;  %v642_v8 = vld [vmem:[%s928_s1 + $0x18] sm:$0xff]  ;;  %v641_v10 = vld [vmem:[%s928_s1 + $0x10] sm:$0xff] }
   0x4   :  { %v651_v7 = vld [vmem:[%s928_s1 + $0x60] sm:$0xff]  ;;  %v650_v9 = vld [vmem:[%s928_s1 + $0x58] sm:$0xff]  ;;  %v649_v11 = vld [vmem:[%s928_s1 + $0x50] sm:$0xff] }
   0x5   :  { %v640_v12 = vld [vmem:[%s928_s1 + $0x8] sm:$0xff]  ;;  %v639_v14 = vld [vmem:[%s928_s1] sm:$0xff]  ;;  %v505_v28 = vld [vmem:[%s929_s0 + $0x10] sm:$0xf] }
   0x6   :  { %275 = vmatpush.bf16.msra.mxu0 %v645_v2  ;;  %703 = vmatpush.bf16.msra.mxu2 %v645_v2  ;;  %v648_v13 = vld [vmem:[%s928_s1 + $0x48] sm:$0xff]  ;;  %v647_v15 = vld [vmem:[%s928_s1 + $0x40] sm:$0xff]  ;;  %v626_v29 = vld [vmem:[%s929_s0 + $0x14] sm:$0xf0] }
   0x7   :  { %324 = vmatpush.bf16.msra.mxu1 %v653_v3  ;;  %711 = vmatpush.bf16.msra.mxu3 %v653_v3  ;;  %v497_v16 = vld [vmem:[%s929_s0] sm:$0xf]  ;;  %v624_v17 = vld [vmem:[%s929_s0 + $0x4] sm:$0xf0]  ;;  %v623_v20 = vld [vmem:[%s929_s0 + $0x4] sm:$0xf]  ;;  %v506_v36 = vor.u32 %v626_v29, %v505_v28 }
   0x8   :  { %v529_v18 = vld [vmem:[%s929_s0 + $0x40] sm:$0xf]  ;;  %v632_v19 = vld [vmem:[%s929_s0 + $0x44] sm:$0xf0]  ;;  %v499_v21 = vld [vmem:[%s929_s0 + $0x8] sm:$0xf0]  ;;  %v498_v24 = vor.u32 %v624_v17, %v497_v16 }
   0x9   :  { %v631_v22 = vld [vmem:[%s929_s0 + $0x44] sm:$0xf]  ;;  %v531_v23 = vld [vmem:[%s929_s0 + $0x48] sm:$0xf0]  ;;  %v530_v25 = vor.u32 %v632_v19, %v529_v18  ;;  %v502_v26 = vor.u32 %v623_v20, %v499_v21  ;;  %v537_v30 = vld [vmem:[%s929_s0 + $0x50] sm:$0xf] }
   0xa   :  { %276 = vmatpush.bf16.msra.mxu0 %v644_v4  ;;  %704 = vmatpush.bf16.msra.mxu2 %v644_v4  ;;  %v534_v27 = vor.u32 %v631_v22, %v531_v23  ;;  %v634_v31 = vld [vmem:[%s929_s0 + $0x54] sm:$0xf0]  ;;  %v625_v32 = vld [vmem:[%s929_s0 + $0x14] sm:$0xf]  ;;  %v507_v33 = vld [vmem:[%s929_s0 + $0x18] sm:$0xf0] }
   0xb   :  { %325 = vmatpush.bf16.msra.mxu1 %v652_v5  ;;  %712 = vmatpush.bf16.msra.mxu3 %v652_v5  ;;  %v633_v34 = vld [vmem:[%s929_s0 + $0x54] sm:$0xf]  ;;  %v539_v35 = vld [vmem:[%s929_s0 + $0x58] sm:$0xf0]  ;;  %v538_v37 = vor.u32 %v634_v31, %v537_v30  ;;  %v510_v38 = vor.u32 %v625_v32, %v507_v33  ;;  %v513_v40 = vld [vmem:[%s929_s0 + $0x20] sm:$0xf] }
   0xc   :  { %v542_v39 = vor.u32 %v633_v34, %v539_v35  ;;  %v628_v41 = vld [vmem:[%s929_s0 + $0x24] sm:$0xf0]  ;;  %v545_v42 = vld [vmem:[%s929_s0 + $0x60] sm:$0xf]  ;;  %v627_v44 = vld [vmem:[%s929_s0 + $0x24] sm:$0xf] }
   0xd   :  { %v636_v43 = vld [vmem:[%s929_s0 + $0x64] sm:$0xf0]  ;;  %v515_v45 = vld [vmem:[%s929_s0 + $0x28] sm:$0xf0]  ;;  %v635_v46 = vld [vmem:[%s929_s0 + $0x64] sm:$0xf]  ;;  %v514_v48 = vor.u32 %v628_v41, %v513_v40 }
   0xe   :  { %277 = vmatpush.bf16.msra.mxu0 %v643_v6  ;;  %705 = vmatpush.bf16.msra.mxu2 %v643_v6  ;;  %v547_v47 = vld [vmem:[%s929_s0 + $0x68] sm:$0xf0]  ;;  %v546_v49 = vor.u32 %v636_v43, %v545_v42  ;;  %v518_v50 = vor.u32 %v627_v44, %v515_v45  ;;  %v521_v52 = vld [vmem:[%s929_s0 + $0x30] sm:$0xf]  ;;  %v630_v53 = vld [vmem:[%s929_s0 + $0x34] sm:$0xf0] }
   0xf   :  { %326 = vmatpush.bf16.msra.mxu1 %v651_v7  ;;  %713 = vmatpush.bf16.msra.mxu3 %v651_v7  ;;  %v550_v51 = vor.u32 %v635_v46, %v547_v47  ;;  %v553_v54 = vld [vmem:[%s929_s0 + $0x70] sm:$0xf]  ;;  %v638_v55 = vld [vmem:[%s929_s0 + $0x74] sm:$0xf0]  ;;  %v629_v56 = vld [vmem:[%s929_s0 + $0x34] sm:$0xf]  ;;  %v522_v60 = vor.u32 %v630_v53, %v521_v52 }
  0x10   :  { %v523_v57 = vld [vmem:[%s929_s0 + $0x38] sm:$0xf0]  ;;  %v637_v58 = vld [vmem:[%s929_s0 + $0x74] sm:$0xf]  ;;  %v554_v61 = vor.u32 %v638_v55, %v553_v54  ;;  %v886_v3 = vld [vmem:[%s930_s2] ss:$0 sm:$0xff] }
  0x11   :  { %v555_v59 = vld [vmem:[%s929_s0 + $0x78] sm:$0xf0]  ;;  %v526_v62 = vor.u32 %v629_v56, %v523_v57 }
  0x12   :  { %278 = vmatpush.bf16.msra.mxu0 %v642_v8  ;;  %706 = vmatpush.bf16.msra.mxu2 %v642_v8  ;;  %v558_v63 = vor.u32 %v637_v58, %v555_v59 }
  0x13   :  { %327 = vmatpush.bf16.msra.mxu1 %v650_v9  ;;  %714 = vmatpush.bf16.msra.mxu3 %v650_v9 }
  0x16   :  { %279 = vmatpush.bf16.msra.mxu0 %v641_v10  ;;  %707 = vmatpush.bf16.msra.mxu2 %v641_v10 }
  0x17   :  { %328 = vmatpush.bf16.msra.mxu1 %v649_v11  ;;  %715 = vmatpush.bf16.msra.mxu3 %v649_v11 }
  0x1a   :  { %280 = vmatpush.bf16.msra.mxu0 %v640_v12  ;;  %708 = vmatpush.bf16.msra.mxu2 %v640_v12 }
  0x1b   :  { %329 = vmatpush.bf16.msra.mxu1 %v648_v13  ;;  %716 = vmatpush.bf16.msra.mxu3 %v648_v13 }
  0x1e   :  { %281 = vmatpush.bf16.msra.mxu0 %v639_v14  ;;  %709 = vmatpush.bf16.msra.mxu2 %v639_v14 }
  0x1f   :  { %330 = vmatpush.bf16.msra.mxu1 %v647_v15  ;;  %717 = vmatpush.bf16.msra.mxu3 %v647_v15 }
  0x21   :  { %282 = vmatmul.bf16.vlgmr.msra.gmra.mxu0 %v498_v24  ;;  %302 = vmatmul.bf16.vlgmr.msra.gmra.mxu2 %v530_v25 }
  0x22   :  { %331 = vmatmul.bf16.vlgmr.msra.gmra.mxu1 %v502_v26  ;;  %351 = vmatmul.bf16.vlgmr.msra.gmra.mxu3 %v534_v27 }
  0x31   :  { %287 = vmatmul.bf16.gmra.mxu0 %v506_v36  ;;  %307 = vmatmul.bf16.gmra.mxu2 %v538_v37 }
  0x32   :  { %336 = vmatmul.bf16.gmra.mxu1 %v510_v38  ;;  %356 = vmatmul.bf16.gmra.mxu3 %v542_v39 }
  0x41   :  { %292 = vmatmul.bf16.gmra.mxu0 %v514_v48  ;;  %312 = vmatmul.bf16.gmra.mxu2 %v546_v49 }
  0x42   :  { %341 = vmatmul.bf16.gmra.mxu1 %v518_v50  ;;  %361 = vmatmul.bf16.gmra.mxu3 %v550_v51 }
  0x51   :  { %297 = vmatmul.bf16.gmra.mxu0 %v522_v60  ;;  %317 = vmatmul.bf16.gmra.mxu2 %v554_v61 }
  0x52   :  { %346 = vmatmul.bf16.gmra.mxu1 %v526_v62  ;;  %366 = vmatmul.bf16.gmra.mxu3 %v558_v63 }
  0x9e   :  { %v283_v0 = vpop.f32.mrf.mxu0 }
  0x9f   :  { %v332_v1 = vpop.f32.mrf.mxu1 }
  0xa0   :  { %v333_v2 = vadd.f32 %v332_v1, %v283_v0 }
  0xa2   :  { %v427_v8 = vadd.f32 %v886_v3, %v333_v2 }
  0xa4   :  { %v303_v4 = vpop.f32.mrf.mxu2  ;;  %v443_v12 = vmax.f32 %v427_v8, 0.0 }
  0xa5   :  { %v352_v5 = vpop.f32.mrf.mxu3 }
  0xa6   :  { %v285_v6 = vpop.f32.mrf.mxu0  ;;  %v353_v10 = vadd.f32 %v352_v5, %v303_v4 }
  0xa7   :  { %v334_v7 = vpop.f32.mrf.mxu1 }
  0xa8   :  { %v335_v9 = vadd.f32 %v334_v7, %v285_v6  ;;  %v435_v16 = vadd.f32 %v886_v3, %v353_v10 }
  0xaa   :  { %v428_v11 = vadd.f32 %v886_v3, %v335_v9  ;;  %v451_v22 = vmax.f32 %v435_v16, 0.0 }
  0xac   :  { %v444_v13 = vmax.f32 %v428_v11, 0.0  ;;  %v305_v14 = vpop.f32.mrf.mxu2 }
  0xad   :  { %v354_v15 = vpop.f32.mrf.mxu3 }
  0xae   :  { %v658_v17 = vpack.c.bf16 %v444_v13, %v443_v12  ;;  %v355_v18 = vadd.f32 %v354_v15, %v305_v14  ;;  %v288_v19 = vpop.f32.mrf.mxu0 }
  0xaf   :  { %v337_v20 = vpop.f32.mrf.mxu1 }
  0xb0   :  { %659 = vst [vmem:[%s931_s3] sm:$0xff] %v658_v17   ;;  %v436_v21 = vadd.f32 %v886_v3, %v355_v18  ;;  %v338_v25 = vadd.f32 %v337_v20, %v288_v19 }
  0xb2   :  { %v452_v23 = vmax.f32 %v436_v21, 0.0  ;;  %v429_v30 = vadd.f32 %v886_v3, %v338_v25 }
  0xb4   :  { %v678_v24 = vpack.c.bf16 %v452_v23, %v451_v22  ;;  %v308_v26 = vpop.f32.mrf.mxu2  ;;  %v445_v34 = vmax.f32 %v429_v30, 0.0 }
  0xb5   :  { %v357_v27 = vpop.f32.mrf.mxu3 }
  0xb6   :  { %698 = vst [vmem:[%s931_s3 + $0x20] sm:$0xff] %v678_v24   ;;  %v290_v28 = vpop.f32.mrf.mxu0  ;;  %v358_v32 = vadd.f32 %v357_v27, %v308_v26 }
  0xb7   :  { %v339_v29 = vpop.f32.mrf.mxu1 }
  0xb8   :  { %v340_v31 = vadd.f32 %v339_v29, %v290_v28  ;;  %v437_v38 = vadd.f32 %v886_v3, %v358_v32 }
  0xba   :  { %v430_v33 = vadd.f32 %v886_v3, %v340_v31  ;;  %v453_v44 = vmax.f32 %v437_v38, 0.0 }
  0xbc   :  { %v446_v35 = vmax.f32 %v430_v33, 0.0  ;;  %v310_v36 = vpop.f32.mrf.mxu2 }
  0xbd   :  { %v359_v37 = vpop.f32.mrf.mxu3 }
  0xbe   :  { %v663_v39 = vpack.c.bf16 %v446_v35, %v445_v34  ;;  %v360_v40 = vadd.f32 %v359_v37, %v310_v36  ;;  %v293_v41 = vpop.f32.mrf.mxu0 }
  0xbf   :  { %v342_v42 = vpop.f32.mrf.mxu1 }
  0xc0   :  { %695 = vst [vmem:[%s931_s3 + $0x8] sm:$0xff] %v663_v39   ;;  %v438_v43 = vadd.f32 %v886_v3, %v360_v40  ;;  %v343_v47 = vadd.f32 %v342_v42, %v293_v41 }
  0xc2   :  { %v454_v45 = vmax.f32 %v438_v43, 0.0  ;;  %v431_v52 = vadd.f32 %v886_v3, %v343_v47 }
  0xc4   :  { %v683_v46 = vpack.c.bf16 %v454_v45, %v453_v44  ;;  %v313_v48 = vpop.f32.mrf.mxu2  ;;  %v447_v56 = vmax.f32 %v431_v52, 0.0 }
  0xc5   :  { %v362_v49 = vpop.f32.mrf.mxu3 }
  0xc6   :  { %699 = vst [vmem:[%s931_s3 + $0x28] sm:$0xff] %v683_v46   ;;  %v295_v50 = vpop.f32.mrf.mxu0  ;;  %v363_v54 = vadd.f32 %v362_v49, %v313_v48 }
  0xc7   :  { %v344_v51 = vpop.f32.mrf.mxu1 }
  0xc8   :  { %v345_v53 = vadd.f32 %v344_v51, %v295_v50  ;;  %v439_v60 = vadd.f32 %v886_v3, %v363_v54 }
  0xca   :  { %v432_v55 = vadd.f32 %v886_v3, %v345_v53  ;;  %v455_v2 = vmax.f32 %v439_v60, 0.0 }
  0xcc   :  { %v448_v57 = vmax.f32 %v432_v55, 0.0  ;;  %v315_v58 = vpop.f32.mrf.mxu2 }
  0xcd   :  { %v364_v59 = vpop.f32.mrf.mxu3 }
  0xce   :  { %v668_v61 = vpack.c.bf16 %v448_v57, %v447_v56  ;;  %v365_v62 = vadd.f32 %v364_v59, %v315_v58  ;;  %v298_v63 = vpop.f32.mrf.mxu0 }
  0xcf   :  { %v347_v0 = vpop.f32.mrf.mxu1 }
  0xd0   :  { %696 = vst [vmem:[%s931_s3 + $0x10] sm:$0xff] %v668_v61   ;;  %v440_v1 = vadd.f32 %v886_v3, %v365_v62  ;;  %v348_v6 = vadd.f32 %v347_v0, %v298_v63 }
  0xd2   :  { %v456_v4 = vmax.f32 %v440_v1, 0.0  ;;  %v433_v11 = vadd.f32 %v886_v3, %v348_v6 }
  0xd4   :  { %v688_v5 = vpack.c.bf16 %v456_v4, %v455_v2  ;;  %v318_v7 = vpop.f32.mrf.mxu2  ;;  %v449_v15 = vmax.f32 %v433_v11, 0.0 }
  0xd5   :  { %v367_v8 = vpop.f32.mrf.mxu3 }
  0xd6   :  { %700 = vst [vmem:[%s931_s3 + $0x30] sm:$0xff] %v688_v5   ;;  %v300_v9 = vpop.f32.mrf.mxu0  ;;  %v368_v13 = vadd.f32 %v367_v8, %v318_v7 }
  0xd7   :  { %v349_v10 = vpop.f32.mrf.mxu1 }
  0xd8   :  { %v350_v12 = vadd.f32 %v349_v10, %v300_v9  ;;  %v441_v19 = vadd.f32 %v886_v3, %v368_v13 }
  0xda   :  { %v434_v14 = vadd.f32 %v886_v3, %v350_v12  ;;  %v457_v23 = vmax.f32 %v441_v19, 0.0 }
  0xdc   :  { %v450_v16 = vmax.f32 %v434_v14, 0.0  ;;  %v320_v17 = vpop.f32.mrf.mxu2 }
  0xdd   :  { %v369_v18 = vpop.f32.mrf.mxu3 }
  0xde   :  { %v673_v20 = vpack.c.bf16 %v450_v16, %v449_v15  ;;  %v370_v21 = vadd.f32 %v369_v18, %v320_v17 }
  0xe0   :  { %697 = vst [vmem:[%s931_s3 + $0x18] sm:$0xff] %v673_v20   ;;  %v442_v22 = vadd.f32 %v886_v3, %v370_v21 }
  0xe2   :  { %v458_v24 = vmax.f32 %v442_v22, 0.0 }
  0xe4   :  { %v693_v25 = vpack.c.bf16 %v458_v24, %v457_v23 }
  0xe6   :  { %701 = vst [vmem:[%s931_s3 + $0x38] sm:$0xff] %v693_v25  }

// kernel: resnet_forward.56
= control target key start
LH: loop header
LB: loop body
LE: loop exit
PB: predicated region body
PF: predicated region fallthrough
CT: control target
= control target key end

     0   :  { %s1045_s12 = smov 0   ;;  %s1047_s13 = smov 0   ;;  %s1161_s0 = inlined_call_operand.vmem [shape: bf16[32,1152], index: 0, kind: input, shape index: {}]   ;;  %s1162_s1 = inlined_call_operand.vmem [shape: bf16[1152,128], index: 1, kind: input, shape index: {}]   ;;  %s1163_s2 = inlined_call_operand.vmem [shape: f32[1,128], index: 2, kind: input, shape index: {}]   ;;  %s1164_s3 = inlined_call_operand.vmem [shape: bf16[32,128], index: 3, kind: output, shape index: {}]  }
   0x1   :  { %s1049_s14 = smov 0   ;;  %s1051_s15 = smov 0  }
   0x2   :  { %s1053_s16 = smov 0  }
   0x3 LB: > { %s25_s17 = sadd.s32 1, %s1018_s15  ;;  %p48_p1 = scmp.ne.s32.totalorder %s1010_s13, %s1006_s12  ;;  %s1022_s16 = sphi %s1053_s16, %s13_s16   ;;  %s1018_s15 = sphi %s1051_s15, %s1168_s15   ;;  %s1014_s14 = sphi %s1049_s14, %s1167_s14   ;;  %s1010_s13 = sphi %s1047_s13, %s1166_s13   ;;  %s1006_s12 = sphi %s1045_s12, %s1165_s12  }
   0x4   : > { %p26_p0 = scmp.ge.s32.totalorder %s25_s17, 3  ;;  %p49_p2 = scmp.eq.s32.totalorder %s1022_s16, 0 }
   0x5   : > { %s41_s19 = sadd.s32 1, %s1010_s13  ;;  %p752_p5 = scmp.ge.s32.totalorder %s1022_s16, 3 }
   0x6   : > { %s1170_s17 = smov (%p26_p0, %s25_s17), 0  ;;  %p50_p3 = por %p49_p2, %p48_p1 }
   0x7   : > { %s37_s18 = ssub.s32 %s1018_s15, %s1170_s17  ;;  %162 = sbr.rel (%p752_p5) target bundleno = 25 (0x19), region = 20 }
   0x8   : > { %p39_p4 = scmp.eq.s32.totalorder %s37_s18, 0 }
   0xa   : > { %s1080_s20 = scalar_select %p39_p4, %s1010_s13, %s41_s19  }
   0xc   : > { %165 = sbr.rel (!%p50_p3) target bundleno = 25 (0x19), region = 24  ;;  %s167_s21 = sand.u32 (%p50_p3), 1, %s1010_s13  }
   0xd   : > { %s890_s22 = smul.u32 (%p50_p3), 12, %s1018_s15 }
   0xe   : > { %s940_s23 = smul.u32 (%p50_p3), 48, %s167_s21 }
   0xf   : > { %s175_s26 = scalar_lea.vmem (%p50_p3), %s1161_s0, %s890_s22 }
  0x10   : > { %v190_v0 = vld [vmem:[%s175_s26] sm:$0xff] (%p50_p3)  ;;  %v194_v2 = vld [vmem:[%s175_s26 + $0x48] sm:$0xff] (%p50_p3)  ;;  %s169_s27 = scalar_lea.vmem (%p50_p3), [#allocation3], %s940_s23  ;;  %v758_v6 = vld [vmem:[%s175_s26 + $0x50] sm:$0xf] (%p50_p3) }
  0x11   : > { %v192_v1 = vld [vmem:[%s175_s26 + $0x24] sm:$0xff]  ;;  %191 = vst [vmem:[%s169_s27] sm:$0xff] %v190_v0  ;;  %v196_v3 = vld [vmem:[%s175_s26 + $0x6c] sm:$0xff]  ;;  %v760_v7 = vld [vmem:[%s175_s26 + $0x74] sm:$0xf] }
  0x12   : > { %193 = vst [vmem:[%s169_s27 + $0xc] sm:$0xff] %v192_v1  ;;  %v754_v4 = vld [vmem:[%s175_s26 + $0x8] sm:$0xf]  ;;  %v756_v5 = vld [vmem:[%s175_s26 + $0x2c] sm:$0xf] }
  0x13   : > { %195 = vst [vmem:[%s169_s27 + $0x18] sm:$0xff] %v194_v2 }
  0x14   : > { %197 = vst [vmem:[%s169_s27 + $0x24] sm:$0xff] %v196_v3 }
  0x15   : > { %755 = vst [vmem:[%s169_s27 + $0x8] sm:$0xf] %v754_v4 }
  0x16   : > { %757 = vst [vmem:[%s169_s27 + $0x14] sm:$0xf] %v756_v5 }
  0x17   : > { %759 = vst [vmem:[%s169_s27 + $0x20] sm:$0xf] %v758_v6 }
  0x18   : > { %761 = vst [vmem:[%s169_s27 + $0x2c] sm:$0xf] %v760_v7 }
  0x19 PF: > { %p762_p6 = scmp.ge.s32.totalorder %s1022_s16, 1  ;;  %p230_p7 = scmp.lt.s32.totalorder %s1022_s16, 4 }
  0x1b   : > { %p231_p8 = pnand %p762_p6, %p230_p7 }
  0x1c   : > { %s237_s28 = sand.u32 (!%p231_p8), 1, %s1006_s12   ;;  %s276_s29 = smul.u32 (!%p231_p8), 48, %s1014_s14 }
  0x1d   : > { %234 = sbr.rel (%p231_p8) target bundleno = 253 (0xfd), region = 54  ;;  %p764_p10 = scmp.ne.s32.totalorder (!%p231_p8), %s1014_s14, 0 }
  0x1e   : > { %s941_s30 = smul.u32 (!%p231_p8), 48, %s237_s28  ;;  %p277_p9 = scmp.lt.s32.totalorder (!%p231_p8), %s276_s29, 143 }
  0x20   : > { %s1097_s8 = scalar_lea.vmem (!%p231_p8), [#allocation3], %s941_s30 }
  0x22   : > { %s1172_s29 = smov (!%p277_p9, %s276_s29), 143  ;;  %300 = sbr.rel (%p764_p10) target bundleno = 44 (0x2c), region = 62 }
  0x23   : > { %s763_s4 = sshll.u32 %s1172_s29, 2 }
  0x24   : > { %s1095_s7 = scalar_lea.vmem %s1162_s1, %s763_s4 }
  0x27   : > { %v1024_v8 = vmov 0.0  }
  0x28   : > { %301 = vst [vmem:[#allocation2 + $0x10] sm:$0xff] %v1024_v8 }
  0x29   : > { %302 = vst [vmem:[#allocation2] sm:$0xff] %v1024_v8 }
  0x2a   : > { %303 = vst [vmem:[#allocation2 + $0x18] sm:$0xff] %v1024_v8 }
  0x2b   : > { %304 = vst [vmem:[#allocation2 + $0x8] sm:$0xff] %v1024_v8 }
  0x2c PF: > { %v904_v9 = vld [vmem:[%s1095_s7 + $0x38] sm:$0xff]  ;;  %v903_v12 = vld [vmem:[%s1095_s7 + $0x30] sm:$0xff]  ;;  %v902_v15 = vld [vmem:[%s1095_s7 + $0x28] sm:$0xff]  ;;  %p885_p11 = scmp.ne.s32.totalorder %s1014_s14, 2 }
  0x2d   : > { %v912_v10 = vld [vmem:[%s1095_s7 + $0x78] sm:$0xff]  ;;  %541 = vmatpush.bf16.msra.mxu0 %v904_v9  ;;  %v911_v13 = vld [vmem:[%s1095_s7 + $0x70] sm:$0xff]  ;;  %932 = vmatpush.bf16.msra.mxu3 %v904_v9  ;;  %v910_v16 = vld [vmem:[%s1095_s7 + $0x68] sm:$0xff] }
  0x2e   : > { %v920_v11 = vld [vmem:[%s1095_s7 + $0xb8] sm:$0xff]  ;;  %560 = vmatpush.bf16.msra.mxu1 %v912_v10  ;;  %v919_v14 = vld [vmem:[%s1095_s7 + $0xb0] sm:$0xff]  ;;  %v918_v17 = vld [vmem:[%s1095_s7 + $0xa8] sm:$0xff] }
  0x2f   : > { %579 = vmatpush.bf16.msra.mxu2 %v920_v11  ;;  %v901_v18 = vld [vmem:[%s1095_s7 + $0x20] sm:$0xff]  ;;  %v900_v21 = vld [vmem:[%s1095_s7 + $0x18] sm:$0xff]  ;;  %v899_v24 = vld [vmem:[%s1095_s7 + $0x10] sm:$0xff] }
  0x30   : > { %v909_v19 = vld [vmem:[%s1095_s7 + $0x60] sm:$0xff]  ;;  %v908_v22 = vld [vmem:[%s1095_s7 + $0x58] sm:$0xff]  ;;  %v907_v25 = vld [vmem:[%s1095_s7 + $0x50] sm:$0xff] }
  0x31   : > { %542 = vmatpush.bf16.msra.mxu0 %v903_v12  ;;  %933 = vmatpush.bf16.msra.mxu3 %v903_v12  ;;  %v917_v20 = vld [vmem:[%s1095_s7 + $0xa0] sm:$0xff]  ;;  %v916_v23 = vld [vmem:[%s1095_s7 + $0x98] sm:$0xff]  ;;  %v915_v26 = vld [vmem:[%s1095_s7 + $0x90] sm:$0xff] }
  0x32   : > { %561 = vmatpush.bf16.msra.mxu1 %v911_v13  ;;  %v898_v27 = vld [vmem:[%s1095_s7 + $0x8] sm:$0xff]  ;;  %v897_v30 = vld [vmem:[%s1095_s7] sm:$0xff]  ;;  %v305_v54 = vld [vmem:[#allocation2 + $0x10] sm:$0xff] }
  0x33   : > { %580 = vmatpush.bf16.msra.mxu2 %v919_v14  ;;  %v906_v28 = vld [vmem:[%s1095_s7 + $0x48] sm:$0xff]  ;;  %v905_v31 = vld [vmem:[%s1095_s7 + $0x40] sm:$0xff]  ;;  %v307_v4 = vld [vmem:[#allocation2 + $0x18] sm:$0xff] }
  0x34   : > { %v914_v29 = vld [vmem:[%s1095_s7 + $0x88] sm:$0xff]  ;;  %v913_v32 = vld [vmem:[%s1095_s7 + $0x80] sm:$0xff] }
  0x35   : > { %543 = vmatpush.bf16.msra.mxu0 %v902_v15  ;;  %934 = vmatpush.bf16.msra.mxu3 %v902_v15  ;;  %v767_v33 = vld [vmem:[%s1097_s8] sm:$0xf]  ;;  %v892_v34 = vld [vmem:[%s1097_s8 + $0x8] sm:$0xf0]  ;;  %v891_v35 = vld [vmem:[%s1097_s8 + $0x4] sm:$0xf] }
  0x36   : > { %562 = vmatpush.bf16.msra.mxu1 %v910_v16  ;;  %v769_v36 = vld [vmem:[%s1097_s8 + $0xc] sm:$0xf0]  ;;  %v775_v37 = vld [vmem:[%s1097_s8 + $0x8] sm:$0xf]  ;;  %v893_v38 = vld [vmem:[%s1097_s8 + $0x10] sm:$0xf0]  ;;  %v768_v41 = vor.u32 %v892_v34, %v767_v33 }
  0x37   : > { %581 = vmatpush.bf16.msra.mxu2 %v918_v17  ;;  %v779_v39 = vld [vmem:[%s1097_s8 + $0x18] sm:$0xf]  ;;  %v895_v40 = vld [vmem:[%s1097_s8 + $0x20] sm:$0xf0]  ;;  %v772_v42 = vor.u32 %v891_v35, %v769_v36  ;;  %v776_v43 = vor.u32 %v893_v38, %v775_v37  ;;  %v894_v45 = vld [vmem:[%s1097_s8 + $0x1c] sm:$0xf] }
  0x38   : > { %v780_v44 = vor.u32 %v895_v40, %v779_v39  ;;  %v781_v46 = vld [vmem:[%s1097_s8 + $0x24] sm:$0xf0]  ;;  %v787_v47 = vld [vmem:[%s1097_s8 + $0x20] sm:$0xf]  ;;  %v896_v48 = vld [vmem:[%s1097_s8 + $0x28] sm:$0xf0] }
  0x39   : > { %544 = vmatpush.bf16.msra.mxu0 %v901_v18  ;;  %935 = vmatpush.bf16.msra.mxu3 %v901_v18  ;;  %v784_v49 = vor.u32 %v894_v45, %v781_v46  ;;  %v788_v50 = vor.u32 %v896_v48, %v787_v47  ;;  %v306_v61 = vld [vmem:[#allocation2] sm:$0xff]  ;;  %v308_v11 = vld [vmem:[#allocation2 + $0x8] sm:$0xff] }
  0x3a   : > { %563 = vmatpush.bf16.msra.mxu1 %v909_v19 }
  0x3b   : > { %582 = vmatpush.bf16.msra.mxu2 %v917_v20 }
  0x3d   : > { %545 = vmatpush.bf16.msra.mxu0 %v900_v21  ;;  %936 = vmatpush.bf16.msra.mxu3 %v900_v21 }
  0x3e   : > { %564 = vmatpush.bf16.msra.mxu1 %v908_v22 }
  0x3f   : > { %583 = vmatpush.bf16.msra.mxu2 %v916_v23 }
  0x41   : > { %546 = vmatpush.bf16.msra.mxu0 %v899_v24  ;;  %937 = vmatpush.bf16.msra.mxu3 %v899_v24 }
  0x42   : > { %565 = vmatpush.bf16.msra.mxu1 %v907_v25 }
  0x43   : > { %584 = vmatpush.bf16.msra.mxu2 %v915_v26 }
  0x45   : > { %547 = vmatpush.bf16.msra.mxu0 %v898_v27  ;;  %938 = vmatpush.bf16.msra.mxu3 %v898_v27 }
  0x46   : > { %566 = vmatpush.bf16.msra.mxu1 %v906_v28 }
  0x47   : > { %585 = vmatpush.bf16.msra.mxu2 %v914_v29 }
  0x49   : > { %548 = vmatpush.bf16.msra.mxu0 %v897_v30  ;;  %939 = vmatpush.bf16.msra.mxu3 %v897_v30 }
  0x4a   : > { %567 = vmatpush.bf16.msra.mxu1 %v905_v31 }
  0x4b   : > { %586 = vmatpush.bf16.msra.mxu2 %v913_v32 }
  0x4c   : > { %549 = vmatmul.bf16.vlgmr.msra.gmra.mxu0 %v768_v41  ;;  %554 = vmatmul.bf16.vlgmr.msra.gmra.mxu3 %v780_v44 }
  0x4d   : > { %568 = vmatmul.bf16.vlgmr.msra.gmra.mxu1 %v772_v42 }
  0x4e   : > { %587 = vmatmul.bf16.vlgmr.msra.gmra.mxu2 %v776_v43 }
  0x5d   : > { %573 = vmatmul.bf16.gmra.mxu1 %v784_v49 }
  0x5e   : > { %592 = vmatmul.bf16.gmra.mxu2 %v788_v50 }
  0xc9   : > { %v550_v52 = vpop.f32.mrf.mxu0 }
  0xca   : > { %v569_v51 = vpop.f32.mrf.mxu1 }
  0xcb   : > { %v570_v53 = vadd.f32 %v569_v51, %v550_v52 }
  0xcf   : > { %v555_v2 = vpop.f32.mrf.mxu3 }
  0xd1   : > { %v588_v55 = vpop.f32.mrf.mxu2  ;;  %v552_v59 = vpop.f32.mrf.mxu0 }
  0xd2   : > { %v589_v56 = vadd.f32 %v588_v55, %v570_v53  ;;  %v571_v57 = vpop.f32.mrf.mxu1 }
  0xd3   : > { %v572_v60 = vadd.f32 %v571_v57, %v552_v59 }
  0xd4   : > { %v598_v58 = vadd.f32 %v589_v56, %v305_v54 }
  0xd6   : > { %602 = vst [vmem:[#allocation2 + $0x10] sm:$0xff] %v598_v58 }
  0xd7   : > { %v557_v9 = vpop.f32.mrf.mxu3 }
  0xd9   : > { %v590_v62 = vpop.f32.mrf.mxu2 }
  0xda   : > { %v591_v63 = vadd.f32 %v590_v62, %v572_v60  ;;  %v574_v0 = vpop.f32.mrf.mxu1 }
  0xdb   : > { %v575_v3 = vadd.f32 %v574_v0, %v555_v2 }
  0xdc   : > { %v599_v1 = vadd.f32 %v591_v63, %v306_v61 }
  0xde   : > { %603 = vst [vmem:[#allocation2] sm:$0xff] %v599_v1 }
  0xe1   : > { %v593_v5 = vpop.f32.mrf.mxu2 }
  0xe2   : > { %v594_v6 = vadd.f32 %v593_v5, %v575_v3  ;;  %v576_v8 = vpop.f32.mrf.mxu1 }
  0xe3   : > { %v577_v10 = vadd.f32 %v576_v8, %v557_v9 }
  0xe4   : > { %v600_v7 = vadd.f32 %v594_v6, %v307_v4 }
  0xe6   : > { %604 = vst [vmem:[#allocation2 + $0x18] sm:$0xff] %v600_v7 }
  0xe9   : > { %v595_v12 = vpop.f32.mrf.mxu2 }
  0xea   : > { %v596_v13 = vadd.f32 %v595_v12, %v577_v10  ;;  %609 = sbr.rel (%p885_p11) target bundleno = 253 (0xfd), region = 66 }
  0xec   : > { %v601_v14 = vadd.f32 %v596_v13, %v308_v11 }
  0xee   : > { %605 = vst [vmem:[#allocation2 + $0x8] sm:$0xff] %v601_v14 }
  0xef   : > { %v610_v15 = vld [vmem:[#allocation2 + $0x10] sm:$0xff]  ;;  %v611_v16 = vld [vmem:[#allocation2] sm:$0xff]  ;;  %v612_v18 = vld [vmem:[#allocation2 + $0x18] sm:$0xff] }
  0xf0   : > { %v983_v17 = vld [vmem:[%s1163_s2] ss:$0 sm:$0xff] }
  0xf1   : > { %v618_v20 = vadd.f32 %v983_v17, %v610_v15  ;;  %v619_v21 = vadd.f32 %v983_v17, %v611_v16  ;;  %v620_v22 = vadd.f32 %v983_v17, %v612_v18 }
  0xf3   : > { %v622_v24 = vmax.f32 %v618_v20, 0.0  ;;  %v623_v25 = vmax.f32 %v619_v21, 0.0  ;;  %v624_v26 = vmax.f32 %v620_v22, 0.0 }
  0xf5   : > { %v613_v19 = vld [vmem:[#allocation2 + $0x8] sm:$0xff]  ;;  %v924_v28 = vpack.c.bf16 %v623_v25, %v622_v24 }
  0xf6   : > { %v621_v23 = vadd.f32 %v983_v17, %v613_v19 }
  0xf7   : > { %925 = vst [vmem:[%s1164_s3] sm:$0xff] %v924_v28  }
  0xf8   : > { %v625_v27 = vmax.f32 %v621_v23, 0.0 }
  0xfa   : > { %v929_v29 = vpack.c.bf16 %v625_v27, %v624_v26 }
  0xfc   : > { %931 = vst [vmem:[%s1164_s3 + $0x8] sm:$0xff] %v929_v29  }
  0xfd PF: > { %s13_s16 = sadd.s32 1, %s1022_s16   ;;  %s1165_s12 = smov %s1010_s13 }
  0xfe   : > { %p10_p12 = scmp.ge.s32.totalorder %s13_s16, 5   ;;  %s1166_s13 = smov %s1080_s20 }
  0xff   : > { %s1167_s14 = smov %s1018_s15  ;;  %s1168_s15 = smov %s1170_s17 }
 0x100   :  { %12 = sbr.rel (!%p10_p12) target bundleno = 3 (0x3), region = 113 }

// kernel: resnet_forward.57
= control target key start
LH: loop header
LB: loop body
LE: loop exit
PB: predicated region body
PF: predicated region fallthrough
CT: control target
= control target key end

     0   :  { %s1107_s15 = smov 0   ;;  %s1109_s16 = smov 0   ;;  %s1278_s0 = inlined_call_operand.vmem [shape: bf16[32,128], index: 0, kind: input, shape index: {}]   ;;  %s1279_s1 = inlined_call_operand.vmem [shape: bf16[128,512], index: 1, kind: input, shape index: {}]   ;;  %s1280_s2 = inlined_call_operand.vmem [shape: f32[1,512], index: 2, kind: input, shape index: {}]   ;;  %s1281_s3 = inlined_call_operand.vmem [shape: bf16[32,512], index: 3, kind: input, shape index: {}]   ;;  %s1282_s4 = inlined_call_operand.vmem [shape: bf16[32,512], index: 4, kind: output, shape index: {}]  }
   0x1   :  { %s1111_s17 = smov 0   ;;  %s1113_s18 = smov 0  }
   0x2   :  { %s1115_s19 = smov 0  }
   0x3 LB: > { %s29_s20 = sadd.s32 1, %s1076_s18  ;;  %s872_s21 = sadd.s32 4294967295, %s1080_s19   ;;  %s1080_s19 = sphi %s1115_s19, %s14_s19   ;;  %s1076_s18 = sphi %s1113_s18, %s1288_s18   ;;  %s1072_s17 = sphi %s1111_s17, %s1287_s17   ;;  %s1068_s16 = sphi %s1109_s16, %s1286_s16   ;;  %s1064_s15 = sphi %s1107_s15, %s1285_s15  }
   0x4   : > { %p31_p0 = scmp.ge.s32.totalorder %s29_s20, 2  ;;  %p77_p1 = scmp.ne.s32.totalorder %s1068_s16, %s1064_s15 }
   0x5   : > { %p78_p2 = scmp.eq.s32.totalorder %s1080_s19, 0  ;;  %p163_p4 = scmp.eq.s32.totalorder %s872_s21, 1 }
   0x6   : > { %s1290_s20 = smov (%p31_p0, %s29_s20), 0  ;;  %s70_s24 = sadd.s32 1, %s1068_s16 }
   0x7   : > { %p1139_p3 = por %p78_p2, %p77_p1  ;;  %s66_s23 = ssub.s32 %s1076_s18, %s1290_s20 }
   0x8   : > { %p68_p5 = scmp.eq.s32.totalorder %s66_s23, 0  ;;  %p1146_p6 = por %p163_p4, %p77_p1 }
   0x9   : > { %p876_p7 = scmp.ge.s32.totalorder %s1080_s19, 2 }
   0xa   : > { %s1151_s26 = scalar_select %p68_p5, %s1068_s16, %s70_s24  }
   0xb   : > { %197 = sbr.rel (%p876_p7) target bundleno = 44 (0x2c), region = 20 }
  0x10   : > { %200 = sbr.rel (!%p1139_p3) target bundleno = 36 (0x24), region = 24  ;;  %s202_s27 = sand.u32 (%p1139_p3), 1, %s1068_s16  }
  0x11   : > { %s965_s28 = sshll.u32 (%p1139_p3), %s1076_s18, 3  ;;  %s877_s29 = sshll.u32 (%p1139_p3), %s202_s27, 7 }
  0x12   : > { %s1161_s6 = scalar_lea.vmem (%p1139_p3), %s1279_s1, %s965_s28  ;;  %s204_s7 = scalar_lea.vmem (%p1139_p3), [#allocation3], %s877_s29 }
  0x13   : > { %v269_v0 = vld [vmem:[%s1161_s6] sm:$0xff] (%p1139_p3)  ;;  %v271_v1 = vld [vmem:[%s1161_s6 + $0x10] sm:$0xff] (%p1139_p3) }
  0x14   : > { %v273_v2 = vld [vmem:[%s1161_s6 + $0x20] sm:$0xff] (%p1139_p3)  ;;  %270 = vst [vmem:[%s204_s7] sm:$0xff] (%p1139_p3), %v269_v0  ;;  %v275_v3 = vld [vmem:[%s1161_s6 + $0x30] sm:$0xff] (%p1139_p3) }
  0x15   : > { %272 = vst [vmem:[%s204_s7 + $0x8] sm:$0xff] %v271_v1  ;;  %v277_v4 = vld [vmem:[%s1161_s6 + $0x40] sm:$0xff]  ;;  %v279_v5 = vld [vmem:[%s1161_s6 + $0x50] sm:$0xff] }
  0x16   : > { %274 = vst [vmem:[%s204_s7 + $0x10] sm:$0xff] %v273_v2  ;;  %v281_v6 = vld [vmem:[%s1161_s6 + $0x60] sm:$0xff]  ;;  %v283_v7 = vld [vmem:[%s1161_s6 + $0x70] sm:$0xff] }
  0x17   : > { %276 = vst [vmem:[%s204_s7 + $0x18] sm:$0xff] %v275_v3  ;;  %v285_v8 = vld [vmem:[%s1161_s6 + $0x80] sm:$0xff]  ;;  %v287_v9 = vld [vmem:[%s1161_s6 + $0x90] sm:$0xff] }
  0x18   : > { %278 = vst [vmem:[%s204_s7 + $0x20] sm:$0xff] %v277_v4  ;;  %v289_v10 = vld [vmem:[%s1161_s6 + $0xa0] sm:$0xff]  ;;  %v291_v11 = vld [vmem:[%s1161_s6 + $0xb0] sm:$0xff] }
  0x19   : > { %280 = vst [vmem:[%s204_s7 + $0x28] sm:$0xff] %v279_v5  ;;  %v293_v12 = vld [vmem:[%s1161_s6 + $0xc0] sm:$0xff]  ;;  %v295_v13 = vld [vmem:[%s1161_s6 + $0xd0] sm:$0xff] }
  0x1a   : > { %282 = vst [vmem:[%s204_s7 + $0x30] sm:$0xff] %v281_v6  ;;  %v297_v14 = vld [vmem:[%s1161_s6 + $0xe0] sm:$0xff]  ;;  %v299_v15 = vld [vmem:[%s1161_s6 + $0xf0] sm:$0xff] }
  0x1b   : > { %284 = vst [vmem:[%s204_s7 + $0x38] sm:$0xff] %v283_v7 }
  0x1c   : > { %286 = vst [vmem:[%s204_s7 + $0x40] sm:$0xff] %v285_v8 }
  0x1d   : > { %288 = vst [vmem:[%s204_s7 + $0x48] sm:$0xff] %v287_v9 }
  0x1e   : > { %290 = vst [vmem:[%s204_s7 + $0x50] sm:$0xff] %v289_v10 }
  0x1f   : > { %292 = vst [vmem:[%s204_s7 + $0x58] sm:$0xff] %v291_v11 }
  0x20   : > { %294 = vst [vmem:[%s204_s7 + $0x60] sm:$0xff] %v293_v12 }
  0x21   : > { %296 = vst [vmem:[%s204_s7 + $0x68] sm:$0xff] %v295_v13 }
  0x22   : > { %298 = vst [vmem:[%s204_s7 + $0x70] sm:$0xff] %v297_v14 }
  0x23   : > { %300 = vst [vmem:[%s204_s7 + $0x78] sm:$0xff] %v299_v15 }
  0x24 PF: > { %314 = sbr.rel (!%p1139_p3) target bundleno = 44 (0x2c), region = 66  ;;  %s316_s8 = sand.u32 (%p1139_p3), 1, %s1068_s16  }
  0x25   : > { %s966_s9 = sshll.u32 (%p1139_p3), %s1076_s18, 3  ;;  %s880_s10 = sshll.u32 (%p1139_p3), %s316_s8, 5 }
  0x26   : > { %s324_s13 = scalar_lea.vmem (%p1139_p3), %s1281_s3, %s966_s9  ;;  %s318_s14 = scalar_lea.vmem (%p1139_p3), [#allocation4], %s880_s10 }
  0x27   : > { %v359_v16 = vld [vmem:[%s324_s13] sm:$0xff] (%p1139_p3)  ;;  %v361_v17 = vld [vmem:[%s324_s13 + $0x10] sm:$0xff] (%p1139_p3) }
  0x28   : > { %v363_v18 = vld [vmem:[%s324_s13 + $0x20] sm:$0xff] (%p1139_p3)  ;;  %360 = vst [vmem:[%s318_s14] sm:$0xff] (%p1139_p3), %v359_v16  ;;  %v365_v19 = vld [vmem:[%s324_s13 + $0x30] sm:$0xff] (%p1139_p3) }
  0x29   : > { %362 = vst [vmem:[%s318_s14 + $0x8] sm:$0xff] %v361_v17 }
  0x2a   : > { %364 = vst [vmem:[%s318_s14 + $0x10] sm:$0xff] %v363_v18 }
  0x2b   : > { %366 = vst [vmem:[%s318_s14 + $0x18] sm:$0xff] %v365_v19 }
  0x2c PF: > { %p883_p8 = scmp.ge.s32.totalorder %s1080_s19, 1  ;;  %p371_p9 = scmp.lt.s32.totalorder %s1080_s19, 3 }
  0x2e   : > { %p372_p10 = pnand %p883_p8, %p371_p9 }
  0x2f   : > { %s378_s21 = sand.u32 (!%p372_p10), 1, %s1064_s15   ;;  %s887_s30 = sshll.u32 (!%p372_p10), %s1072_s17, 1 }
  0x30   : > { %375 = sbr.rel (%p372_p10) target bundleno = 245 (0xf5), region = 104  ;;  %s884_s22 = sshll.u32 (!%p372_p10), %s378_s21, 7 }
  0x31   : > { %s1191_s23 = scalar_lea.vmem (!%p372_p10), [#allocation3], %s884_s22  ;;  %p437_p11 = scmp.lt.s32.totalorder (!%p372_p10), %s887_s30, 3 }
  0x32   : > { %s1234_s5 = sshll.u32 (!%p372_p10), %s378_s21, 5 }
  0x33   : > { %s1240_s9 = scalar_lea.vmem (!%p372_p10), [#allocation4], %s1234_s5  ;;  %s1246_s15 = scalar_lea.vmem (!%p372_p10), [#allocation5], %s1234_s5 }
  0x35   : > { %v954_v20 = vld [vmem:[%s1191_s23 + $0x70] sm:$0xf]  ;;  %v984_v21 = vld [vmem:[%s1191_s23 + $0x74] sm:$0xf0]  ;;  %v983_v22 = vld [vmem:[%s1191_s23 + $0x74] sm:$0xf] }
  0x36   : > { %v955_v23 = vor.u32 %v984_v21, %v954_v20  ;;  %v956_v24 = vld [vmem:[%s1191_s23 + $0x78] sm:$0xf0]  ;;  %v946_v25 = vld [vmem:[%s1191_s23 + $0x60] sm:$0xf]  ;;  %v982_v26 = vld [vmem:[%s1191_s23 + $0x64] sm:$0xf0] }
  0x37   : > { %v959_v27 = vor.u32 %v983_v22, %v956_v24  ;;  %v981_v28 = vld [vmem:[%s1191_s23 + $0x64] sm:$0xf]  ;;  %v948_v29 = vld [vmem:[%s1191_s23 + $0x68] sm:$0xf0]  ;;  %v947_v30 = vor.u32 %v982_v26, %v946_v25  ;;  %v938_v32 = vld [vmem:[%s1191_s23 + $0x50] sm:$0xf] }
  0x38   : > { %577 = vmatpush.bf16.msra.mxu0 %v955_v23  ;;  %986 = vmatpush.bf16.msra.mxu2 %v955_v23  ;;  %v951_v31 = vor.u32 %v981_v28, %v948_v29  ;;  %v980_v33 = vld [vmem:[%s1191_s23 + $0x54] sm:$0xf0]  ;;  %v979_v34 = vld [vmem:[%s1191_s23 + $0x54] sm:$0xf]  ;;  %v940_v35 = vld [vmem:[%s1191_s23 + $0x58] sm:$0xf0] }
  0x39   : > { %596 = vmatpush.bf16.msra.mxu1 %v959_v27  ;;  %994 = vmatpush.bf16.msra.mxu3 %v959_v27  ;;  %v939_v36 = vor.u32 %v980_v33, %v938_v32  ;;  %v943_v37 = vor.u32 %v979_v34, %v940_v35  ;;  %v930_v38 = vld [vmem:[%s1191_s23 + $0x40] sm:$0xf]  ;;  %v978_v39 = vld [vmem:[%s1191_s23 + $0x44] sm:$0xf0]  ;;  %v977_v40 = vld [vmem:[%s1191_s23 + $0x44] sm:$0xf] }
  0x3a   : > { %v932_v41 = vld [vmem:[%s1191_s23 + $0x48] sm:$0xf0]  ;;  %v931_v42 = vor.u32 %v978_v39, %v930_v38  ;;  %v922_v44 = vld [vmem:[%s1191_s23 + $0x30] sm:$0xf]  ;;  %v976_v45 = vld [vmem:[%s1191_s23 + $0x34] sm:$0xf0] }
  0x3b   : > { %v935_v43 = vor.u32 %v977_v40, %v932_v41  ;;  %v975_v46 = vld [vmem:[%s1191_s23 + $0x34] sm:$0xf]  ;;  %v924_v47 = vld [vmem:[%s1191_s23 + $0x38] sm:$0xf0]  ;;  %v923_v48 = vor.u32 %v976_v45, %v922_v44  ;;  %v914_v50 = vld [vmem:[%s1191_s23 + $0x20] sm:$0xf] }
  0x3c   : > { %578 = vmatpush.bf16.msra.mxu0 %v947_v30  ;;  %987 = vmatpush.bf16.msra.mxu2 %v947_v30  ;;  %v927_v49 = vor.u32 %v975_v46, %v924_v47  ;;  %v974_v51 = vld [vmem:[%s1191_s23 + $0x24] sm:$0xf0]  ;;  %v973_v52 = vld [vmem:[%s1191_s23 + $0x24] sm:$0xf]  ;;  %v916_v53 = vld [vmem:[%s1191_s23 + $0x28] sm:$0xf0] }
  0x3d   : > { %597 = vmatpush.bf16.msra.mxu1 %v951_v31  ;;  %995 = vmatpush.bf16.msra.mxu3 %v951_v31  ;;  %v915_v54 = vor.u32 %v974_v51, %v914_v50  ;;  %v919_v55 = vor.u32 %v973_v52, %v916_v53  ;;  %v906_v56 = vld [vmem:[%s1191_s23 + $0x10] sm:$0xf]  ;;  %v972_v57 = vld [vmem:[%s1191_s23 + $0x14] sm:$0xf0]  ;;  %v971_v58 = vld [vmem:[%s1191_s23 + $0x14] sm:$0xf] }
  0x3e   : > { %v908_v59 = vld [vmem:[%s1191_s23 + $0x18] sm:$0xf0]  ;;  %v907_v60 = vor.u32 %v972_v57, %v906_v56  ;;  %v898_v62 = vld [vmem:[%s1191_s23] sm:$0xf]  ;;  %v970_v63 = vld [vmem:[%s1191_s23 + $0x4] sm:$0xf0] }
  0x3f   : > { %v911_v61 = vor.u32 %v971_v58, %v908_v59  ;;  %v969_v0 = vld [vmem:[%s1191_s23 + $0x4] sm:$0xf]  ;;  %v900_v1 = vld [vmem:[%s1191_s23 + $0x8] sm:$0xf0]  ;;  %v899_v2 = vor.u32 %v970_v63, %v898_v62  ;;  %s1292_s30 = smov (!%p437_p11, %s887_s30), 3  ;;  %v658_v16 = vld [vmem:[%s1240_s9 + $0x10] sm:$0xff] }
  0x40   : > { %579 = vmatpush.bf16.msra.mxu0 %v939_v36  ;;  %988 = vmatpush.bf16.msra.mxu2 %v939_v36  ;;  %v903_v3 = vor.u32 %v969_v0, %v900_v1  ;;  %v967_v4 = vld [vmem:[%s1278_s0] sm:$0xff]  ;;  %v968_v5 = vld [vmem:[%s1278_s0 + $0x8] sm:$0xff]  ;;  %s439_s8 = scalar_lea.vmem %s1280_s2, %s1292_s30  ;;  %v664_v21 = vunpack.c.l.bf16 %v658_v16  ;;  %v665_v24 = vunpack.c.h.bf16 %v658_v16  ;;  %s985_s10 = sshll.u32 (%p1146_p6), %s1072_s17, 3 }
  0x41   : > { %598 = vmatpush.bf16.msra.mxu1 %v943_v37  ;;  %996 = vmatpush.bf16.msra.mxu3 %v943_v37  ;;  %v642_v6 = vld [vmem:[%s439_s8] sm:$0x3]  ;;  %v657_v19 = vld [vmem:[%s1240_s9 + $0x8] sm:$0xff]  ;;  %v659_v37 = vld [vmem:[%s1240_s9 + $0x18] sm:$0xff]  ;;  %s704_s13 = scalar_lea.vmem (%p1146_p6), %s1282_s4, %s985_s10 }
  0x42   : > { %v656_v7 = vld [vmem:[%s1240_s9] sm:$0xff]  ;;  %v644_v8 = vperm.slane %v642_v6, 0  ;;  %v645_v9 = vperm.slane %v642_v6, 1  ;;  %v662_v27 = vunpack.c.l.bf16 %v657_v19  ;;  %v663_v31 = vunpack.c.h.bf16 %v657_v19 }
  0x43   : > { %v660_v10 = vunpack.c.l.bf16 %v656_v7  ;;  %v661_v12 = vunpack.c.h.bf16 %v656_v7  ;;  %v667_v47 = vunpack.c.h.bf16 %v659_v37 }
  0x44   : > { %580 = vmatpush.bf16.msra.mxu0 %v931_v42  ;;  %989 = vmatpush.bf16.msra.mxu2 %v931_v42 }
  0x45   : > { %599 = vmatpush.bf16.msra.mxu1 %v935_v43  ;;  %997 = vmatpush.bf16.msra.mxu3 %v935_v43  ;;  %v666_v43 = vunpack.c.l.bf16 %v659_v37 }
  0x48   : > { %581 = vmatpush.bf16.msra.mxu0 %v923_v48  ;;  %990 = vmatpush.bf16.msra.mxu2 %v923_v48 }
  0x49   : > { %600 = vmatpush.bf16.msra.mxu1 %v927_v49  ;;  %998 = vmatpush.bf16.msra.mxu3 %v927_v49 }
  0x4c   : > { %582 = vmatpush.bf16.msra.mxu0 %v915_v54  ;;  %991 = vmatpush.bf16.msra.mxu2 %v915_v54 }
  0x4d   : > { %601 = vmatpush.bf16.msra.mxu1 %v919_v55  ;;  %999 = vmatpush.bf16.msra.mxu3 %v919_v55 }
  0x50   : > { %583 = vmatpush.bf16.msra.mxu0 %v907_v60  ;;  %992 = vmatpush.bf16.msra.mxu2 %v907_v60 }
  0x51   : > { %602 = vmatpush.bf16.msra.mxu1 %v911_v61  ;;  %1000 = vmatpush.bf16.msra.mxu3 %v911_v61 }
  0x54   : > { %584 = vmatpush.bf16.msra.mxu0 %v899_v2  ;;  %993 = vmatpush.bf16.msra.mxu2 %v899_v2 }
  0x55   : > { %603 = vmatpush.bf16.msra.mxu1 %v903_v3  ;;  %1001 = vmatpush.bf16.msra.mxu3 %v903_v3 }
  0x57   : > { %585 = vmatmul.bf16.vlgmr.msra.gmra.mxu0 %v967_v4  ;;  %590 = vmatmul.bf16.vlgmr.msra.gmra.mxu2 %v968_v5 }
  0x58   : > { %604 = vmatmul.bf16.vlgmr.msra.gmra.mxu1 %v967_v4  ;;  %609 = vmatmul.bf16.vlgmr.msra.gmra.mxu3 %v968_v5 }
  0xd4   : > { %v586_v11 = vpop.f32.mrf.mxu0 }
  0xd5   : > { %v648_v13 = vadd.f32 %v644_v8, %v586_v11  ;;  %v605_v14 = vpop.f32.mrf.mxu1 }
  0xd6   : > { %v649_v15 = vadd.f32 %v645_v9, %v605_v14 }
  0xd7   : > { %v668_v17 = vadd.f32 %v660_v10, %v648_v13 }
  0xd8   : > { %v669_v18 = vadd.f32 %v661_v12, %v649_v15 }
  0xd9   : > { %v676_v20 = vmax.f32 %v668_v17, 0.0 }
  0xda   : > { %v677_v22 = vmax.f32 %v669_v18, 0.0  ;;  %v591_v23 = vpop.f32.mrf.mxu2 }
  0xdb   : > { %v652_v25 = vadd.f32 %v644_v8, %v591_v23  ;;  %v610_v26 = vpop.f32.mrf.mxu3 }
  0xdc   : > { %v684_v28 = vpack.c.bf16 %v677_v22, %v676_v20  ;;  %v653_v29 = vadd.f32 %v645_v9, %v610_v26  ;;  %v588_v30 = vpop.f32.mrf.mxu0 }
  0xdd   : > { %v672_v32 = vadd.f32 %v664_v21, %v652_v25  ;;  %v650_v33 = vadd.f32 %v644_v8, %v588_v30  ;;  %v607_v34 = vpop.f32.mrf.mxu1 }
  0xde   : > { %688 = vst [vmem:[%s1246_s15] sm:$0xff] %v684_v28  ;;  %v673_v35 = vadd.f32 %v665_v24, %v653_v29  ;;  %v651_v36 = vadd.f32 %v645_v9, %v607_v34 }
  0xdf   : > { %v680_v38 = vmax.f32 %v672_v32, 0.0  ;;  %v670_v39 = vadd.f32 %v662_v27, %v650_v33 }
  0xe0   : > { %v681_v40 = vmax.f32 %v673_v35, 0.0  ;;  %v671_v41 = vadd.f32 %v663_v31, %v651_v36 }
  0xe1   : > { %v678_v42 = vmax.f32 %v670_v39, 0.0 }
  0xe2   : > { %v686_v44 = vpack.c.bf16 %v681_v40, %v680_v38  ;;  %v679_v45 = vmax.f32 %v671_v41, 0.0  ;;  %v593_v46 = vpop.f32.mrf.mxu2 }
  0xe3   : > { %v654_v48 = vadd.f32 %v644_v8, %v593_v46  ;;  %v612_v49 = vpop.f32.mrf.mxu3 }
  0xe4   : > { %690 = vst [vmem:[%s1246_s15 + $0x10] sm:$0xff] %v686_v44  ;;  %v685_v50 = vpack.c.bf16 %v679_v45, %v678_v42  ;;  %v655_v51 = vadd.f32 %v645_v9, %v612_v49 }
  0xe5   : > { %v674_v52 = vadd.f32 %v666_v43, %v654_v48  ;;  %v739_v57 = vld [vmem:[%s1246_s15] sm:$0xff] (%p1146_p6) }
  0xe6   : > { %689 = vst [vmem:[%s1246_s15 + $0x8] sm:$0xff] %v685_v50  ;;  %v675_v53 = vadd.f32 %v667_v47, %v655_v51 }
  0xe7   : > { %v682_v54 = vmax.f32 %v674_v52, 0.0  ;;  %740 = vst [vmem:[%s704_s13] sm:$0xff] (%p1146_p6), %v739_v57 }
  0xe8   : > { %v683_v55 = vmax.f32 %v675_v53, 0.0  ;;  %698 = sbr.rel (!%p1146_p6) target bundleno = 245 (0xf5), region = 124 }
  0xea   : > { %v687_v56 = vpack.c.bf16 %v683_v55, %v682_v54 }
  0xeb   : > { %v743_v59 = vld [vmem:[%s1246_s15 + $0x10] sm:$0xff] (%p1146_p6) }
  0xec   : > { %691 = vst [vmem:[%s1246_s15 + $0x18] sm:$0xff] %v687_v56 }
  0xed   : > { %v741_v58 = vld [vmem:[%s1246_s15 + $0x8] sm:$0xff]  ;;  %744 = vst [vmem:[%s704_s13 + $0x20] sm:$0xff] %v743_v59 }
  0xee   : > { %742 = vst [vmem:[%s704_s13 + $0x10] sm:$0xff] %v741_v58 }
  0xf3   : > { %v745_v60 = vld [vmem:[%s1246_s15 + $0x18] sm:$0xff] }
  0xf4   : > { %746 = vst [vmem:[%s704_s13 + $0x30] sm:$0xff] %v745_v60 }
  0xf5 PF: > { %s14_s19 = sadd.s32 1, %s1080_s19   ;;  %s1285_s15 = smov %s1068_s16 }
  0xf6   : > { %p11_p12 = scmp.ge.s32.totalorder %s14_s19, 4   ;;  %s1286_s16 = smov %s1151_s26 }
  0xf7   : > { %s1287_s17 = smov %s1076_s18  ;;  %s1288_s18 = smov %s1290_s20 }
  0xf8   :  { %13 = sbr.rel (!%p11_p12) target bundleno = 3 (0x3), region = 207 }

// kernel: resnet_forward.54
= control target key start
LH: loop header
LB: loop body
LE: loop exit
PB: predicated region body
PF: predicated region fallthrough
CT: control target
= control target key end

     0   :  { %s1237_s12 = smov 0   ;;  %s1239_s13 = smov 0   ;;  %s1485_s0 = inlined_call_operand.vmem [shape: bf16[32,256], index: 0, kind: input, shape index: {}]   ;;  %s1486_s1 = inlined_call_operand.vmem [shape: bf16[256,512], index: 1, kind: input, shape index: {}]   ;;  %s1487_s2 = inlined_call_operand.vmem [shape: f32[1,512], index: 2, kind: input, shape index: {}]   ;;  %s1488_s3 = inlined_call_operand.vmem [shape: bf16[32,512], index: 3, kind: output, shape index: {}]  }
   0x1   :  { %s1241_s14 = smov 0   ;;  %s1243_s15 = smov 0  }
   0x2   :  { %s1245_s16 = smov 0  }
   0x3 LB: > { %s28_s17 = sadd.s32 1, %s1211_s15  ;;  %s938_s18 = sadd.s32 4294967295, %s1215_s16   ;;  %s1215_s16 = sphi %s1245_s16, %s13_s16   ;;  %s1211_s15 = sphi %s1243_s15, %s1493_s15   ;;  %s1207_s14 = sphi %s1241_s14, %s1492_s14   ;;  %s1203_s13 = sphi %s1239_s13, %s1491_s13   ;;  %s1199_s12 = sphi %s1237_s12, %s1490_s12  }
   0x4   : > { %p30_p0 = scmp.ge.s32.totalorder %s28_s17, 2  ;;  %p76_p1 = scmp.ne.s32.totalorder %s1203_s13, %s1199_s12 }
   0x5   : > { %p77_p2 = scmp.eq.s32.totalorder %s1215_s16, 0  ;;  %p134_p4 = scmp.eq.s32.totalorder %s938_s18, 1 }
   0x6   : > { %s1495_s17 = smov (%p30_p0, %s28_s17), 0  ;;  %s69_s20 = sadd.s32 1, %s1203_s13 }
   0x7   : > { %p78_p3 = por %p77_p2, %p76_p1  ;;  %s65_s19 = ssub.s32 %s1211_s15, %s1495_s17 }
   0x8   : > { %p67_p5 = scmp.eq.s32.totalorder %s65_s19, 0  ;;  %p1272_p6 = por %p134_p4, %p76_p1 }
   0x9   : > { %p942_p7 = scmp.ge.s32.totalorder %s1215_s16, 2 }
   0xa   : > { %s1277_s22 = scalar_select %p67_p5, %s1203_s13, %s69_s20  }
   0xb   : > { %171 = sbr.rel (%p942_p7) target bundleno = 52 (0x34), region = 20 }
  0x10   : > { %174 = sbr.rel (!%p78_p3) target bundleno = 52 (0x34), region = 24  ;;  %s176_s23 = sand.u32 (%p78_p3), 1, %s1203_s13  }
  0x11   : > { %s1099_s24 = sshll.u32 (%p78_p3), %s1211_s15, 3  ;;  %s943_s25 = sshll.u32 (%p78_p3), %s176_s23, 8 }
  0x12   : > { %s1285_s28 = scalar_lea.vmem (%p78_p3), %s1486_s1, %s1099_s24  ;;  %s1290_s29 = scalar_lea.vmem (%p78_p3), [#allocation3], %s943_s25 }
  0x13   : > { %v275_v0 = vld [vmem:[%s1285_s28] sm:$0xff] (%p78_p3)  ;;  %v277_v1 = vld [vmem:[%s1285_s28 + $0x10] sm:$0xff] (%p78_p3) }
  0x14   : > { %v279_v2 = vld [vmem:[%s1285_s28 + $0x20] sm:$0xff] (%p78_p3)  ;;  %276 = vst [vmem:[%s1290_s29] sm:$0xff] (%p78_p3), %v275_v0  ;;  %v281_v3 = vld [vmem:[%s1285_s28 + $0x30] sm:$0xff] (%p78_p3) }
  0x15   : > { %278 = vst [vmem:[%s1290_s29 + $0x8] sm:$0xff] %v277_v1  ;;  %v283_v4 = vld [vmem:[%s1285_s28 + $0x40] sm:$0xff]  ;;  %v285_v5 = vld [vmem:[%s1285_s28 + $0x50] sm:$0xff] }
  0x16   : > { %280 = vst [vmem:[%s1290_s29 + $0x10] sm:$0xff] %v279_v2  ;;  %v287_v6 = vld [vmem:[%s1285_s28 + $0x60] sm:$0xff]  ;;  %v289_v7 = vld [vmem:[%s1285_s28 + $0x70] sm:$0xff] }
  0x17   : > { %282 = vst [vmem:[%s1290_s29 + $0x18] sm:$0xff] %v281_v3  ;;  %v291_v8 = vld [vmem:[%s1285_s28 + $0x80] sm:$0xff]  ;;  %v293_v9 = vld [vmem:[%s1285_s28 + $0x90] sm:$0xff] }
  0x18   : > { %284 = vst [vmem:[%s1290_s29 + $0x20] sm:$0xff] %v283_v4  ;;  %v295_v10 = vld [vmem:[%s1285_s28 + $0xa0] sm:$0xff]  ;;  %v297_v11 = vld [vmem:[%s1285_s28 + $0xb0] sm:$0xff] }
  0x19   : > { %286 = vst [vmem:[%s1290_s29 + $0x28] sm:$0xff] %v285_v5  ;;  %v299_v12 = vld [vmem:[%s1285_s28 + $0xc0] sm:$0xff]  ;;  %v301_v13 = vld [vmem:[%s1285_s28 + $0xd0] sm:$0xff] }
  0x1a   : > { %288 = vst [vmem:[%s1290_s29 + $0x30] sm:$0xff] %v287_v6  ;;  %v303_v14 = vld [vmem:[%s1285_s28 + $0xe0] sm:$0xff]  ;;  %v305_v15 = vld [vmem:[%s1285_s28 + $0xf0] sm:$0xff] }
  0x1b   : > { %290 = vst [vmem:[%s1290_s29 + $0x38] sm:$0xff] %v289_v7  ;;  %v307_v16 = vld [vmem:[%s1285_s28 + $0x100] sm:$0xff]  ;;  %v309_v17 = vld [vmem:[%s1285_s28 + $0x110] sm:$0xff] }
  0x1c   : > { %292 = vst [vmem:[%s1290_s29 + $0x40] sm:$0xff] %v291_v8  ;;  %v311_v18 = vld [vmem:[%s1285_s28 + $0x120] sm:$0xff]  ;;  %v313_v19 = vld [vmem:[%s1285_s28 + $0x130] sm:$0xff] }
  0x1d   : > { %294 = vst [vmem:[%s1290_s29 + $0x48] sm:$0xff] %v293_v9  ;;  %v315_v20 = vld [vmem:[%s1285_s28 + $0x140] sm:$0xff]  ;;  %v317_v21 = vld [vmem:[%s1285_s28 + $0x150] sm:$0xff] }
  0x1e   : > { %296 = vst [vmem:[%s1290_s29 + $0x50] sm:$0xff] %v295_v10  ;;  %v319_v22 = vld [vmem:[%s1285_s28 + $0x160] sm:$0xff]  ;;  %v321_v23 = vld [vmem:[%s1285_s28 + $0x170] sm:$0xff] }
  0x1f   : > { %298 = vst [vmem:[%s1290_s29 + $0x58] sm:$0xff] %v297_v11  ;;  %v323_v24 = vld [vmem:[%s1285_s28 + $0x180] sm:$0xff]  ;;  %v325_v25 = vld [vmem:[%s1285_s28 + $0x190] sm:$0xff] }
  0x20   : > { %300 = vst [vmem:[%s1290_s29 + $0x60] sm:$0xff] %v299_v12  ;;  %v327_v26 = vld [vmem:[%s1285_s28 + $0x1a0] sm:$0xff]  ;;  %v329_v27 = vld [vmem:[%s1285_s28 + $0x1b0] sm:$0xff] }
  0x21   : > { %302 = vst [vmem:[%s1290_s29 + $0x68] sm:$0xff] %v301_v13  ;;  %v331_v28 = vld [vmem:[%s1285_s28 + $0x1c0] sm:$0xff]  ;;  %v333_v29 = vld [vmem:[%s1285_s28 + $0x1d0] sm:$0xff] }
  0x22   : > { %304 = vst [vmem:[%s1290_s29 + $0x70] sm:$0xff] %v303_v14  ;;  %v335_v30 = vld [vmem:[%s1285_s28 + $0x1e0] sm:$0xff]  ;;  %v337_v31 = vld [vmem:[%s1285_s28 + $0x1f0] sm:$0xff] }
  0x23   : > { %306 = vst [vmem:[%s1290_s29 + $0x78] sm:$0xff] %v305_v15 }
  0x24   : > { %308 = vst [vmem:[%s1290_s29 + $0x80] sm:$0xff] %v307_v16 }
  0x25   : > { %310 = vst [vmem:[%s1290_s29 + $0x88] sm:$0xff] %v309_v17 }
  0x26   : > { %312 = vst [vmem:[%s1290_s29 + $0x90] sm:$0xff] %v311_v18 }
  0x27   : > { %314 = vst [vmem:[%s1290_s29 + $0x98] sm:$0xff] %v313_v19 }
  0x28   : > { %316 = vst [vmem:[%s1290_s29 + $0xa0] sm:$0xff] %v315_v20 }
  0x29   : > { %318 = vst [vmem:[%s1290_s29 + $0xa8] sm:$0xff] %v317_v21 }
  0x2a   : > { %320 = vst [vmem:[%s1290_s29 + $0xb0] sm:$0xff] %v319_v22 }
  0x2b   : > { %322 = vst [vmem:[%s1290_s29 + $0xb8] sm:$0xff] %v321_v23 }
  0x2c   : > { %324 = vst [vmem:[%s1290_s29 + $0xc0] sm:$0xff] %v323_v24 }
  0x2d   : > { %326 = vst [vmem:[%s1290_s29 + $0xc8] sm:$0xff] %v325_v25 }
  0x2e   : > { %328 = vst [vmem:[%s1290_s29 + $0xd0] sm:$0xff] %v327_v26 }
  0x2f   : > { %330 = vst [vmem:[%s1290_s29 + $0xd8] sm:$0xff] %v329_v27 }
  0x30   : > { %332 = vst [vmem:[%s1290_s29 + $0xe0] sm:$0xff] %v331_v28 }
  0x31   : > { %334 = vst [vmem:[%s1290_s29 + $0xe8] sm:$0xff] %v333_v29 }
  0x32   : > { %336 = vst [vmem:[%s1290_s29 + $0xf0] sm:$0xff] %v335_v30 }
  0x33   : > { %338 = vst [vmem:[%s1290_s29 + $0xf8] sm:$0xff] %v337_v31 }
  0x34 PF: > { %p946_p8 = scmp.ge.s32.totalorder %s1215_s16, 1  ;;  %p351_p9 = scmp.lt.s32.totalorder %s1215_s16, 3 }
  0x36   : > { %p352_p10 = pnand %p946_p8, %p351_p9 }
  0x37   : > { %s358_s30 = sand.u32 (!%p352_p10), 1, %s1199_s12  }
  0x38   : > { %355 = sbr.rel (%p352_p10) target bundleno = 268 (0x10c), region = 66  ;;  %s947_s4 = sshll.u32 (!%p352_p10), %s358_s30, 8 }
  0x39   : > { %s1358_s5 = scalar_lea.vmem (!%p352_p10), [#allocation3], %s947_s4  ;;  %s949_s4 = sshll.u32 (!%p352_p10), %s1207_s14, 1 }
  0x3a   : > { %p409_p11 = scmp.lt.s32.totalorder (!%p352_p10), %s949_s4, 3  ;;  %s948_s8 = sshll.u32 (!%p352_p10), %s358_s30, 5 }
  0x3b   : > { %s1454_s9 = scalar_lea.vmem (!%p352_p10), [#allocation4], %s948_s8 }
  0x3d   : > { %v1024_v32 = vld [vmem:[%s1358_s5 + $0x70] sm:$0xf]  ;;  %v1119_v33 = vld [vmem:[%s1358_s5 + $0x74] sm:$0xf0]  ;;  %v1118_v37 = vld [vmem:[%s1358_s5 + $0x74] sm:$0xf] }
  0x3e   : > { %v1088_v34 = vld [vmem:[%s1358_s5 + $0xf0] sm:$0xf]  ;;  %v1025_v35 = vor.u32 %v1119_v33, %v1024_v32  ;;  %v1135_v36 = vld [vmem:[%s1358_s5 + $0xf4] sm:$0xf0]  ;;  %v1026_v38 = vld [vmem:[%s1358_s5 + $0x78] sm:$0xf0] }
  0x3f   : > { %v1089_v39 = vor.u32 %v1135_v36, %v1088_v34  ;;  %v1029_v40 = vor.u32 %v1118_v37, %v1026_v38  ;;  %v1134_v41 = vld [vmem:[%s1358_s5 + $0xf4] sm:$0xf]  ;;  %v1090_v42 = vld [vmem:[%s1358_s5 + $0xf8] sm:$0xf0]  ;;  %v1016_v43 = vld [vmem:[%s1358_s5 + $0x60] sm:$0xf] }
  0x40   : > { %651 = vmatpush.bf16.msra.mxu0 %v1025_v35  ;;  %v1093_v44 = vor.u32 %v1134_v41, %v1090_v42  ;;  %v1117_v45 = vld [vmem:[%s1358_s5 + $0x64] sm:$0xf0]  ;;  %v1080_v46 = vld [vmem:[%s1358_s5 + $0xe0] sm:$0xf]  ;;  %v1116_v50 = vld [vmem:[%s1358_s5 + $0x64] sm:$0xf] }
  0x41   : > { %v1133_v47 = vld [vmem:[%s1358_s5 + $0xe4] sm:$0xf0]  ;;  %670 = vmatpush.bf16.msra.mxu1 %v1089_v39  ;;  %689 = vmatpush.bf16.msra.mxu2 %v1029_v40  ;;  %v1017_v48 = vor.u32 %v1117_v45, %v1016_v43  ;;  %v1018_v51 = vld [vmem:[%s1358_s5 + $0x68] sm:$0xf0]  ;;  %v1132_v52 = vld [vmem:[%s1358_s5 + $0xe4] sm:$0xf] }
  0x42   : > { %v1081_v49 = vor.u32 %v1133_v47, %v1080_v46  ;;  %708 = vmatpush.bf16.msra.mxu3 %v1093_v44  ;;  %v1021_v53 = vor.u32 %v1116_v50, %v1018_v51  ;;  %v1082_v54 = vld [vmem:[%s1358_s5 + $0xe8] sm:$0xf0]  ;;  %v1008_v55 = vld [vmem:[%s1358_s5 + $0x50] sm:$0xf]  ;;  %v1115_v56 = vld [vmem:[%s1358_s5 + $0x54] sm:$0xf0] }
  0x43   : > { %v1085_v57 = vor.u32 %v1132_v52, %v1082_v54  ;;  %v1072_v58 = vld [vmem:[%s1358_s5 + $0xd0] sm:$0xf]  ;;  %v1131_v59 = vld [vmem:[%s1358_s5 + $0xd4] sm:$0xf0]  ;;  %v1114_v60 = vld [vmem:[%s1358_s5 + $0x54] sm:$0xf]  ;;  %v1009_v61 = vor.u32 %v1115_v56, %v1008_v55 }
  0x44   : > { %652 = vmatpush.bf16.msra.mxu0 %v1017_v48  ;;  %v1010_v62 = vld [vmem:[%s1358_s5 + $0x58] sm:$0xf0]  ;;  %v1130_v63 = vld [vmem:[%s1358_s5 + $0xd4] sm:$0xf]  ;;  %v1073_v1 = vor.u32 %v1131_v59, %v1072_v58  ;;  %v1000_v3 = vld [vmem:[%s1358_s5 + $0x40] sm:$0xf] }
  0x45   : > { %v1074_v0 = vld [vmem:[%s1358_s5 + $0xd8] sm:$0xf0]  ;;  %671 = vmatpush.bf16.msra.mxu1 %v1081_v49  ;;  %690 = vmatpush.bf16.msra.mxu2 %v1021_v53  ;;  %v1013_v2 = vor.u32 %v1114_v60, %v1010_v62  ;;  %v1113_v4 = vld [vmem:[%s1358_s5 + $0x44] sm:$0xf0]  ;;  %v1064_v5 = vld [vmem:[%s1358_s5 + $0xc0] sm:$0xf] }
  0x46   : > { %709 = vmatpush.bf16.msra.mxu3 %v1085_v57  ;;  %v1077_v6 = vor.u32 %v1130_v63, %v1074_v0  ;;  %v1129_v7 = vld [vmem:[%s1358_s5 + $0xc4] sm:$0xf0]  ;;  %v1112_v8 = vld [vmem:[%s1358_s5 + $0x44] sm:$0xf]  ;;  %v1002_v9 = vld [vmem:[%s1358_s5 + $0x48] sm:$0xf0]  ;;  %v1001_v12 = vor.u32 %v1113_v4, %v1000_v3 }
  0x47   : > { %v1128_v10 = vld [vmem:[%s1358_s5 + $0xc4] sm:$0xf]  ;;  %v1066_v11 = vld [vmem:[%s1358_s5 + $0xc8] sm:$0xf0]  ;;  %v1065_v13 = vor.u32 %v1129_v7, %v1064_v5  ;;  %v1005_v14 = vor.u32 %v1112_v8, %v1002_v9  ;;  %v992_v15 = vld [vmem:[%s1358_s5 + $0x30] sm:$0xf] }
  0x48   : > { %653 = vmatpush.bf16.msra.mxu0 %v1009_v61  ;;  %v1111_v16 = vld [vmem:[%s1358_s5 + $0x34] sm:$0xf0]  ;;  %v1056_v17 = vld [vmem:[%s1358_s5 + $0xb0] sm:$0xf]  ;;  %v1069_v18 = vor.u32 %v1128_v10, %v1066_v11  ;;  %v1110_v20 = vld [vmem:[%s1358_s5 + $0x34] sm:$0xf] }
  0x49   : > { %672 = vmatpush.bf16.msra.mxu1 %v1073_v1  ;;  %691 = vmatpush.bf16.msra.mxu2 %v1013_v2  ;;  %v1127_v19 = vld [vmem:[%s1358_s5 + $0xb4] sm:$0xf0]  ;;  %v994_v21 = vld [vmem:[%s1358_s5 + $0x38] sm:$0xf0]  ;;  %v1126_v22 = vld [vmem:[%s1358_s5 + $0xb4] sm:$0xf]  ;;  %v993_v24 = vor.u32 %v1111_v16, %v992_v15 }
  0x4a   : > { %710 = vmatpush.bf16.msra.mxu3 %v1077_v6  ;;  %v1058_v23 = vld [vmem:[%s1358_s5 + $0xb8] sm:$0xf0]  ;;  %v1057_v25 = vor.u32 %v1127_v19, %v1056_v17  ;;  %v997_v26 = vor.u32 %v1110_v20, %v994_v21  ;;  %v984_v27 = vld [vmem:[%s1358_s5 + $0x20] sm:$0xf]  ;;  %v1109_v28 = vld [vmem:[%s1358_s5 + $0x24] sm:$0xf0] }
  0x4b   : > { %v1048_v29 = vld [vmem:[%s1358_s5 + $0xa0] sm:$0xf]  ;;  %v1061_v30 = vor.u32 %v1126_v22, %v1058_v23  ;;  %v1125_v31 = vld [vmem:[%s1358_s5 + $0xa4] sm:$0xf0]  ;;  %v1108_v32 = vld [vmem:[%s1358_s5 + $0x24] sm:$0xf]  ;;  %v985_v36 = vor.u32 %v1109_v28, %v984_v27 }
  0x4c   : > { %654 = vmatpush.bf16.msra.mxu0 %v1001_v12  ;;  %v986_v33 = vld [vmem:[%s1358_s5 + $0x28] sm:$0xf0]  ;;  %v1124_v34 = vld [vmem:[%s1358_s5 + $0xa4] sm:$0xf]  ;;  %v1049_v37 = vor.u32 %v1125_v31, %v1048_v29  ;;  %v976_v39 = vld [vmem:[%s1358_s5 + $0x10] sm:$0xf] }
  0x4d   : > { %673 = vmatpush.bf16.msra.mxu1 %v1065_v13  ;;  %692 = vmatpush.bf16.msra.mxu2 %v1005_v14  ;;  %v1050_v35 = vld [vmem:[%s1358_s5 + $0xa8] sm:$0xf0]  ;;  %v989_v38 = vor.u32 %v1108_v32, %v986_v33  ;;  %v1107_v40 = vld [vmem:[%s1358_s5 + $0x14] sm:$0xf0]  ;;  %v1040_v41 = vld [vmem:[%s1358_s5 + $0x90] sm:$0xf] }
  0x4e   : > { %711 = vmatpush.bf16.msra.mxu3 %v1069_v18  ;;  %v1053_v42 = vor.u32 %v1124_v34, %v1050_v35  ;;  %v1123_v43 = vld [vmem:[%s1358_s5 + $0x94] sm:$0xf0]  ;;  %v1106_v44 = vld [vmem:[%s1358_s5 + $0x14] sm:$0xf]  ;;  %v978_v45 = vld [vmem:[%s1358_s5 + $0x18] sm:$0xf0]  ;;  %v977_v48 = vor.u32 %v1107_v40, %v976_v39 }
  0x4f   : > { %v1122_v46 = vld [vmem:[%s1358_s5 + $0x94] sm:$0xf]  ;;  %v1042_v47 = vld [vmem:[%s1358_s5 + $0x98] sm:$0xf0]  ;;  %v1041_v49 = vor.u32 %v1123_v43, %v1040_v41  ;;  %v981_v50 = vor.u32 %v1106_v44, %v978_v45  ;;  %v968_v51 = vld [vmem:[%s1358_s5] sm:$0xf] }
  0x50   : > { %655 = vmatpush.bf16.msra.mxu0 %v993_v24  ;;  %v1105_v52 = vld [vmem:[%s1358_s5 + $0x4] sm:$0xf0]  ;;  %v1032_v53 = vld [vmem:[%s1358_s5 + $0x80] sm:$0xf]  ;;  %v1045_v54 = vor.u32 %v1122_v46, %v1042_v47  ;;  %v1104_v56 = vld [vmem:[%s1358_s5 + $0x4] sm:$0xf] }
  0x51   : > { %674 = vmatpush.bf16.msra.mxu1 %v1057_v25  ;;  %693 = vmatpush.bf16.msra.mxu2 %v997_v26  ;;  %v1121_v55 = vld [vmem:[%s1358_s5 + $0x84] sm:$0xf0]  ;;  %v970_v57 = vld [vmem:[%s1358_s5 + $0x8] sm:$0xf0]  ;;  %v1120_v58 = vld [vmem:[%s1358_s5 + $0x84] sm:$0xf]  ;;  %v969_v60 = vor.u32 %v1105_v52, %v968_v51 }
  0x52   : > { %712 = vmatpush.bf16.msra.mxu3 %v1061_v30  ;;  %v1034_v59 = vld [vmem:[%s1358_s5 + $0x88] sm:$0xf0]  ;;  %v952_v61 = vld [vmem:[%s1485_s0] sm:$0xf]  ;;  %v1101_v62 = vld [vmem:[%s1485_s0 + $0x4] sm:$0xf0]  ;;  %v1033_v63 = vor.u32 %v1121_v55, %v1032_v53  ;;  %v973_v0 = vor.u32 %v1104_v56, %v970_v57 }
  0x53   : > { %v1100_v1 = vld [vmem:[%s1485_s0 + $0x4] sm:$0xf]  ;;  %v954_v2 = vld [vmem:[%s1485_s0 + $0x8] sm:$0xf0]  ;;  %v1037_v3 = vor.u32 %v1120_v58, %v1034_v59  ;;  %v953_v4 = vor.u32 %v1101_v62, %v952_v61  ;;  %v960_v6 = vld [vmem:[%s1485_s0 + $0x10] sm:$0xf] }
  0x54   : > { %656 = vmatpush.bf16.msra.mxu0 %v985_v36  ;;  %v957_v5 = vor.u32 %v1100_v1, %v954_v2  ;;  %v1103_v7 = vld [vmem:[%s1485_s0 + $0x14] sm:$0xf0]  ;;  %v1102_v8 = vld [vmem:[%s1485_s0 + $0x14] sm:$0xf]  ;;  %v962_v9 = vld [vmem:[%s1485_s0 + $0x18] sm:$0xf0] }
  0x55   : > { %675 = vmatpush.bf16.msra.mxu1 %v1049_v37  ;;  %694 = vmatpush.bf16.msra.mxu2 %v989_v38  ;;  %v961_v10 = vor.u32 %v1103_v7, %v960_v6  ;;  %v965_v11 = vor.u32 %v1102_v8, %v962_v9  ;;  %s1497_s4 = smov (!%p409_p11, %s949_s4), 3  ;;  %s1136_s12 = sshll.u32 (%p1272_p6), %s1207_s14, 3 }
  0x56   : > { %713 = vmatpush.bf16.msra.mxu3 %v1053_v42  ;;  %s411_s7 = scalar_lea.vmem %s1487_s2, %s1497_s4  ;;  %s788_s11 = scalar_lea.vmem (%p1272_p6), %s1488_s3, %s1136_s12 }
  0x57   : > { %v754_v14 = vld [vmem:[%s411_s7] sm:$0x3] }
  0x58   : > { %657 = vmatpush.bf16.msra.mxu0 %v977_v48  ;;  %v756_v16 = vperm.slane %v754_v14, 0  ;;  %v757_v18 = vperm.slane %v754_v14, 1 }
  0x59   : > { %676 = vmatpush.bf16.msra.mxu1 %v1041_v49  ;;  %695 = vmatpush.bf16.msra.mxu2 %v981_v50 }
  0x5a   : > { %714 = vmatpush.bf16.msra.mxu3 %v1045_v54 }
  0x5c   : > { %658 = vmatpush.bf16.msra.mxu0 %v969_v60 }
  0x5d   : > { %677 = vmatpush.bf16.msra.mxu1 %v1033_v63  ;;  %696 = vmatpush.bf16.msra.mxu2 %v973_v0 }
  0x5e   : > { %715 = vmatpush.bf16.msra.mxu3 %v1037_v3 }
  0x5f   : > { %659 = vmatmul.bf16.vlgmr.msra.gmra.mxu0 %v953_v4 }
  0x60   : > { %678 = vmatmul.bf16.vlgmr.msra.gmra.mxu1 %v957_v5  ;;  %697 = vmatmul.bf16.vlgmr.msra.gmra.mxu2 %v953_v4 }
  0x61   : > { %716 = vmatmul.bf16.vlgmr.msra.gmra.mxu3 %v957_v5 }
  0x6f   : > { %664 = vmatmul.bf16.gmra.mxu0 %v961_v10 }
  0x70   : > { %683 = vmatmul.bf16.gmra.mxu1 %v965_v11  ;;  %702 = vmatmul.bf16.gmra.mxu2 %v961_v10 }
  0x71   : > { %721 = vmatmul.bf16.gmra.mxu3 %v965_v11 }
  0xdc   : > { %v660_v12 = vpop.f32.mrf.mxu0 }
  0xdd   : > { %v679_v13 = vpop.f32.mrf.mxu1 }
  0xde   : > { %v680_v15 = vadd.f32 %v679_v13, %v660_v12 }
  0xe0   : > { %v760_v21 = vadd.f32 %v756_v16, %v680_v15 }
  0xe3   : > { %v698_v17 = vpop.f32.mrf.mxu2 }
  0xe4   : > { %v717_v19 = vpop.f32.mrf.mxu3  ;;  %v662_v20 = vpop.f32.mrf.mxu0 }
  0xe5   : > { %v718_v22 = vadd.f32 %v717_v19, %v698_v17  ;;  %v681_v23 = vpop.f32.mrf.mxu1 }
  0xe6   : > { %v682_v26 = vadd.f32 %v681_v23, %v662_v20 }
  0xe7   : > { %v761_v24 = vadd.f32 %v757_v18, %v718_v22 }
  0xe8   : > { %v762_v32 = vadd.f32 %v756_v16, %v682_v26 }
  0xe9   : > { %v768_v25 = vpack.c.bf16 %v761_v24, %v760_v21 }
  0xeb   : > { %772 = vst [vmem:[%s1454_s9] sm:$0xff] %v768_v25  ;;  %v700_v27 = vpop.f32.mrf.mxu2 }
  0xec   : > { %v719_v28 = vpop.f32.mrf.mxu3  ;;  %v665_v30 = vpop.f32.mrf.mxu0 }
  0xed   : > { %v720_v29 = vadd.f32 %v719_v28, %v700_v27  ;;  %v684_v31 = vpop.f32.mrf.mxu1 }
  0xee   : > { %v685_v35 = vadd.f32 %v684_v31, %v665_v30 }
  0xef   : > { %v763_v33 = vadd.f32 %v757_v18, %v720_v29 }
  0xf0   : > { %v764_v38 = vadd.f32 %v756_v16, %v685_v35 }
  0xf1   : > { %v769_v34 = vpack.c.bf16 %v763_v33, %v762_v32 }
  0xf2   : > { %v823_v51 = vld [vmem:[%s1454_s9] sm:$0xff] (%p1272_p6) }
  0xf3   : > { %773 = vst [vmem:[%s1454_s9 + $0x8] sm:$0xff] %v769_v34  ;;  %v703_v36 = vpop.f32.mrf.mxu2 }
  0xf4   : > { %v722_v37 = vpop.f32.mrf.mxu3  ;;  %v667_v41 = vpop.f32.mrf.mxu0  ;;  %824 = vst [vmem:[%s788_s11] sm:$0xff] (%p1272_p6), %v823_v51 }
  0xf5   : > { %v723_v39 = vadd.f32 %v722_v37, %v703_v36  ;;  %v686_v42 = vpop.f32.mrf.mxu1 }
  0xf6   : > { %v687_v44 = vadd.f32 %v686_v42, %v667_v41 }
  0xf7   : > { %v765_v40 = vadd.f32 %v757_v18, %v723_v39 }
  0xf8   : > { %v766_v48 = vadd.f32 %v756_v16, %v687_v44 }
  0xf9   : > { %v770_v43 = vpack.c.bf16 %v765_v40, %v764_v38 }
  0xfa   : > { %v825_v52 = vld [vmem:[%s1454_s9 + $0x8] sm:$0xff] (%p1272_p6) }
  0xfb   : > { %774 = vst [vmem:[%s1454_s9 + $0x10] sm:$0xff] %v770_v43  ;;  %v705_v45 = vpop.f32.mrf.mxu2 }
  0xfc   : > { %v724_v46 = vpop.f32.mrf.mxu3  ;;  %826 = vst [vmem:[%s788_s11 + $0x10] sm:$0xff] (%p1272_p6), %v825_v52 }
  0xfd   : > { %v725_v47 = vadd.f32 %v724_v46, %v705_v45 }
  0xff   : > { %v767_v49 = vadd.f32 %v757_v18, %v725_v47  ;;  %782 = sbr.rel (!%p1272_p6) target bundleno = 268 (0x10c), region = 82 }
 0x101   : > { %v771_v50 = vpack.c.bf16 %v767_v49, %v766_v48 }
 0x102   : > { %v827_v53 = vld [vmem:[%s1454_s9 + $0x10] sm:$0xff] (%p1272_p6) }
 0x103   : > { %775 = vst [vmem:[%s1454_s9 + $0x18] sm:$0xff] %v771_v50 }
 0x104   : > { %828 = vst [vmem:[%s788_s11 + $0x20] sm:$0xff] %v827_v53 }
 0x10a   : > { %v829_v54 = vld [vmem:[%s1454_s9 + $0x18] sm:$0xff] }
 0x10b   : > { %830 = vst [vmem:[%s788_s11 + $0x30] sm:$0xff] %v829_v54 }
 0x10c PF: > { %s13_s16 = sadd.s32 1, %s1215_s16   ;;  %s1490_s12 = smov %s1203_s13 }
 0x10d   : > { %p10_p12 = scmp.ge.s32.totalorder %s13_s16, 4   ;;  %s1491_s13 = smov %s1277_s22 }
 0x10e   : > { %s1492_s14 = smov %s1211_s15  ;;  %s1493_s15 = smov %s1495_s17 }
 0x10f   :  { %12 = sbr.rel (!%p10_p12) target bundleno = 3 (0x3), region = 157 }

// kernel: resnet_forward.58
= control target key start
LH: loop header
LB: loop body
LE: loop exit
PB: predicated region body
PF: predicated region fallthrough
CT: control target
= control target key end

     0   :  { %s830_s1 = inlined_call_operand.vmem [shape: bf16[512,128], index: 1, kind: input, shape index: {}]   ;;  %s831_s0 = inlined_call_operand.vmem [shape: bf16[32,512], index: 0, kind: input, shape index: {}]   ;;  %s832_s2 = inlined_call_operand.vmem [shape: f32[1,128], index: 2, kind: input, shape index: {}]   ;;  %s833_s3 = inlined_call_operand.vmem [shape: bf16[32,128], index: 3, kind: output, shape index: {}]  }
   0x1   :  { %v620_v0 = vld [vmem:[%s830_s1 + $0x38] sm:$0xff]  ;;  %v619_v4 = vld [vmem:[%s830_s1 + $0x30] sm:$0xff]  ;;  %v618_v8 = vld [vmem:[%s830_s1 + $0x28] sm:$0xff] }
   0x2   :  { %v628_v1 = vld [vmem:[%s830_s1 + $0x78] sm:$0xff]  ;;  %330 = vmatpush.bf16.msra.mxu0 %v620_v0  ;;  %v627_v5 = vld [vmem:[%s830_s1 + $0x70] sm:$0xff]  ;;  %v626_v9 = vld [vmem:[%s830_s1 + $0x68] sm:$0xff] }
   0x3   :  { %v636_v2 = vld [vmem:[%s830_s1 + $0xb8] sm:$0xff]  ;;  %349 = vmatpush.bf16.msra.mxu1 %v628_v1  ;;  %v635_v6 = vld [vmem:[%s830_s1 + $0xb0] sm:$0xff]  ;;  %v634_v10 = vld [vmem:[%s830_s1 + $0xa8] sm:$0xff] }
   0x4   :  { %v644_v3 = vld [vmem:[%s830_s1 + $0xf8] sm:$0xff]  ;;  %368 = vmatpush.bf16.msra.mxu2 %v636_v2  ;;  %v643_v7 = vld [vmem:[%s830_s1 + $0xf0] sm:$0xff]  ;;  %v642_v11 = vld [vmem:[%s830_s1 + $0xe8] sm:$0xff] }
   0x5   :  { %387 = vmatpush.bf16.msra.mxu3 %v644_v3  ;;  %v617_v12 = vld [vmem:[%s830_s1 + $0x20] sm:$0xff]  ;;  %v616_v16 = vld [vmem:[%s830_s1 + $0x18] sm:$0xff]  ;;  %v615_v20 = vld [vmem:[%s830_s1 + $0x10] sm:$0xff] }
   0x6   :  { %331 = vmatpush.bf16.msra.mxu0 %v619_v4  ;;  %v625_v13 = vld [vmem:[%s830_s1 + $0x60] sm:$0xff]  ;;  %v624_v17 = vld [vmem:[%s830_s1 + $0x58] sm:$0xff]  ;;  %v623_v21 = vld [vmem:[%s830_s1 + $0x50] sm:$0xff] }
   0x7   :  { %350 = vmatpush.bf16.msra.mxu1 %v627_v5  ;;  %v633_v14 = vld [vmem:[%s830_s1 + $0xa0] sm:$0xff]  ;;  %v632_v18 = vld [vmem:[%s830_s1 + $0x98] sm:$0xff]  ;;  %v631_v22 = vld [vmem:[%s830_s1 + $0x90] sm:$0xff] }
   0x8   :  { %369 = vmatpush.bf16.msra.mxu2 %v635_v6  ;;  %v641_v15 = vld [vmem:[%s830_s1 + $0xe0] sm:$0xff]  ;;  %v640_v19 = vld [vmem:[%s830_s1 + $0xd8] sm:$0xff]  ;;  %v639_v23 = vld [vmem:[%s830_s1 + $0xd0] sm:$0xff] }
   0x9   :  { %388 = vmatpush.bf16.msra.mxu3 %v643_v7  ;;  %v614_v24 = vld [vmem:[%s830_s1 + $0x8] sm:$0xff]  ;;  %v613_v28 = vld [vmem:[%s830_s1] sm:$0xff]  ;;  %v607_v33 = vld [vmem:[%s831_s0 + $0xc] sm:$0xf0] }
   0xa   :  { %332 = vmatpush.bf16.msra.mxu0 %v618_v8  ;;  %v622_v25 = vld [vmem:[%s830_s1 + $0x48] sm:$0xff]  ;;  %v621_v29 = vld [vmem:[%s830_s1 + $0x40] sm:$0xff]  ;;  %v449_v35 = vld [vmem:[%s831_s0 + $0x10] sm:$0xf0] }
   0xb   :  { %351 = vmatpush.bf16.msra.mxu1 %v626_v9  ;;  %v630_v26 = vld [vmem:[%s830_s1 + $0x88] sm:$0xff]  ;;  %v629_v30 = vld [vmem:[%s830_s1 + $0x80] sm:$0xff]  ;;  %v608_v37 = vld [vmem:[%s831_s0 + $0x14] sm:$0xf0] }
   0xc   :  { %370 = vmatpush.bf16.msra.mxu2 %v634_v10  ;;  %v638_v27 = vld [vmem:[%s830_s1 + $0xc8] sm:$0xff]  ;;  %v637_v31 = vld [vmem:[%s830_s1 + $0xc0] sm:$0xff]  ;;  %v457_v39 = vld [vmem:[%s831_s0 + $0x18] sm:$0xf0] }
   0xd   :  { %389 = vmatpush.bf16.msra.mxu3 %v642_v11  ;;  %v447_v32 = vld [vmem:[%s831_s0] sm:$0xf]  ;;  %v605_v34 = vld [vmem:[%s831_s0 + $0x4] sm:$0xf]  ;;  %v455_v36 = vld [vmem:[%s831_s0 + $0x8] sm:$0xf] }
   0xe   :  { %333 = vmatpush.bf16.msra.mxu0 %v617_v12  ;;  %v606_v38 = vld [vmem:[%s831_s0 + $0xc] sm:$0xf]  ;;  %v448_v40 = vor.u32 %v607_v33, %v447_v32  ;;  %v452_v41 = vor.u32 %v605_v34, %v449_v35  ;;  %v456_v42 = vor.u32 %v608_v37, %v455_v36  ;;  %v463_v44 = vld [vmem:[%s831_s0 + $0x20] sm:$0xf]  ;;  %v611_v45 = vld [vmem:[%s831_s0 + $0x2c] sm:$0xf0] }
   0xf   :  { %352 = vmatpush.bf16.msra.mxu1 %v625_v13  ;;  %v460_v43 = vor.u32 %v606_v38, %v457_v39  ;;  %v609_v46 = vld [vmem:[%s831_s0 + $0x24] sm:$0xf]  ;;  %v465_v47 = vld [vmem:[%s831_s0 + $0x30] sm:$0xf0]  ;;  %v471_v48 = vld [vmem:[%s831_s0 + $0x28] sm:$0xf]  ;;  %v464_v52 = vor.u32 %v611_v45, %v463_v44 }
  0x10   :  { %371 = vmatpush.bf16.msra.mxu2 %v633_v14  ;;  %v612_v49 = vld [vmem:[%s831_s0 + $0x34] sm:$0xf0]  ;;  %v610_v50 = vld [vmem:[%s831_s0 + $0x2c] sm:$0xf]  ;;  %v473_v51 = vld [vmem:[%s831_s0 + $0x38] sm:$0xf0]  ;;  %v468_v53 = vor.u32 %v609_v46, %v465_v47 }
  0x11   :  { %390 = vmatpush.bf16.msra.mxu3 %v641_v15  ;;  %v472_v54 = vor.u32 %v612_v49, %v471_v48  ;;  %v476_v55 = vor.u32 %v610_v50, %v473_v51  ;;  %v656_v1 = vld [vmem:[%s832_s2] ss:$0 sm:$0xff] }
  0x12   :  { %334 = vmatpush.bf16.msra.mxu0 %v616_v16 }
  0x13   :  { %353 = vmatpush.bf16.msra.mxu1 %v624_v17 }
  0x14   :  { %372 = vmatpush.bf16.msra.mxu2 %v632_v18 }
  0x15   :  { %391 = vmatpush.bf16.msra.mxu3 %v640_v19 }
  0x16   :  { %335 = vmatpush.bf16.msra.mxu0 %v615_v20 }
  0x17   :  { %354 = vmatpush.bf16.msra.mxu1 %v623_v21 }
  0x18   :  { %373 = vmatpush.bf16.msra.mxu2 %v631_v22 }
  0x19   :  { %392 = vmatpush.bf16.msra.mxu3 %v639_v23 }
  0x1a   :  { %336 = vmatpush.bf16.msra.mxu0 %v614_v24 }
  0x1b   :  { %355 = vmatpush.bf16.msra.mxu1 %v622_v25 }
  0x1c   :  { %374 = vmatpush.bf16.msra.mxu2 %v630_v26 }
  0x1d   :  { %393 = vmatpush.bf16.msra.mxu3 %v638_v27 }
  0x1e   :  { %337 = vmatpush.bf16.msra.mxu0 %v613_v28 }
  0x1f   :  { %356 = vmatpush.bf16.msra.mxu1 %v621_v29 }
  0x20   :  { %375 = vmatpush.bf16.msra.mxu2 %v629_v30 }
  0x21   :  { %394 = vmatpush.bf16.msra.mxu3 %v637_v31  ;;  %338 = vmatmul.bf16.vlgmr.msra.gmra.mxu0 %v448_v40 }
  0x22   :  { %357 = vmatmul.bf16.vlgmr.msra.gmra.mxu1 %v452_v41 }
  0x23   :  { %376 = vmatmul.bf16.vlgmr.msra.gmra.mxu2 %v456_v42 }
  0x24   :  { %395 = vmatmul.bf16.vlgmr.msra.gmra.mxu3 %v460_v43 }
  0x31   :  { %343 = vmatmul.bf16.gmra.mxu0 %v464_v52 }
  0x32   :  { %362 = vmatmul.bf16.gmra.mxu1 %v468_v53 }
  0x33   :  { %381 = vmatmul.bf16.gmra.mxu2 %v472_v54 }
  0x34   :  { %400 = vmatmul.bf16.gmra.mxu3 %v476_v55 }
  0x9e   :  { %v339_v56 = vpop.f32.mrf.mxu0 }
  0x9f   :  { %v358_v57 = vpop.f32.mrf.mxu1 }
  0xa0   :  { %v359_v58 = vadd.f32 %v358_v57, %v339_v56 }
  0xa6   :  { %v377_v59 = vpop.f32.mrf.mxu2  ;;  %v341_v61 = vpop.f32.mrf.mxu0 }
  0xa7   :  { %v396_v60 = vpop.f32.mrf.mxu3  ;;  %v360_v62 = vpop.f32.mrf.mxu1  ;;  %v378_v63 = vadd.f32 %v377_v59, %v359_v58 }
  0xa8   :  { %v361_v2 = vadd.f32 %v360_v62, %v341_v61 }
  0xa9   :  { %v397_v0 = vadd.f32 %v396_v60, %v378_v63 }
  0xab   :  { %v425_v8 = vadd.f32 %v656_v1, %v397_v0 }
  0xad   :  { %v429_v11 = vmax.f32 %v425_v8, 0.0 }
  0xae   :  { %v379_v3 = vpop.f32.mrf.mxu2  ;;  %v344_v6 = vpop.f32.mrf.mxu0 }
  0xaf   :  { %v398_v4 = vpop.f32.mrf.mxu3  ;;  %v380_v5 = vadd.f32 %v379_v3, %v361_v2  ;;  %v363_v7 = vpop.f32.mrf.mxu1 }
  0xb0   :  { %v364_v13 = vadd.f32 %v363_v7, %v344_v6 }
  0xb1   :  { %v399_v9 = vadd.f32 %v398_v4, %v380_v5 }
  0xb3   :  { %v426_v10 = vadd.f32 %v656_v1, %v399_v9 }
  0xb5   :  { %v430_v12 = vmax.f32 %v426_v10, 0.0 }
  0xb6   :  { %v382_v14 = vpop.f32.mrf.mxu2  ;;  %v346_v18 = vpop.f32.mrf.mxu0 }
  0xb7   :  { %v401_v15 = vpop.f32.mrf.mxu3  ;;  %v648_v16 = vpack.c.bf16 %v430_v12, %v429_v11  ;;  %v383_v17 = vadd.f32 %v382_v14, %v364_v13  ;;  %v365_v19 = vpop.f32.mrf.mxu1 }
  0xb8   :  { %v366_v21 = vadd.f32 %v365_v19, %v346_v18 }
  0xb9   :  { %649 = vst [vmem:[%s833_s3] sm:$0xff] %v648_v16   ;;  %v402_v20 = vadd.f32 %v401_v15, %v383_v17 }
  0xbb   :  { %v427_v25 = vadd.f32 %v656_v1, %v402_v20 }
  0xbd   :  { %v431_v28 = vmax.f32 %v427_v25, 0.0 }
  0xbe   :  { %v384_v22 = vpop.f32.mrf.mxu2 }
  0xbf   :  { %v385_v23 = vadd.f32 %v384_v22, %v366_v21  ;;  %v403_v24 = vpop.f32.mrf.mxu3 }
  0xc1   :  { %v404_v26 = vadd.f32 %v403_v24, %v385_v23 }
  0xc3   :  { %v428_v27 = vadd.f32 %v656_v1, %v404_v26 }
  0xc5   :  { %v432_v29 = vmax.f32 %v428_v27, 0.0 }
  0xc7   :  { %v653_v30 = vpack.c.bf16 %v432_v29, %v431_v28 }
  0xc9   :  { %655 = vst [vmem:[%s833_s3 + $0x8] sm:$0xff] %v653_v30  }

// kernel: resnet_forward.61
= control target key start
LH: loop header
LB: loop body
LE: loop exit
PB: predicated region body
PF: predicated region fallthrough
CT: control target
= control target key end

     0   :  { %8 = vsyncpa [#allocation4], 0  ;;  %s699_s15 = smov [#allocation3]   ;;  %s873_s0 = inlined_call_operand.vmem [shape: bf16[32,512], index: 0, kind: input, shape index: {}]   ;;  %s874_s1 = inlined_call_operand.vmem [shape: bf16[512,128], index: 1, kind: input, shape index: {}]   ;;  %s875_s2 = inlined_call_operand.hbm [shape: f32[1,128], index: 2, kind: input, shape index: {}]   ;;  %s876_s3 = inlined_call_operand.vmem [shape: bf16[32,128], index: 3, kind: output, shape index: {}]  }
   0x1   :  { %s18_s14 = sshll.u32 %s875_s2, 4  ;;  %s20_s16 = sshll.u32 %s699_s15, 4  ;;  %s19_s14 = int_to_ptr.hbm [resolvable:$true] %s18_s14  ;;  %s21_s16 = int_to_ptr.vmem [resolvable:$true] %s20_s16 }
   0x2   :  { %23 = dma.hbm_to_vmem [thread:$0]  %s19_s14, 16, %s21_s16, [#allocation4]  }
   0x3   :  { %697 = dma.done.wait [#allocation4], 16  }
   0x4   :  { %698 = vsyncadd [#allocation4], 4294967280  ;;  %v635_v0 = vld [vmem:[%s874_s1 + $0x38] sm:$0xff]  ;;  %v634_v4 = vld [vmem:[%s874_s1 + $0x30] sm:$0xff] }
   0x5   :  { %v643_v1 = vld [vmem:[%s874_s1 + $0x78] sm:$0xff]  ;;  %344 = vmatpush.bf16.msra.mxu0 %v635_v0  ;;  %v642_v5 = vld [vmem:[%s874_s1 + $0x70] sm:$0xff]  ;;  %v633_v8 = vld [vmem:[%s874_s1 + $0x28] sm:$0xff] }
   0x6   :  { %v651_v2 = vld [vmem:[%s874_s1 + $0xb8] sm:$0xff]  ;;  %363 = vmatpush.bf16.msra.mxu1 %v643_v1  ;;  %v650_v6 = vld [vmem:[%s874_s1 + $0xb0] sm:$0xff]  ;;  %v641_v9 = vld [vmem:[%s874_s1 + $0x68] sm:$0xff] }
   0x7   :  { %v659_v3 = vld [vmem:[%s874_s1 + $0xf8] sm:$0xff]  ;;  %382 = vmatpush.bf16.msra.mxu2 %v651_v2  ;;  %v658_v7 = vld [vmem:[%s874_s1 + $0xf0] sm:$0xff]  ;;  %v649_v10 = vld [vmem:[%s874_s1 + $0xa8] sm:$0xff] }
   0x8   :  { %401 = vmatpush.bf16.msra.mxu3 %v659_v3  ;;  %v657_v11 = vld [vmem:[%s874_s1 + $0xe8] sm:$0xff]  ;;  %v632_v12 = vld [vmem:[%s874_s1 + $0x20] sm:$0xff]  ;;  %v631_v16 = vld [vmem:[%s874_s1 + $0x18] sm:$0xff] }
   0x9   :  { %345 = vmatpush.bf16.msra.mxu0 %v634_v4  ;;  %v640_v13 = vld [vmem:[%s874_s1 + $0x60] sm:$0xff]  ;;  %v639_v17 = vld [vmem:[%s874_s1 + $0x58] sm:$0xff]  ;;  %v630_v20 = vld [vmem:[%s874_s1 + $0x10] sm:$0xff] }
   0xa   :  { %364 = vmatpush.bf16.msra.mxu1 %v642_v5  ;;  %v648_v14 = vld [vmem:[%s874_s1 + $0xa0] sm:$0xff]  ;;  %v647_v18 = vld [vmem:[%s874_s1 + $0x98] sm:$0xff]  ;;  %v638_v21 = vld [vmem:[%s874_s1 + $0x50] sm:$0xff] }
   0xb   :  { %383 = vmatpush.bf16.msra.mxu2 %v650_v6  ;;  %v656_v15 = vld [vmem:[%s874_s1 + $0xe0] sm:$0xff]  ;;  %v655_v19 = vld [vmem:[%s874_s1 + $0xd8] sm:$0xff]  ;;  %v646_v22 = vld [vmem:[%s874_s1 + $0x90] sm:$0xff] }
   0xc   :  { %402 = vmatpush.bf16.msra.mxu3 %v658_v7  ;;  %v654_v23 = vld [vmem:[%s874_s1 + $0xd0] sm:$0xff]  ;;  %v629_v24 = vld [vmem:[%s874_s1 + $0x8] sm:$0xff]  ;;  %v628_v28 = vld [vmem:[%s874_s1] sm:$0xff] }
   0xd   :  { %346 = vmatpush.bf16.msra.mxu0 %v633_v8  ;;  %v637_v25 = vld [vmem:[%s874_s1 + $0x48] sm:$0xff]  ;;  %v636_v29 = vld [vmem:[%s874_s1 + $0x40] sm:$0xff]  ;;  %v622_v33 = vld [vmem:[%s873_s0 + $0xc] sm:$0xf0] }
   0xe   :  { %365 = vmatpush.bf16.msra.mxu1 %v641_v9  ;;  %v645_v26 = vld [vmem:[%s874_s1 + $0x88] sm:$0xff]  ;;  %v644_v30 = vld [vmem:[%s874_s1 + $0x80] sm:$0xff]  ;;  %v464_v35 = vld [vmem:[%s873_s0 + $0x10] sm:$0xf0] }
   0xf   :  { %384 = vmatpush.bf16.msra.mxu2 %v649_v10  ;;  %v653_v27 = vld [vmem:[%s874_s1 + $0xc8] sm:$0xff]  ;;  %v652_v31 = vld [vmem:[%s874_s1 + $0xc0] sm:$0xff]  ;;  %v623_v37 = vld [vmem:[%s873_s0 + $0x14] sm:$0xf0] }
  0x10   :  { %403 = vmatpush.bf16.msra.mxu3 %v657_v11  ;;  %v462_v32 = vld [vmem:[%s873_s0] sm:$0xf]  ;;  %v620_v34 = vld [vmem:[%s873_s0 + $0x4] sm:$0xf]  ;;  %v470_v36 = vld [vmem:[%s873_s0 + $0x8] sm:$0xf] }
  0x11   :  { %347 = vmatpush.bf16.msra.mxu0 %v632_v12  ;;  %v621_v38 = vld [vmem:[%s873_s0 + $0xc] sm:$0xf]  ;;  %v472_v39 = vld [vmem:[%s873_s0 + $0x18] sm:$0xf0]  ;;  %v463_v40 = vor.u32 %v622_v33, %v462_v32  ;;  %v467_v41 = vor.u32 %v620_v34, %v464_v35  ;;  %v471_v42 = vor.u32 %v623_v37, %v470_v36  ;;  %v478_v44 = vld [vmem:[%s873_s0 + $0x20] sm:$0xf] }
  0x12   :  { %366 = vmatpush.bf16.msra.mxu1 %v640_v13  ;;  %v475_v43 = vor.u32 %v621_v38, %v472_v39  ;;  %v626_v45 = vld [vmem:[%s873_s0 + $0x2c] sm:$0xf0]  ;;  %v624_v46 = vld [vmem:[%s873_s0 + $0x24] sm:$0xf]  ;;  %v480_v47 = vld [vmem:[%s873_s0 + $0x30] sm:$0xf0] }
  0x13   :  { %385 = vmatpush.bf16.msra.mxu2 %v648_v14  ;;  %v486_v48 = vld [vmem:[%s873_s0 + $0x28] sm:$0xf]  ;;  %v627_v49 = vld [vmem:[%s873_s0 + $0x34] sm:$0xf0]  ;;  %v625_v50 = vld [vmem:[%s873_s0 + $0x2c] sm:$0xf]  ;;  %v479_v52 = vor.u32 %v626_v45, %v478_v44  ;;  %v483_v53 = vor.u32 %v624_v46, %v480_v47 }
  0x14   :  { %404 = vmatpush.bf16.msra.mxu3 %v656_v15  ;;  %v488_v51 = vld [vmem:[%s873_s0 + $0x38] sm:$0xf0]  ;;  %v487_v54 = vor.u32 %v627_v49, %v486_v48  ;;  %v672_v1 = vld [vmem:[#allocation3] ss:$0 sm:$0xff] }
  0x15   :  { %348 = vmatpush.bf16.msra.mxu0 %v631_v16  ;;  %v491_v55 = vor.u32 %v625_v50, %v488_v51 }
  0x16   :  { %367 = vmatpush.bf16.msra.mxu1 %v639_v17 }
  0x17   :  { %386 = vmatpush.bf16.msra.mxu2 %v647_v18 }
  0x18   :  { %405 = vmatpush.bf16.msra.mxu3 %v655_v19 }
  0x19   :  { %349 = vmatpush.bf16.msra.mxu0 %v630_v20 }
  0x1a   :  { %368 = vmatpush.bf16.msra.mxu1 %v638_v21 }
  0x1b   :  { %387 = vmatpush.bf16.msra.mxu2 %v646_v22 }
  0x1c   :  { %406 = vmatpush.bf16.msra.mxu3 %v654_v23 }
  0x1d   :  { %350 = vmatpush.bf16.msra.mxu0 %v629_v24 }
  0x1e   :  { %369 = vmatpush.bf16.msra.mxu1 %v637_v25 }
  0x1f   :  { %388 = vmatpush.bf16.msra.mxu2 %v645_v26 }
  0x20   :  { %407 = vmatpush.bf16.msra.mxu3 %v653_v27 }
  0x21   :  { %351 = vmatpush.bf16.msra.mxu0 %v628_v28 }
  0x22   :  { %370 = vmatpush.bf16.msra.mxu1 %v636_v29 }
  0x23   :  { %389 = vmatpush.bf16.msra.mxu2 %v644_v30 }
  0x24   :  { %408 = vmatpush.bf16.msra.mxu3 %v652_v31  ;;  %352 = vmatmul.bf16.vlgmr.msra.gmra.mxu0 %v463_v40 }
  0x25   :  { %371 = vmatmul.bf16.vlgmr.msra.gmra.mxu1 %v467_v41 }
  0x26   :  { %390 = vmatmul.bf16.vlgmr.msra.gmra.mxu2 %v471_v42 }
  0x27   :  { %409 = vmatmul.bf16.vlgmr.msra.gmra.mxu3 %v475_v43 }
  0x34   :  { %357 = vmatmul.bf16.gmra.mxu0 %v479_v52 }
  0x35   :  { %376 = vmatmul.bf16.gmra.mxu1 %v483_v53 }
  0x36   :  { %395 = vmatmul.bf16.gmra.mxu2 %v487_v54 }
  0x37   :  { %414 = vmatmul.bf16.gmra.mxu3 %v491_v55 }
  0xa1   :  { %v353_v56 = vpop.f32.mrf.mxu0 }
  0xa2   :  { %v372_v57 = vpop.f32.mrf.mxu1 }
  0xa3   :  { %v373_v58 = vadd.f32 %v372_v57, %v353_v56 }
  0xa9   :  { %v391_v59 = vpop.f32.mrf.mxu2  ;;  %v355_v61 = vpop.f32.mrf.mxu0 }
  0xaa   :  { %v410_v60 = vpop.f32.mrf.mxu3  ;;  %v374_v62 = vpop.f32.mrf.mxu1  ;;  %v392_v63 = vadd.f32 %v391_v59, %v373_v58 }
  0xab   :  { %v375_v2 = vadd.f32 %v374_v62, %v355_v61 }
  0xac   :  { %v411_v0 = vadd.f32 %v410_v60, %v392_v63 }
  0xae   :  { %v439_v8 = vadd.f32 %v672_v1, %v411_v0 }
  0xb0   :  { %v443_v11 = vmax.f32 %v439_v8, 0.0 }
  0xb1   :  { %v393_v3 = vpop.f32.mrf.mxu2  ;;  %v358_v6 = vpop.f32.mrf.mxu0 }
  0xb2   :  { %v412_v4 = vpop.f32.mrf.mxu3  ;;  %v394_v5 = vadd.f32 %v393_v3, %v375_v2  ;;  %v377_v7 = vpop.f32.mrf.mxu1 }
  0xb3   :  { %v378_v13 = vadd.f32 %v377_v7, %v358_v6 }
  0xb4   :  { %v413_v9 = vadd.f32 %v412_v4, %v394_v5 }
  0xb6   :  { %v440_v10 = vadd.f32 %v672_v1, %v413_v9 }
  0xb8   :  { %v444_v12 = vmax.f32 %v440_v10, 0.0 }
  0xb9   :  { %v396_v14 = vpop.f32.mrf.mxu2  ;;  %v360_v18 = vpop.f32.mrf.mxu0 }
  0xba   :  { %v415_v15 = vpop.f32.mrf.mxu3  ;;  %v663_v16 = vpack.c.bf16 %v444_v12, %v443_v11  ;;  %v397_v17 = vadd.f32 %v396_v14, %v378_v13  ;;  %v379_v19 = vpop.f32.mrf.mxu1 }
  0xbb   :  { %v380_v21 = vadd.f32 %v379_v19, %v360_v18 }
  0xbc   :  { %664 = vst [vmem:[%s876_s3] sm:$0xff] %v663_v16   ;;  %v416_v20 = vadd.f32 %v415_v15, %v397_v17 }
  0xbe   :  { %v441_v25 = vadd.f32 %v672_v1, %v416_v20 }
  0xc0   :  { %v445_v28 = vmax.f32 %v441_v25, 0.0 }
  0xc1   :  { %v398_v22 = vpop.f32.mrf.mxu2 }
  0xc2   :  { %v399_v23 = vadd.f32 %v398_v22, %v380_v21  ;;  %v417_v24 = vpop.f32.mrf.mxu3 }
  0xc4   :  { %v418_v26 = vadd.f32 %v417_v24, %v399_v23 }
  0xc6   :  { %v442_v27 = vadd.f32 %v672_v1, %v418_v26 }
  0xc8   :  { %v446_v29 = vmax.f32 %v442_v27, 0.0 }
  0xca   :  { %v668_v30 = vpack.c.bf16 %v446_v29, %v445_v28 }
  0xcc   :  { %670 = vst [vmem:[%s876_s3 + $0x8] sm:$0xff] %v668_v30  }
  0xcd   :  { %459 = vsyncpa [#allocation4], 1 }

// kernel: resnet_forward.62
= control target key start
LH: loop header
LB: loop body
LE: loop exit
PB: predicated region body
PF: predicated region fallthrough
CT: control target
= control target key end

     0   :  { %8 = vsyncpa [#allocation5], 0  ;;  %s1100_s12 = smov 0   ;;  %s1102_s13 = smov 0   ;;  %s1241_s0 = inlined_call_operand.vmem [shape: bf16[32,1152], index: 0, kind: input, shape index: {}]   ;;  %s1242_s1 = inlined_call_operand.vmem [shape: bf16[1152,128], index: 1, kind: input, shape index: {}]   ;;  %s1243_s2 = inlined_call_operand.hbm [shape: f32[1,128], index: 2, kind: input, shape index: {}]   ;;  %s1244_s3 = inlined_call_operand.vmem [shape: bf16[32,128], index: 3, kind: output, shape index: {}]  }
   0x1   :  { %s1104_s14 = smov 0   ;;  %s1106_s15 = smov 0  }
   0x2   :  { %s1108_s16 = smov 0  }
   0x3 LB: > { %s757_s17 = sadd.s32 4294967295, %s1076_s16   ;;  %s26_s18 = sadd.s32 1, %s1072_s15  ;;  %s1076_s16 = sphi %s1108_s16, %s14_s16   ;;  %s1072_s15 = sphi %s1106_s15, %s1251_s15   ;;  %s1068_s14 = sphi %s1104_s14, %s1250_s14   ;;  %s1064_s13 = sphi %s1102_s13, %s1249_s13   ;;  %s1060_s12 = sphi %s1100_s12, %s1248_s12  }
   0x4   : > { %p27_p0 = scmp.ge.s32.totalorder %s26_s18, 3  ;;  %s42_s19 = sadd.s32 1, %s1064_s13 }
   0x5   : > { %p49_p1 = scmp.ne.s32.totalorder %s1064_s13, %s1060_s12  ;;  %p50_p2 = scmp.eq.s32.totalorder %s1076_s16, 0 }
   0x6   : > { %s1253_s18 = smov (%p27_p0, %s26_s18), 0  ;;  %p758_p4 = scmp.ge.s32.totalorder %s1076_s16, 1 }
   0x7   : > { %p1133_p3 = por %p50_p2, %p49_p1  ;;  %s38_s21 = ssub.s32 %s1072_s15, %s1253_s18 }
   0x8   : > { %p148_p5 = scmp.lt.s32.totalorder %s1076_s16, 4  ;;  %p40_p6 = scmp.eq.s32.totalorder %s38_s21, 0 }
   0x9   : > { %p1145_p8 = scmp.eq.s32.totalorder %s757_s17, 0  ;;  %s161_s27 = sshll.u32 %s1243_s2, 4  ;;  %s162_s27 = int_to_ptr.hbm [resolvable:$true] %s161_s27 }
   0xa   : > { %p1141_p7 = pnand %p758_p4, %p148_p5  ;;  %s1078_s28 = smov [#allocation4]  }
   0xb   : > { %s1150_s24 = scalar_select %p40_p6, %s1064_s13, %s42_s19  }
   0xc   : > { %p955_p9 = pneg %p1141_p7  ;;  %s163_s29 = sshll.u32 %s1078_s28, 4  ;;  %s164_s29 = int_to_ptr.vmem [resolvable:$true] %s163_s29 }
   0xd   : > { %p760_p11 = scmp.ge.s32.totalorder %s1076_s16, 3 }
   0xe   : > { %p956_p10 = pnand %p1145_p8, %p955_p9 }
   0xf   : > { %170 = sbr.rel (%p760_p11) target bundleno = 33 (0x21), region = 20 }
  0x10   : > { %958 = dma.hbm_to_vmem [thread:$0]  (!%p956_p10), %s162_s27, 16, %s164_s29, [#allocation5]  }
  0x14   : > { %173 = sbr.rel (!%p1133_p3) target bundleno = 33 (0x21), region = 24  ;;  %s175_s30 = sand.u32 (%p1133_p3), 1, %s1064_s13  }
  0x15   : > { %s899_s4 = smul.u32 (%p1133_p3), 12, %s1072_s15 }
  0x16   : > { %s949_s5 = smul.u32 (%p1133_p3), 48, %s175_s30 }
  0x17   : > { %s183_s8 = scalar_lea.vmem (%p1133_p3), %s1241_s0, %s899_s4 }
  0x18   : > { %v198_v0 = vld [vmem:[%s183_s8] sm:$0xff] (%p1133_p3)  ;;  %v202_v2 = vld [vmem:[%s183_s8 + $0x48] sm:$0xff] (%p1133_p3)  ;;  %s177_s9 = scalar_lea.vmem (%p1133_p3), [#allocation3], %s949_s5  ;;  %v766_v6 = vld [vmem:[%s183_s8 + $0x50] sm:$0xf] (%p1133_p3) }
  0x19   : > { %v200_v1 = vld [vmem:[%s183_s8 + $0x24] sm:$0xff]  ;;  %199 = vst [vmem:[%s177_s9] sm:$0xff] %v198_v0  ;;  %v204_v3 = vld [vmem:[%s183_s8 + $0x6c] sm:$0xff]  ;;  %v768_v7 = vld [vmem:[%s183_s8 + $0x74] sm:$0xf] }
  0x1a   : > { %201 = vst [vmem:[%s177_s9 + $0xc] sm:$0xff] %v200_v1  ;;  %v762_v4 = vld [vmem:[%s183_s8 + $0x8] sm:$0xf]  ;;  %v764_v5 = vld [vmem:[%s183_s8 + $0x2c] sm:$0xf] }
  0x1b   : > { %203 = vst [vmem:[%s177_s9 + $0x18] sm:$0xff] %v202_v2 }
  0x1c   : > { %205 = vst [vmem:[%s177_s9 + $0x24] sm:$0xff] %v204_v3 }
  0x1d   : > { %763 = vst [vmem:[%s177_s9 + $0x8] sm:$0xf] %v762_v4 }
  0x1e   : > { %765 = vst [vmem:[%s177_s9 + $0x14] sm:$0xf] %v764_v5 }
  0x1f   : > { %767 = vst [vmem:[%s177_s9 + $0x20] sm:$0xf] %v766_v6 }
  0x20   : > { %769 = vst [vmem:[%s177_s9 + $0x2c] sm:$0xf] %v768_v7 }
  0x21 PF: > { %242 = sbr.rel (%p1141_p7) target bundleno = 260 (0x104), region = 54  ;;  %s245_s10 = sand.u32 (!%p1141_p7), 1, %s1060_s12  }
  0x22   : > { %s950_s11 = smul.u32 (!%p1141_p7), 48, %s245_s10 }
  0x24   : > { %s1170_s17 = scalar_lea.vmem (!%p1141_p7), [#allocation3], %s950_s11 }
  0x26   : > { %1055 = dma.done.wait (%p1145_p8), [#allocation5], 16  }
  0x27   : > { %1057 = vsyncadd (%p1145_p8), [#allocation5], 4294967280  ;;  %s286_s19 = smul.u32 48, %s1068_s14  ;;  %p773_p13 = scmp.ne.s32.totalorder %s1068_s14, 0 }
  0x29   : > { %p287_p12 = scmp.lt.s32.totalorder %s286_s19, 143  ;;  %307 = sbr.rel (%p773_p13) target bundleno = 51 (0x33), region = 66 }
  0x2b   : > { %s1255_s19 = smov (!%p287_p12, %s286_s19), 143 }
  0x2c   : > { %s772_s20 = sshll.u32 %s1255_s19, 2 }
  0x2d   : > { %s1180_s22 = scalar_lea.vmem %s1242_s1, %s772_s20 }
  0x2e   : > { %v1079_v8 = vmov 0.0  }
  0x2f   : > { %308 = vst [vmem:[#allocation2 + $0x10] sm:$0xff] %v1079_v8 }
  0x30   : > { %309 = vst [vmem:[#allocation2] sm:$0xff] %v1079_v8 }
  0x31   : > { %310 = vst [vmem:[#allocation2 + $0x18] sm:$0xff] %v1079_v8 }
  0x32   : > { %311 = vst [vmem:[#allocation2 + $0x8] sm:$0xff] %v1079_v8 }
  0x33 PF: > { %v913_v9 = vld [vmem:[%s1180_s22 + $0x38] sm:$0xff]  ;;  %v912_v12 = vld [vmem:[%s1180_s22 + $0x30] sm:$0xff]  ;;  %v911_v15 = vld [vmem:[%s1180_s22 + $0x28] sm:$0xff]  ;;  %p894_p0 = scmp.ne.s32.totalorder %s1068_s14, 2 }
  0x34   : > { %v921_v10 = vld [vmem:[%s1180_s22 + $0x78] sm:$0xff]  ;;  %548 = vmatpush.bf16.msra.mxu0 %v913_v9  ;;  %v920_v13 = vld [vmem:[%s1180_s22 + $0x70] sm:$0xff]  ;;  %941 = vmatpush.bf16.msra.mxu3 %v913_v9  ;;  %v919_v16 = vld [vmem:[%s1180_s22 + $0x68] sm:$0xff] }
  0x35   : > { %v929_v11 = vld [vmem:[%s1180_s22 + $0xb8] sm:$0xff]  ;;  %567 = vmatpush.bf16.msra.mxu1 %v921_v10  ;;  %v928_v14 = vld [vmem:[%s1180_s22 + $0xb0] sm:$0xff]  ;;  %v927_v17 = vld [vmem:[%s1180_s22 + $0xa8] sm:$0xff] }
  0x36   : > { %586 = vmatpush.bf16.msra.mxu2 %v929_v11  ;;  %v910_v18 = vld [vmem:[%s1180_s22 + $0x20] sm:$0xff]  ;;  %v909_v21 = vld [vmem:[%s1180_s22 + $0x18] sm:$0xff]  ;;  %v908_v24 = vld [vmem:[%s1180_s22 + $0x10] sm:$0xff] }
  0x37   : > { %v918_v19 = vld [vmem:[%s1180_s22 + $0x60] sm:$0xff]  ;;  %v917_v22 = vld [vmem:[%s1180_s22 + $0x58] sm:$0xff]  ;;  %v916_v25 = vld [vmem:[%s1180_s22 + $0x50] sm:$0xff] }
  0x38   : > { %549 = vmatpush.bf16.msra.mxu0 %v912_v12  ;;  %942 = vmatpush.bf16.msra.mxu3 %v912_v12  ;;  %v926_v20 = vld [vmem:[%s1180_s22 + $0xa0] sm:$0xff]  ;;  %v925_v23 = vld [vmem:[%s1180_s22 + $0x98] sm:$0xff]  ;;  %v924_v26 = vld [vmem:[%s1180_s22 + $0x90] sm:$0xff] }
  0x39   : > { %568 = vmatpush.bf16.msra.mxu1 %v920_v13  ;;  %v907_v27 = vld [vmem:[%s1180_s22 + $0x8] sm:$0xff]  ;;  %v906_v30 = vld [vmem:[%s1180_s22] sm:$0xff]  ;;  %v312_v54 = vld [vmem:[#allocation2 + $0x10] sm:$0xff] }
  0x3a   : > { %587 = vmatpush.bf16.msra.mxu2 %v928_v14  ;;  %v915_v28 = vld [vmem:[%s1180_s22 + $0x48] sm:$0xff]  ;;  %v914_v31 = vld [vmem:[%s1180_s22 + $0x40] sm:$0xff]  ;;  %v314_v4 = vld [vmem:[#allocation2 + $0x18] sm:$0xff] }
  0x3b   : > { %v923_v29 = vld [vmem:[%s1180_s22 + $0x88] sm:$0xff]  ;;  %v922_v32 = vld [vmem:[%s1180_s22 + $0x80] sm:$0xff] }
  0x3c   : > { %550 = vmatpush.bf16.msra.mxu0 %v911_v15  ;;  %943 = vmatpush.bf16.msra.mxu3 %v911_v15  ;;  %v776_v33 = vld [vmem:[%s1170_s17] sm:$0xf]  ;;  %v901_v34 = vld [vmem:[%s1170_s17 + $0x8] sm:$0xf0]  ;;  %v900_v35 = vld [vmem:[%s1170_s17 + $0x4] sm:$0xf] }
  0x3d   : > { %569 = vmatpush.bf16.msra.mxu1 %v919_v16  ;;  %v778_v36 = vld [vmem:[%s1170_s17 + $0xc] sm:$0xf0]  ;;  %v784_v37 = vld [vmem:[%s1170_s17 + $0x8] sm:$0xf]  ;;  %v902_v38 = vld [vmem:[%s1170_s17 + $0x10] sm:$0xf0]  ;;  %v777_v41 = vor.u32 %v901_v34, %v776_v33 }
  0x3e   : > { %588 = vmatpush.bf16.msra.mxu2 %v927_v17  ;;  %v788_v39 = vld [vmem:[%s1170_s17 + $0x18] sm:$0xf]  ;;  %v904_v40 = vld [vmem:[%s1170_s17 + $0x20] sm:$0xf0]  ;;  %v781_v42 = vor.u32 %v900_v35, %v778_v36  ;;  %v785_v43 = vor.u32 %v902_v38, %v784_v37  ;;  %v903_v45 = vld [vmem:[%s1170_s17 + $0x1c] sm:$0xf] }
  0x3f   : > { %v789_v44 = vor.u32 %v904_v40, %v788_v39  ;;  %v790_v46 = vld [vmem:[%s1170_s17 + $0x24] sm:$0xf0]  ;;  %v796_v47 = vld [vmem:[%s1170_s17 + $0x20] sm:$0xf]  ;;  %v905_v48 = vld [vmem:[%s1170_s17 + $0x28] sm:$0xf0] }
  0x40   : > { %551 = vmatpush.bf16.msra.mxu0 %v910_v18  ;;  %944 = vmatpush.bf16.msra.mxu3 %v910_v18  ;;  %v793_v49 = vor.u32 %v903_v45, %v790_v46  ;;  %v797_v50 = vor.u32 %v905_v48, %v796_v47  ;;  %v313_v61 = vld [vmem:[#allocation2] sm:$0xff]  ;;  %v315_v11 = vld [vmem:[#allocation2 + $0x8] sm:$0xff] }
  0x41   : > { %570 = vmatpush.bf16.msra.mxu1 %v918_v19 }
  0x42   : > { %589 = vmatpush.bf16.msra.mxu2 %v926_v20 }
  0x44   : > { %552 = vmatpush.bf16.msra.mxu0 %v909_v21  ;;  %945 = vmatpush.bf16.msra.mxu3 %v909_v21 }
  0x45   : > { %571 = vmatpush.bf16.msra.mxu1 %v917_v22 }
  0x46   : > { %590 = vmatpush.bf16.msra.mxu2 %v925_v23 }
  0x48   : > { %553 = vmatpush.bf16.msra.mxu0 %v908_v24  ;;  %946 = vmatpush.bf16.msra.mxu3 %v908_v24 }
  0x49   : > { %572 = vmatpush.bf16.msra.mxu1 %v916_v25 }
  0x4a   : > { %591 = vmatpush.bf16.msra.mxu2 %v924_v26 }
  0x4c   : > { %554 = vmatpush.bf16.msra.mxu0 %v907_v27  ;;  %947 = vmatpush.bf16.msra.mxu3 %v907_v27 }
  0x4d   : > { %573 = vmatpush.bf16.msra.mxu1 %v915_v28 }
  0x4e   : > { %592 = vmatpush.bf16.msra.mxu2 %v923_v29 }
  0x50   : > { %555 = vmatpush.bf16.msra.mxu0 %v906_v30  ;;  %948 = vmatpush.bf16.msra.mxu3 %v906_v30 }
  0x51   : > { %574 = vmatpush.bf16.msra.mxu1 %v914_v31 }
  0x52   : > { %593 = vmatpush.bf16.msra.mxu2 %v922_v32 }
  0x53   : > { %556 = vmatmul.bf16.vlgmr.msra.gmra.mxu0 %v777_v41  ;;  %561 = vmatmul.bf16.vlgmr.msra.gmra.mxu3 %v789_v44 }
  0x54   : > { %575 = vmatmul.bf16.vlgmr.msra.gmra.mxu1 %v781_v42 }
  0x55   : > { %594 = vmatmul.bf16.vlgmr.msra.gmra.mxu2 %v785_v43 }
  0x64   : > { %580 = vmatmul.bf16.gmra.mxu1 %v793_v49 }
  0x65   : > { %599 = vmatmul.bf16.gmra.mxu2 %v797_v50 }
  0xd0   : > { %v557_v52 = vpop.f32.mrf.mxu0 }
  0xd1   : > { %v576_v51 = vpop.f32.mrf.mxu1 }
  0xd2   : > { %v577_v53 = vadd.f32 %v576_v51, %v557_v52 }
  0xd6   : > { %v562_v2 = vpop.f32.mrf.mxu3 }
  0xd8   : > { %v595_v55 = vpop.f32.mrf.mxu2  ;;  %v559_v59 = vpop.f32.mrf.mxu0 }
  0xd9   : > { %v596_v56 = vadd.f32 %v595_v55, %v577_v53  ;;  %v578_v57 = vpop.f32.mrf.mxu1 }
  0xda   : > { %v579_v60 = vadd.f32 %v578_v57, %v559_v59 }
  0xdb   : > { %v605_v58 = vadd.f32 %v596_v56, %v312_v54 }
  0xdd   : > { %609 = vst [vmem:[#allocation2 + $0x10] sm:$0xff] %v605_v58 }
  0xde   : > { %v564_v9 = vpop.f32.mrf.mxu3 }
  0xe0   : > { %v597_v62 = vpop.f32.mrf.mxu2 }
  0xe1   : > { %v598_v63 = vadd.f32 %v597_v62, %v579_v60  ;;  %v581_v0 = vpop.f32.mrf.mxu1 }
  0xe2   : > { %v582_v3 = vadd.f32 %v581_v0, %v562_v2 }
  0xe3   : > { %v606_v1 = vadd.f32 %v598_v63, %v313_v61 }
  0xe5   : > { %610 = vst [vmem:[#allocation2] sm:$0xff] %v606_v1 }
  0xe8   : > { %v600_v5 = vpop.f32.mrf.mxu2 }
  0xe9   : > { %v601_v6 = vadd.f32 %v600_v5, %v582_v3  ;;  %v583_v8 = vpop.f32.mrf.mxu1 }
  0xea   : > { %v584_v10 = vadd.f32 %v583_v8, %v564_v9 }
  0xeb   : > { %v607_v7 = vadd.f32 %v601_v6, %v314_v4 }
  0xed   : > { %611 = vst [vmem:[#allocation2 + $0x18] sm:$0xff] %v607_v7 }
  0xf0   : > { %v602_v12 = vpop.f32.mrf.mxu2 }
  0xf1   : > { %v603_v13 = vadd.f32 %v602_v12, %v584_v10  ;;  %616 = sbr.rel (%p894_p0) target bundleno = 260 (0x104), region = 70 }
  0xf3   : > { %v608_v14 = vadd.f32 %v603_v13, %v315_v11 }
  0xf5   : > { %612 = vst [vmem:[#allocation2 + $0x8] sm:$0xff] %v608_v14 }
  0xf6   : > { %v617_v15 = vld [vmem:[#allocation2 + $0x10] sm:$0xff]  ;;  %v618_v16 = vld [vmem:[#allocation2] sm:$0xff]  ;;  %v619_v18 = vld [vmem:[#allocation2 + $0x18] sm:$0xff] }
  0xf7   : > { %v1003_v17 = vld [vmem:[#allocation4] ss:$0 sm:$0xff] }
  0xf8   : > { %v625_v20 = vadd.f32 %v1003_v17, %v617_v15  ;;  %v626_v21 = vadd.f32 %v1003_v17, %v618_v16  ;;  %v627_v22 = vadd.f32 %v1003_v17, %v619_v18 }
  0xfa   : > { %v629_v24 = vmax.f32 %v625_v20, 0.0  ;;  %v630_v25 = vmax.f32 %v626_v21, 0.0  ;;  %v631_v26 = vmax.f32 %v627_v22, 0.0 }
  0xfc   : > { %v620_v19 = vld [vmem:[#allocation2 + $0x8] sm:$0xff]  ;;  %v933_v28 = vpack.c.bf16 %v630_v25, %v629_v24 }
  0xfd   : > { %v628_v23 = vadd.f32 %v1003_v17, %v620_v19 }
  0xfe   : > { %934 = vst [vmem:[%s1244_s3] sm:$0xff] %v933_v28  }
  0xff   : > { %v632_v27 = vmax.f32 %v628_v23, 0.0 }
 0x101   : > { %v938_v29 = vpack.c.bf16 %v632_v27, %v631_v26 }
 0x103   : > { %940 = vst [vmem:[%s1244_s3 + $0x8] sm:$0xff] %v938_v29  }
 0x104 PF: > { %s14_s16 = sadd.s32 1, %s1076_s16   ;;  %s1248_s12 = smov %s1064_s13 }
 0x105   : > { %p11_p1 = scmp.ge.s32.totalorder %s14_s16, 5   ;;  %s1249_s13 = smov %s1150_s24 }
 0x106   : > { %s1250_s14 = smov %s1072_s15  ;;  %s1251_s15 = smov %s1253_s18 }
 0x107   :  { %13 = sbr.rel (!%p11_p1) target bundleno = 3 (0x3), region = 116 }
 0x10c   :  { %669 = vsyncpa [#allocation5], 1 }
 0x10d   :  { %671 = vsyncpa [#allocation5 + $0x1], 1 }

// kernel: resnet_forward.68
= control target key start
LH: loop header
LB: loop body
LE: loop exit
PB: predicated region body
PF: predicated region fallthrough
CT: control target
= control target key end

     0   :  { %s1534_s1 = inlined_call_operand.vmem [shape: bf16[512,256], index: 1, kind: input, shape index: {}]   ;;  %s1535_s0 = inlined_call_operand.vmem [shape: bf16[32,512], index: 0, kind: input, shape index: {}]   ;;  %s1536_s2 = inlined_call_operand.vmem [shape: f32[1,256], index: 2, kind: input, shape index: {}]   ;;  %s1537_s3 = inlined_call_operand.vmem [shape: bf16[32,256], index: 3, kind: output, shape index: {}]  }
   0x1   :  { %v769_v0 = vld [vmem:[%s1534_s1 + $0x70] sm:$0xf]  ;;  %v990_v1 = vld [vmem:[%s1534_s1 + $0x74] sm:$0xf0]  ;;  %v761_v11 = vld [vmem:[%s1534_s1 + $0x60] sm:$0xf] }
   0x2   :  { %v833_v2 = vld [vmem:[%s1534_s1 + $0xf0] sm:$0xf]  ;;  %v770_v3 = vor.u32 %v990_v1, %v769_v0  ;;  %v1006_v4 = vld [vmem:[%s1534_s1 + $0xf4] sm:$0xf0]  ;;  %v988_v13 = vld [vmem:[%s1534_s1 + $0x64] sm:$0xf0] }
   0x3   :  { %v897_v5 = vld [vmem:[%s1534_s1 + $0x170] sm:$0xf]  ;;  %v1022_v6 = vld [vmem:[%s1534_s1 + $0x174] sm:$0xf0]  ;;  %v834_v7 = vor.u32 %v1006_v4, %v833_v2  ;;  %v825_v14 = vld [vmem:[%s1534_s1 + $0xe0] sm:$0xf]  ;;  %v762_v16 = vor.u32 %v988_v13, %v761_v11 }
   0x4   :  { %v898_v8 = vor.u32 %v1022_v6, %v897_v5  ;;  %v961_v9 = vld [vmem:[%s1534_s1 + $0x1f0] sm:$0xf]  ;;  %v1038_v10 = vld [vmem:[%s1534_s1 + $0x1f4] sm:$0xf0]  ;;  %466 = vmatpush.bf16.msra.mxu0 %v770_v3  ;;  %v1004_v15 = vld [vmem:[%s1534_s1 + $0xe4] sm:$0xf0] }
   0x5   :  { %v962_v12 = vor.u32 %v1038_v10, %v961_v9  ;;  %485 = vmatpush.bf16.msra.mxu1 %v834_v7  ;;  %v826_v17 = vor.u32 %v1004_v15, %v825_v14  ;;  %v889_v18 = vld [vmem:[%s1534_s1 + $0x160] sm:$0xf]  ;;  %v1020_v19 = vld [vmem:[%s1534_s1 + $0x164] sm:$0xf0]  ;;  %v753_v23 = vld [vmem:[%s1534_s1 + $0x50] sm:$0xf] }
   0x6   :  { %504 = vmatpush.bf16.msra.mxu2 %v898_v8  ;;  %v953_v20 = vld [vmem:[%s1534_s1 + $0x1e0] sm:$0xf]  ;;  %v890_v21 = vor.u32 %v1020_v19, %v889_v18  ;;  %v1036_v22 = vld [vmem:[%s1534_s1 + $0x1e4] sm:$0xf0]  ;;  %v986_v24 = vld [vmem:[%s1534_s1 + $0x54] sm:$0xf0] }
   0x7   :  { %523 = vmatpush.bf16.msra.mxu3 %v962_v12  ;;  %v954_v25 = vor.u32 %v1036_v22, %v953_v20  ;;  %v817_v26 = vld [vmem:[%s1534_s1 + $0xd0] sm:$0xf]  ;;  %v1002_v27 = vld [vmem:[%s1534_s1 + $0xd4] sm:$0xf0]  ;;  %v754_v29 = vor.u32 %v986_v24, %v753_v23  ;;  %v745_v35 = vld [vmem:[%s1534_s1 + $0x40] sm:$0xf] }
   0x8   :  { %v881_v28 = vld [vmem:[%s1534_s1 + $0x150] sm:$0xf]  ;;  %467 = vmatpush.bf16.msra.mxu0 %v762_v16  ;;  %v1018_v30 = vld [vmem:[%s1534_s1 + $0x154] sm:$0xf0]  ;;  %v818_v33 = vor.u32 %v1002_v27, %v817_v26  ;;  %v984_v36 = vld [vmem:[%s1534_s1 + $0x44] sm:$0xf0] }
   0x9   :  { %v945_v31 = vld [vmem:[%s1534_s1 + $0x1d0] sm:$0xf]  ;;  %v1034_v32 = vld [vmem:[%s1534_s1 + $0x1d4] sm:$0xf0]  ;;  %486 = vmatpush.bf16.msra.mxu1 %v826_v17  ;;  %v882_v34 = vor.u32 %v1018_v30, %v881_v28  ;;  %v809_v37 = vld [vmem:[%s1534_s1 + $0xc0] sm:$0xf]  ;;  %v746_v44 = vor.u32 %v984_v36, %v745_v35 }
   0xa   :  { %505 = vmatpush.bf16.msra.mxu2 %v890_v21  ;;  %v946_v38 = vor.u32 %v1034_v32, %v945_v31  ;;  %v1000_v39 = vld [vmem:[%s1534_s1 + $0xc4] sm:$0xf0]  ;;  %v873_v40 = vld [vmem:[%s1534_s1 + $0x140] sm:$0xf]  ;;  %v737_v47 = vld [vmem:[%s1534_s1 + $0x30] sm:$0xf] }
   0xb   :  { %524 = vmatpush.bf16.msra.mxu3 %v954_v25  ;;  %v1016_v41 = vld [vmem:[%s1534_s1 + $0x144] sm:$0xf0]  ;;  %v937_v42 = vld [vmem:[%s1534_s1 + $0x1c0] sm:$0xf]  ;;  %v810_v45 = vor.u32 %v1000_v39, %v809_v37  ;;  %v982_v48 = vld [vmem:[%s1534_s1 + $0x34] sm:$0xf0] }
   0xc   :  { %v1032_v43 = vld [vmem:[%s1534_s1 + $0x1c4] sm:$0xf0]  ;;  %468 = vmatpush.bf16.msra.mxu0 %v754_v29  ;;  %v874_v46 = vor.u32 %v1016_v41, %v873_v40  ;;  %v801_v49 = vld [vmem:[%s1534_s1 + $0xb0] sm:$0xf]  ;;  %v998_v51 = vld [vmem:[%s1534_s1 + $0xb4] sm:$0xf0]  ;;  %v738_v56 = vor.u32 %v982_v48, %v737_v47 }
   0xd   :  { %487 = vmatpush.bf16.msra.mxu1 %v818_v33  ;;  %v938_v50 = vor.u32 %v1032_v43, %v937_v42  ;;  %v865_v52 = vld [vmem:[%s1534_s1 + $0x130] sm:$0xf]  ;;  %v1014_v53 = vld [vmem:[%s1534_s1 + $0x134] sm:$0xf0]  ;;  %v802_v57 = vor.u32 %v998_v51, %v801_v49  ;;  %v729_v59 = vld [vmem:[%s1534_s1 + $0x20] sm:$0xf] }
   0xe   :  { %506 = vmatpush.bf16.msra.mxu2 %v882_v34  ;;  %v929_v54 = vld [vmem:[%s1534_s1 + $0x1b0] sm:$0xf]  ;;  %v1030_v55 = vld [vmem:[%s1534_s1 + $0x1b4] sm:$0xf0]  ;;  %v866_v58 = vor.u32 %v1014_v53, %v865_v52  ;;  %v980_v60 = vld [vmem:[%s1534_s1 + $0x24] sm:$0xf0] }
   0xf   :  { %525 = vmatpush.bf16.msra.mxu3 %v946_v38  ;;  %v793_v61 = vld [vmem:[%s1534_s1 + $0xa0] sm:$0xf]  ;;  %v930_v62 = vor.u32 %v1030_v55, %v929_v54  ;;  %v996_v63 = vld [vmem:[%s1534_s1 + $0xa4] sm:$0xf0]  ;;  %v730_v4 = vor.u32 %v980_v60, %v729_v59  ;;  %v721_v7 = vld [vmem:[%s1534_s1 + $0x10] sm:$0xf] }
  0x10   :  { %469 = vmatpush.bf16.msra.mxu0 %v746_v44  ;;  %v857_v0 = vld [vmem:[%s1534_s1 + $0x120] sm:$0xf]  ;;  %v1012_v1 = vld [vmem:[%s1534_s1 + $0x124] sm:$0xf0]  ;;  %v794_v5 = vor.u32 %v996_v63, %v793_v61  ;;  %v978_v8 = vld [vmem:[%s1534_s1 + $0x14] sm:$0xf0] }
  0x11   :  { %488 = vmatpush.bf16.msra.mxu1 %v810_v45  ;;  %v921_v2 = vld [vmem:[%s1534_s1 + $0x1a0] sm:$0xf]  ;;  %v1028_v3 = vld [vmem:[%s1534_s1 + $0x1a4] sm:$0xf0]  ;;  %v858_v6 = vor.u32 %v1012_v1, %v857_v0  ;;  %v785_v9 = vld [vmem:[%s1534_s1 + $0x90] sm:$0xf]  ;;  %v722_v17 = vor.u32 %v978_v8, %v721_v7 }
  0x12   :  { %507 = vmatpush.bf16.msra.mxu2 %v874_v46  ;;  %v922_v10 = vor.u32 %v1028_v3, %v921_v2  ;;  %v994_v11 = vld [vmem:[%s1534_s1 + $0x94] sm:$0xf0]  ;;  %v849_v12 = vld [vmem:[%s1534_s1 + $0x110] sm:$0xf]  ;;  %v713_v16 = vld [vmem:[%s1534_s1] sm:$0xf] }
  0x13   :  { %526 = vmatpush.bf16.msra.mxu3 %v938_v50  ;;  %v1010_v13 = vld [vmem:[%s1534_s1 + $0x114] sm:$0xf0]  ;;  %v913_v14 = vld [vmem:[%s1534_s1 + $0x190] sm:$0xf]  ;;  %v976_v18 = vld [vmem:[%s1534_s1 + $0x4] sm:$0xf0]  ;;  %v786_v21 = vor.u32 %v994_v11, %v785_v9 }
  0x14   :  { %470 = vmatpush.bf16.msra.mxu0 %v738_v56  ;;  %v1026_v15 = vld [vmem:[%s1534_s1 + $0x194] sm:$0xf0]  ;;  %v777_v19 = vld [vmem:[%s1534_s1 + $0x80] sm:$0xf]  ;;  %v992_v20 = vld [vmem:[%s1534_s1 + $0x84] sm:$0xf0]  ;;  %v850_v22 = vor.u32 %v1010_v13, %v849_v12  ;;  %v714_v34 = vor.u32 %v976_v18, %v713_v16 }
  0x15   :  { %489 = vmatpush.bf16.msra.mxu1 %v802_v57  ;;  %v841_v23 = vld [vmem:[%s1534_s1 + $0x100] sm:$0xf]  ;;  %v1008_v24 = vld [vmem:[%s1534_s1 + $0x104] sm:$0xf0]  ;;  %v914_v26 = vor.u32 %v1026_v15, %v913_v14  ;;  %v969_v29 = vld [vmem:[%s1535_s0 + $0xc] sm:$0xf0]  ;;  %v778_v38 = vor.u32 %v992_v20, %v777_v19 }
  0x16   :  { %508 = vmatpush.bf16.msra.mxu2 %v866_v58  ;;  %v905_v25 = vld [vmem:[%s1534_s1 + $0x180] sm:$0xf]  ;;  %v1024_v27 = vld [vmem:[%s1534_s1 + $0x184] sm:$0xf0]  ;;  %v967_v30 = vld [vmem:[%s1535_s0 + $0x4] sm:$0xf]  ;;  %v842_v39 = vor.u32 %v1008_v24, %v841_v23 }
  0x17   :  { %527 = vmatpush.bf16.msra.mxu3 %v930_v62  ;;  %v681_v28 = vld [vmem:[%s1535_s0] sm:$0xf]  ;;  %v683_v31 = vld [vmem:[%s1535_s0 + $0x10] sm:$0xf0]  ;;  %v899_v33 = vld [vmem:[%s1534_s1 + $0x178] sm:$0xf0]  ;;  %v906_v43 = vor.u32 %v1024_v27, %v905_v25 }
  0x18   :  { %471 = vmatpush.bf16.msra.mxu0 %v730_v4  ;;  %v1021_v32 = vld [vmem:[%s1534_s1 + $0x174] sm:$0xf]  ;;  %v689_v35 = vld [vmem:[%s1535_s0 + $0x8] sm:$0xf]  ;;  %v835_v37 = vld [vmem:[%s1534_s1 + $0xf8] sm:$0xf0]  ;;  %v1296_v48 = vor.u32 %v969_v29, %v681_v28  ;;  %v1307_v53 = vor.u32 %v967_v30, %v683_v31 }
  0x19   :  { %490 = vmatpush.bf16.msra.mxu1 %v794_v5  ;;  %v1005_v36 = vld [vmem:[%s1534_s1 + $0xf4] sm:$0xf]  ;;  %v970_v40 = vld [vmem:[%s1535_s0 + $0x14] sm:$0xf0]  ;;  %v968_v41 = vld [vmem:[%s1535_s0 + $0xc] sm:$0xf]  ;;  %v902_v44 = vor.u32 %v1021_v32, %v899_v33 }
  0x1a   :  { %509 = vmatpush.bf16.msra.mxu2 %v858_v6  ;;  %v691_v42 = vld [vmem:[%s1535_s0 + $0x18] sm:$0xf0]  ;;  %v989_v45 = vld [vmem:[%s1534_s1 + $0x74] sm:$0xf]  ;;  %v838_v49 = vor.u32 %v1005_v36, %v835_v37  ;;  %v1019_v51 = vld [vmem:[%s1534_s1 + $0x164] sm:$0xf]  ;;  %v1309_v54 = vor.u32 %v970_v40, %v689_v35 }
  0x1b   :  { %528 = vmatpush.bf16.msra.mxu3 %v922_v10  ;;  %v771_v46 = vld [vmem:[%s1534_s1 + $0x78] sm:$0xf0]  ;;  %v1037_v47 = vld [vmem:[%s1534_s1 + $0x1f4] sm:$0xf]  ;;  %v891_v52 = vld [vmem:[%s1534_s1 + $0x168] sm:$0xf0]  ;;  %v1317_v57 = vor.u32 %v968_v41, %v691_v42 }
  0x1c   :  { %472 = vmatpush.bf16.msra.mxu0 %v722_v17  ;;  %v963_v50 = vld [vmem:[%s1534_s1 + $0x1f8] sm:$0xf0]  ;;  %v1003_v55 = vld [vmem:[%s1534_s1 + $0xe4] sm:$0xf]  ;;  %v827_v56 = vld [vmem:[%s1534_s1 + $0xe8] sm:$0xf0]  ;;  %v774_v58 = vor.u32 %v989_v45, %v771_v46  ;;  %v894_v60 = vor.u32 %v1019_v51, %v891_v52 }
  0x1d   :  { %491 = vmatpush.bf16.msra.mxu1 %v786_v21  ;;  %v966_v59 = vor.u32 %v1037_v47, %v963_v50  ;;  %v987_v61 = vld [vmem:[%s1534_s1 + $0x64] sm:$0xf]  ;;  %v763_v62 = vld [vmem:[%s1534_s1 + $0x68] sm:$0xf0]  ;;  %v830_v0 = vor.u32 %v1003_v55, %v827_v56  ;;  %v1017_v2 = vld [vmem:[%s1534_s1 + $0x154] sm:$0xf] }
  0x1e   :  { %510 = vmatpush.bf16.msra.mxu2 %v850_v22  ;;  %v1035_v63 = vld [vmem:[%s1534_s1 + $0x1e4] sm:$0xf]  ;;  %v955_v1 = vld [vmem:[%s1534_s1 + $0x1e8] sm:$0xf0]  ;;  %v883_v3 = vld [vmem:[%s1534_s1 + $0x158] sm:$0xf0]  ;;  %v766_v6 = vor.u32 %v987_v61, %v763_v62 }
  0x1f   :  { %529 = vmatpush.bf16.msra.mxu3 %v914_v26  ;;  %v1001_v4 = vld [vmem:[%s1534_s1 + $0xd4] sm:$0xf]  ;;  %v819_v5 = vld [vmem:[%s1534_s1 + $0xd8] sm:$0xf0]  ;;  %v958_v7 = vor.u32 %v1035_v63, %v955_v1  ;;  %v886_v8 = vor.u32 %v1017_v2, %v883_v3  ;;  %v1015_v14 = vld [vmem:[%s1534_s1 + $0x144] sm:$0xf] }
  0x20   :  { %473 = vmatpush.bf16.msra.mxu0 %v714_v34  ;;  %v985_v9 = vld [vmem:[%s1534_s1 + $0x54] sm:$0xf]  ;;  %v755_v10 = vld [vmem:[%s1534_s1 + $0x58] sm:$0xf0]  ;;  %v822_v12 = vor.u32 %v1001_v4, %v819_v5  ;;  %v875_v15 = vld [vmem:[%s1534_s1 + $0x148] sm:$0xf0] }
  0x21   :  { %492 = vmatpush.bf16.msra.mxu1 %v778_v38  ;;  %v1033_v11 = vld [vmem:[%s1534_s1 + $0x1d4] sm:$0xf]  ;;  %v947_v13 = vld [vmem:[%s1534_s1 + $0x1d8] sm:$0xf0]  ;;  %v999_v16 = vld [vmem:[%s1534_s1 + $0xc4] sm:$0xf]  ;;  %v758_v18 = vor.u32 %v985_v9, %v755_v10  ;;  %v878_v23 = vor.u32 %v1015_v14, %v875_v15 }
  0x22   :  { %511 = vmatpush.bf16.msra.mxu2 %v842_v39  ;;  %v811_v17 = vld [vmem:[%s1534_s1 + $0xc8] sm:$0xf0]  ;;  %v983_v19 = vld [vmem:[%s1534_s1 + $0x44] sm:$0xf]  ;;  %v950_v22 = vor.u32 %v1033_v11, %v947_v13  ;;  %v697_v25 = vld [vmem:[%s1535_s0 + $0x20] sm:$0xf] }
  0x23   :  { %530 = vmatpush.bf16.msra.mxu3 %v906_v43  ;;  %474 = vmatmul.bf16.vlgmr.msra.gmra.mxu0 %v1296_v48  ;;  %v747_v20 = vld [vmem:[%s1534_s1 + $0x48] sm:$0xf0]  ;;  %v1031_v21 = vld [vmem:[%s1534_s1 + $0x1c4] sm:$0xf]  ;;  %v973_v26 = vld [vmem:[%s1535_s0 + $0x2c] sm:$0xf0]  ;;  %v814_v27 = vor.u32 %v999_v16, %v811_v17 }
  0x24   :  { %493 = vmatmul.bf16.vlgmr.msra.gmra.mxu1 %v1307_v53  ;;  %542 = vmatpush.bf16.msrb.mxu0 %v774_v58  ;;  %v939_v24 = vld [vmem:[%s1534_s1 + $0x1c8] sm:$0xf0]  ;;  %v971_v28 = vld [vmem:[%s1535_s0 + $0x24] sm:$0xf]  ;;  %v699_v29 = vld [vmem:[%s1535_s0 + $0x30] sm:$0xf0]  ;;  %v750_v35 = vor.u32 %v983_v19, %v747_v20 }
  0x25   :  { %561 = vmatpush.bf16.msrb.mxu1 %v838_v49  ;;  %512 = vmatmul.bf16.vlgmr.msra.gmra.mxu2 %v1309_v54  ;;  %v1013_v30 = vld [vmem:[%s1534_s1 + $0x134] sm:$0xf]  ;;  %v867_v31 = vld [vmem:[%s1534_s1 + $0x138] sm:$0xf0]  ;;  %v705_v32 = vld [vmem:[%s1535_s0 + $0x28] sm:$0xf]  ;;  %v942_v39 = vor.u32 %v1031_v21, %v939_v24  ;;  %v1439_v50 = vor.u32 %v971_v28, %v699_v29 }
  0x26   :  { %580 = vmatpush.bf16.msrb.mxu2 %v902_v44  ;;  %531 = vmatmul.bf16.vlgmr.msra.gmra.mxu3 %v1317_v57  ;;  %v997_v33 = vld [vmem:[%s1534_s1 + $0xb4] sm:$0xf]  ;;  %v803_v34 = vld [vmem:[%s1534_s1 + $0xb8] sm:$0xf0]  ;;  %v974_v36 = vld [vmem:[%s1535_s0 + $0x34] sm:$0xf0]  ;;  %v870_v40 = vor.u32 %v1013_v30, %v867_v31  ;;  %v1428_v44 = vor.u32 %v973_v26, %v697_v25 }
  0x27   :  { %599 = vmatpush.bf16.msrb.mxu3 %v966_v59  ;;  %v972_v37 = vld [vmem:[%s1535_s0 + $0x2c] sm:$0xf]  ;;  %v707_v38 = vld [vmem:[%s1535_s0 + $0x38] sm:$0xf0]  ;;  %v981_v41 = vld [vmem:[%s1534_s1 + $0x34] sm:$0xf]  ;;  %v806_v45 = vor.u32 %v997_v33, %v803_v34  ;;  %v1441_v51 = vor.u32 %v974_v36, %v705_v32 }
  0x28   :  { %543 = vmatpush.bf16.msrb.mxu0 %v766_v6  ;;  %v739_v42 = vld [vmem:[%s1534_s1 + $0x38] sm:$0xf0]  ;;  %v1029_v43 = vld [vmem:[%s1534_s1 + $0x1b4] sm:$0xf]  ;;  %v1011_v47 = vld [vmem:[%s1534_s1 + $0x124] sm:$0xf]  ;;  %v710_v56 = vor.u32 %v972_v37, %v707_v38 }
  0x29   :  { %562 = vmatpush.bf16.msrb.mxu1 %v830_v0  ;;  %v931_v46 = vld [vmem:[%s1534_s1 + $0x1b8] sm:$0xf0]  ;;  %v859_v49 = vld [vmem:[%s1534_s1 + $0x128] sm:$0xf0]  ;;  %v995_v52 = vld [vmem:[%s1534_s1 + $0xa4] sm:$0xf]  ;;  %v742_v58 = vor.u32 %v981_v41, %v739_v42 }
  0x2a   :  { %581 = vmatpush.bf16.msrb.mxu2 %v894_v60  ;;  %v795_v55 = vld [vmem:[%s1534_s1 + $0xa8] sm:$0xf0]  ;;  %v934_v59 = vor.u32 %v1029_v43, %v931_v46  ;;  %v862_v60 = vor.u32 %v1011_v47, %v859_v49  ;;  %v979_v61 = vld [vmem:[%s1534_s1 + $0x24] sm:$0xf]  ;;  %v1009_v2 = vld [vmem:[%s1534_s1 + $0x114] sm:$0xf] }
  0x2b   :  { %600 = vmatpush.bf16.msrb.mxu3 %v958_v7  ;;  %v731_v62 = vld [vmem:[%s1534_s1 + $0x28] sm:$0xf0]  ;;  %v1027_v63 = vld [vmem:[%s1534_s1 + $0x1a4] sm:$0xf]  ;;  %v798_v0 = vor.u32 %v995_v52, %v795_v55  ;;  %v851_v3 = vld [vmem:[%s1534_s1 + $0x118] sm:$0xf0] }
  0x2c   :  { %544 = vmatpush.bf16.msrb.mxu0 %v758_v18  ;;  %v923_v1 = vld [vmem:[%s1534_s1 + $0x1a8] sm:$0xf0]  ;;  %v993_v4 = vld [vmem:[%s1534_s1 + $0x94] sm:$0xf]  ;;  %v787_v5 = vld [vmem:[%s1534_s1 + $0x98] sm:$0xf0]  ;;  %v734_v6 = vor.u32 %v979_v61, %v731_v62 }
  0x2d   :  { %563 = vmatpush.bf16.msrb.mxu1 %v822_v12  ;;  %v926_v7 = vor.u32 %v1027_v63, %v923_v1  ;;  %v977_v9 = vld [vmem:[%s1534_s1 + $0x14] sm:$0xf]  ;;  %v723_v10 = vld [vmem:[%s1534_s1 + $0x18] sm:$0xf0]  ;;  %v790_v12 = vor.u32 %v993_v4, %v787_v5  ;;  %v1007_v14 = vld [vmem:[%s1534_s1 + $0x104] sm:$0xf] }
  0x2e   :  { %582 = vmatpush.bf16.msrb.mxu2 %v886_v8  ;;  %v854_v8 = vor.u32 %v1009_v2, %v851_v3  ;;  %v1025_v11 = vld [vmem:[%s1534_s1 + $0x194] sm:$0xf]  ;;  %v915_v13 = vld [vmem:[%s1534_s1 + $0x198] sm:$0xf0]  ;;  %v843_v15 = vld [vmem:[%s1534_s1 + $0x108] sm:$0xf0]  ;;  %v726_v18 = vor.u32 %v977_v9, %v723_v10 }
  0x2f   :  { %601 = vmatpush.bf16.msrb.mxu3 %v950_v22  ;;  %v991_v16 = vld [vmem:[%s1534_s1 + $0x84] sm:$0xf]  ;;  %v779_v17 = vld [vmem:[%s1534_s1 + $0x88] sm:$0xf0]  ;;  %v918_v19 = vor.u32 %v1025_v11, %v915_v13  ;;  %v846_v20 = vor.u32 %v1007_v14, %v843_v15 }
  0x30   :  { %545 = vmatpush.bf16.msrb.mxu0 %v750_v35  ;;  %v975_v21 = vld [vmem:[%s1534_s1 + $0x4] sm:$0xf]  ;;  %v715_v22 = vld [vmem:[%s1534_s1 + $0x8] sm:$0xf0] }
  0x31   :  { %564 = vmatpush.bf16.msrb.mxu1 %v814_v27  ;;  %v1023_v24 = vld [vmem:[%s1534_s1 + $0x184] sm:$0xf]  ;;  %v907_v25 = vld [vmem:[%s1534_s1 + $0x188] sm:$0xf0]  ;;  %v718_v26 = vor.u32 %v975_v21, %v715_v22 }
  0x32   :  { %583 = vmatpush.bf16.msrb.mxu2 %v878_v23  ;;  %v782_v23 = vor.u32 %v991_v16, %v779_v17  ;;  %v910_v27 = vor.u32 %v1023_v24, %v907_v25 }
  0x33   :  { %602 = vmatpush.bf16.msrb.mxu3 %v942_v39  ;;  %479 = vmatmul.bf16.gmra.mxu0 %v1428_v44 }
  0x34   :  { %498 = vmatmul.bf16.gmra.mxu1 %v1439_v50  ;;  %546 = vmatpush.bf16.msrb.mxu0 %v742_v58 }
  0x35   :  { %565 = vmatpush.bf16.msrb.mxu1 %v806_v45  ;;  %517 = vmatmul.bf16.gmra.mxu2 %v1441_v51 }
  0x36   :  { %584 = vmatpush.bf16.msrb.mxu2 %v870_v40  ;;  %536 = vmatmul.bf16.gmra.mxu3 %v710_v56 }
  0x37   :  { %603 = vmatpush.bf16.msrb.mxu3 %v934_v59 }
  0x38   :  { %547 = vmatpush.bf16.msrb.mxu0 %v734_v6 }
  0x39   :  { %566 = vmatpush.bf16.msrb.mxu1 %v798_v0 }
  0x3a   :  { %585 = vmatpush.bf16.msrb.mxu2 %v862_v60 }
  0x3b   :  { %604 = vmatpush.bf16.msrb.mxu3 %v926_v7 }
  0x3c   :  { %548 = vmatpush.bf16.msrb.mxu0 %v726_v18 }
  0x3d   :  { %567 = vmatpush.bf16.msrb.mxu1 %v790_v12 }
  0x3e   :  { %586 = vmatpush.bf16.msrb.mxu2 %v854_v8 }
  0x3f   :  { %605 = vmatpush.bf16.msrb.mxu3 %v918_v19 }
  0x40   :  { %549 = vmatpush.bf16.msrb.mxu0 %v718_v26 }
  0x41   :  { %568 = vmatpush.bf16.msrb.mxu1 %v782_v23 }
  0x42   :  { %587 = vmatpush.bf16.msrb.mxu2 %v846_v20 }
  0x43   :  { %606 = vmatpush.bf16.msrb.mxu3 %v910_v27  ;;  %550 = vmatmul.bf16.vlgmr.msrb.gmra.mxu0 %v1296_v48 }
  0x44   :  { %569 = vmatmul.bf16.vlgmr.msrb.gmra.mxu1 %v1307_v53 }
  0x45   :  { %588 = vmatmul.bf16.vlgmr.msrb.gmra.mxu2 %v1309_v54 }
  0x46   :  { %607 = vmatmul.bf16.vlgmr.msrb.gmra.mxu3 %v1317_v57 }
  0x53   :  { %555 = vmatmul.bf16.gmra.mxu0 %v1428_v44  ;;  %v645_v44 = vld [vmem:[%s1536_s2] sm:$0x3] }
  0x54   :  { %574 = vmatmul.bf16.gmra.mxu1 %v1439_v50  ;;  %v647_v47 = vperm.slane %v645_v44, 0  ;;  %v648_v55 = vperm.slane %v645_v44, 1 }
  0x55   :  { %593 = vmatmul.bf16.gmra.mxu2 %v1441_v51 }
  0x56   :  { %612 = vmatmul.bf16.gmra.mxu3 %v710_v56 }
  0xa0   :  { %v475_v28 = vpop.f32.mrf.mxu0 }
  0xa1   :  { %v494_v29 = vpop.f32.mrf.mxu1 }
  0xa2   :  { %v495_v38 = vadd.f32 %v494_v29, %v475_v28 }
  0xa8   :  { %v513_v30 = vpop.f32.mrf.mxu2  ;;  %v477_v32 = vpop.f32.mrf.mxu0 }
  0xa9   :  { %v532_v31 = vpop.f32.mrf.mxu3  ;;  %v496_v33 = vpop.f32.mrf.mxu1  ;;  %v514_v43 = vadd.f32 %v513_v30, %v495_v38 }
  0xaa   :  { %v497_v51 = vadd.f32 %v496_v33, %v477_v32 }
  0xab   :  { %v533_v46 = vadd.f32 %v532_v31, %v514_v43 }
  0xad   :  { %v651_v59 = vadd.f32 %v647_v47, %v533_v46 }
  0xaf   :  { %v659_v63 = vmax.f32 %v651_v59, 0.0 }
  0xb0   :  { %v515_v48 = vpop.f32.mrf.mxu2  ;;  %v480_v53 = vpop.f32.mrf.mxu0 }
  0xb1   :  { %v534_v34 = vpop.f32.mrf.mxu3  ;;  %v499_v35 = vpop.f32.mrf.mxu1  ;;  %v516_v60 = vadd.f32 %v515_v48, %v497_v51 }
  0xb2   :  { %v500_v1 = vadd.f32 %v499_v35, %v480_v53 }
  0xb3   :  { %v535_v0 = vadd.f32 %v534_v34, %v516_v60 }
  0xb5   :  { %v653_v10 = vadd.f32 %v647_v47, %v535_v0 }
  0xb7   :  { %v661_v15 = vmax.f32 %v653_v10, 0.0 }
  0xb8   :  { %v518_v54 = vpop.f32.mrf.mxu2  ;;  %v482_v57 = vpop.f32.mrf.mxu0 }
  0xb9   :  { %v537_v36 = vpop.f32.mrf.mxu3  ;;  %v501_v37 = vpop.f32.mrf.mxu1  ;;  %v519_v11 = vadd.f32 %v518_v54, %v500_v1 }
  0xba   :  { %v502_v20 = vadd.f32 %v501_v37, %v482_v57 }
  0xbb   :  { %v538_v16 = vadd.f32 %v537_v36, %v519_v11 }
  0xbd   :  { %v655_v23 = vadd.f32 %v647_v47, %v538_v16 }
  0xbf   :  { %v663_v29 = vmax.f32 %v655_v23, 0.0 }
  0xc0   :  { %v520_v39 = vpop.f32.mrf.mxu2  ;;  %v551_v41 = vpop.f32.mrf.mxu0 }
  0xc1   :  { %v539_v40 = vpop.f32.mrf.mxu3  ;;  %v570_v42 = vpop.f32.mrf.mxu1  ;;  %v521_v24 = vadd.f32 %v520_v39, %v502_v20 }
  0xc2   :  { %v571_v45 = vadd.f32 %v570_v42, %v551_v41 }
  0xc3   :  { %v540_v30 = vadd.f32 %v539_v40, %v521_v24 }
  0xc5   :  { %v657_v35 = vadd.f32 %v647_v47, %v540_v30 }
  0xc7   :  { %v665_v57 = vmax.f32 %v657_v35, 0.0 }
  0xc8   :  { %v589_v49 = vpop.f32.mrf.mxu2  ;;  %v553_v56 = vpop.f32.mrf.mxu0 }
  0xc9   :  { %v608_v50 = vpop.f32.mrf.mxu3  ;;  %v590_v52 = vadd.f32 %v589_v49, %v571_v45  ;;  %v572_v58 = vpop.f32.mrf.mxu1 }
  0xca   :  { %v573_v3 = vadd.f32 %v572_v58, %v553_v56 }
  0xcb   :  { %v609_v61 = vadd.f32 %v608_v50, %v590_v52 }
  0xcd   :  { %v652_v62 = vadd.f32 %v648_v55, %v609_v61 }
  0xcf   :  { %v660_v2 = vmax.f32 %v652_v62, 0.0 }
  0xd0   :  { %v591_v4 = vpop.f32.mrf.mxu2  ;;  %v556_v8 = vpop.f32.mrf.mxu0 }
  0xd1   :  { %v610_v5 = vpop.f32.mrf.mxu3  ;;  %v667_v6 = vpack.c.bf16 %v660_v2, %v659_v63  ;;  %v592_v7 = vadd.f32 %v591_v4, %v573_v3  ;;  %v575_v9 = vpop.f32.mrf.mxu1 }
  0xd2   :  { %v576_v14 = vadd.f32 %v575_v9, %v556_v8 }
  0xd3   :  { %671 = vst [vmem:[%s1537_s3] sm:$0xff] %v667_v6  ;;  %v611_v12 = vadd.f32 %v610_v5, %v592_v7 }
  0xd5   :  { %v654_v13 = vadd.f32 %v648_v55, %v611_v12 }
  0xd7   :  { %v662_v17 = vmax.f32 %v654_v13, 0.0 }
  0xd8   :  { %v594_v18 = vpop.f32.mrf.mxu2  ;;  %v558_v26 = vpop.f32.mrf.mxu0 }
  0xd9   :  { %v613_v19 = vpop.f32.mrf.mxu3  ;;  %v668_v21 = vpack.c.bf16 %v662_v17, %v661_v15  ;;  %v595_v22 = vadd.f32 %v594_v18, %v576_v14  ;;  %v577_v27 = vpop.f32.mrf.mxu1 }
  0xda   :  { %v578_v32 = vadd.f32 %v577_v27, %v558_v26 }
  0xdb   :  { %672 = vst [vmem:[%s1537_s3 + $0x8] sm:$0xff] %v668_v21  ;;  %v614_v25 = vadd.f32 %v613_v19, %v595_v22 }
  0xdd   :  { %v656_v28 = vadd.f32 %v648_v55, %v614_v25 }
  0xdf   :  { %v664_v31 = vmax.f32 %v656_v28, 0.0 }
  0xe0   :  { %v596_v33 = vpop.f32.mrf.mxu2 }
  0xe1   :  { %v669_v48 = vpack.c.bf16 %v664_v31, %v663_v29  ;;  %v597_v34 = vadd.f32 %v596_v33, %v578_v32  ;;  %v615_v53 = vpop.f32.mrf.mxu3 }
  0xe3   :  { %673 = vst [vmem:[%s1537_s3 + $0x10] sm:$0xff] %v669_v48  ;;  %v616_v54 = vadd.f32 %v615_v53, %v597_v34 }
  0xe5   :  { %v658_v36 = vadd.f32 %v648_v55, %v616_v54 }
  0xe7   :  { %v666_v37 = vmax.f32 %v658_v36, 0.0 }
  0xe9   :  { %v670_v38 = vpack.c.bf16 %v666_v37, %v665_v57 }
  0xeb   :  { %674 = vst [vmem:[%s1537_s3 + $0x18] sm:$0xff] %v670_v38 }

// kernel: resnet_forward.69
= control target key start
LH: loop header
LB: loop body
LE: loop exit
PB: predicated region body
PF: predicated region fallthrough
CT: control target
= control target key end

     0   :  { %s1376_s12 = smov 0   ;;  %s1378_s13 = smov 0   ;;  %s1578_s0 = inlined_call_operand.vmem [shape: bf16[32,2304], index: 0, kind: input, shape index: {}]   ;;  %s1579_s1 = inlined_call_operand.vmem [shape: bf16[2304,256], index: 1, kind: input, shape index: {}]   ;;  %s1580_s2 = inlined_call_operand.vmem [shape: f32[1,256], index: 2, kind: input, shape index: {}]   ;;  %s1581_s3 = inlined_call_operand.vmem [shape: bf16[32,256], index: 3, kind: output, shape index: {}]  }
   0x1   :  { %s1380_s14 = smov 0   ;;  %s1382_s15 = smov 0  }
   0x2   :  { %s1384_s16 = smov 0  }
   0x3 LB: > { %s25_s17 = sadd.s32 1, %s1349_s15  ;;  %p48_p1 = scmp.ne.s32.totalorder %s1341_s13, %s1337_s12  ;;  %s1353_s16 = sphi %s1384_s16, %s13_s16   ;;  %s1349_s15 = sphi %s1382_s15, %s1585_s15   ;;  %s1345_s14 = sphi %s1380_s14, %s1584_s14   ;;  %s1341_s13 = sphi %s1378_s13, %s1583_s13   ;;  %s1337_s12 = sphi %s1376_s12, %s1582_s12  }
   0x4   : > { %p26_p0 = scmp.ge.s32.totalorder %s25_s17, 6  ;;  %p49_p2 = scmp.eq.s32.totalorder %s1353_s16, 0 }
   0x5   : > { %s41_s19 = sadd.s32 1, %s1341_s13  ;;  %p965_p5 = scmp.ge.s32.totalorder %s1353_s16, 6 }
   0x6   : > { %s1587_s17 = smov (%p26_p0, %s25_s17), 0  ;;  %p50_p3 = por %p49_p2, %p48_p1 }
   0x7   : > { %s37_s18 = ssub.s32 %s1349_s15, %s1587_s17  ;;  %164 = sbr.rel (%p965_p5) target bundleno = 25 (0x19), region = 20 }
   0x8   : > { %p39_p4 = scmp.eq.s32.totalorder %s37_s18, 0 }
   0xa   : > { %s1411_s20 = scalar_select %p39_p4, %s1341_s13, %s41_s19  }
   0xc   : > { %167 = sbr.rel (!%p50_p3) target bundleno = 25 (0x19), region = 24  ;;  %s169_s21 = sand.u32 (%p50_p3), 1, %s1341_s13  }
   0xd   : > { %s1200_s22 = smul.u32 (%p50_p3), 12, %s1349_s15 }
   0xe   : > { %s1272_s23 = smul.u32 (%p50_p3), 48, %s169_s21 }
   0xf   : > { %s177_s26 = scalar_lea.vmem (%p50_p3), %s1578_s0, %s1200_s22 }
  0x10   : > { %v192_v0 = vld [vmem:[%s177_s26] sm:$0xff] (%p50_p3)  ;;  %v194_v1 = vld [vmem:[%s177_s26 + $0x48] sm:$0xff] (%p50_p3)  ;;  %v196_v2 = vld [vmem:[%s177_s26 + $0x90] sm:$0xff] (%p50_p3)  ;;  %s171_s27 = scalar_lea.vmem (%p50_p3), [#allocation3], %s1272_s23 }
  0x11   : > { %193 = vst [vmem:[%s171_s27] sm:$0xff] %v192_v0  ;;  %v198_v3 = vld [vmem:[%s177_s26 + $0xd8] sm:$0xff]  ;;  %v967_v4 = vld [vmem:[%s177_s26 + $0x8] sm:$0xf]  ;;  %v969_v5 = vld [vmem:[%s177_s26 + $0x50] sm:$0xf] }
  0x12   : > { %195 = vst [vmem:[%s171_s27 + $0xc] sm:$0xff] %v194_v1  ;;  %v971_v6 = vld [vmem:[%s177_s26 + $0x98] sm:$0xf]  ;;  %v973_v7 = vld [vmem:[%s177_s26 + $0xe0] sm:$0xf] }
  0x13   : > { %197 = vst [vmem:[%s171_s27 + $0x18] sm:$0xff] %v196_v2 }
  0x14   : > { %199 = vst [vmem:[%s171_s27 + $0x24] sm:$0xff] %v198_v3 }
  0x15   : > { %968 = vst [vmem:[%s171_s27 + $0x8] sm:$0xf] %v967_v4 }
  0x16   : > { %970 = vst [vmem:[%s171_s27 + $0x14] sm:$0xf] %v969_v5 }
  0x17   : > { %972 = vst [vmem:[%s171_s27 + $0x20] sm:$0xf] %v971_v6 }
  0x18   : > { %974 = vst [vmem:[%s171_s27 + $0x2c] sm:$0xf] %v973_v7 }
  0x19 PF: > { %p975_p6 = scmp.ge.s32.totalorder %s1353_s16, 1  ;;  %p235_p7 = scmp.lt.s32.totalorder %s1353_s16, 7 }
  0x1b   : > { %p236_p8 = pnand %p975_p6, %p235_p7 }
  0x1c   : > { %s242_s28 = sand.u32 (!%p236_p8), 1, %s1337_s12   ;;  %s286_s29 = smul.u32 (!%p236_p8), 48, %s1345_s14 }
  0x1d   : > { %239 = sbr.rel (%p236_p8) target bundleno = 277 (0x115), region = 54  ;;  %p978_p10 = scmp.ne.s32.totalorder (!%p236_p8), %s1345_s14, 0 }
  0x1e   : > { %s1273_s30 = smul.u32 (!%p236_p8), 48, %s242_s28  ;;  %p288_p9 = scmp.lt.s32.totalorder (!%p236_p8), %s286_s29, 287 }
  0x20   : > { %s1428_s8 = scalar_lea.vmem (!%p236_p8), [#allocation3], %s1273_s30 }
  0x22   : > { %s1589_s29 = smov (!%p288_p9, %s286_s29), 287  ;;  %318 = sbr.rel (%p978_p10) target bundleno = 48 (0x30), region = 62 }
  0x23   : > { %s1201_s4 = sshll.u32 %s1589_s29, 3 }
  0x24   : > { %s1426_s7 = scalar_lea.vmem %s1579_s1, %s1201_s4 }
  0x27   : > { %v1355_v8 = vmov 0.0  }
  0x28   : > { %319 = vst [vmem:[#allocation2 + $0x30] sm:$0xff] %v1355_v8 }
  0x29   : > { %320 = vst [vmem:[#allocation2] sm:$0xff] %v1355_v8 }
  0x2a   : > { %321 = vst [vmem:[#allocation2 + $0x18] sm:$0xff] %v1355_v8 }
  0x2b   : > { %322 = vst [vmem:[#allocation2 + $0x10] sm:$0xff] %v1355_v8 }
  0x2c   : > { %323 = vst [vmem:[#allocation2 + $0x8] sm:$0xff] %v1355_v8 }
  0x2d   : > { %324 = vst [vmem:[#allocation2 + $0x20] sm:$0xff] %v1355_v8 }
  0x2e   : > { %325 = vst [vmem:[#allocation2 + $0x28] sm:$0xff] %v1355_v8 }
  0x2f   : > { %326 = vst [vmem:[#allocation2 + $0x38] sm:$0xff] %v1355_v8 }
  0x30 PF: > { %v1061_v9 = vld [vmem:[%s1426_s7 + $0x70] sm:$0xf]  ;;  %v1223_v10 = vld [vmem:[%s1426_s7 + $0x74] sm:$0xf0]  ;;  %v1222_v18 = vld [vmem:[%s1426_s7 + $0x74] sm:$0xf] }
  0x31   : > { %v1125_v11 = vld [vmem:[%s1426_s7 + $0xf0] sm:$0xf]  ;;  %v1062_v12 = vor.u32 %v1223_v10, %v1061_v9  ;;  %v1239_v13 = vld [vmem:[%s1426_s7 + $0xf4] sm:$0xf0]  ;;  %v1063_v19 = vld [vmem:[%s1426_s7 + $0x78] sm:$0xf0] }
  0x32   : > { %v1189_v14 = vld [vmem:[%s1426_s7 + $0x170] sm:$0xf]  ;;  %v1255_v15 = vld [vmem:[%s1426_s7 + $0x174] sm:$0xf0]  ;;  %v1126_v16 = vor.u32 %v1239_v13, %v1125_v11  ;;  %v1053_v20 = vld [vmem:[%s1426_s7 + $0x60] sm:$0xf]  ;;  %v1066_v21 = vor.u32 %v1222_v18, %v1063_v19 }
  0x33   : > { %v1190_v17 = vor.u32 %v1255_v15, %v1189_v14  ;;  %663 = vmatpush.bf16.msra.mxu0 %v1062_v12  ;;  %v1221_v22 = vld [vmem:[%s1426_s7 + $0x64] sm:$0xf0]  ;;  %v1117_v23 = vld [vmem:[%s1426_s7 + $0xe0] sm:$0xf]  ;;  %v1220_v29 = vld [vmem:[%s1426_s7 + $0x64] sm:$0xf] }
  0x34   : > { %v1237_v24 = vld [vmem:[%s1426_s7 + $0xe4] sm:$0xf0]  ;;  %682 = vmatpush.bf16.msra.mxu1 %v1126_v16  ;;  %v1054_v25 = vor.u32 %v1221_v22, %v1053_v20  ;;  %v1181_v27 = vld [vmem:[%s1426_s7 + $0x160] sm:$0xf]  ;;  %720 = vmatpush.bf16.msra.mxu3 %v1066_v21  ;;  %v1055_v31 = vld [vmem:[%s1426_s7 + $0x68] sm:$0xf0] }
  0x35   : > { %701 = vmatpush.bf16.msra.mxu2 %v1190_v17  ;;  %v1118_v26 = vor.u32 %v1237_v24, %v1117_v23  ;;  %v1253_v28 = vld [vmem:[%s1426_s7 + $0x164] sm:$0xf0]  ;;  %v1045_v32 = vld [vmem:[%s1426_s7 + $0x50] sm:$0xf]  ;;  %v1219_v33 = vld [vmem:[%s1426_s7 + $0x54] sm:$0xf0]  ;;  %v1058_v34 = vor.u32 %v1220_v29, %v1055_v31 }
  0x36   : > { %v1182_v30 = vor.u32 %v1253_v28, %v1181_v27  ;;  %v1109_v35 = vld [vmem:[%s1426_s7 + $0xd0] sm:$0xf]  ;;  %v1235_v36 = vld [vmem:[%s1426_s7 + $0xd4] sm:$0xf0]  ;;  %v1046_v38 = vor.u32 %v1219_v33, %v1045_v32  ;;  %v1218_v40 = vld [vmem:[%s1426_s7 + $0x54] sm:$0xf] }
  0x37   : > { %v1173_v37 = vld [vmem:[%s1426_s7 + $0x150] sm:$0xf]  ;;  %664 = vmatpush.bf16.msra.mxu0 %v1054_v25  ;;  %v1251_v39 = vld [vmem:[%s1426_s7 + $0x154] sm:$0xf0]  ;;  %v1047_v41 = vld [vmem:[%s1426_s7 + $0x58] sm:$0xf0]  ;;  %v1110_v42 = vor.u32 %v1235_v36, %v1109_v35 }
  0x38   : > { %683 = vmatpush.bf16.msra.mxu1 %v1118_v26  ;;  %v1174_v43 = vor.u32 %v1251_v39, %v1173_v37  ;;  %v1037_v44 = vld [vmem:[%s1426_s7 + $0x40] sm:$0xf]  ;;  %v1217_v45 = vld [vmem:[%s1426_s7 + $0x44] sm:$0xf0]  ;;  %721 = vmatpush.bf16.msra.mxu3 %v1058_v34  ;;  %v1050_v47 = vor.u32 %v1218_v40, %v1047_v41  ;;  %v1216_v51 = vld [vmem:[%s1426_s7 + $0x44] sm:$0xf] }
  0x39   : > { %702 = vmatpush.bf16.msra.mxu2 %v1182_v30  ;;  %v1101_v46 = vld [vmem:[%s1426_s7 + $0xc0] sm:$0xf]  ;;  %v1233_v48 = vld [vmem:[%s1426_s7 + $0xc4] sm:$0xf0]  ;;  %v1039_v52 = vld [vmem:[%s1426_s7 + $0x48] sm:$0xf0]  ;;  %v1038_v53 = vor.u32 %v1217_v45, %v1037_v44 }
  0x3a   : > { %v1165_v49 = vld [vmem:[%s1426_s7 + $0x140] sm:$0xf]  ;;  %v1249_v50 = vld [vmem:[%s1426_s7 + $0x144] sm:$0xf0]  ;;  %v1102_v54 = vor.u32 %v1233_v48, %v1101_v46  ;;  %v1029_v56 = vld [vmem:[%s1426_s7 + $0x30] sm:$0xf]  ;;  %v1042_v59 = vor.u32 %v1216_v51, %v1039_v52 }
  0x3b   : > { %665 = vmatpush.bf16.msra.mxu0 %v1046_v38  ;;  %v1166_v55 = vor.u32 %v1249_v50, %v1165_v49  ;;  %v1215_v57 = vld [vmem:[%s1426_s7 + $0x34] sm:$0xf0]  ;;  %v1093_v58 = vld [vmem:[%s1426_s7 + $0xb0] sm:$0xf]  ;;  %v1214_v63 = vld [vmem:[%s1426_s7 + $0x34] sm:$0xf] }
  0x3c   : > { %684 = vmatpush.bf16.msra.mxu1 %v1110_v42  ;;  %722 = vmatpush.bf16.msra.mxu3 %v1050_v47  ;;  %v1231_v60 = vld [vmem:[%s1426_s7 + $0xb4] sm:$0xf0]  ;;  %v1157_v61 = vld [vmem:[%s1426_s7 + $0x130] sm:$0xf]  ;;  %v1031_v0 = vld [vmem:[%s1426_s7 + $0x38] sm:$0xf0]  ;;  %v1030_v1 = vor.u32 %v1215_v57, %v1029_v56 }
  0x3d   : > { %703 = vmatpush.bf16.msra.mxu2 %v1174_v43  ;;  %v1247_v62 = vld [vmem:[%s1426_s7 + $0x134] sm:$0xf0]  ;;  %v1094_v2 = vor.u32 %v1231_v60, %v1093_v58  ;;  %v1021_v4 = vld [vmem:[%s1426_s7 + $0x20] sm:$0xf]  ;;  %v1213_v5 = vld [vmem:[%s1426_s7 + $0x24] sm:$0xf0]  ;;  %v1034_v7 = vor.u32 %v1214_v63, %v1031_v0 }
  0x3e   : > { %v1158_v3 = vor.u32 %v1247_v62, %v1157_v61  ;;  %v1085_v6 = vld [vmem:[%s1426_s7 + $0xa0] sm:$0xf]  ;;  %v1229_v8 = vld [vmem:[%s1426_s7 + $0xa4] sm:$0xf0]  ;;  %v1212_v11 = vld [vmem:[%s1426_s7 + $0x24] sm:$0xf]  ;;  %v1022_v13 = vor.u32 %v1213_v5, %v1021_v4 }
  0x3f   : > { %666 = vmatpush.bf16.msra.mxu0 %v1038_v53  ;;  %v1149_v9 = vld [vmem:[%s1426_s7 + $0x120] sm:$0xf]  ;;  %v1245_v10 = vld [vmem:[%s1426_s7 + $0x124] sm:$0xf0]  ;;  %v1023_v12 = vld [vmem:[%s1426_s7 + $0x28] sm:$0xf0]  ;;  %v1086_v14 = vor.u32 %v1229_v8, %v1085_v6 }
  0x40   : > { %685 = vmatpush.bf16.msra.mxu1 %v1102_v54  ;;  %723 = vmatpush.bf16.msra.mxu3 %v1042_v59  ;;  %v1150_v15 = vor.u32 %v1245_v10, %v1149_v9  ;;  %v1013_v16 = vld [vmem:[%s1426_s7 + $0x10] sm:$0xf]  ;;  %v1211_v17 = vld [vmem:[%s1426_s7 + $0x14] sm:$0xf0]  ;;  %v1026_v19 = vor.u32 %v1212_v11, %v1023_v12  ;;  %v1210_v23 = vld [vmem:[%s1426_s7 + $0x14] sm:$0xf] }
  0x41   : > { %704 = vmatpush.bf16.msra.mxu2 %v1166_v55  ;;  %v1077_v18 = vld [vmem:[%s1426_s7 + $0x90] sm:$0xf]  ;;  %v1227_v20 = vld [vmem:[%s1426_s7 + $0x94] sm:$0xf0]  ;;  %v1015_v24 = vld [vmem:[%s1426_s7 + $0x18] sm:$0xf0]  ;;  %v1014_v25 = vor.u32 %v1211_v17, %v1013_v16 }
  0x42   : > { %v1141_v21 = vld [vmem:[%s1426_s7 + $0x110] sm:$0xf]  ;;  %v1243_v22 = vld [vmem:[%s1426_s7 + $0x114] sm:$0xf0]  ;;  %v1005_v26 = vld [vmem:[%s1426_s7] sm:$0xf]  ;;  %v1078_v29 = vor.u32 %v1227_v20, %v1077_v18  ;;  %v1018_v34 = vor.u32 %v1210_v23, %v1015_v24 }
  0x43   : > { %667 = vmatpush.bf16.msra.mxu0 %v1030_v1  ;;  %v1209_v27 = vld [vmem:[%s1426_s7 + $0x4] sm:$0xf0]  ;;  %v1069_v28 = vld [vmem:[%s1426_s7 + $0x80] sm:$0xf]  ;;  %v1142_v30 = vor.u32 %v1243_v22, %v1141_v21  ;;  %v1208_v35 = vld [vmem:[%s1426_s7 + $0x4] sm:$0xf] }
  0x44   : > { %686 = vmatpush.bf16.msra.mxu1 %v1094_v2  ;;  %724 = vmatpush.bf16.msra.mxu3 %v1034_v7  ;;  %v1225_v31 = vld [vmem:[%s1426_s7 + $0x84] sm:$0xf0]  ;;  %v1133_v32 = vld [vmem:[%s1426_s7 + $0x100] sm:$0xf]  ;;  %v1007_v36 = vld [vmem:[%s1426_s7 + $0x8] sm:$0xf0]  ;;  %v1006_v41 = vor.u32 %v1209_v27, %v1005_v26 }
  0x45   : > { %705 = vmatpush.bf16.msra.mxu2 %v1158_v3  ;;  %v1241_v33 = vld [vmem:[%s1426_s7 + $0x104] sm:$0xf0]  ;;  %v981_v37 = vld [vmem:[%s1428_s8] sm:$0xf]  ;;  %v1203_v38 = vld [vmem:[%s1428_s8 + $0x8] sm:$0xf0]  ;;  %v1070_v45 = vor.u32 %v1225_v31, %v1069_v28  ;;  %v1010_v50 = vor.u32 %v1208_v35, %v1007_v36 }
  0x46   : > { %v1238_v39 = vld [vmem:[%s1426_s7 + $0xf4] sm:$0xf]  ;;  %v1127_v40 = vld [vmem:[%s1426_s7 + $0xf8] sm:$0xf0]  ;;  %v1134_v46 = vor.u32 %v1241_v33, %v1133_v32  ;;  %v983_v47 = vld [vmem:[%s1428_s8 + $0xc] sm:$0xf0]  ;;  %v982_v52 = vor.u32 %v1203_v38, %v981_v37 }
  0x47   : > { %668 = vmatpush.bf16.msra.mxu0 %v1022_v13  ;;  %v1202_v42 = vld [vmem:[%s1428_s8 + $0x4] sm:$0xf]  ;;  %v1191_v44 = vld [vmem:[%s1426_s7 + $0x178] sm:$0xf0]  ;;  %v989_v48 = vld [vmem:[%s1428_s8 + $0x8] sm:$0xf]  ;;  %v1130_v51 = vor.u32 %v1238_v39, %v1127_v40 }
  0x48   : > { %687 = vmatpush.bf16.msra.mxu1 %v1086_v14  ;;  %725 = vmatpush.bf16.msra.mxu3 %v1026_v19  ;;  %v1254_v43 = vld [vmem:[%s1426_s7 + $0x174] sm:$0xf]  ;;  %v1236_v54 = vld [vmem:[%s1426_s7 + $0xe4] sm:$0xf]  ;;  %v1119_v55 = vld [vmem:[%s1426_s7 + $0xe8] sm:$0xf0]  ;;  %v1507_v56 = vor.u32 %v1202_v42, %v983_v47 }
  0x49   : > { %706 = vmatpush.bf16.msra.mxu2 %v1150_v15  ;;  %v1204_v49 = vld [vmem:[%s1428_s8 + $0x10] sm:$0xf0]  ;;  %v1194_v53 = vor.u32 %v1254_v43, %v1191_v44  ;;  %v1183_v59 = vld [vmem:[%s1426_s7 + $0x168] sm:$0xf0]  ;;  %v1122_v60 = vor.u32 %v1236_v54, %v1119_v55  ;;  %v1111_v63 = vld [vmem:[%s1426_s7 + $0xd8] sm:$0xf0] }
  0x4a   : > { %v1509_v57 = vor.u32 %v1204_v49, %v989_v48  ;;  %v1252_v58 = vld [vmem:[%s1426_s7 + $0x164] sm:$0xf]  ;;  %v1234_v62 = vld [vmem:[%s1426_s7 + $0xd4] sm:$0xf]  ;;  %v1175_v1 = vld [vmem:[%s1426_s7 + $0x158] sm:$0xf0] }
  0x4b   : > { %669 = vmatpush.bf16.msra.mxu0 %v1014_v25  ;;  %v1186_v61 = vor.u32 %v1252_v58, %v1183_v59  ;;  %v1250_v0 = vld [vmem:[%s1426_s7 + $0x154] sm:$0xf]  ;;  %v1114_v2 = vor.u32 %v1234_v62, %v1111_v63  ;;  %v1232_v4 = vld [vmem:[%s1426_s7 + $0xc4] sm:$0xf]  ;;  %v1103_v5 = vld [vmem:[%s1426_s7 + $0xc8] sm:$0xf0] }
  0x4c   : > { %688 = vmatpush.bf16.msra.mxu1 %v1078_v29  ;;  %726 = vmatpush.bf16.msra.mxu3 %v1018_v34  ;;  %v1178_v3 = vor.u32 %v1250_v0, %v1175_v1  ;;  %v1248_v6 = vld [vmem:[%s1426_s7 + $0x144] sm:$0xf]  ;;  %v1167_v7 = vld [vmem:[%s1426_s7 + $0x148] sm:$0xf0]  ;;  %v1106_v8 = vor.u32 %v1232_v4, %v1103_v5  ;;  %v993_v9 = vld [vmem:[%s1428_s8 + $0x18] sm:$0xf] }
  0x4d   : > { %707 = vmatpush.bf16.msra.mxu2 %v1142_v30  ;;  %v1170_v10 = vor.u32 %v1248_v6, %v1167_v7  ;;  %v1206_v11 = vld [vmem:[%s1428_s8 + $0x20] sm:$0xf0]  ;;  %v1095_v13 = vld [vmem:[%s1426_s7 + $0xb8] sm:$0xf0]  ;;  %v995_v17 = vld [vmem:[%s1428_s8 + $0x24] sm:$0xf0] }
  0x4e   : > { %v1230_v12 = vld [vmem:[%s1426_s7 + $0xb4] sm:$0xf]  ;;  %v1205_v14 = vld [vmem:[%s1428_s8 + $0x1c] sm:$0xf]  ;;  %v1001_v18 = vld [vmem:[%s1428_s8 + $0x20] sm:$0xf]  ;;  %v994_v21 = vor.u32 %v1206_v11, %v993_v9 }
  0x4f   : > { %670 = vmatpush.bf16.msra.mxu0 %v1006_v41  ;;  %v1246_v15 = vld [vmem:[%s1426_s7 + $0x134] sm:$0xf]  ;;  %v1159_v16 = vld [vmem:[%s1426_s7 + $0x138] sm:$0xf0]  ;;  %v1098_v20 = vor.u32 %v1230_v12, %v1095_v13  ;;  %v1228_v23 = vld [vmem:[%s1426_s7 + $0xa4] sm:$0xf]  ;;  %v998_v25 = vor.u32 %v1205_v14, %v995_v17 }
  0x50   : > { %689 = vmatpush.bf16.msra.mxu1 %v1070_v45  ;;  %727 = vmatpush.bf16.msra.mxu3 %v1010_v50  ;;  %v1207_v19 = vld [vmem:[%s1428_s8 + $0x28] sm:$0xf0]  ;;  %v1162_v22 = vor.u32 %v1246_v15, %v1159_v16  ;;  %v1244_v27 = vld [vmem:[%s1426_s7 + $0x124] sm:$0xf]  ;;  %v1226_v31 = vld [vmem:[%s1426_s7 + $0x94] sm:$0xf] }
  0x51   : > { %708 = vmatpush.bf16.msra.mxu2 %v1134_v46  ;;  %v1087_v24 = vld [vmem:[%s1426_s7 + $0xa8] sm:$0xf0]  ;;  %v1002_v26 = vor.u32 %v1207_v19, %v1001_v18  ;;  %v1079_v32 = vld [vmem:[%s1426_s7 + $0x98] sm:$0xf0]  ;;  %v1242_v33 = vld [vmem:[%s1426_s7 + $0x114] sm:$0xf] }
  0x52   : > { %671 = vmatmul.bf16.vlgmr.msra.gmra.mxu0 %v982_v52  ;;  %v1151_v28 = vld [vmem:[%s1426_s7 + $0x128] sm:$0xf0]  ;;  %v1090_v29 = vor.u32 %v1228_v23, %v1087_v24  ;;  %v1143_v34 = vld [vmem:[%s1426_s7 + $0x118] sm:$0xf0]  ;;  %v1082_v35 = vor.u32 %v1226_v31, %v1079_v32  ;;  %v1224_v37 = vld [vmem:[%s1426_s7 + $0x84] sm:$0xf] }
  0x53   : > { %690 = vmatmul.bf16.vlgmr.msra.gmra.mxu1 %v1507_v56  ;;  %728 = vmatmul.bf16.vlgmr.msra.gmra.mxu3 %v982_v52  ;;  %v1154_v30 = vor.u32 %v1244_v27, %v1151_v28  ;;  %v1146_v36 = vor.u32 %v1242_v33, %v1143_v34  ;;  %v1071_v38 = vld [vmem:[%s1426_s7 + $0x88] sm:$0xf0]  ;;  %v1240_v39 = vld [vmem:[%s1426_s7 + $0x104] sm:$0xf]  ;;  %v327_v46 = vld [vmem:[#allocation2 + $0x30] sm:$0xff]  ;;  %p1195_p11 = scmp.ne.s32.totalorder %s1345_s14, 5 }
  0x54   : > { %758 = vmatpush.bf16.msrb.mxu1 %v1194_v53  ;;  %709 = vmatmul.bf16.vlgmr.msra.gmra.mxu2 %v1509_v57  ;;  %v1135_v40 = vld [vmem:[%s1426_s7 + $0x108] sm:$0xf0]  ;;  %v1074_v41 = vor.u32 %v1224_v37, %v1071_v38  ;;  %v329_v54 = vld [vmem:[#allocation2 + $0x18] sm:$0xff]  ;;  %v328_v14 = vld [vmem:[#allocation2] sm:$0xff] }
  0x55   : > { %1256 = vmatpush.bf16.msrb.mxu2 %v1130_v51  ;;  %739 = vmatpush.bf16.msrb.mxu0 %v1130_v51  ;;  %v1138_v42 = vor.u32 %v1240_v39, %v1135_v40  ;;  %v331_v62 = vld [vmem:[#allocation2 + $0x8] sm:$0xff]  ;;  %v330_v24 = vld [vmem:[#allocation2 + $0x10] sm:$0xff]  ;;  %v334_v31 = vld [vmem:[#allocation2 + $0x38] sm:$0xff] }
  0x56   : > { %1264 = vmatpush.bf16.msrb.mxu3 %v1194_v53  ;;  %v333_v6 = vld [vmem:[#allocation2 + $0x28] sm:$0xff] }
  0x58   : > { %759 = vmatpush.bf16.msrb.mxu1 %v1186_v61 }
  0x59   : > { %1257 = vmatpush.bf16.msrb.mxu2 %v1122_v60  ;;  %740 = vmatpush.bf16.msrb.mxu0 %v1122_v60 }
  0x5a   : > { %1265 = vmatpush.bf16.msrb.mxu3 %v1186_v61 }
  0x5c   : > { %760 = vmatpush.bf16.msrb.mxu1 %v1178_v3 }
  0x5d   : > { %1258 = vmatpush.bf16.msrb.mxu2 %v1114_v2  ;;  %741 = vmatpush.bf16.msrb.mxu0 %v1114_v2 }
  0x5e   : > { %1266 = vmatpush.bf16.msrb.mxu3 %v1178_v3 }
  0x60   : > { %761 = vmatpush.bf16.msrb.mxu1 %v1170_v10 }
  0x61   : > { %1259 = vmatpush.bf16.msrb.mxu2 %v1106_v8  ;;  %742 = vmatpush.bf16.msrb.mxu0 %v1106_v8 }
  0x62   : > { %1267 = vmatpush.bf16.msrb.mxu3 %v1170_v10  ;;  %676 = vmatmul.bf16.gmra.mxu0 %v994_v21 }
  0x63   : > { %695 = vmatmul.bf16.gmra.mxu1 %v998_v25  ;;  %733 = vmatmul.bf16.gmra.mxu3 %v994_v21 }
  0x64   : > { %762 = vmatpush.bf16.msrb.mxu1 %v1162_v22  ;;  %714 = vmatmul.bf16.gmra.mxu2 %v1002_v26 }
  0x65   : > { %1260 = vmatpush.bf16.msrb.mxu2 %v1098_v20  ;;  %743 = vmatpush.bf16.msrb.mxu0 %v1098_v20  ;;  %v332_v20 = vld [vmem:[#allocation2 + $0x20] sm:$0xff] }
  0x66   : > { %1268 = vmatpush.bf16.msrb.mxu3 %v1162_v22 }
  0x68   : > { %763 = vmatpush.bf16.msrb.mxu1 %v1154_v30 }
  0x69   : > { %1261 = vmatpush.bf16.msrb.mxu2 %v1090_v29  ;;  %744 = vmatpush.bf16.msrb.mxu0 %v1090_v29 }
  0x6a   : > { %1269 = vmatpush.bf16.msrb.mxu3 %v1154_v30 }
  0x6c   : > { %764 = vmatpush.bf16.msrb.mxu1 %v1146_v36 }
  0x6d   : > { %1262 = vmatpush.bf16.msrb.mxu2 %v1082_v35  ;;  %745 = vmatpush.bf16.msrb.mxu0 %v1082_v35 }
  0x6e   : > { %1270 = vmatpush.bf16.msrb.mxu3 %v1146_v36 }
  0x70   : > { %765 = vmatpush.bf16.msrb.mxu1 %v1138_v42 }
  0x71   : > { %1263 = vmatpush.bf16.msrb.mxu2 %v1074_v41  ;;  %746 = vmatpush.bf16.msrb.mxu0 %v1074_v41 }
  0x72   : > { %1271 = vmatpush.bf16.msrb.mxu3 %v1138_v42 }
  0x73   : > { %766 = vmatmul.bf16.vlgmr.msrb.gmra.mxu1 %v1509_v57 }
  0x74   : > { %747 = vmatmul.bf16.vlgmr.msrb.gmra.mxu0 %v1507_v56  ;;  %752 = vmatmul.bf16.vlgmr.msrb.gmra.mxu2 %v998_v25 }
  0x75   : > { %771 = vmatmul.bf16.vlgmr.msrb.gmra.mxu3 %v1002_v26 }
  0xcf   : > { %v672_v43 = vpop.f32.mrf.mxu0 }
  0xd0   : > { %v691_v44 = vpop.f32.mrf.mxu1 }
  0xd1   : > { %v692_v45 = vadd.f32 %v691_v44, %v672_v43 }
  0xd6   : > { %v729_v49 = vpop.f32.mrf.mxu3 }
  0xd7   : > { %v710_v47 = vpop.f32.mrf.mxu2  ;;  %v674_v50 = vpop.f32.mrf.mxu0 }
  0xd8   : > { %v711_v48 = vadd.f32 %v710_v47, %v692_v45  ;;  %v693_v51 = vpop.f32.mrf.mxu1 }
  0xd9   : > { %v694_v53 = vadd.f32 %v693_v51, %v674_v50 }
  0xda   : > { %v777_v52 = vadd.f32 %v711_v48, %v327_v46 }
  0xdc   : > { %785 = vst [vmem:[#allocation2 + $0x30] sm:$0xff] %v777_v52 }
  0xde   : > { %v731_v56 = vpop.f32.mrf.mxu3 }
  0xdf   : > { %v712_v55 = vpop.f32.mrf.mxu2  ;;  %v677_v59 = vpop.f32.mrf.mxu0 }
  0xe0   : > { %v713_v58 = vadd.f32 %v712_v55, %v694_v53  ;;  %v696_v60 = vpop.f32.mrf.mxu1 }
  0xe1   : > { %v697_v61 = vadd.f32 %v696_v60, %v677_v59 }
  0xe2   : > { %v779_v57 = vadd.f32 %v713_v58, %v329_v54 }
  0xe4   : > { %787 = vst [vmem:[#allocation2 + $0x18] sm:$0xff] %v779_v57 }
  0xe6   : > { %v734_v1 = vpop.f32.mrf.mxu3 }
  0xe7   : > { %v715_v63 = vpop.f32.mrf.mxu2  ;;  %v679_v2 = vpop.f32.mrf.mxu0 }
  0xe8   : > { %v716_v0 = vadd.f32 %v715_v63, %v697_v61  ;;  %v698_v3 = vpop.f32.mrf.mxu1 }
  0xe9   : > { %v699_v5 = vadd.f32 %v698_v3, %v679_v2 }
  0xea   : > { %v781_v4 = vadd.f32 %v716_v0, %v331_v62 }
  0xec   : > { %789 = vst [vmem:[#allocation2 + $0x8] sm:$0xff] %v781_v4 }
  0xee   : > { %v736_v9 = vpop.f32.mrf.mxu3 }
  0xef   : > { %v717_v7 = vpop.f32.mrf.mxu2 }
  0xf0   : > { %v718_v8 = vadd.f32 %v717_v7, %v699_v5  ;;  %v767_v13 = vpop.f32.mrf.mxu1 }
  0xf1   : > { %v748_v10 = vpop.f32.mrf.mxu0 }
  0xf2   : > { %v783_v11 = vadd.f32 %v718_v8, %v333_v6  ;;  %v749_v12 = vadd.f32 %v748_v10, %v729_v49 }
  0xf4   : > { %791 = vst [vmem:[#allocation2 + $0x28] sm:$0xff] %v783_v11  ;;  %v768_v15 = vadd.f32 %v767_v13, %v749_v12 }
  0xf6   : > { %v778_v16 = vadd.f32 %v768_v15, %v328_v14 }
  0xf7   : > { %v753_v17 = vpop.f32.mrf.mxu2 }
  0xf8   : > { %786 = vst [vmem:[#allocation2] sm:$0xff] %v778_v16  ;;  %v754_v18 = vadd.f32 %v753_v17, %v734_v1  ;;  %v772_v19 = vpop.f32.mrf.mxu3  ;;  %v769_v25 = vpop.f32.mrf.mxu1 }
  0xf9   : > { %v750_v21 = vpop.f32.mrf.mxu0 }
  0xfa   : > { %v773_v22 = vadd.f32 %v772_v19, %v754_v18  ;;  %v751_v23 = vadd.f32 %v750_v21, %v731_v56 }
  0xfc   : > { %v782_v26 = vadd.f32 %v773_v22, %v332_v20  ;;  %v770_v27 = vadd.f32 %v769_v25, %v751_v23 }
  0xfe   : > { %790 = vst [vmem:[#allocation2 + $0x20] sm:$0xff] %v782_v26  ;;  %v780_v28 = vadd.f32 %v770_v27, %v330_v24 }
  0xff   : > { %v755_v29 = vpop.f32.mrf.mxu2 }
 0x100   : > { %788 = vst [vmem:[#allocation2 + $0x10] sm:$0xff] %v780_v28  ;;  %v756_v30 = vadd.f32 %v755_v29, %v736_v9  ;;  %v774_v32 = vpop.f32.mrf.mxu3 }
 0x102   : > { %v775_v33 = vadd.f32 %v774_v32, %v756_v30  ;;  %796 = sbr.rel (%p1195_p11) target bundleno = 277 (0x115), region = 66 }
 0x104   : > { %v784_v34 = vadd.f32 %v775_v33, %v334_v31 }
 0x106   : > { %792 = vst [vmem:[#allocation2 + $0x38] sm:$0xff] %v784_v34 }
 0x107   : > { %v797_v35 = vld [vmem:[#allocation2 + $0x30] sm:$0xff]  ;;  %v798_v36 = vld [vmem:[#allocation2] sm:$0xff]  ;;  %v799_v40 = vld [vmem:[#allocation2 + $0x18] sm:$0xff] }
 0x108   : > { %v805_v37 = vld [vmem:[%s1580_s2] sm:$0x3]  ;;  %v800_v41 = vld [vmem:[#allocation2 + $0x10] sm:$0xff]  ;;  %v801_v42 = vld [vmem:[#allocation2 + $0x8] sm:$0xff] }
 0x109   : > { %v807_v38 = vperm.slane %v805_v37, 0  ;;  %v808_v39 = vperm.slane %v805_v37, 1  ;;  %v802_v43 = vld [vmem:[#allocation2 + $0x20] sm:$0xff]  ;;  %v803_v44 = vld [vmem:[#allocation2 + $0x28] sm:$0xff] }
 0x10b   : > { %v811_v46 = vadd.f32 %v807_v38, %v797_v35  ;;  %v812_v47 = vadd.f32 %v808_v39, %v798_v36  ;;  %v813_v48 = vadd.f32 %v807_v38, %v799_v40  ;;  %v814_v49 = vadd.f32 %v808_v39, %v800_v41 }
 0x10c   : > { %v815_v50 = vadd.f32 %v807_v38, %v801_v42  ;;  %v816_v51 = vadd.f32 %v808_v39, %v802_v43  ;;  %v817_v52 = vadd.f32 %v807_v38, %v803_v44 }
 0x10d   : > { %v804_v45 = vld [vmem:[#allocation2 + $0x38] sm:$0xff]  ;;  %v819_v54 = vmax.f32 %v811_v46, 0.0  ;;  %v820_v55 = vmax.f32 %v812_v47, 0.0  ;;  %v821_v58 = vmax.f32 %v813_v48, 0.0  ;;  %v822_v56 = vmax.f32 %v814_v49, 0.0 }
 0x10e   : > { %v818_v53 = vadd.f32 %v808_v39, %v804_v45  ;;  %v823_v59 = vmax.f32 %v815_v50, 0.0  ;;  %v824_v60 = vmax.f32 %v816_v51, 0.0  ;;  %v825_v57 = vmax.f32 %v817_v52, 0.0 }
 0x10f   : > { %v827_v62 = vpack.c.bf16 %v820_v55, %v819_v54  ;;  %v828_v63 = vpack.c.bf16 %v822_v56, %v821_v58 }
 0x110   : > { %v826_v61 = vmax.f32 %v818_v53, 0.0  ;;  %v829_v0 = vpack.c.bf16 %v824_v60, %v823_v59 }
 0x111   : > { %831 = vst [vmem:[%s1581_s3] sm:$0xff] %v827_v62 }
 0x112   : > { %v830_v1 = vpack.c.bf16 %v826_v61, %v825_v57  ;;  %832 = vst [vmem:[%s1581_s3 + $0x8] sm:$0xff] %v828_v63 }
 0x113   : > { %833 = vst [vmem:[%s1581_s3 + $0x10] sm:$0xff] %v829_v0 }
 0x114   : > { %834 = vst [vmem:[%s1581_s3 + $0x18] sm:$0xff] %v830_v1 }
 0x115 PF: > { %s13_s16 = sadd.s32 1, %s1353_s16   ;;  %s1582_s12 = smov %s1341_s13 }
 0x116   : > { %p10_p12 = scmp.ge.s32.totalorder %s13_s16, 8   ;;  %s1583_s13 = smov %s1411_s20 }
 0x117   : > { %s1584_s14 = smov %s1349_s15  ;;  %s1585_s15 = smov %s1587_s17 }
 0x118   :  { %12 = sbr.rel (!%p10_p12) target bundleno = 3 (0x3), region = 113 }

// kernel: resnet_forward.67
= control target key start
LH: loop header
LB: loop body
LE: loop exit
PB: predicated region body
PF: predicated region fallthrough
CT: control target
= control target key end

     0   :  { %s1837_s12 = smov 0   ;;  %s1839_s13 = smov 0   ;;  %s2265_s0 = inlined_call_operand.vmem [shape: bf16[32,512], index: 0, kind: input, shape index: {}]   ;;  %s2266_s1 = inlined_call_operand.vmem [shape: bf16[512,1024], index: 1, kind: input, shape index: {}]   ;;  %s2267_s2 = inlined_call_operand.vmem [shape: f32[1,1024], index: 2, kind: input, shape index: {}]   ;;  %s2268_s3 = inlined_call_operand.vmem [shape: bf16[32,1024], index: 3, kind: output, shape index: {}]  }
   0x1   :  { %s1841_s14 = smov 0   ;;  %s1843_s15 = smov 0  }
   0x2   :  { %s1845_s16 = smov 0  }
   0x3 LB: > { %s28_s17 = sadd.s32 1, %s1811_s15  ;;  %s1358_s18 = sadd.s32 4294967295, %s1815_s16   ;;  %s1815_s16 = sphi %s1845_s16, %s13_s16   ;;  %s1811_s15 = sphi %s1843_s15, %s2273_s15   ;;  %s1807_s14 = sphi %s1841_s14, %s2272_s14   ;;  %s1803_s13 = sphi %s1839_s13, %s2271_s13   ;;  %s1799_s12 = sphi %s1837_s12, %s2270_s12  }
   0x4   : > { %p30_p0 = scmp.ge.s32.totalorder %s28_s17, 4  ;;  %p76_p1 = scmp.ne.s32.totalorder %s1803_s13, %s1799_s12 }
   0x5   : > { %p77_p2 = scmp.eq.s32.totalorder %s1815_s16, 0  ;;  %p134_p4 = scmp.eq.s32.totalorder %s1358_s18, 3 }
   0x6   : > { %s2275_s17 = smov (%p30_p0, %s28_s17), 0  ;;  %s69_s20 = sadd.s32 1, %s1803_s13 }
   0x7   : > { %p78_p3 = por %p77_p2, %p76_p1  ;;  %s65_s19 = ssub.s32 %s1811_s15, %s2275_s17 }
   0x8   : > { %p67_p5 = scmp.eq.s32.totalorder %s65_s19, 0  ;;  %p1872_p6 = por %p134_p4, %p76_p1 }
   0x9   : > { %p1362_p7 = scmp.ge.s32.totalorder %s1815_s16, 4 }
   0xa   : > { %s1877_s22 = scalar_select %p67_p5, %s1803_s13, %s69_s20  }
   0xb   : > { %171 = sbr.rel (%p1362_p7) target bundleno = 84 (0x54), region = 20 }
  0x10   : > { %174 = sbr.rel (!%p78_p3) target bundleno = 84 (0x54), region = 24  ;;  %s176_s23 = sand.u32 (%p78_p3), 1, %s1803_s13  }
  0x11   : > { %s1663_s24 = sshll.u32 (%p78_p3), %s1811_s15, 3  ;;  %s1363_s25 = sshll.u32 (%p78_p3), %s176_s23, 9 }
  0x12   : > { %s1885_s28 = scalar_lea.vmem (%p78_p3), %s2266_s1, %s1663_s24  ;;  %s1890_s29 = scalar_lea.vmem (%p78_p3), [#allocation3], %s1363_s25 }
  0x13   : > { %v339_v0 = vld [vmem:[%s1885_s28] sm:$0xff] (%p78_p3) }
  0x14   : > { %v341_v1 = vld [vmem:[%s1885_s28 + $0x20] sm:$0xff] (%p78_p3)  ;;  %340 = vst [vmem:[%s1890_s29] sm:$0xff] (%p78_p3), %v339_v0 }
  0x15   : > { %v343_v2 = vld [vmem:[%s1885_s28 + $0x40] sm:$0xff]  ;;  %342 = vst [vmem:[%s1890_s29 + $0x8] sm:$0xff] %v341_v1 }
  0x16   : > { %v345_v3 = vld [vmem:[%s1885_s28 + $0x60] sm:$0xff]  ;;  %344 = vst [vmem:[%s1890_s29 + $0x10] sm:$0xff] %v343_v2 }
  0x17   : > { %v347_v4 = vld [vmem:[%s1885_s28 + $0x80] sm:$0xff]  ;;  %346 = vst [vmem:[%s1890_s29 + $0x18] sm:$0xff] %v345_v3 }
  0x18   : > { %v349_v5 = vld [vmem:[%s1885_s28 + $0xa0] sm:$0xff]  ;;  %348 = vst [vmem:[%s1890_s29 + $0x20] sm:$0xff] %v347_v4 }
  0x19   : > { %v351_v6 = vld [vmem:[%s1885_s28 + $0xc0] sm:$0xff]  ;;  %350 = vst [vmem:[%s1890_s29 + $0x28] sm:$0xff] %v349_v5 }
  0x1a   : > { %v353_v7 = vld [vmem:[%s1885_s28 + $0xe0] sm:$0xff]  ;;  %352 = vst [vmem:[%s1890_s29 + $0x30] sm:$0xff] %v351_v6 }
  0x1b   : > { %v355_v8 = vld [vmem:[%s1885_s28 + $0x100] sm:$0xff]  ;;  %354 = vst [vmem:[%s1890_s29 + $0x38] sm:$0xff] %v353_v7 }
  0x1c   : > { %v357_v9 = vld [vmem:[%s1885_s28 + $0x120] sm:$0xff]  ;;  %356 = vst [vmem:[%s1890_s29 + $0x40] sm:$0xff] %v355_v8 }
  0x1d   : > { %v359_v10 = vld [vmem:[%s1885_s28 + $0x140] sm:$0xff]  ;;  %358 = vst [vmem:[%s1890_s29 + $0x48] sm:$0xff] %v357_v9 }
  0x1e   : > { %v361_v11 = vld [vmem:[%s1885_s28 + $0x160] sm:$0xff]  ;;  %360 = vst [vmem:[%s1890_s29 + $0x50] sm:$0xff] %v359_v10 }
  0x1f   : > { %v363_v12 = vld [vmem:[%s1885_s28 + $0x180] sm:$0xff]  ;;  %362 = vst [vmem:[%s1890_s29 + $0x58] sm:$0xff] %v361_v11 }
  0x20   : > { %v365_v13 = vld [vmem:[%s1885_s28 + $0x1a0] sm:$0xff]  ;;  %364 = vst [vmem:[%s1890_s29 + $0x60] sm:$0xff] %v363_v12 }
  0x21   : > { %v367_v14 = vld [vmem:[%s1885_s28 + $0x1c0] sm:$0xff]  ;;  %366 = vst [vmem:[%s1890_s29 + $0x68] sm:$0xff] %v365_v13 }
  0x22   : > { %v369_v15 = vld [vmem:[%s1885_s28 + $0x1e0] sm:$0xff]  ;;  %368 = vst [vmem:[%s1890_s29 + $0x70] sm:$0xff] %v367_v14 }
  0x23   : > { %v371_v16 = vld [vmem:[%s1885_s28 + $0x200] sm:$0xff]  ;;  %370 = vst [vmem:[%s1890_s29 + $0x78] sm:$0xff] %v369_v15 }
  0x24   : > { %v373_v17 = vld [vmem:[%s1885_s28 + $0x220] sm:$0xff]  ;;  %372 = vst [vmem:[%s1890_s29 + $0x80] sm:$0xff] %v371_v16 }
  0x25   : > { %v375_v18 = vld [vmem:[%s1885_s28 + $0x240] sm:$0xff]  ;;  %374 = vst [vmem:[%s1890_s29 + $0x88] sm:$0xff] %v373_v17 }
  0x26   : > { %v377_v19 = vld [vmem:[%s1885_s28 + $0x260] sm:$0xff]  ;;  %376 = vst [vmem:[%s1890_s29 + $0x90] sm:$0xff] %v375_v18 }
  0x27   : > { %v379_v20 = vld [vmem:[%s1885_s28 + $0x280] sm:$0xff]  ;;  %378 = vst [vmem:[%s1890_s29 + $0x98] sm:$0xff] %v377_v19 }
  0x28   : > { %v381_v21 = vld [vmem:[%s1885_s28 + $0x2a0] sm:$0xff]  ;;  %380 = vst [vmem:[%s1890_s29 + $0xa0] sm:$0xff] %v379_v20 }
  0x29   : > { %v383_v22 = vld [vmem:[%s1885_s28 + $0x2c0] sm:$0xff]  ;;  %382 = vst [vmem:[%s1890_s29 + $0xa8] sm:$0xff] %v381_v21 }
  0x2a   : > { %v385_v23 = vld [vmem:[%s1885_s28 + $0x2e0] sm:$0xff]  ;;  %384 = vst [vmem:[%s1890_s29 + $0xb0] sm:$0xff] %v383_v22 }
  0x2b   : > { %v387_v24 = vld [vmem:[%s1885_s28 + $0x300] sm:$0xff]  ;;  %386 = vst [vmem:[%s1890_s29 + $0xb8] sm:$0xff] %v385_v23 }
  0x2c   : > { %v389_v25 = vld [vmem:[%s1885_s28 + $0x320] sm:$0xff]  ;;  %388 = vst [vmem:[%s1890_s29 + $0xc0] sm:$0xff] %v387_v24 }
  0x2d   : > { %v391_v26 = vld [vmem:[%s1885_s28 + $0x340] sm:$0xff]  ;;  %390 = vst [vmem:[%s1890_s29 + $0xc8] sm:$0xff] %v389_v25 }
  0x2e   : > { %v393_v27 = vld [vmem:[%s1885_s28 + $0x360] sm:$0xff]  ;;  %392 = vst [vmem:[%s1890_s29 + $0xd0] sm:$0xff] %v391_v26 }
  0x2f   : > { %v395_v28 = vld [vmem:[%s1885_s28 + $0x380] sm:$0xff]  ;;  %394 = vst [vmem:[%s1890_s29 + $0xd8] sm:$0xff] %v393_v27 }
  0x30   : > { %v397_v29 = vld [vmem:[%s1885_s28 + $0x3a0] sm:$0xff]  ;;  %396 = vst [vmem:[%s1890_s29 + $0xe0] sm:$0xff] %v395_v28 }
  0x31   : > { %v399_v30 = vld [vmem:[%s1885_s28 + $0x3c0] sm:$0xff]  ;;  %398 = vst [vmem:[%s1890_s29 + $0xe8] sm:$0xff] %v397_v29 }
  0x32   : > { %v401_v31 = vld [vmem:[%s1885_s28 + $0x3e0] sm:$0xff]  ;;  %400 = vst [vmem:[%s1890_s29 + $0xf0] sm:$0xff] %v399_v30 }
  0x33   : > { %v403_v32 = vld [vmem:[%s1885_s28 + $0x400] sm:$0xff]  ;;  %402 = vst [vmem:[%s1890_s29 + $0xf8] sm:$0xff] %v401_v31 }
  0x34   : > { %v405_v33 = vld [vmem:[%s1885_s28 + $0x420] sm:$0xff]  ;;  %404 = vst [vmem:[%s1890_s29 + $0x100] sm:$0xff] %v403_v32 }
  0x35   : > { %v407_v34 = vld [vmem:[%s1885_s28 + $0x440] sm:$0xff]  ;;  %406 = vst [vmem:[%s1890_s29 + $0x108] sm:$0xff] %v405_v33 }
  0x36   : > { %v409_v35 = vld [vmem:[%s1885_s28 + $0x460] sm:$0xff]  ;;  %408 = vst [vmem:[%s1890_s29 + $0x110] sm:$0xff] %v407_v34 }
  0x37   : > { %v411_v36 = vld [vmem:[%s1885_s28 + $0x480] sm:$0xff]  ;;  %410 = vst [vmem:[%s1890_s29 + $0x118] sm:$0xff] %v409_v35 }
  0x38   : > { %v413_v37 = vld [vmem:[%s1885_s28 + $0x4a0] sm:$0xff]  ;;  %412 = vst [vmem:[%s1890_s29 + $0x120] sm:$0xff] %v411_v36 }
  0x39   : > { %v415_v38 = vld [vmem:[%s1885_s28 + $0x4c0] sm:$0xff]  ;;  %414 = vst [vmem:[%s1890_s29 + $0x128] sm:$0xff] %v413_v37 }
  0x3a   : > { %v417_v39 = vld [vmem:[%s1885_s28 + $0x4e0] sm:$0xff]  ;;  %416 = vst [vmem:[%s1890_s29 + $0x130] sm:$0xff] %v415_v38 }
  0x3b   : > { %v419_v40 = vld [vmem:[%s1885_s28 + $0x500] sm:$0xff]  ;;  %418 = vst [vmem:[%s1890_s29 + $0x138] sm:$0xff] %v417_v39 }
  0x3c   : > { %v421_v41 = vld [vmem:[%s1885_s28 + $0x520] sm:$0xff]  ;;  %420 = vst [vmem:[%s1890_s29 + $0x140] sm:$0xff] %v419_v40 }
  0x3d   : > { %v423_v42 = vld [vmem:[%s1885_s28 + $0x540] sm:$0xff]  ;;  %422 = vst [vmem:[%s1890_s29 + $0x148] sm:$0xff] %v421_v41 }
  0x3e   : > { %v425_v43 = vld [vmem:[%s1885_s28 + $0x560] sm:$0xff]  ;;  %424 = vst [vmem:[%s1890_s29 + $0x150] sm:$0xff] %v423_v42 }
  0x3f   : > { %v427_v44 = vld [vmem:[%s1885_s28 + $0x580] sm:$0xff]  ;;  %426 = vst [vmem:[%s1890_s29 + $0x158] sm:$0xff] %v425_v43 }
  0x40   : > { %v429_v45 = vld [vmem:[%s1885_s28 + $0x5a0] sm:$0xff]  ;;  %428 = vst [vmem:[%s1890_s29 + $0x160] sm:$0xff] %v427_v44 }
  0x41   : > { %v431_v46 = vld [vmem:[%s1885_s28 + $0x5c0] sm:$0xff]  ;;  %430 = vst [vmem:[%s1890_s29 + $0x168] sm:$0xff] %v429_v45 }
  0x42   : > { %v433_v47 = vld [vmem:[%s1885_s28 + $0x5e0] sm:$0xff]  ;;  %432 = vst [vmem:[%s1890_s29 + $0x170] sm:$0xff] %v431_v46 }
  0x43   : > { %v435_v48 = vld [vmem:[%s1885_s28 + $0x600] sm:$0xff]  ;;  %434 = vst [vmem:[%s1890_s29 + $0x178] sm:$0xff] %v433_v47 }
  0x44   : > { %v437_v49 = vld [vmem:[%s1885_s28 + $0x620] sm:$0xff]  ;;  %436 = vst [vmem:[%s1890_s29 + $0x180] sm:$0xff] %v435_v48 }
  0x45   : > { %v439_v50 = vld [vmem:[%s1885_s28 + $0x640] sm:$0xff]  ;;  %438 = vst [vmem:[%s1890_s29 + $0x188] sm:$0xff] %v437_v49 }
  0x46   : > { %v441_v51 = vld [vmem:[%s1885_s28 + $0x660] sm:$0xff]  ;;  %440 = vst [vmem:[%s1890_s29 + $0x190] sm:$0xff] %v439_v50 }
  0x47   : > { %v443_v52 = vld [vmem:[%s1885_s28 + $0x680] sm:$0xff]  ;;  %442 = vst [vmem:[%s1890_s29 + $0x198] sm:$0xff] %v441_v51 }
  0x48   : > { %v445_v53 = vld [vmem:[%s1885_s28 + $0x6a0] sm:$0xff]  ;;  %444 = vst [vmem:[%s1890_s29 + $0x1a0] sm:$0xff] %v443_v52 }
  0x49   : > { %v447_v54 = vld [vmem:[%s1885_s28 + $0x6c0] sm:$0xff]  ;;  %446 = vst [vmem:[%s1890_s29 + $0x1a8] sm:$0xff] %v445_v53 }
  0x4a   : > { %v449_v55 = vld [vmem:[%s1885_s28 + $0x6e0] sm:$0xff]  ;;  %448 = vst [vmem:[%s1890_s29 + $0x1b0] sm:$0xff] %v447_v54 }
  0x4b   : > { %v451_v56 = vld [vmem:[%s1885_s28 + $0x700] sm:$0xff]  ;;  %450 = vst [vmem:[%s1890_s29 + $0x1b8] sm:$0xff] %v449_v55 }
  0x4c   : > { %v453_v57 = vld [vmem:[%s1885_s28 + $0x720] sm:$0xff]  ;;  %452 = vst [vmem:[%s1890_s29 + $0x1c0] sm:$0xff] %v451_v56 }
  0x4d   : > { %v455_v58 = vld [vmem:[%s1885_s28 + $0x740] sm:$0xff]  ;;  %454 = vst [vmem:[%s1890_s29 + $0x1c8] sm:$0xff] %v453_v57 }
  0x4e   : > { %v457_v59 = vld [vmem:[%s1885_s28 + $0x760] sm:$0xff]  ;;  %456 = vst [vmem:[%s1890_s29 + $0x1d0] sm:$0xff] %v455_v58 }
  0x4f   : > { %v459_v60 = vld [vmem:[%s1885_s28 + $0x780] sm:$0xff]  ;;  %458 = vst [vmem:[%s1890_s29 + $0x1d8] sm:$0xff] %v457_v59 }
  0x50   : > { %v461_v61 = vld [vmem:[%s1885_s28 + $0x7a0] sm:$0xff]  ;;  %460 = vst [vmem:[%s1890_s29 + $0x1e0] sm:$0xff] %v459_v60 }
  0x51   : > { %v463_v62 = vld [vmem:[%s1885_s28 + $0x7c0] sm:$0xff]  ;;  %462 = vst [vmem:[%s1890_s29 + $0x1e8] sm:$0xff] %v461_v61 }
  0x52   : > { %v465_v63 = vld [vmem:[%s1885_s28 + $0x7e0] sm:$0xff]  ;;  %464 = vst [vmem:[%s1890_s29 + $0x1f0] sm:$0xff] %v463_v62 }
  0x53   : > { %466 = vst [vmem:[%s1890_s29 + $0x1f8] sm:$0xff] %v465_v63 }
  0x54 PF: > { %p1366_p8 = scmp.ge.s32.totalorder %s1815_s16, 1  ;;  %p479_p9 = scmp.lt.s32.totalorder %s1815_s16, 5 }
  0x56   : > { %p480_p10 = pnand %p1366_p8, %p479_p9 }
  0x57   : > { %s486_s30 = sand.u32 (!%p480_p10), 1, %s1799_s12  }
  0x58   : > { %483 = sbr.rel (%p480_p10) target bundleno = 334 (0x14e), region = 66  ;;  %s1367_s4 = sshll.u32 (!%p480_p10), %s486_s30, 9 }
  0x59   : > { %s2022_s5 = scalar_lea.vmem (!%p480_p10), [#allocation3], %s1367_s4  ;;  %s1368_s7 = sshll.u32 (!%p480_p10), %s486_s30, 5 }
  0x5a   : > { %s2234_s8 = scalar_lea.vmem (!%p480_p10), [#allocation4], %s1368_s7 }
  0x5d   : > { %v1460_v0 = vld [vmem:[%s2022_s5 + $0x70] sm:$0xf]  ;;  %v1687_v1 = vld [vmem:[%s2022_s5 + $0x74] sm:$0xf0]  ;;  %v1452_v11 = vld [vmem:[%s2022_s5 + $0x60] sm:$0xf] }
  0x5e   : > { %v1524_v2 = vld [vmem:[%s2022_s5 + $0xf0] sm:$0xf]  ;;  %v1461_v3 = vor.u32 %v1687_v1, %v1460_v0  ;;  %v1703_v4 = vld [vmem:[%s2022_s5 + $0xf4] sm:$0xf0]  ;;  %v1685_v13 = vld [vmem:[%s2022_s5 + $0x64] sm:$0xf0] }
  0x5f   : > { %v1588_v5 = vld [vmem:[%s2022_s5 + $0x170] sm:$0xf]  ;;  %v1719_v6 = vld [vmem:[%s2022_s5 + $0x174] sm:$0xf0]  ;;  %v1525_v7 = vor.u32 %v1703_v4, %v1524_v2  ;;  %v1516_v14 = vld [vmem:[%s2022_s5 + $0xe0] sm:$0xf]  ;;  %v1453_v16 = vor.u32 %v1685_v13, %v1452_v11 }
  0x60   : > { %v1589_v8 = vor.u32 %v1719_v6, %v1588_v5  ;;  %v1652_v9 = vld [vmem:[%s2022_s5 + $0x1f0] sm:$0xf]  ;;  %v1735_v10 = vld [vmem:[%s2022_s5 + $0x1f4] sm:$0xf0]  ;;  %995 = vmatpush.bf16.msra.mxu0 %v1461_v3  ;;  %v1701_v15 = vld [vmem:[%s2022_s5 + $0xe4] sm:$0xf0] }
  0x61   : > { %v1653_v12 = vor.u32 %v1735_v10, %v1652_v9  ;;  %1014 = vmatpush.bf16.msra.mxu1 %v1525_v7  ;;  %v1517_v17 = vor.u32 %v1701_v15, %v1516_v14  ;;  %v1580_v18 = vld [vmem:[%s2022_s5 + $0x160] sm:$0xf]  ;;  %v1717_v19 = vld [vmem:[%s2022_s5 + $0x164] sm:$0xf0]  ;;  %v1444_v23 = vld [vmem:[%s2022_s5 + $0x50] sm:$0xf] }
  0x62   : > { %1033 = vmatpush.bf16.msra.mxu2 %v1589_v8  ;;  %v1644_v20 = vld [vmem:[%s2022_s5 + $0x1e0] sm:$0xf]  ;;  %v1581_v21 = vor.u32 %v1717_v19, %v1580_v18  ;;  %v1733_v22 = vld [vmem:[%s2022_s5 + $0x1e4] sm:$0xf0]  ;;  %v1683_v24 = vld [vmem:[%s2022_s5 + $0x54] sm:$0xf0] }
  0x63   : > { %1052 = vmatpush.bf16.msra.mxu3 %v1653_v12  ;;  %v1645_v25 = vor.u32 %v1733_v22, %v1644_v20  ;;  %v1508_v26 = vld [vmem:[%s2022_s5 + $0xd0] sm:$0xf]  ;;  %v1699_v27 = vld [vmem:[%s2022_s5 + $0xd4] sm:$0xf0]  ;;  %v1445_v29 = vor.u32 %v1683_v24, %v1444_v23  ;;  %v1436_v35 = vld [vmem:[%s2022_s5 + $0x40] sm:$0xf] }
  0x64   : > { %v1572_v28 = vld [vmem:[%s2022_s5 + $0x150] sm:$0xf]  ;;  %996 = vmatpush.bf16.msra.mxu0 %v1453_v16  ;;  %v1715_v30 = vld [vmem:[%s2022_s5 + $0x154] sm:$0xf0]  ;;  %v1509_v33 = vor.u32 %v1699_v27, %v1508_v26  ;;  %v1681_v36 = vld [vmem:[%s2022_s5 + $0x44] sm:$0xf0] }
  0x65   : > { %v1636_v31 = vld [vmem:[%s2022_s5 + $0x1d0] sm:$0xf]  ;;  %v1731_v32 = vld [vmem:[%s2022_s5 + $0x1d4] sm:$0xf0]  ;;  %1015 = vmatpush.bf16.msra.mxu1 %v1517_v17  ;;  %v1573_v34 = vor.u32 %v1715_v30, %v1572_v28  ;;  %v1500_v37 = vld [vmem:[%s2022_s5 + $0xc0] sm:$0xf]  ;;  %v1437_v44 = vor.u32 %v1681_v36, %v1436_v35 }
  0x66   : > { %1034 = vmatpush.bf16.msra.mxu2 %v1581_v21  ;;  %v1637_v38 = vor.u32 %v1731_v32, %v1636_v31  ;;  %v1697_v39 = vld [vmem:[%s2022_s5 + $0xc4] sm:$0xf0]  ;;  %v1564_v40 = vld [vmem:[%s2022_s5 + $0x140] sm:$0xf]  ;;  %v1428_v47 = vld [vmem:[%s2022_s5 + $0x30] sm:$0xf] }
  0x67   : > { %1053 = vmatpush.bf16.msra.mxu3 %v1645_v25  ;;  %v1713_v41 = vld [vmem:[%s2022_s5 + $0x144] sm:$0xf0]  ;;  %v1628_v42 = vld [vmem:[%s2022_s5 + $0x1c0] sm:$0xf]  ;;  %v1501_v45 = vor.u32 %v1697_v39, %v1500_v37  ;;  %v1679_v48 = vld [vmem:[%s2022_s5 + $0x34] sm:$0xf0] }
  0x68   : > { %v1729_v43 = vld [vmem:[%s2022_s5 + $0x1c4] sm:$0xf0]  ;;  %997 = vmatpush.bf16.msra.mxu0 %v1445_v29  ;;  %v1565_v46 = vor.u32 %v1713_v41, %v1564_v40  ;;  %v1492_v49 = vld [vmem:[%s2022_s5 + $0xb0] sm:$0xf]  ;;  %v1695_v51 = vld [vmem:[%s2022_s5 + $0xb4] sm:$0xf0]  ;;  %v1429_v56 = vor.u32 %v1679_v48, %v1428_v47 }
  0x69   : > { %1016 = vmatpush.bf16.msra.mxu1 %v1509_v33  ;;  %v1629_v50 = vor.u32 %v1729_v43, %v1628_v42  ;;  %v1556_v52 = vld [vmem:[%s2022_s5 + $0x130] sm:$0xf]  ;;  %v1711_v53 = vld [vmem:[%s2022_s5 + $0x134] sm:$0xf0]  ;;  %v1493_v57 = vor.u32 %v1695_v51, %v1492_v49  ;;  %v1420_v59 = vld [vmem:[%s2022_s5 + $0x20] sm:$0xf] }
  0x6a   : > { %1035 = vmatpush.bf16.msra.mxu2 %v1573_v34  ;;  %v1620_v54 = vld [vmem:[%s2022_s5 + $0x1b0] sm:$0xf]  ;;  %v1727_v55 = vld [vmem:[%s2022_s5 + $0x1b4] sm:$0xf0]  ;;  %v1557_v58 = vor.u32 %v1711_v53, %v1556_v52  ;;  %v1677_v60 = vld [vmem:[%s2022_s5 + $0x24] sm:$0xf0] }
  0x6b   : > { %1054 = vmatpush.bf16.msra.mxu3 %v1637_v38  ;;  %v1484_v61 = vld [vmem:[%s2022_s5 + $0xa0] sm:$0xf]  ;;  %v1621_v62 = vor.u32 %v1727_v55, %v1620_v54  ;;  %v1693_v63 = vld [vmem:[%s2022_s5 + $0xa4] sm:$0xf0]  ;;  %v1421_v4 = vor.u32 %v1677_v60, %v1420_v59  ;;  %v1412_v7 = vld [vmem:[%s2022_s5 + $0x10] sm:$0xf] }
  0x6c   : > { %998 = vmatpush.bf16.msra.mxu0 %v1437_v44  ;;  %v1548_v0 = vld [vmem:[%s2022_s5 + $0x120] sm:$0xf]  ;;  %v1709_v1 = vld [vmem:[%s2022_s5 + $0x124] sm:$0xf0]  ;;  %v1485_v5 = vor.u32 %v1693_v63, %v1484_v61  ;;  %v1675_v8 = vld [vmem:[%s2022_s5 + $0x14] sm:$0xf0] }
  0x6d   : > { %1017 = vmatpush.bf16.msra.mxu1 %v1501_v45  ;;  %v1612_v2 = vld [vmem:[%s2022_s5 + $0x1a0] sm:$0xf]  ;;  %v1725_v3 = vld [vmem:[%s2022_s5 + $0x1a4] sm:$0xf0]  ;;  %v1549_v6 = vor.u32 %v1709_v1, %v1548_v0  ;;  %v1476_v9 = vld [vmem:[%s2022_s5 + $0x90] sm:$0xf]  ;;  %v1413_v17 = vor.u32 %v1675_v8, %v1412_v7 }
  0x6e   : > { %1036 = vmatpush.bf16.msra.mxu2 %v1565_v46  ;;  %v1613_v10 = vor.u32 %v1725_v3, %v1612_v2  ;;  %v1691_v11 = vld [vmem:[%s2022_s5 + $0x94] sm:$0xf0]  ;;  %v1540_v12 = vld [vmem:[%s2022_s5 + $0x110] sm:$0xf]  ;;  %v1404_v16 = vld [vmem:[%s2022_s5] sm:$0xf] }
  0x6f   : > { %1055 = vmatpush.bf16.msra.mxu3 %v1629_v50  ;;  %v1707_v13 = vld [vmem:[%s2022_s5 + $0x114] sm:$0xf0]  ;;  %v1604_v14 = vld [vmem:[%s2022_s5 + $0x190] sm:$0xf]  ;;  %v1673_v18 = vld [vmem:[%s2022_s5 + $0x4] sm:$0xf0]  ;;  %v1477_v21 = vor.u32 %v1691_v11, %v1476_v9 }
  0x70   : > { %999 = vmatpush.bf16.msra.mxu0 %v1429_v56  ;;  %v1723_v15 = vld [vmem:[%s2022_s5 + $0x194] sm:$0xf0]  ;;  %v1468_v19 = vld [vmem:[%s2022_s5 + $0x80] sm:$0xf]  ;;  %v1689_v20 = vld [vmem:[%s2022_s5 + $0x84] sm:$0xf0]  ;;  %v1541_v22 = vor.u32 %v1707_v13, %v1540_v12  ;;  %v1405_v34 = vor.u32 %v1673_v18, %v1404_v16 }
  0x71   : > { %1018 = vmatpush.bf16.msra.mxu1 %v1493_v57  ;;  %v1532_v23 = vld [vmem:[%s2022_s5 + $0x100] sm:$0xf]  ;;  %v1705_v24 = vld [vmem:[%s2022_s5 + $0x104] sm:$0xf0]  ;;  %v1605_v26 = vor.u32 %v1723_v15, %v1604_v14  ;;  %v1666_v29 = vld [vmem:[%s2265_s0 + $0xc] sm:$0xf0]  ;;  %v1469_v38 = vor.u32 %v1689_v20, %v1468_v19 }
  0x72   : > { %1037 = vmatpush.bf16.msra.mxu2 %v1557_v58  ;;  %v1596_v25 = vld [vmem:[%s2022_s5 + $0x180] sm:$0xf]  ;;  %v1721_v27 = vld [vmem:[%s2022_s5 + $0x184] sm:$0xf0]  ;;  %v1664_v30 = vld [vmem:[%s2265_s0 + $0x4] sm:$0xf]  ;;  %v1533_v39 = vor.u32 %v1705_v24, %v1532_v23 }
  0x73   : > { %1056 = vmatpush.bf16.msra.mxu3 %v1621_v62  ;;  %v1372_v28 = vld [vmem:[%s2265_s0] sm:$0xf]  ;;  %v1374_v31 = vld [vmem:[%s2265_s0 + $0x10] sm:$0xf0]  ;;  %v1590_v33 = vld [vmem:[%s2022_s5 + $0x178] sm:$0xf0]  ;;  %v1597_v43 = vor.u32 %v1721_v27, %v1596_v25 }
  0x74   : > { %1000 = vmatpush.bf16.msra.mxu0 %v1421_v4  ;;  %v1718_v32 = vld [vmem:[%s2022_s5 + $0x174] sm:$0xf]  ;;  %v1380_v35 = vld [vmem:[%s2265_s0 + $0x8] sm:$0xf]  ;;  %v1526_v37 = vld [vmem:[%s2022_s5 + $0xf8] sm:$0xf0]  ;;  %v2119_v48 = vor.u32 %v1666_v29, %v1372_v28  ;;  %v2124_v53 = vor.u32 %v1664_v30, %v1374_v31 }
  0x75   : > { %1019 = vmatpush.bf16.msra.mxu1 %v1485_v5  ;;  %v1702_v36 = vld [vmem:[%s2022_s5 + $0xf4] sm:$0xf]  ;;  %v1667_v40 = vld [vmem:[%s2265_s0 + $0x14] sm:$0xf0]  ;;  %v1665_v41 = vld [vmem:[%s2265_s0 + $0xc] sm:$0xf]  ;;  %v1593_v44 = vor.u32 %v1718_v32, %v1590_v33 }
  0x76   : > { %1038 = vmatpush.bf16.msra.mxu2 %v1549_v6  ;;  %v1382_v42 = vld [vmem:[%s2265_s0 + $0x18] sm:$0xf0]  ;;  %v1686_v45 = vld [vmem:[%s2022_s5 + $0x74] sm:$0xf]  ;;  %v1529_v49 = vor.u32 %v1702_v36, %v1526_v37  ;;  %v1716_v51 = vld [vmem:[%s2022_s5 + $0x164] sm:$0xf]  ;;  %v2126_v54 = vor.u32 %v1667_v40, %v1380_v35 }
  0x77   : > { %1057 = vmatpush.bf16.msra.mxu3 %v1613_v10  ;;  %v1462_v46 = vld [vmem:[%s2022_s5 + $0x78] sm:$0xf0]  ;;  %v1734_v47 = vld [vmem:[%s2022_s5 + $0x1f4] sm:$0xf]  ;;  %v1582_v52 = vld [vmem:[%s2022_s5 + $0x168] sm:$0xf0]  ;;  %v2130_v57 = vor.u32 %v1665_v41, %v1382_v42 }
  0x78   : > { %1001 = vmatpush.bf16.msra.mxu0 %v1413_v17  ;;  %v1654_v50 = vld [vmem:[%s2022_s5 + $0x1f8] sm:$0xf0]  ;;  %v1700_v55 = vld [vmem:[%s2022_s5 + $0xe4] sm:$0xf]  ;;  %v1518_v56 = vld [vmem:[%s2022_s5 + $0xe8] sm:$0xf0]  ;;  %v1465_v58 = vor.u32 %v1686_v45, %v1462_v46  ;;  %v1585_v60 = vor.u32 %v1716_v51, %v1582_v52 }
  0x79   : > { %1020 = vmatpush.bf16.msra.mxu1 %v1477_v21  ;;  %v1657_v59 = vor.u32 %v1734_v47, %v1654_v50  ;;  %v1684_v61 = vld [vmem:[%s2022_s5 + $0x64] sm:$0xf]  ;;  %v1454_v62 = vld [vmem:[%s2022_s5 + $0x68] sm:$0xf0]  ;;  %v1521_v0 = vor.u32 %v1700_v55, %v1518_v56  ;;  %v1714_v2 = vld [vmem:[%s2022_s5 + $0x154] sm:$0xf] }
  0x7a   : > { %1039 = vmatpush.bf16.msra.mxu2 %v1541_v22  ;;  %v1732_v63 = vld [vmem:[%s2022_s5 + $0x1e4] sm:$0xf]  ;;  %v1646_v1 = vld [vmem:[%s2022_s5 + $0x1e8] sm:$0xf0]  ;;  %v1574_v3 = vld [vmem:[%s2022_s5 + $0x158] sm:$0xf0]  ;;  %v1457_v6 = vor.u32 %v1684_v61, %v1454_v62 }
  0x7b   : > { %1058 = vmatpush.bf16.msra.mxu3 %v1605_v26  ;;  %v1698_v4 = vld [vmem:[%s2022_s5 + $0xd4] sm:$0xf]  ;;  %v1510_v5 = vld [vmem:[%s2022_s5 + $0xd8] sm:$0xf0]  ;;  %v1649_v7 = vor.u32 %v1732_v63, %v1646_v1  ;;  %v1577_v8 = vor.u32 %v1714_v2, %v1574_v3  ;;  %v1712_v14 = vld [vmem:[%s2022_s5 + $0x144] sm:$0xf] }
  0x7c   : > { %1002 = vmatpush.bf16.msra.mxu0 %v1405_v34  ;;  %v1682_v9 = vld [vmem:[%s2022_s5 + $0x54] sm:$0xf]  ;;  %v1446_v10 = vld [vmem:[%s2022_s5 + $0x58] sm:$0xf0]  ;;  %v1513_v12 = vor.u32 %v1698_v4, %v1510_v5  ;;  %v1566_v15 = vld [vmem:[%s2022_s5 + $0x148] sm:$0xf0] }
  0x7d   : > { %1021 = vmatpush.bf16.msra.mxu1 %v1469_v38  ;;  %v1730_v11 = vld [vmem:[%s2022_s5 + $0x1d4] sm:$0xf]  ;;  %v1638_v13 = vld [vmem:[%s2022_s5 + $0x1d8] sm:$0xf0]  ;;  %v1696_v16 = vld [vmem:[%s2022_s5 + $0xc4] sm:$0xf]  ;;  %v1449_v18 = vor.u32 %v1682_v9, %v1446_v10  ;;  %v1569_v23 = vor.u32 %v1712_v14, %v1566_v15 }
  0x7e   : > { %1040 = vmatpush.bf16.msra.mxu2 %v1533_v39  ;;  %v1502_v17 = vld [vmem:[%s2022_s5 + $0xc8] sm:$0xf0]  ;;  %v1680_v19 = vld [vmem:[%s2022_s5 + $0x44] sm:$0xf]  ;;  %v1641_v22 = vor.u32 %v1730_v11, %v1638_v13  ;;  %v1388_v25 = vld [vmem:[%s2265_s0 + $0x20] sm:$0xf] }
  0x7f   : > { %1059 = vmatpush.bf16.msra.mxu3 %v1597_v43  ;;  %1003 = vmatmul.bf16.vlgmr.msra.gmra.mxu0 %v2119_v48  ;;  %v1438_v20 = vld [vmem:[%s2022_s5 + $0x48] sm:$0xf0]  ;;  %v1728_v21 = vld [vmem:[%s2022_s5 + $0x1c4] sm:$0xf]  ;;  %v1670_v26 = vld [vmem:[%s2265_s0 + $0x2c] sm:$0xf0]  ;;  %v1505_v27 = vor.u32 %v1696_v16, %v1502_v17 }
  0x80   : > { %1022 = vmatmul.bf16.vlgmr.msra.gmra.mxu1 %v2124_v53  ;;  %1071 = vmatpush.bf16.msrb.mxu0 %v1465_v58  ;;  %v1630_v24 = vld [vmem:[%s2022_s5 + $0x1c8] sm:$0xf0]  ;;  %v1668_v28 = vld [vmem:[%s2265_s0 + $0x24] sm:$0xf]  ;;  %v1390_v29 = vld [vmem:[%s2265_s0 + $0x30] sm:$0xf0]  ;;  %v1441_v35 = vor.u32 %v1680_v19, %v1438_v20 }
  0x81   : > { %1090 = vmatpush.bf16.msrb.mxu1 %v1529_v49  ;;  %1041 = vmatmul.bf16.vlgmr.msra.gmra.mxu2 %v2126_v54  ;;  %v1710_v30 = vld [vmem:[%s2022_s5 + $0x134] sm:$0xf]  ;;  %v1558_v31 = vld [vmem:[%s2022_s5 + $0x138] sm:$0xf0]  ;;  %v1396_v32 = vld [vmem:[%s2265_s0 + $0x28] sm:$0xf]  ;;  %v1633_v39 = vor.u32 %v1728_v21, %v1630_v24  ;;  %v2192_v50 = vor.u32 %v1668_v28, %v1390_v29 }
  0x82   : > { %1109 = vmatpush.bf16.msrb.mxu2 %v1593_v44  ;;  %1060 = vmatmul.bf16.vlgmr.msra.gmra.mxu3 %v2130_v57  ;;  %v1694_v33 = vld [vmem:[%s2022_s5 + $0xb4] sm:$0xf]  ;;  %v1494_v34 = vld [vmem:[%s2022_s5 + $0xb8] sm:$0xf0]  ;;  %v1671_v36 = vld [vmem:[%s2265_s0 + $0x34] sm:$0xf0]  ;;  %v1561_v40 = vor.u32 %v1710_v30, %v1558_v31  ;;  %v2187_v44 = vor.u32 %v1670_v26, %v1388_v25 }
  0x83   : > { %1128 = vmatpush.bf16.msrb.mxu3 %v1657_v59  ;;  %v1669_v37 = vld [vmem:[%s2265_s0 + $0x2c] sm:$0xf]  ;;  %v1398_v38 = vld [vmem:[%s2265_s0 + $0x38] sm:$0xf0]  ;;  %v1678_v41 = vld [vmem:[%s2022_s5 + $0x34] sm:$0xf]  ;;  %v1497_v45 = vor.u32 %v1694_v33, %v1494_v34  ;;  %v2194_v51 = vor.u32 %v1671_v36, %v1396_v32 }
  0x84   : > { %1072 = vmatpush.bf16.msrb.mxu0 %v1457_v6  ;;  %v1430_v42 = vld [vmem:[%s2022_s5 + $0x38] sm:$0xf0]  ;;  %v1726_v43 = vld [vmem:[%s2022_s5 + $0x1b4] sm:$0xf]  ;;  %v1708_v47 = vld [vmem:[%s2022_s5 + $0x124] sm:$0xf]  ;;  %v1401_v56 = vor.u32 %v1669_v37, %v1398_v38 }
  0x85   : > { %1091 = vmatpush.bf16.msrb.mxu1 %v1521_v0  ;;  %v1622_v46 = vld [vmem:[%s2022_s5 + $0x1b8] sm:$0xf0]  ;;  %v1550_v49 = vld [vmem:[%s2022_s5 + $0x128] sm:$0xf0]  ;;  %v1692_v52 = vld [vmem:[%s2022_s5 + $0xa4] sm:$0xf]  ;;  %v1433_v58 = vor.u32 %v1678_v41, %v1430_v42 }
  0x86   : > { %1110 = vmatpush.bf16.msrb.mxu2 %v1585_v60  ;;  %v1486_v55 = vld [vmem:[%s2022_s5 + $0xa8] sm:$0xf0]  ;;  %v1625_v59 = vor.u32 %v1726_v43, %v1622_v46  ;;  %v1553_v60 = vor.u32 %v1708_v47, %v1550_v49  ;;  %v1676_v61 = vld [vmem:[%s2022_s5 + $0x24] sm:$0xf]  ;;  %v1706_v2 = vld [vmem:[%s2022_s5 + $0x114] sm:$0xf] }
  0x87   : > { %1129 = vmatpush.bf16.msrb.mxu3 %v1649_v7  ;;  %v1422_v62 = vld [vmem:[%s2022_s5 + $0x28] sm:$0xf0]  ;;  %v1724_v63 = vld [vmem:[%s2022_s5 + $0x1a4] sm:$0xf]  ;;  %v1489_v0 = vor.u32 %v1692_v52, %v1486_v55  ;;  %v1542_v3 = vld [vmem:[%s2022_s5 + $0x118] sm:$0xf0] }
  0x88   : > { %1073 = vmatpush.bf16.msrb.mxu0 %v1449_v18  ;;  %v1614_v1 = vld [vmem:[%s2022_s5 + $0x1a8] sm:$0xf0]  ;;  %v1690_v4 = vld [vmem:[%s2022_s5 + $0x94] sm:$0xf]  ;;  %v1478_v5 = vld [vmem:[%s2022_s5 + $0x98] sm:$0xf0]  ;;  %v1425_v6 = vor.u32 %v1676_v61, %v1422_v62 }
  0x89   : > { %1092 = vmatpush.bf16.msrb.mxu1 %v1513_v12  ;;  %v1617_v7 = vor.u32 %v1724_v63, %v1614_v1  ;;  %v1674_v9 = vld [vmem:[%s2022_s5 + $0x14] sm:$0xf]  ;;  %v1414_v10 = vld [vmem:[%s2022_s5 + $0x18] sm:$0xf0]  ;;  %v1481_v12 = vor.u32 %v1690_v4, %v1478_v5  ;;  %v1704_v14 = vld [vmem:[%s2022_s5 + $0x104] sm:$0xf] }
  0x8a   : > { %1111 = vmatpush.bf16.msrb.mxu2 %v1577_v8  ;;  %v1545_v8 = vor.u32 %v1706_v2, %v1542_v3  ;;  %v1722_v11 = vld [vmem:[%s2022_s5 + $0x194] sm:$0xf]  ;;  %v1606_v13 = vld [vmem:[%s2022_s5 + $0x198] sm:$0xf0]  ;;  %v1534_v15 = vld [vmem:[%s2022_s5 + $0x108] sm:$0xf0]  ;;  %v1417_v18 = vor.u32 %v1674_v9, %v1414_v10 }
  0x8b   : > { %1130 = vmatpush.bf16.msrb.mxu3 %v1641_v22  ;;  %v1688_v16 = vld [vmem:[%s2022_s5 + $0x84] sm:$0xf]  ;;  %v1470_v17 = vld [vmem:[%s2022_s5 + $0x88] sm:$0xf0]  ;;  %v1609_v19 = vor.u32 %v1722_v11, %v1606_v13  ;;  %v1537_v20 = vor.u32 %v1704_v14, %v1534_v15  ;;  %s1736_s12 = sshll.u32 (%p1872_p6), %s1807_s14, 3 }
  0x8c   : > { %1074 = vmatpush.bf16.msrb.mxu0 %v1441_v35  ;;  %v1672_v21 = vld [vmem:[%s2022_s5 + $0x4] sm:$0xf]  ;;  %v1406_v22 = vld [vmem:[%s2022_s5 + $0x8] sm:$0xf0]  ;;  %s1208_s10 = scalar_lea.vmem (%p1872_p6), %s2268_s3, %s1736_s12 }
  0x8d   : > { %1093 = vmatpush.bf16.msrb.mxu1 %v1505_v27  ;;  %v1720_v24 = vld [vmem:[%s2022_s5 + $0x184] sm:$0xf]  ;;  %v1598_v25 = vld [vmem:[%s2022_s5 + $0x188] sm:$0xf0]  ;;  %v1409_v26 = vor.u32 %v1672_v21, %v1406_v22  ;;  %s1369_s5 = sshll.u32 %s1807_s14, 1 }
  0x8e   : > { %1112 = vmatpush.bf16.msrb.mxu2 %v1569_v23  ;;  %v1473_v23 = vor.u32 %v1688_v16, %v1470_v17  ;;  %v1601_v27 = vor.u32 %v1720_v24, %v1598_v25  ;;  %p537_p11 = scmp.lt.s32.totalorder %s1369_s5, 7 }
  0x8f   : > { %1131 = vmatpush.bf16.msrb.mxu3 %v1633_v39  ;;  %1008 = vmatmul.bf16.gmra.mxu0 %v2187_v44 }
  0x90   : > { %1027 = vmatmul.bf16.gmra.mxu1 %v2192_v50  ;;  %1075 = vmatpush.bf16.msrb.mxu0 %v1433_v58  ;;  %s2277_s5 = smov (!%p537_p11, %s1369_s5), 7 }
  0x91   : > { %1094 = vmatpush.bf16.msrb.mxu1 %v1497_v45  ;;  %1046 = vmatmul.bf16.gmra.mxu2 %v2194_v51  ;;  %s539_s6 = scalar_lea.vmem %s2267_s2, %s2277_s5 }
  0x92   : > { %1113 = vmatpush.bf16.msrb.mxu2 %v1561_v40  ;;  %1065 = vmatmul.bf16.gmra.mxu3 %v1401_v56  ;;  %v1174_v45 = vld [vmem:[%s539_s6] sm:$0x3] }
  0x93   : > { %1132 = vmatpush.bf16.msrb.mxu3 %v1625_v59  ;;  %v1177_v52 = vperm.slane %v1174_v45, 1 }
  0x94   : > { %1076 = vmatpush.bf16.msrb.mxu0 %v1425_v6 }
  0x95   : > { %1095 = vmatpush.bf16.msrb.mxu1 %v1489_v0 }
  0x96   : > { %1114 = vmatpush.bf16.msrb.mxu2 %v1553_v60 }
  0x97   : > { %1133 = vmatpush.bf16.msrb.mxu3 %v1617_v7 }
  0x98   : > { %1077 = vmatpush.bf16.msrb.mxu0 %v1417_v18 }
  0x99   : > { %1096 = vmatpush.bf16.msrb.mxu1 %v1481_v12 }
  0x9a   : > { %1115 = vmatpush.bf16.msrb.mxu2 %v1545_v8 }
  0x9b   : > { %1134 = vmatpush.bf16.msrb.mxu3 %v1609_v19 }
  0x9c   : > { %1078 = vmatpush.bf16.msrb.mxu0 %v1409_v26 }
  0x9d   : > { %1097 = vmatpush.bf16.msrb.mxu1 %v1473_v23 }
  0x9e   : > { %1116 = vmatpush.bf16.msrb.mxu2 %v1537_v20 }
  0x9f   : > { %1135 = vmatpush.bf16.msrb.mxu3 %v1601_v27  ;;  %1079 = vmatmul.bf16.vlgmr.msrb.gmra.mxu0 %v2119_v48 }
  0xa0   : > { %1098 = vmatmul.bf16.vlgmr.msrb.gmra.mxu1 %v2124_v53 }
  0xa1   : > { %1117 = vmatmul.bf16.vlgmr.msrb.gmra.mxu2 %v2126_v54 }
  0xa2   : > { %1136 = vmatmul.bf16.vlgmr.msrb.gmra.mxu3 %v2130_v57 }
  0xaf   : > { %1084 = vmatmul.bf16.gmra.mxu0 %v2187_v44 }
  0xb0   : > { %1103 = vmatmul.bf16.gmra.mxu1 %v2192_v50  ;;  %v1176_v50 = vperm.slane %v1174_v45, 0 }
  0xb1   : > { %1122 = vmatmul.bf16.gmra.mxu2 %v2194_v51 }
  0xb2   : > { %1141 = vmatmul.bf16.gmra.mxu3 %v1401_v56 }
  0xfc   : > { %v1004_v28 = vpop.f32.mrf.mxu0 }
  0xfd   : > { %v1023_v29 = vpop.f32.mrf.mxu1 }
  0xfe   : > { %v1024_v40 = vadd.f32 %v1023_v29, %v1004_v28 }
 0x104   : > { %v1042_v30 = vpop.f32.mrf.mxu2  ;;  %v1006_v32 = vpop.f32.mrf.mxu0 }
 0x105   : > { %v1061_v31 = vpop.f32.mrf.mxu3  ;;  %v1025_v48 = vpop.f32.mrf.mxu1  ;;  %v1043_v43 = vadd.f32 %v1042_v30, %v1024_v40 }
 0x106   : > { %v1026_v58 = vadd.f32 %v1025_v48, %v1006_v32 }
 0x107   : > { %v1062_v49 = vadd.f32 %v1061_v31, %v1043_v43 }
 0x109   : > { %v1180_v60 = vadd.f32 %v1176_v50, %v1062_v49 }
 0x10c   : > { %v1044_v33 = vpop.f32.mrf.mxu2  ;;  %v1009_v34 = vpop.f32.mrf.mxu0 }
 0x10d   : > { %v1063_v53 = vpop.f32.mrf.mxu3  ;;  %v1028_v54 = vpop.f32.mrf.mxu1  ;;  %v1045_v61 = vadd.f32 %v1044_v33, %v1026_v58 }
 0x10e   : > { %v1029_v4 = vadd.f32 %v1028_v54, %v1009_v34 }
 0x10f   : > { %v1064_v3 = vadd.f32 %v1063_v53, %v1045_v61 }
 0x111   : > { %v1182_v9 = vadd.f32 %v1176_v50, %v1064_v3 }
 0x114   : > { %v1047_v35 = vpop.f32.mrf.mxu2  ;;  %v1011_v36 = vpop.f32.mrf.mxu0 }
 0x115   : > { %v1066_v57 = vpop.f32.mrf.mxu3  ;;  %v1030_v37 = vpop.f32.mrf.mxu1  ;;  %v1048_v10 = vadd.f32 %v1047_v35, %v1029_v4 }
 0x116   : > { %v1031_v18 = vadd.f32 %v1030_v37, %v1011_v36 }
 0x117   : > { %v1067_v16 = vadd.f32 %v1066_v57, %v1048_v10 }
 0x119   : > { %v1184_v22 = vadd.f32 %v1176_v50, %v1067_v16 }
 0x11c   : > { %v1049_v38 = vpop.f32.mrf.mxu2  ;;  %v1080_v41 = vpop.f32.mrf.mxu0 }
 0x11d   : > { %v1068_v39 = vpop.f32.mrf.mxu3  ;;  %v1099_v42 = vpop.f32.mrf.mxu1  ;;  %v1050_v23 = vadd.f32 %v1049_v38, %v1031_v18 }
 0x11e   : > { %v1100_v44 = vadd.f32 %v1099_v42, %v1080_v41 }
 0x11f   : > { %v1069_v28 = vadd.f32 %v1068_v39, %v1050_v23 }
 0x121   : > { %v1186_v32 = vadd.f32 %v1176_v50, %v1069_v28 }
 0x124   : > { %v1118_v46 = vpop.f32.mrf.mxu2  ;;  %v1082_v55 = vpop.f32.mrf.mxu0 }
 0x125   : > { %v1137_v47 = vpop.f32.mrf.mxu3  ;;  %v1119_v51 = vadd.f32 %v1118_v46, %v1100_v44  ;;  %v1101_v56 = vpop.f32.mrf.mxu1 }
 0x126   : > { %v1102_v0 = vadd.f32 %v1101_v56, %v1082_v55 }
 0x127   : > { %v1138_v59 = vadd.f32 %v1137_v47, %v1119_v51 }
 0x129   : > { %v1181_v62 = vadd.f32 %v1177_v52, %v1138_v59 }
 0x12b   : > { %v1188_v63 = vpack.c.bf16 %v1181_v62, %v1180_v60 }
 0x12c   : > { %v1120_v1 = vpop.f32.mrf.mxu2  ;;  %v1085_v6 = vpop.f32.mrf.mxu0 }
 0x12d   : > { %v1139_v2 = vpop.f32.mrf.mxu3  ;;  %1192 = vst [vmem:[%s2234_s8] sm:$0xff] %v1188_v63  ;;  %v1121_v5 = vadd.f32 %v1120_v1, %v1102_v0  ;;  %v1104_v7 = vpop.f32.mrf.mxu1 }
 0x12e   : > { %v1105_v12 = vadd.f32 %v1104_v7, %v1085_v6 }
 0x12f   : > { %v1140_v8 = vadd.f32 %v1139_v2, %v1121_v5 }
 0x131   : > { %v1183_v11 = vadd.f32 %v1177_v52, %v1140_v8 }
 0x133   : > { %v1189_v13 = vpack.c.bf16 %v1183_v11, %v1182_v9 }
 0x134   : > { %v1123_v14 = vpop.f32.mrf.mxu2  ;;  %v1087_v20 = vpop.f32.mrf.mxu0  ;;  %v1243_v53 = vld [vmem:[%s2234_s8] sm:$0xff] (%p1872_p6) }
 0x135   : > { %v1142_v15 = vpop.f32.mrf.mxu3  ;;  %1193 = vst [vmem:[%s2234_s8 + $0x8] sm:$0xff] %v1189_v13  ;;  %v1124_v17 = vadd.f32 %v1123_v14, %v1105_v12  ;;  %v1106_v21 = vpop.f32.mrf.mxu1 }
 0x136   : > { %v1107_v26 = vadd.f32 %v1106_v21, %v1087_v20  ;;  %1244 = vst [vmem:[%s1208_s10] sm:$0xff] (%p1872_p6), %v1243_v53 }
 0x137   : > { %v1143_v19 = vadd.f32 %v1142_v15, %v1124_v17 }
 0x139   : > { %v1185_v24 = vadd.f32 %v1177_v52, %v1143_v19 }
 0x13b   : > { %v1190_v25 = vpack.c.bf16 %v1185_v24, %v1184_v22 }
 0x13c   : > { %v1125_v27 = vpop.f32.mrf.mxu2  ;;  %v1245_v34 = vld [vmem:[%s2234_s8 + $0x8] sm:$0xff] (%p1872_p6) }
 0x13d   : > { %1194 = vst [vmem:[%s2234_s8 + $0x10] sm:$0xff] %v1190_v25  ;;  %v1126_v29 = vadd.f32 %v1125_v27, %v1107_v26  ;;  %v1144_v30 = vpop.f32.mrf.mxu3 }
 0x13e   : > { %1246 = vst [vmem:[%s1208_s10 + $0x20] sm:$0xff] (%p1872_p6), %v1245_v34 }
 0x13f   : > { %v1145_v31 = vadd.f32 %v1144_v30, %v1126_v29 }
 0x141   : > { %v1187_v48 = vadd.f32 %v1177_v52, %v1145_v31  ;;  %1202 = sbr.rel (!%p1872_p6) target bundleno = 334 (0x14e), region = 82 }
 0x143   : > { %v1191_v33 = vpack.c.bf16 %v1187_v48, %v1186_v32 }
 0x144   : > { %v1247_v54 = vld [vmem:[%s2234_s8 + $0x10] sm:$0xff] (%p1872_p6) }
 0x145   : > { %1195 = vst [vmem:[%s2234_s8 + $0x18] sm:$0xff] %v1191_v33 }
 0x146   : > { %1248 = vst [vmem:[%s1208_s10 + $0x40] sm:$0xff] %v1247_v54 }
 0x14c   : > { %v1249_v35 = vld [vmem:[%s2234_s8 + $0x18] sm:$0xff] }
 0x14d   : > { %1250 = vst [vmem:[%s1208_s10 + $0x60] sm:$0xff] %v1249_v35 }
 0x14e PF: > { %s13_s16 = sadd.s32 1, %s1815_s16   ;;  %s2270_s12 = smov %s1803_s13 }
 0x14f   : > { %p10_p12 = scmp.ge.s32.totalorder %s13_s16, 6   ;;  %s2271_s13 = smov %s1877_s22 }
 0x150   : > { %s2272_s14 = smov %s1811_s15  ;;  %s2273_s15 = smov %s2275_s17 }
 0x151   :  { %12 = sbr.rel (!%p10_p12) target bundleno = 3 (0x3), region = 157 }

// kernel: resnet_forward.70
= control target key start
LH: loop header
LB: loop body
LE: loop exit
PB: predicated region body
PF: predicated region fallthrough
CT: control target
= control target key end

     0   :  { %s1398_s15 = smov 0   ;;  %s1400_s16 = smov 0   ;;  %s1669_s0 = inlined_call_operand.vmem [shape: bf16[32,256], index: 0, kind: input, shape index: {}]   ;;  %s1670_s1 = inlined_call_operand.vmem [shape: bf16[256,1024], index: 1, kind: input, shape index: {}]   ;;  %s1671_s2 = inlined_call_operand.vmem [shape: f32[1,1024], index: 2, kind: input, shape index: {}]   ;;  %s1672_s3 = inlined_call_operand.vmem [shape: bf16[32,1024], index: 3, kind: input, shape index: {}]   ;;  %s1673_s4 = inlined_call_operand.vmem [shape: bf16[32,1024], index: 4, kind: output, shape index: {}]  }
   0x1   :  { %s1402_s17 = smov 0   ;;  %s1404_s18 = smov 0  }
   0x2   :  { %s1406_s19 = smov 0  }
   0x3 LB: > { %s29_s20 = sadd.s32 1, %s1367_s18  ;;  %s1089_s21 = sadd.s32 4294967295, %s1371_s19   ;;  %s1371_s19 = sphi %s1406_s19, %s14_s19   ;;  %s1367_s18 = sphi %s1404_s18, %s1679_s18   ;;  %s1363_s17 = sphi %s1402_s17, %s1678_s17   ;;  %s1359_s16 = sphi %s1400_s16, %s1677_s16   ;;  %s1355_s15 = sphi %s1398_s15, %s1676_s15  }
   0x4   : > { %p31_p0 = scmp.ge.s32.totalorder %s29_s20, 4  ;;  %p77_p1 = scmp.ne.s32.totalorder %s1359_s16, %s1355_s15 }
   0x5   : > { %p78_p2 = scmp.eq.s32.totalorder %s1371_s19, 0  ;;  %p163_p4 = scmp.eq.s32.totalorder %s1089_s21, 3 }
   0x6   : > { %s1681_s20 = smov (%p31_p0, %s29_s20), 0  ;;  %s70_s24 = sadd.s32 1, %s1359_s16 }
   0x7   : > { %p1430_p3 = por %p78_p2, %p77_p1  ;;  %s66_s23 = ssub.s32 %s1367_s18, %s1681_s20 }
   0x8   : > { %p68_p5 = scmp.eq.s32.totalorder %s66_s23, 0  ;;  %p1437_p6 = por %p163_p4, %p77_p1 }
   0x9   : > { %p1093_p7 = scmp.ge.s32.totalorder %s1371_s19, 4 }
   0xa   : > { %s1442_s26 = scalar_select %p68_p5, %s1359_s16, %s70_s24  }
   0xb   : > { %200 = sbr.rel (%p1093_p7) target bundleno = 60 (0x3c), region = 20 }
  0x10   : > { %203 = sbr.rel (!%p1430_p3) target bundleno = 52 (0x34), region = 24  ;;  %s205_s27 = sand.u32 (%p1430_p3), 1, %s1359_s16  }
  0x11   : > { %s1254_s28 = sshll.u32 (%p1430_p3), %s1367_s18, 3  ;;  %s1094_s29 = sshll.u32 (%p1430_p3), %s205_s27, 8 }
  0x12   : > { %s1452_s6 = scalar_lea.vmem (%p1430_p3), %s1670_s1, %s1254_s28  ;;  %s1457_s7 = scalar_lea.vmem (%p1430_p3), [#allocation3], %s1094_s29 }
  0x13   : > { %v304_v0 = vld [vmem:[%s1452_s6] sm:$0xff] (%p1430_p3) }
  0x14   : > { %v306_v1 = vld [vmem:[%s1452_s6 + $0x20] sm:$0xff] (%p1430_p3)  ;;  %305 = vst [vmem:[%s1457_s7] sm:$0xff] (%p1430_p3), %v304_v0 }
  0x15   : > { %v308_v2 = vld [vmem:[%s1452_s6 + $0x40] sm:$0xff]  ;;  %307 = vst [vmem:[%s1457_s7 + $0x8] sm:$0xff] %v306_v1 }
  0x16   : > { %v310_v3 = vld [vmem:[%s1452_s6 + $0x60] sm:$0xff]  ;;  %309 = vst [vmem:[%s1457_s7 + $0x10] sm:$0xff] %v308_v2 }
  0x17   : > { %v312_v4 = vld [vmem:[%s1452_s6 + $0x80] sm:$0xff]  ;;  %311 = vst [vmem:[%s1457_s7 + $0x18] sm:$0xff] %v310_v3 }
  0x18   : > { %v314_v5 = vld [vmem:[%s1452_s6 + $0xa0] sm:$0xff]  ;;  %313 = vst [vmem:[%s1457_s7 + $0x20] sm:$0xff] %v312_v4 }
  0x19   : > { %v316_v6 = vld [vmem:[%s1452_s6 + $0xc0] sm:$0xff]  ;;  %315 = vst [vmem:[%s1457_s7 + $0x28] sm:$0xff] %v314_v5 }
  0x1a   : > { %v318_v7 = vld [vmem:[%s1452_s6 + $0xe0] sm:$0xff]  ;;  %317 = vst [vmem:[%s1457_s7 + $0x30] sm:$0xff] %v316_v6 }
  0x1b   : > { %v320_v8 = vld [vmem:[%s1452_s6 + $0x100] sm:$0xff]  ;;  %319 = vst [vmem:[%s1457_s7 + $0x38] sm:$0xff] %v318_v7 }
  0x1c   : > { %v322_v9 = vld [vmem:[%s1452_s6 + $0x120] sm:$0xff]  ;;  %321 = vst [vmem:[%s1457_s7 + $0x40] sm:$0xff] %v320_v8 }
  0x1d   : > { %v324_v10 = vld [vmem:[%s1452_s6 + $0x140] sm:$0xff]  ;;  %323 = vst [vmem:[%s1457_s7 + $0x48] sm:$0xff] %v322_v9 }
  0x1e   : > { %v326_v11 = vld [vmem:[%s1452_s6 + $0x160] sm:$0xff]  ;;  %325 = vst [vmem:[%s1457_s7 + $0x50] sm:$0xff] %v324_v10 }
  0x1f   : > { %v328_v12 = vld [vmem:[%s1452_s6 + $0x180] sm:$0xff]  ;;  %327 = vst [vmem:[%s1457_s7 + $0x58] sm:$0xff] %v326_v11 }
  0x20   : > { %v330_v13 = vld [vmem:[%s1452_s6 + $0x1a0] sm:$0xff]  ;;  %329 = vst [vmem:[%s1457_s7 + $0x60] sm:$0xff] %v328_v12 }
  0x21   : > { %v332_v14 = vld [vmem:[%s1452_s6 + $0x1c0] sm:$0xff]  ;;  %331 = vst [vmem:[%s1457_s7 + $0x68] sm:$0xff] %v330_v13 }
  0x22   : > { %v334_v15 = vld [vmem:[%s1452_s6 + $0x1e0] sm:$0xff]  ;;  %333 = vst [vmem:[%s1457_s7 + $0x70] sm:$0xff] %v332_v14 }
  0x23   : > { %v336_v16 = vld [vmem:[%s1452_s6 + $0x200] sm:$0xff]  ;;  %335 = vst [vmem:[%s1457_s7 + $0x78] sm:$0xff] %v334_v15 }
  0x24   : > { %v338_v17 = vld [vmem:[%s1452_s6 + $0x220] sm:$0xff]  ;;  %337 = vst [vmem:[%s1457_s7 + $0x80] sm:$0xff] %v336_v16 }
  0x25   : > { %v340_v18 = vld [vmem:[%s1452_s6 + $0x240] sm:$0xff]  ;;  %339 = vst [vmem:[%s1457_s7 + $0x88] sm:$0xff] %v338_v17 }
  0x26   : > { %v342_v19 = vld [vmem:[%s1452_s6 + $0x260] sm:$0xff]  ;;  %341 = vst [vmem:[%s1457_s7 + $0x90] sm:$0xff] %v340_v18 }
  0x27   : > { %v344_v20 = vld [vmem:[%s1452_s6 + $0x280] sm:$0xff]  ;;  %343 = vst [vmem:[%s1457_s7 + $0x98] sm:$0xff] %v342_v19 }
  0x28   : > { %v346_v21 = vld [vmem:[%s1452_s6 + $0x2a0] sm:$0xff]  ;;  %345 = vst [vmem:[%s1457_s7 + $0xa0] sm:$0xff] %v344_v20 }
  0x29   : > { %v348_v22 = vld [vmem:[%s1452_s6 + $0x2c0] sm:$0xff]  ;;  %347 = vst [vmem:[%s1457_s7 + $0xa8] sm:$0xff] %v346_v21 }
  0x2a   : > { %v350_v23 = vld [vmem:[%s1452_s6 + $0x2e0] sm:$0xff]  ;;  %349 = vst [vmem:[%s1457_s7 + $0xb0] sm:$0xff] %v348_v22 }
  0x2b   : > { %v352_v24 = vld [vmem:[%s1452_s6 + $0x300] sm:$0xff]  ;;  %351 = vst [vmem:[%s1457_s7 + $0xb8] sm:$0xff] %v350_v23 }
  0x2c   : > { %v354_v25 = vld [vmem:[%s1452_s6 + $0x320] sm:$0xff]  ;;  %353 = vst [vmem:[%s1457_s7 + $0xc0] sm:$0xff] %v352_v24 }
  0x2d   : > { %v356_v26 = vld [vmem:[%s1452_s6 + $0x340] sm:$0xff]  ;;  %355 = vst [vmem:[%s1457_s7 + $0xc8] sm:$0xff] %v354_v25 }
  0x2e   : > { %v358_v27 = vld [vmem:[%s1452_s6 + $0x360] sm:$0xff]  ;;  %357 = vst [vmem:[%s1457_s7 + $0xd0] sm:$0xff] %v356_v26 }
  0x2f   : > { %v360_v28 = vld [vmem:[%s1452_s6 + $0x380] sm:$0xff]  ;;  %359 = vst [vmem:[%s1457_s7 + $0xd8] sm:$0xff] %v358_v27 }
  0x30   : > { %v362_v29 = vld [vmem:[%s1452_s6 + $0x3a0] sm:$0xff]  ;;  %361 = vst [vmem:[%s1457_s7 + $0xe0] sm:$0xff] %v360_v28 }
  0x31   : > { %v364_v30 = vld [vmem:[%s1452_s6 + $0x3c0] sm:$0xff]  ;;  %363 = vst [vmem:[%s1457_s7 + $0xe8] sm:$0xff] %v362_v29 }
  0x32   : > { %v366_v31 = vld [vmem:[%s1452_s6 + $0x3e0] sm:$0xff]  ;;  %365 = vst [vmem:[%s1457_s7 + $0xf0] sm:$0xff] %v364_v30 }
  0x33   : > { %367 = vst [vmem:[%s1457_s7 + $0xf8] sm:$0xff] %v366_v31 }
  0x34 PF: > { %381 = sbr.rel (!%p1430_p3) target bundleno = 60 (0x3c), region = 66  ;;  %s383_s8 = sand.u32 (%p1430_p3), 1, %s1359_s16  }
  0x35   : > { %s1255_s9 = sshll.u32 (%p1430_p3), %s1367_s18, 3  ;;  %s1097_s10 = sshll.u32 (%p1430_p3), %s383_s8, 5 }
  0x36   : > { %s391_s13 = scalar_lea.vmem (%p1430_p3), %s1672_s3, %s1255_s9  ;;  %s385_s14 = scalar_lea.vmem (%p1430_p3), [#allocation4], %s1097_s10 }
  0x37   : > { %v426_v32 = vld [vmem:[%s391_s13] sm:$0xff] (%p1430_p3) }
  0x38   : > { %v428_v33 = vld [vmem:[%s391_s13 + $0x20] sm:$0xff] (%p1430_p3)  ;;  %427 = vst [vmem:[%s385_s14] sm:$0xff] (%p1430_p3), %v426_v32 }
  0x39   : > { %v430_v34 = vld [vmem:[%s391_s13 + $0x40] sm:$0xff]  ;;  %429 = vst [vmem:[%s385_s14 + $0x8] sm:$0xff] %v428_v33 }
  0x3a   : > { %v432_v35 = vld [vmem:[%s391_s13 + $0x60] sm:$0xff]  ;;  %431 = vst [vmem:[%s385_s14 + $0x10] sm:$0xff] %v430_v34 }
  0x3b   : > { %433 = vst [vmem:[%s385_s14 + $0x18] sm:$0xff] %v432_v35 }
  0x3c PF: > { %p1100_p8 = scmp.ge.s32.totalorder %s1371_s19, 1  ;;  %p438_p9 = scmp.lt.s32.totalorder %s1371_s19, 5 }
  0x3e   : > { %p439_p10 = pnand %p1100_p8, %p438_p9 }
  0x3f   : > { %s445_s21 = sand.u32 (!%p439_p10), 1, %s1355_s15  }
  0x40   : > { %442 = sbr.rel (%p439_p10) target bundleno = 280 (0x118), region = 104  ;;  %s1101_s22 = sshll.u32 (!%p439_p10), %s445_s21, 8 }
  0x41   : > { %s1532_s23 = scalar_lea.vmem (!%p439_p10), [#allocation3], %s1101_s22  ;;  %s1628_s29 = sshll.u32 (!%p439_p10), %s445_s21, 5 }
  0x42   : > { %s1631_s30 = scalar_lea.vmem (!%p439_p10), [#allocation4], %s1628_s29  ;;  %s1637_s15 = scalar_lea.vmem (!%p439_p10), [#allocation5], %s1628_s29 }
  0x45   : > { %v1179_v36 = vld [vmem:[%s1532_s23 + $0x70] sm:$0xf]  ;;  %v1275_v37 = vld [vmem:[%s1532_s23 + $0x74] sm:$0xf0]  ;;  %v1274_v41 = vld [vmem:[%s1532_s23 + $0x74] sm:$0xf] }
  0x46   : > { %v1243_v38 = vld [vmem:[%s1532_s23 + $0xf0] sm:$0xf]  ;;  %v1180_v39 = vor.u32 %v1275_v37, %v1179_v36  ;;  %v1291_v40 = vld [vmem:[%s1532_s23 + $0xf4] sm:$0xf0]  ;;  %v1181_v42 = vld [vmem:[%s1532_s23 + $0x78] sm:$0xf0] }
  0x47   : > { %v1244_v43 = vor.u32 %v1291_v40, %v1243_v38  ;;  %v1184_v44 = vor.u32 %v1274_v41, %v1181_v42  ;;  %v1290_v45 = vld [vmem:[%s1532_s23 + $0xf4] sm:$0xf]  ;;  %v1245_v46 = vld [vmem:[%s1532_s23 + $0xf8] sm:$0xf0]  ;;  %v1171_v47 = vld [vmem:[%s1532_s23 + $0x60] sm:$0xf] }
  0x48   : > { %753 = vmatpush.bf16.msra.mxu0 %v1180_v39  ;;  %v1248_v48 = vor.u32 %v1290_v45, %v1245_v46  ;;  %v1273_v49 = vld [vmem:[%s1532_s23 + $0x64] sm:$0xf0]  ;;  %v1235_v50 = vld [vmem:[%s1532_s23 + $0xe0] sm:$0xf]  ;;  %v1272_v54 = vld [vmem:[%s1532_s23 + $0x64] sm:$0xf] }
  0x49   : > { %v1289_v51 = vld [vmem:[%s1532_s23 + $0xe4] sm:$0xf0]  ;;  %772 = vmatpush.bf16.msra.mxu1 %v1244_v43  ;;  %791 = vmatpush.bf16.msra.mxu2 %v1184_v44  ;;  %v1172_v52 = vor.u32 %v1273_v49, %v1171_v47  ;;  %v1173_v55 = vld [vmem:[%s1532_s23 + $0x68] sm:$0xf0]  ;;  %v1288_v56 = vld [vmem:[%s1532_s23 + $0xe4] sm:$0xf] }
  0x4a   : > { %v1236_v53 = vor.u32 %v1289_v51, %v1235_v50  ;;  %810 = vmatpush.bf16.msra.mxu3 %v1248_v48  ;;  %v1176_v57 = vor.u32 %v1272_v54, %v1173_v55  ;;  %v1237_v58 = vld [vmem:[%s1532_s23 + $0xe8] sm:$0xf0]  ;;  %v1163_v59 = vld [vmem:[%s1532_s23 + $0x50] sm:$0xf]  ;;  %v1271_v60 = vld [vmem:[%s1532_s23 + $0x54] sm:$0xf0] }
  0x4b   : > { %v1240_v61 = vor.u32 %v1288_v56, %v1237_v58  ;;  %v1227_v62 = vld [vmem:[%s1532_s23 + $0xd0] sm:$0xf]  ;;  %v1287_v63 = vld [vmem:[%s1532_s23 + $0xd4] sm:$0xf0]  ;;  %v1270_v0 = vld [vmem:[%s1532_s23 + $0x54] sm:$0xf]  ;;  %v1164_v1 = vor.u32 %v1271_v60, %v1163_v59 }
  0x4c   : > { %754 = vmatpush.bf16.msra.mxu0 %v1172_v52  ;;  %v1165_v2 = vld [vmem:[%s1532_s23 + $0x58] sm:$0xf0]  ;;  %v1286_v3 = vld [vmem:[%s1532_s23 + $0xd4] sm:$0xf]  ;;  %v1228_v5 = vor.u32 %v1287_v63, %v1227_v62  ;;  %v1155_v7 = vld [vmem:[%s1532_s23 + $0x40] sm:$0xf] }
  0x4d   : > { %v1229_v4 = vld [vmem:[%s1532_s23 + $0xd8] sm:$0xf0]  ;;  %773 = vmatpush.bf16.msra.mxu1 %v1236_v53  ;;  %792 = vmatpush.bf16.msra.mxu2 %v1176_v57  ;;  %v1168_v6 = vor.u32 %v1270_v0, %v1165_v2  ;;  %v1269_v8 = vld [vmem:[%s1532_s23 + $0x44] sm:$0xf0]  ;;  %v1219_v9 = vld [vmem:[%s1532_s23 + $0xc0] sm:$0xf] }
  0x4e   : > { %811 = vmatpush.bf16.msra.mxu3 %v1240_v61  ;;  %v1232_v10 = vor.u32 %v1286_v3, %v1229_v4  ;;  %v1285_v11 = vld [vmem:[%s1532_s23 + $0xc4] sm:$0xf0]  ;;  %v1268_v12 = vld [vmem:[%s1532_s23 + $0x44] sm:$0xf]  ;;  %v1157_v13 = vld [vmem:[%s1532_s23 + $0x48] sm:$0xf0]  ;;  %v1156_v16 = vor.u32 %v1269_v8, %v1155_v7 }
  0x4f   : > { %v1284_v14 = vld [vmem:[%s1532_s23 + $0xc4] sm:$0xf]  ;;  %v1221_v15 = vld [vmem:[%s1532_s23 + $0xc8] sm:$0xf0]  ;;  %v1220_v17 = vor.u32 %v1285_v11, %v1219_v9  ;;  %v1160_v18 = vor.u32 %v1268_v12, %v1157_v13  ;;  %v1147_v19 = vld [vmem:[%s1532_s23 + $0x30] sm:$0xf] }
  0x50   : > { %755 = vmatpush.bf16.msra.mxu0 %v1164_v1  ;;  %v1267_v20 = vld [vmem:[%s1532_s23 + $0x34] sm:$0xf0]  ;;  %v1211_v21 = vld [vmem:[%s1532_s23 + $0xb0] sm:$0xf]  ;;  %v1224_v22 = vor.u32 %v1284_v14, %v1221_v15  ;;  %v1266_v24 = vld [vmem:[%s1532_s23 + $0x34] sm:$0xf] }
  0x51   : > { %774 = vmatpush.bf16.msra.mxu1 %v1228_v5  ;;  %793 = vmatpush.bf16.msra.mxu2 %v1168_v6  ;;  %v1283_v23 = vld [vmem:[%s1532_s23 + $0xb4] sm:$0xf0]  ;;  %v1149_v25 = vld [vmem:[%s1532_s23 + $0x38] sm:$0xf0]  ;;  %v1282_v26 = vld [vmem:[%s1532_s23 + $0xb4] sm:$0xf]  ;;  %v1148_v28 = vor.u32 %v1267_v20, %v1147_v19 }
  0x52   : > { %812 = vmatpush.bf16.msra.mxu3 %v1232_v10  ;;  %v1213_v27 = vld [vmem:[%s1532_s23 + $0xb8] sm:$0xf0]  ;;  %v1212_v29 = vor.u32 %v1283_v23, %v1211_v21  ;;  %v1152_v30 = vor.u32 %v1266_v24, %v1149_v25  ;;  %v1139_v31 = vld [vmem:[%s1532_s23 + $0x20] sm:$0xf]  ;;  %v1265_v32 = vld [vmem:[%s1532_s23 + $0x24] sm:$0xf0] }
  0x53   : > { %v1203_v33 = vld [vmem:[%s1532_s23 + $0xa0] sm:$0xf]  ;;  %v1216_v34 = vor.u32 %v1282_v26, %v1213_v27  ;;  %v1281_v35 = vld [vmem:[%s1532_s23 + $0xa4] sm:$0xf0]  ;;  %v1264_v36 = vld [vmem:[%s1532_s23 + $0x24] sm:$0xf]  ;;  %v1140_v40 = vor.u32 %v1265_v32, %v1139_v31 }
  0x54   : > { %756 = vmatpush.bf16.msra.mxu0 %v1156_v16  ;;  %v1141_v37 = vld [vmem:[%s1532_s23 + $0x28] sm:$0xf0]  ;;  %v1280_v38 = vld [vmem:[%s1532_s23 + $0xa4] sm:$0xf]  ;;  %v1204_v41 = vor.u32 %v1281_v35, %v1203_v33  ;;  %v1131_v43 = vld [vmem:[%s1532_s23 + $0x10] sm:$0xf] }
  0x55   : > { %775 = vmatpush.bf16.msra.mxu1 %v1220_v17  ;;  %794 = vmatpush.bf16.msra.mxu2 %v1160_v18  ;;  %v1205_v39 = vld [vmem:[%s1532_s23 + $0xa8] sm:$0xf0]  ;;  %v1144_v42 = vor.u32 %v1264_v36, %v1141_v37  ;;  %v1263_v44 = vld [vmem:[%s1532_s23 + $0x14] sm:$0xf0]  ;;  %v1195_v45 = vld [vmem:[%s1532_s23 + $0x90] sm:$0xf] }
  0x56   : > { %813 = vmatpush.bf16.msra.mxu3 %v1224_v22  ;;  %v1208_v46 = vor.u32 %v1280_v38, %v1205_v39  ;;  %v1279_v47 = vld [vmem:[%s1532_s23 + $0x94] sm:$0xf0]  ;;  %v1262_v48 = vld [vmem:[%s1532_s23 + $0x14] sm:$0xf]  ;;  %v1133_v49 = vld [vmem:[%s1532_s23 + $0x18] sm:$0xf0]  ;;  %v1132_v52 = vor.u32 %v1263_v44, %v1131_v43 }
  0x57   : > { %v1278_v50 = vld [vmem:[%s1532_s23 + $0x94] sm:$0xf]  ;;  %v1197_v51 = vld [vmem:[%s1532_s23 + $0x98] sm:$0xf0]  ;;  %v1196_v53 = vor.u32 %v1279_v47, %v1195_v45  ;;  %v1136_v54 = vor.u32 %v1262_v48, %v1133_v49  ;;  %v1123_v55 = vld [vmem:[%s1532_s23] sm:$0xf] }
  0x58   : > { %757 = vmatpush.bf16.msra.mxu0 %v1148_v28  ;;  %v1261_v56 = vld [vmem:[%s1532_s23 + $0x4] sm:$0xf0]  ;;  %v1187_v57 = vld [vmem:[%s1532_s23 + $0x80] sm:$0xf]  ;;  %v1200_v58 = vor.u32 %v1278_v50, %v1197_v51  ;;  %v1260_v60 = vld [vmem:[%s1532_s23 + $0x4] sm:$0xf] }
  0x59   : > { %776 = vmatpush.bf16.msra.mxu1 %v1212_v29  ;;  %795 = vmatpush.bf16.msra.mxu2 %v1152_v30  ;;  %v1277_v59 = vld [vmem:[%s1532_s23 + $0x84] sm:$0xf0]  ;;  %v1125_v61 = vld [vmem:[%s1532_s23 + $0x8] sm:$0xf0]  ;;  %v1276_v62 = vld [vmem:[%s1532_s23 + $0x84] sm:$0xf]  ;;  %v1124_v0 = vor.u32 %v1261_v56, %v1123_v55 }
  0x5a   : > { %814 = vmatpush.bf16.msra.mxu3 %v1216_v34  ;;  %v1189_v63 = vld [vmem:[%s1532_s23 + $0x88] sm:$0xf0]  ;;  %v1107_v1 = vld [vmem:[%s1669_s0] sm:$0xf]  ;;  %v1257_v2 = vld [vmem:[%s1669_s0 + $0x4] sm:$0xf0]  ;;  %v1188_v3 = vor.u32 %v1277_v59, %v1187_v57  ;;  %v1128_v4 = vor.u32 %v1260_v60, %v1125_v61 }
  0x5b   : > { %v1256_v5 = vld [vmem:[%s1669_s0 + $0x4] sm:$0xf]  ;;  %v1109_v6 = vld [vmem:[%s1669_s0 + $0x8] sm:$0xf0]  ;;  %v1192_v7 = vor.u32 %v1276_v62, %v1189_v63  ;;  %v1108_v8 = vor.u32 %v1257_v2, %v1107_v1  ;;  %v1115_v10 = vld [vmem:[%s1669_s0 + $0x10] sm:$0xf] }
  0x5c   : > { %758 = vmatpush.bf16.msra.mxu0 %v1140_v40  ;;  %v1112_v9 = vor.u32 %v1256_v5, %v1109_v6  ;;  %v1259_v11 = vld [vmem:[%s1669_s0 + $0x14] sm:$0xf0]  ;;  %v1258_v12 = vld [vmem:[%s1669_s0 + $0x14] sm:$0xf]  ;;  %v1117_v13 = vld [vmem:[%s1669_s0 + $0x18] sm:$0xf0] }
  0x5d   : > { %777 = vmatpush.bf16.msra.mxu1 %v1204_v41  ;;  %796 = vmatpush.bf16.msra.mxu2 %v1144_v42  ;;  %v1116_v14 = vor.u32 %v1259_v11, %v1115_v10  ;;  %v1120_v15 = vor.u32 %v1258_v12, %v1117_v13  ;;  %s1104_s23 = sshll.u32 %s1363_s17, 1  ;;  %v870_v21 = vld [vmem:[%s1631_s30] sm:$0xff]  ;;  %v871_v34 = vld [vmem:[%s1631_s30 + $0x8] sm:$0xff]  ;;  %v872_v48 = vld [vmem:[%s1631_s30 + $0x10] sm:$0xff]  ;;  %s1292_s21 = sshll.u32 (%p1437_p6), %s1363_s17, 3 }
  0x5e   : > { %815 = vmatpush.bf16.msra.mxu3 %v1208_v46  ;;  %p509_p11 = scmp.lt.s32.totalorder %s1104_s23, 7  ;;  %v874_v23 = vunpack.c.l.bf16 %v870_v21  ;;  %v875_v30 = vunpack.c.h.bf16 %v870_v21  ;;  %v876_v39 = vunpack.c.l.bf16 %v871_v34  ;;  %v877_v45 = vunpack.c.h.bf16 %v871_v34  ;;  %v873_v2 = vld [vmem:[%s1631_s30 + $0x18] sm:$0xff]  ;;  %s918_s7 = scalar_lea.vmem (%p1437_p6), %s1673_s4, %s1292_s21 }
  0x5f   : > { %v879_v62 = vunpack.c.h.bf16 %v872_v48  ;;  %v881_v12 = vunpack.c.h.bf16 %v873_v2 }
  0x60   : > { %759 = vmatpush.bf16.msra.mxu0 %v1132_v52  ;;  %s1683_s23 = smov (!%p509_p11, %s1104_s23), 7 }
  0x61   : > { %778 = vmatpush.bf16.msra.mxu1 %v1196_v53  ;;  %797 = vmatpush.bf16.msra.mxu2 %v1136_v54  ;;  %s511_s28 = scalar_lea.vmem %s1671_s2, %s1683_s23  ;;  %v878_v53 = vunpack.c.l.bf16 %v872_v48 }
  0x62   : > { %816 = vmatpush.bf16.msra.mxu3 %v1200_v58  ;;  %v856_v16 = vld [vmem:[%s511_s28] sm:$0x3] }
  0x63   : > { %v858_v19 = vperm.slane %v856_v16, 0  ;;  %v859_v25 = vperm.slane %v856_v16, 1 }
  0x64   : > { %760 = vmatpush.bf16.msra.mxu0 %v1124_v0 }
  0x65   : > { %779 = vmatpush.bf16.msra.mxu1 %v1188_v3  ;;  %798 = vmatpush.bf16.msra.mxu2 %v1128_v4 }
  0x66   : > { %817 = vmatpush.bf16.msra.mxu3 %v1192_v7  ;;  %v880_v7 = vunpack.c.l.bf16 %v873_v2 }
  0x67   : > { %761 = vmatmul.bf16.vlgmr.msra.gmra.mxu0 %v1108_v8 }
  0x68   : > { %780 = vmatmul.bf16.vlgmr.msra.gmra.mxu1 %v1112_v9  ;;  %799 = vmatmul.bf16.vlgmr.msra.gmra.mxu2 %v1108_v8 }
  0x69   : > { %818 = vmatmul.bf16.vlgmr.msra.gmra.mxu3 %v1112_v9 }
  0x77   : > { %766 = vmatmul.bf16.gmra.mxu0 %v1116_v14 }
  0x78   : > { %785 = vmatmul.bf16.gmra.mxu1 %v1120_v15  ;;  %804 = vmatmul.bf16.gmra.mxu2 %v1116_v14 }
  0x79   : > { %823 = vmatmul.bf16.gmra.mxu3 %v1120_v15 }
  0xe4   : > { %v762_v17 = vpop.f32.mrf.mxu0 }
  0xe5   : > { %v781_v18 = vpop.f32.mrf.mxu1 }
  0xe6   : > { %v782_v20 = vadd.f32 %v781_v18, %v762_v17 }
  0xe8   : > { %v862_v22 = vadd.f32 %v858_v19, %v782_v20 }
  0xea   : > { %v882_v28 = vadd.f32 %v874_v23, %v862_v22 }
  0xeb   : > { %v800_v24 = vpop.f32.mrf.mxu2 }
  0xec   : > { %v819_v26 = vpop.f32.mrf.mxu3  ;;  %v764_v27 = vpop.f32.mrf.mxu0  ;;  %v890_v35 = vmax.f32 %v882_v28, 0.0 }
  0xed   : > { %v820_v29 = vadd.f32 %v819_v26, %v800_v24  ;;  %v783_v31 = vpop.f32.mrf.mxu1 }
  0xee   : > { %v784_v33 = vadd.f32 %v783_v31, %v764_v27 }
  0xef   : > { %v863_v32 = vadd.f32 %v859_v25, %v820_v29 }
  0xf0   : > { %v864_v38 = vadd.f32 %v858_v19, %v784_v33 }
  0xf1   : > { %v883_v36 = vadd.f32 %v875_v30, %v863_v32 }
  0xf2   : > { %v884_v49 = vadd.f32 %v876_v39, %v864_v38 }
  0xf3   : > { %v891_v37 = vmax.f32 %v883_v36, 0.0  ;;  %v802_v40 = vpop.f32.mrf.mxu2 }
  0xf4   : > { %v821_v41 = vpop.f32.mrf.mxu3  ;;  %v767_v42 = vpop.f32.mrf.mxu0  ;;  %v892_v54 = vmax.f32 %v884_v49, 0.0 }
  0xf5   : > { %v898_v43 = vpack.c.bf16 %v891_v37, %v890_v35  ;;  %v822_v44 = vadd.f32 %v821_v41, %v802_v40  ;;  %v786_v46 = vpop.f32.mrf.mxu1 }
  0xf6   : > { %v787_v47 = vadd.f32 %v786_v46, %v767_v42 }
  0xf7   : > { %902 = vst [vmem:[%s1637_s15] sm:$0xff] %v898_v43  ;;  %v865_v50 = vadd.f32 %v859_v25, %v822_v44 }
  0xf8   : > { %v866_v52 = vadd.f32 %v858_v19, %v787_v47 }
  0xf9   : > { %v885_v51 = vadd.f32 %v877_v45, %v865_v50 }
  0xfa   : > { %v886_v60 = vadd.f32 %v878_v53, %v866_v52 }
  0xfb   : > { %v893_v55 = vmax.f32 %v885_v51, 0.0  ;;  %v805_v56 = vpop.f32.mrf.mxu2 }
  0xfc   : > { %v824_v57 = vpop.f32.mrf.mxu3  ;;  %v769_v58 = vpop.f32.mrf.mxu0  ;;  %v894_v3 = vmax.f32 %v886_v60, 0.0 }
  0xfd   : > { %v899_v59 = vpack.c.bf16 %v893_v55, %v892_v54  ;;  %v825_v61 = vadd.f32 %v824_v57, %v805_v56  ;;  %v788_v63 = vpop.f32.mrf.mxu1 }
  0xfe   : > { %v789_v1 = vadd.f32 %v788_v63, %v769_v58 }
  0xff   : > { %903 = vst [vmem:[%s1637_s15 + $0x8] sm:$0xff] %v899_v59  ;;  %v867_v0 = vadd.f32 %v859_v25, %v825_v61 }
 0x100   : > { %v868_v6 = vadd.f32 %v858_v19, %v789_v1  ;;  %v953_v19 = vld [vmem:[%s1637_s15] sm:$0xff] (%p1437_p6) }
 0x101   : > { %v887_v4 = vadd.f32 %v879_v62, %v867_v0  ;;  %954 = vst [vmem:[%s918_s7] sm:$0xff] (%p1437_p6), %v953_v19 }
 0x102   : > { %v888_v13 = vadd.f32 %v880_v7, %v868_v6 }
 0x103   : > { %v895_v5 = vmax.f32 %v887_v4, 0.0  ;;  %v807_v8 = vpop.f32.mrf.mxu2 }
 0x104   : > { %v826_v9 = vpop.f32.mrf.mxu3  ;;  %v896_v16 = vmax.f32 %v888_v13, 0.0 }
 0x105   : > { %v900_v10 = vpack.c.bf16 %v895_v5, %v894_v3  ;;  %v827_v11 = vadd.f32 %v826_v9, %v807_v8 }
 0x106   : > { %v955_v20 = vld [vmem:[%s1637_s15 + $0x8] sm:$0xff] (%p1437_p6) }
 0x107   : > { %904 = vst [vmem:[%s1637_s15 + $0x10] sm:$0xff] %v900_v10  ;;  %v869_v14 = vadd.f32 %v859_v25, %v827_v11 }
 0x108   : > { %956 = vst [vmem:[%s918_s7 + $0x20] sm:$0xff] (%p1437_p6), %v955_v20 }
 0x109   : > { %v889_v15 = vadd.f32 %v881_v12, %v869_v14 }
 0x10b   : > { %v897_v17 = vmax.f32 %v889_v15, 0.0  ;;  %912 = sbr.rel (!%p1437_p6) target bundleno = 280 (0x118), region = 124 }
 0x10d   : > { %v901_v18 = vpack.c.bf16 %v897_v17, %v896_v16 }
 0x10e   : > { %v957_v21 = vld [vmem:[%s1637_s15 + $0x10] sm:$0xff] (%p1437_p6) }
 0x10f   : > { %905 = vst [vmem:[%s1637_s15 + $0x18] sm:$0xff] %v901_v18 }
 0x110   : > { %958 = vst [vmem:[%s918_s7 + $0x40] sm:$0xff] %v957_v21 }
 0x116   : > { %v959_v22 = vld [vmem:[%s1637_s15 + $0x18] sm:$0xff] }
 0x117   : > { %960 = vst [vmem:[%s918_s7 + $0x60] sm:$0xff] %v959_v22 }
 0x118 PF: > { %s14_s19 = sadd.s32 1, %s1371_s19   ;;  %s1676_s15 = smov %s1359_s16 }
 0x119   : > { %p11_p12 = scmp.ge.s32.totalorder %s14_s19, 6   ;;  %s1677_s16 = smov %s1442_s26 }
 0x11a   : > { %s1678_s17 = smov %s1367_s18  ;;  %s1679_s18 = smov %s1681_s20 }
 0x11b   :  { %13 = sbr.rel (!%p11_p12) target bundleno = 3 (0x3), region = 207 }

// kernel: resnet_forward.71
= control target key start
LH: loop header
LB: loop body
LE: loop exit
PB: predicated region body
PF: predicated region fallthrough
CT: control target
= control target key end

     0   :  { %8 = vsyncpa [#allocation5], 0  ;;  %s1625_s12 = smov 0   ;;  %s1627_s13 = smov 0   ;;  %s1908_s0 = inlined_call_operand.vmem [shape: bf16[32,1024], index: 0, kind: input, shape index: {}]   ;;  %s1909_s1 = inlined_call_operand.vmem [shape: bf16[1024,256], index: 1, kind: input, shape index: {}]   ;;  %s1910_s2 = inlined_call_operand.hbm [shape: f32[1,256], index: 2, kind: input, shape index: {}]   ;;  %s1911_s3 = inlined_call_operand.vmem [shape: bf16[32,256], index: 3, kind: output, shape index: {}]  }
   0x1   :  { %s1629_s14 = smov 0   ;;  %s1631_s15 = smov 0  }
   0x2   :  { %s1633_s16 = smov 0  }
   0x3 LB: > { %s1096_s17 = sadd.s32 4294967295, %s1601_s16   ;;  %s26_s18 = sadd.s32 1, %s1597_s15  ;;  %s1601_s16 = sphi %s1633_s16, %s14_s16   ;;  %s1597_s15 = sphi %s1631_s15, %s1918_s15   ;;  %s1593_s14 = sphi %s1629_s14, %s1917_s14   ;;  %s1589_s13 = sphi %s1627_s13, %s1916_s13   ;;  %s1585_s12 = sphi %s1625_s12, %s1915_s12  }
   0x4   : > { %p27_p0 = scmp.ge.s32.totalorder %s26_s18, 2  ;;  %s42_s19 = sadd.s32 1, %s1589_s13 }
   0x5   : > { %p49_p1 = scmp.ne.s32.totalorder %s1589_s13, %s1585_s12  ;;  %p50_p2 = scmp.eq.s32.totalorder %s1601_s16, 0 }
   0x6   : > { %s1920_s18 = smov (%p27_p0, %s26_s18), 0  ;;  %p1097_p4 = scmp.ge.s32.totalorder %s1601_s16, 1 }
   0x7   : > { %p1658_p3 = por %p50_p2, %p49_p1  ;;  %s38_s21 = ssub.s32 %s1597_s15, %s1920_s18 }
   0x8   : > { %p148_p5 = scmp.lt.s32.totalorder %s1601_s16, 3  ;;  %p40_p6 = scmp.eq.s32.totalorder %s38_s21, 0 }
   0x9   : > { %p1670_p8 = scmp.eq.s32.totalorder %s1096_s17, 0  ;;  %s162_s27 = sshll.u32 %s1910_s2, 4  ;;  %s163_s27 = int_to_ptr.hbm [resolvable:$true] %s162_s27 }
   0xa   : > { %p1666_p7 = pnand %p1097_p4, %p148_p5  ;;  %s1603_s28 = smov [#allocation4]  }
   0xb   : > { %s1675_s24 = scalar_select %p40_p6, %s1589_s13, %s42_s19  }
   0xc   : > { %p1481_p9 = pneg %p1666_p7  ;;  %s164_s29 = sshll.u32 %s1603_s28, 4  ;;  %s165_s29 = int_to_ptr.vmem [resolvable:$true] %s164_s29 }
   0xd   : > { %p1099_p11 = scmp.ge.s32.totalorder %s1601_s16, 2 }
   0xe   : > { %p1482_p10 = pnand %p1670_p8, %p1481_p9 }
   0xf   : > { %171 = sbr.rel (%p1099_p11) target bundleno = 32 (0x20), region = 20 }
  0x10   : > { %1484 = dma.hbm_to_vmem [thread:$0]  (!%p1482_p10), %s163_s27, 32, %s165_s29, [#allocation5]  }
  0x14   : > { %174 = sbr.rel (!%p1658_p3) target bundleno = 32 (0x20), region = 24  ;;  %s176_s30 = sand.u32 (%p1658_p3), 1, %s1589_s13  }
  0x15   : > { %s1403_s4 = sshll.u32 (%p1658_p3), %s1597_s15, 4  ;;  %s1100_s5 = sshll.u32 (%p1658_p3), %s176_s30, 6 }
  0x16   : > { %s184_s8 = scalar_lea.vmem (%p1658_p3), %s1908_s0, %s1403_s4  ;;  %s178_s9 = scalar_lea.vmem (%p1658_p3), [#allocation3], %s1100_s5 }
  0x17   : > { %v197_v0 = vld [vmem:[%s184_s8] sm:$0xff] (%p1658_p3)  ;;  %v199_v1 = vld [vmem:[%s184_s8 + $0x8] sm:$0xff] (%p1658_p3) }
  0x18   : > { %v201_v2 = vld [vmem:[%s184_s8 + $0x20] sm:$0xff] (%p1658_p3)  ;;  %198 = vst [vmem:[%s178_s9] sm:$0xff] (%p1658_p3), %v197_v0  ;;  %v203_v3 = vld [vmem:[%s184_s8 + $0x28] sm:$0xff] (%p1658_p3) }
  0x19   : > { %200 = vst [vmem:[%s178_s9 + $0x8] sm:$0xff] %v199_v1  ;;  %v205_v4 = vld [vmem:[%s184_s8 + $0x40] sm:$0xff]  ;;  %v207_v5 = vld [vmem:[%s184_s8 + $0x48] sm:$0xff] }
  0x1a   : > { %202 = vst [vmem:[%s178_s9 + $0x10] sm:$0xff] %v201_v2  ;;  %v209_v6 = vld [vmem:[%s184_s8 + $0x60] sm:$0xff]  ;;  %v211_v7 = vld [vmem:[%s184_s8 + $0x68] sm:$0xff] }
  0x1b   : > { %204 = vst [vmem:[%s178_s9 + $0x18] sm:$0xff] %v203_v3 }
  0x1c   : > { %206 = vst [vmem:[%s178_s9 + $0x20] sm:$0xff] %v205_v4 }
  0x1d   : > { %208 = vst [vmem:[%s178_s9 + $0x28] sm:$0xff] %v207_v5 }
  0x1e   : > { %210 = vst [vmem:[%s178_s9 + $0x30] sm:$0xff] %v209_v6 }
  0x1f   : > { %212 = vst [vmem:[%s178_s9 + $0x38] sm:$0xff] %v211_v7 }
  0x20 PF: > { %236 = sbr.rel (%p1666_p7) target bundleno = 299 (0x12b), region = 51  ;;  %s239_s10 = sand.u32 (!%p1666_p7), 1, %s1585_s12  }
  0x21   : > { %s1104_s11 = sshll.u32 (!%p1666_p7), %s239_s10, 6 }
  0x22   : > { %s1695_s17 = scalar_lea.vmem (!%p1666_p7), [#allocation3], %s1104_s11 }
  0x25   : > { %1580 = dma.done.wait (%p1670_p8), [#allocation5], 32  }
  0x26   : > { %1582 = vsyncadd (%p1670_p8), [#allocation5], 4294967264  ;;  %s1106_s19 = sshll.u32 %s1593_s14, 6  ;;  %p1109_p13 = scmp.ne.s32.totalorder %s1593_s14, 0 }
  0x27   : > { %p286_p12 = scmp.lt.s32.totalorder %s1106_s19, 127 }
  0x28   : > { %312 = sbr.rel (%p1109_p13) target bundleno = 54 (0x36), region = 63 }
  0x29   : > { %s1922_s19 = smov (!%p286_p12, %s1106_s19), 127 }
  0x2a   : > { %s1404_s20 = sshll.u32 %s1922_s19, 3 }
  0x2b   : > { %s1705_s22 = scalar_lea.vmem %s1909_s1, %s1404_s20 }
  0x2d   : > { %v1604_v8 = vmov 0.0  }
  0x2e   : > { %313 = vst [vmem:[#allocation2 + $0x30] sm:$0xff] %v1604_v8 }
  0x2f   : > { %314 = vst [vmem:[#allocation2] sm:$0xff] %v1604_v8 }
  0x30   : > { %315 = vst [vmem:[#allocation2 + $0x18] sm:$0xff] %v1604_v8 }
  0x31   : > { %316 = vst [vmem:[#allocation2 + $0x10] sm:$0xff] %v1604_v8 }
  0x32   : > { %317 = vst [vmem:[#allocation2 + $0x8] sm:$0xff] %v1604_v8 }
  0x33   : > { %318 = vst [vmem:[#allocation2 + $0x20] sm:$0xff] %v1604_v8 }
  0x34   : > { %319 = vst [vmem:[#allocation2 + $0x28] sm:$0xff] %v1604_v8 }
  0x35   : > { %320 = vst [vmem:[#allocation2 + $0x38] sm:$0xff] %v1604_v8 }
  0x36 PF: > { %v1200_v9 = vld [vmem:[%s1705_s22 + $0x70] sm:$0xf]  ;;  %v1428_v10 = vld [vmem:[%s1705_s22 + $0x74] sm:$0xf0]  ;;  %v1192_v20 = vld [vmem:[%s1705_s22 + $0x60] sm:$0xf] }
  0x37   : > { %v1264_v11 = vld [vmem:[%s1705_s22 + $0xf0] sm:$0xf]  ;;  %v1201_v12 = vor.u32 %v1428_v10, %v1200_v9  ;;  %v1444_v13 = vld [vmem:[%s1705_s22 + $0xf4] sm:$0xf0]  ;;  %v1426_v22 = vld [vmem:[%s1705_s22 + $0x64] sm:$0xf0] }
  0x38   : > { %v1328_v14 = vld [vmem:[%s1705_s22 + $0x170] sm:$0xf]  ;;  %v1460_v15 = vld [vmem:[%s1705_s22 + $0x174] sm:$0xf0]  ;;  %v1265_v16 = vor.u32 %v1444_v13, %v1264_v11  ;;  %v1256_v23 = vld [vmem:[%s1705_s22 + $0xe0] sm:$0xf]  ;;  %v1193_v25 = vor.u32 %v1426_v22, %v1192_v20 }
  0x39   : > { %v1329_v17 = vor.u32 %v1460_v15, %v1328_v14  ;;  %v1392_v18 = vld [vmem:[%s1705_s22 + $0x1f0] sm:$0xf]  ;;  %v1476_v19 = vld [vmem:[%s1705_s22 + $0x1f4] sm:$0xf0]  ;;  %761 = vmatpush.bf16.msra.mxu0 %v1201_v12  ;;  %v1442_v24 = vld [vmem:[%s1705_s22 + $0xe4] sm:$0xf0] }
  0x3a   : > { %v1393_v21 = vor.u32 %v1476_v19, %v1392_v18  ;;  %780 = vmatpush.bf16.msra.mxu1 %v1265_v16  ;;  %v1257_v26 = vor.u32 %v1442_v24, %v1256_v23  ;;  %v1320_v27 = vld [vmem:[%s1705_s22 + $0x160] sm:$0xf]  ;;  %v1458_v28 = vld [vmem:[%s1705_s22 + $0x164] sm:$0xf0]  ;;  %v1184_v32 = vld [vmem:[%s1705_s22 + $0x50] sm:$0xf] }
  0x3b   : > { %799 = vmatpush.bf16.msra.mxu2 %v1329_v17  ;;  %v1384_v29 = vld [vmem:[%s1705_s22 + $0x1e0] sm:$0xf]  ;;  %v1321_v30 = vor.u32 %v1458_v28, %v1320_v27  ;;  %v1474_v31 = vld [vmem:[%s1705_s22 + $0x1e4] sm:$0xf0]  ;;  %v1424_v33 = vld [vmem:[%s1705_s22 + $0x54] sm:$0xf0] }
  0x3c   : > { %818 = vmatpush.bf16.msra.mxu3 %v1393_v21  ;;  %v1385_v34 = vor.u32 %v1474_v31, %v1384_v29  ;;  %v1248_v35 = vld [vmem:[%s1705_s22 + $0xd0] sm:$0xf]  ;;  %v1440_v36 = vld [vmem:[%s1705_s22 + $0xd4] sm:$0xf0]  ;;  %v1185_v38 = vor.u32 %v1424_v33, %v1184_v32  ;;  %v1176_v44 = vld [vmem:[%s1705_s22 + $0x40] sm:$0xf] }
  0x3d   : > { %v1312_v37 = vld [vmem:[%s1705_s22 + $0x150] sm:$0xf]  ;;  %762 = vmatpush.bf16.msra.mxu0 %v1193_v25  ;;  %v1456_v39 = vld [vmem:[%s1705_s22 + $0x154] sm:$0xf0]  ;;  %v1249_v42 = vor.u32 %v1440_v36, %v1248_v35  ;;  %v1422_v45 = vld [vmem:[%s1705_s22 + $0x44] sm:$0xf0] }
  0x3e   : > { %v1376_v40 = vld [vmem:[%s1705_s22 + $0x1d0] sm:$0xf]  ;;  %v1472_v41 = vld [vmem:[%s1705_s22 + $0x1d4] sm:$0xf0]  ;;  %781 = vmatpush.bf16.msra.mxu1 %v1257_v26  ;;  %v1313_v43 = vor.u32 %v1456_v39, %v1312_v37  ;;  %v1240_v46 = vld [vmem:[%s1705_s22 + $0xc0] sm:$0xf]  ;;  %v1177_v53 = vor.u32 %v1422_v45, %v1176_v44 }
  0x3f   : > { %800 = vmatpush.bf16.msra.mxu2 %v1321_v30  ;;  %v1377_v47 = vor.u32 %v1472_v41, %v1376_v40  ;;  %v1438_v48 = vld [vmem:[%s1705_s22 + $0xc4] sm:$0xf0]  ;;  %v1304_v49 = vld [vmem:[%s1705_s22 + $0x140] sm:$0xf]  ;;  %v1168_v56 = vld [vmem:[%s1705_s22 + $0x30] sm:$0xf] }
  0x40   : > { %819 = vmatpush.bf16.msra.mxu3 %v1385_v34  ;;  %v1454_v50 = vld [vmem:[%s1705_s22 + $0x144] sm:$0xf0]  ;;  %v1368_v51 = vld [vmem:[%s1705_s22 + $0x1c0] sm:$0xf]  ;;  %v1241_v54 = vor.u32 %v1438_v48, %v1240_v46  ;;  %v1420_v57 = vld [vmem:[%s1705_s22 + $0x34] sm:$0xf0] }
  0x41   : > { %v1470_v52 = vld [vmem:[%s1705_s22 + $0x1c4] sm:$0xf0]  ;;  %763 = vmatpush.bf16.msra.mxu0 %v1185_v38  ;;  %v1305_v55 = vor.u32 %v1454_v50, %v1304_v49  ;;  %v1232_v58 = vld [vmem:[%s1705_s22 + $0xb0] sm:$0xf]  ;;  %v1436_v60 = vld [vmem:[%s1705_s22 + $0xb4] sm:$0xf0]  ;;  %v1169_v1 = vor.u32 %v1420_v57, %v1168_v56 }
  0x42   : > { %782 = vmatpush.bf16.msra.mxu1 %v1249_v42  ;;  %v1369_v59 = vor.u32 %v1470_v52, %v1368_v51  ;;  %v1296_v61 = vld [vmem:[%s1705_s22 + $0x130] sm:$0xf]  ;;  %v1452_v62 = vld [vmem:[%s1705_s22 + $0x134] sm:$0xf0]  ;;  %v1233_v2 = vor.u32 %v1436_v60, %v1232_v58  ;;  %v1160_v4 = vld [vmem:[%s1705_s22 + $0x20] sm:$0xf] }
  0x43   : > { %801 = vmatpush.bf16.msra.mxu2 %v1313_v43  ;;  %v1360_v63 = vld [vmem:[%s1705_s22 + $0x1b0] sm:$0xf]  ;;  %v1468_v0 = vld [vmem:[%s1705_s22 + $0x1b4] sm:$0xf0]  ;;  %v1297_v3 = vor.u32 %v1452_v62, %v1296_v61  ;;  %v1418_v5 = vld [vmem:[%s1705_s22 + $0x24] sm:$0xf0] }
  0x44   : > { %820 = vmatpush.bf16.msra.mxu3 %v1377_v47  ;;  %v1224_v6 = vld [vmem:[%s1705_s22 + $0xa0] sm:$0xf]  ;;  %v1361_v7 = vor.u32 %v1468_v0, %v1360_v63  ;;  %v1434_v8 = vld [vmem:[%s1705_s22 + $0xa4] sm:$0xf0]  ;;  %v1161_v13 = vor.u32 %v1418_v5, %v1160_v4  ;;  %v1152_v16 = vld [vmem:[%s1705_s22 + $0x10] sm:$0xf] }
  0x45   : > { %764 = vmatpush.bf16.msra.mxu0 %v1177_v53  ;;  %v1288_v9 = vld [vmem:[%s1705_s22 + $0x120] sm:$0xf]  ;;  %v1450_v10 = vld [vmem:[%s1705_s22 + $0x124] sm:$0xf0]  ;;  %v1225_v14 = vor.u32 %v1434_v8, %v1224_v6  ;;  %v1416_v17 = vld [vmem:[%s1705_s22 + $0x14] sm:$0xf0] }
  0x46   : > { %783 = vmatpush.bf16.msra.mxu1 %v1241_v54  ;;  %v1352_v11 = vld [vmem:[%s1705_s22 + $0x1a0] sm:$0xf]  ;;  %v1466_v12 = vld [vmem:[%s1705_s22 + $0x1a4] sm:$0xf0]  ;;  %v1289_v15 = vor.u32 %v1450_v10, %v1288_v9  ;;  %v1216_v18 = vld [vmem:[%s1705_s22 + $0x90] sm:$0xf]  ;;  %v1153_v26 = vor.u32 %v1416_v17, %v1152_v16 }
  0x47   : > { %802 = vmatpush.bf16.msra.mxu2 %v1305_v55  ;;  %v1353_v19 = vor.u32 %v1466_v12, %v1352_v11  ;;  %v1432_v20 = vld [vmem:[%s1705_s22 + $0x94] sm:$0xf0]  ;;  %v1280_v21 = vld [vmem:[%s1705_s22 + $0x110] sm:$0xf]  ;;  %v1144_v25 = vld [vmem:[%s1705_s22] sm:$0xf] }
  0x48   : > { %821 = vmatpush.bf16.msra.mxu3 %v1369_v59  ;;  %v1448_v22 = vld [vmem:[%s1705_s22 + $0x114] sm:$0xf0]  ;;  %v1344_v23 = vld [vmem:[%s1705_s22 + $0x190] sm:$0xf]  ;;  %v1414_v27 = vld [vmem:[%s1705_s22 + $0x4] sm:$0xf0]  ;;  %v1217_v30 = vor.u32 %v1432_v20, %v1216_v18 }
  0x49   : > { %765 = vmatpush.bf16.msra.mxu0 %v1169_v1  ;;  %v1464_v24 = vld [vmem:[%s1705_s22 + $0x194] sm:$0xf0]  ;;  %v1208_v28 = vld [vmem:[%s1705_s22 + $0x80] sm:$0xf]  ;;  %v1430_v29 = vld [vmem:[%s1705_s22 + $0x84] sm:$0xf0]  ;;  %v1281_v31 = vor.u32 %v1448_v22, %v1280_v21  ;;  %v1145_v43 = vor.u32 %v1414_v27, %v1144_v25 }
  0x4a   : > { %784 = vmatpush.bf16.msra.mxu1 %v1233_v2  ;;  %v1272_v32 = vld [vmem:[%s1705_s22 + $0x100] sm:$0xf]  ;;  %v1446_v33 = vld [vmem:[%s1705_s22 + $0x104] sm:$0xf0]  ;;  %v1345_v35 = vor.u32 %v1464_v24, %v1344_v23  ;;  %v1407_v38 = vld [vmem:[%s1695_s17 + $0xc] sm:$0xf0]  ;;  %v1209_v47 = vor.u32 %v1430_v29, %v1208_v28 }
  0x4b   : > { %803 = vmatpush.bf16.msra.mxu2 %v1297_v3  ;;  %v1336_v34 = vld [vmem:[%s1705_s22 + $0x180] sm:$0xf]  ;;  %v1462_v36 = vld [vmem:[%s1705_s22 + $0x184] sm:$0xf0]  ;;  %v1405_v39 = vld [vmem:[%s1695_s17 + $0x4] sm:$0xf]  ;;  %v1273_v48 = vor.u32 %v1446_v33, %v1272_v32 }
  0x4c   : > { %822 = vmatpush.bf16.msra.mxu3 %v1361_v7  ;;  %v1112_v37 = vld [vmem:[%s1695_s17] sm:$0xf]  ;;  %v1114_v40 = vld [vmem:[%s1695_s17 + $0x10] sm:$0xf0]  ;;  %v1330_v42 = vld [vmem:[%s1705_s22 + $0x178] sm:$0xf0]  ;;  %v1337_v52 = vor.u32 %v1462_v36, %v1336_v34 }
  0x4d   : > { %766 = vmatpush.bf16.msra.mxu0 %v1161_v13  ;;  %v1459_v41 = vld [vmem:[%s1705_s22 + $0x174] sm:$0xf]  ;;  %v1120_v44 = vld [vmem:[%s1695_s17 + $0x8] sm:$0xf]  ;;  %v1266_v46 = vld [vmem:[%s1705_s22 + $0xf8] sm:$0xf0]  ;;  %v1787_v57 = vor.u32 %v1407_v38, %v1112_v37  ;;  %v1792_v62 = vor.u32 %v1405_v39, %v1114_v40 }
  0x4e   : > { %785 = vmatpush.bf16.msra.mxu1 %v1225_v14  ;;  %v1443_v45 = vld [vmem:[%s1705_s22 + $0xf4] sm:$0xf]  ;;  %v1408_v49 = vld [vmem:[%s1695_s17 + $0x14] sm:$0xf0]  ;;  %v1406_v50 = vld [vmem:[%s1695_s17 + $0xc] sm:$0xf]  ;;  %v1333_v53 = vor.u32 %v1459_v41, %v1330_v42 }
  0x4f   : > { %804 = vmatpush.bf16.msra.mxu2 %v1289_v15  ;;  %v1122_v51 = vld [vmem:[%s1695_s17 + $0x18] sm:$0xf0]  ;;  %v1427_v54 = vld [vmem:[%s1705_s22 + $0x74] sm:$0xf]  ;;  %v1269_v58 = vor.u32 %v1443_v45, %v1266_v46  ;;  %v1457_v60 = vld [vmem:[%s1705_s22 + $0x164] sm:$0xf]  ;;  %v1794_v63 = vor.u32 %v1408_v49, %v1120_v44 }
  0x50   : > { %823 = vmatpush.bf16.msra.mxu3 %v1353_v19  ;;  %v1202_v55 = vld [vmem:[%s1705_s22 + $0x78] sm:$0xf0]  ;;  %v1475_v56 = vld [vmem:[%s1705_s22 + $0x1f4] sm:$0xf]  ;;  %v1322_v61 = vld [vmem:[%s1705_s22 + $0x168] sm:$0xf0]  ;;  %v1798_v2 = vor.u32 %v1406_v50, %v1122_v51 }
  0x51   : > { %767 = vmatpush.bf16.msra.mxu0 %v1153_v26  ;;  %v1394_v59 = vld [vmem:[%s1705_s22 + $0x1f8] sm:$0xf0]  ;;  %v1441_v0 = vld [vmem:[%s1705_s22 + $0xe4] sm:$0xf]  ;;  %v1258_v1 = vld [vmem:[%s1705_s22 + $0xe8] sm:$0xf0]  ;;  %v1205_v3 = vor.u32 %v1427_v54, %v1202_v55  ;;  %v1325_v5 = vor.u32 %v1457_v60, %v1322_v61 }
  0x52   : > { %786 = vmatpush.bf16.msra.mxu1 %v1217_v30  ;;  %v1397_v4 = vor.u32 %v1475_v56, %v1394_v59  ;;  %v1425_v6 = vld [vmem:[%s1705_s22 + $0x64] sm:$0xf]  ;;  %v1194_v7 = vld [vmem:[%s1705_s22 + $0x68] sm:$0xf0]  ;;  %v1261_v9 = vor.u32 %v1441_v0, %v1258_v1  ;;  %v1455_v11 = vld [vmem:[%s1705_s22 + $0x154] sm:$0xf] }
  0x53   : > { %805 = vmatpush.bf16.msra.mxu2 %v1281_v31  ;;  %v1473_v8 = vld [vmem:[%s1705_s22 + $0x1e4] sm:$0xf]  ;;  %v1386_v10 = vld [vmem:[%s1705_s22 + $0x1e8] sm:$0xf0]  ;;  %v1314_v12 = vld [vmem:[%s1705_s22 + $0x158] sm:$0xf0]  ;;  %v1197_v15 = vor.u32 %v1425_v6, %v1194_v7 }
  0x54   : > { %824 = vmatpush.bf16.msra.mxu3 %v1345_v35  ;;  %v1439_v13 = vld [vmem:[%s1705_s22 + $0xd4] sm:$0xf]  ;;  %v1250_v14 = vld [vmem:[%s1705_s22 + $0xd8] sm:$0xf0]  ;;  %v1389_v16 = vor.u32 %v1473_v8, %v1386_v10  ;;  %v1317_v17 = vor.u32 %v1455_v11, %v1314_v12  ;;  %v1453_v23 = vld [vmem:[%s1705_s22 + $0x144] sm:$0xf] }
  0x55   : > { %768 = vmatpush.bf16.msra.mxu0 %v1145_v43  ;;  %v1423_v18 = vld [vmem:[%s1705_s22 + $0x54] sm:$0xf]  ;;  %v1186_v19 = vld [vmem:[%s1705_s22 + $0x58] sm:$0xf0]  ;;  %v1253_v21 = vor.u32 %v1439_v13, %v1250_v14  ;;  %v1306_v24 = vld [vmem:[%s1705_s22 + $0x148] sm:$0xf0] }
  0x56   : > { %787 = vmatpush.bf16.msra.mxu1 %v1209_v47  ;;  %v1471_v20 = vld [vmem:[%s1705_s22 + $0x1d4] sm:$0xf]  ;;  %v1378_v22 = vld [vmem:[%s1705_s22 + $0x1d8] sm:$0xf0]  ;;  %v1437_v25 = vld [vmem:[%s1705_s22 + $0xc4] sm:$0xf]  ;;  %v1189_v27 = vor.u32 %v1423_v18, %v1186_v19  ;;  %v1309_v32 = vor.u32 %v1453_v23, %v1306_v24 }
  0x57   : > { %806 = vmatpush.bf16.msra.mxu2 %v1273_v48  ;;  %v1242_v26 = vld [vmem:[%s1705_s22 + $0xc8] sm:$0xf0]  ;;  %v1421_v28 = vld [vmem:[%s1705_s22 + $0x44] sm:$0xf]  ;;  %v1381_v31 = vor.u32 %v1471_v20, %v1378_v22  ;;  %v1128_v34 = vld [vmem:[%s1695_s17 + $0x20] sm:$0xf] }
  0x58   : > { %825 = vmatpush.bf16.msra.mxu3 %v1337_v52  ;;  %769 = vmatmul.bf16.vlgmr.msra.gmra.mxu0 %v1787_v57  ;;  %v1178_v29 = vld [vmem:[%s1705_s22 + $0x48] sm:$0xf0]  ;;  %v1469_v30 = vld [vmem:[%s1705_s22 + $0x1c4] sm:$0xf]  ;;  %v1411_v35 = vld [vmem:[%s1695_s17 + $0x2c] sm:$0xf0]  ;;  %v1245_v36 = vor.u32 %v1437_v25, %v1242_v26 }
  0x59   : > { %788 = vmatmul.bf16.vlgmr.msra.gmra.mxu1 %v1792_v62  ;;  %837 = vmatpush.bf16.msrb.mxu0 %v1205_v3  ;;  %v1370_v33 = vld [vmem:[%s1705_s22 + $0x1c8] sm:$0xf0]  ;;  %v1409_v37 = vld [vmem:[%s1695_s17 + $0x24] sm:$0xf]  ;;  %v1130_v38 = vld [vmem:[%s1695_s17 + $0x30] sm:$0xf0]  ;;  %v1181_v44 = vor.u32 %v1421_v28, %v1178_v29 }
  0x5a   : > { %856 = vmatpush.bf16.msrb.mxu1 %v1269_v58  ;;  %807 = vmatmul.bf16.vlgmr.msra.gmra.mxu2 %v1794_v63  ;;  %v1451_v39 = vld [vmem:[%s1705_s22 + $0x134] sm:$0xf]  ;;  %v1298_v40 = vld [vmem:[%s1705_s22 + $0x138] sm:$0xf0]  ;;  %v1136_v41 = vld [vmem:[%s1695_s17 + $0x28] sm:$0xf]  ;;  %v1373_v48 = vor.u32 %v1469_v30, %v1370_v33  ;;  %v1844_v59 = vor.u32 %v1409_v37, %v1130_v38 }
  0x5b   : > { %875 = vmatpush.bf16.msrb.mxu2 %v1333_v53  ;;  %826 = vmatmul.bf16.vlgmr.msra.gmra.mxu3 %v1798_v2  ;;  %v1435_v42 = vld [vmem:[%s1705_s22 + $0xb4] sm:$0xf]  ;;  %v1234_v43 = vld [vmem:[%s1705_s22 + $0xb8] sm:$0xf0]  ;;  %v1412_v45 = vld [vmem:[%s1695_s17 + $0x34] sm:$0xf0]  ;;  %v1301_v49 = vor.u32 %v1451_v39, %v1298_v40  ;;  %v1839_v53 = vor.u32 %v1411_v35, %v1128_v34 }
  0x5c   : > { %894 = vmatpush.bf16.msrb.mxu3 %v1397_v4  ;;  %v1410_v46 = vld [vmem:[%s1695_s17 + $0x2c] sm:$0xf]  ;;  %v1138_v47 = vld [vmem:[%s1695_s17 + $0x38] sm:$0xf0]  ;;  %v1419_v50 = vld [vmem:[%s1705_s22 + $0x34] sm:$0xf]  ;;  %v1237_v54 = vor.u32 %v1435_v42, %v1234_v43  ;;  %v1846_v60 = vor.u32 %v1412_v45, %v1136_v41 }
  0x5d   : > { %838 = vmatpush.bf16.msrb.mxu0 %v1197_v15  ;;  %v1170_v51 = vld [vmem:[%s1705_s22 + $0x38] sm:$0xf0]  ;;  %v1467_v52 = vld [vmem:[%s1705_s22 + $0x1b4] sm:$0xf]  ;;  %v1449_v56 = vld [vmem:[%s1705_s22 + $0x124] sm:$0xf]  ;;  %v1141_v1 = vor.u32 %v1410_v46, %v1138_v47 }
  0x5e   : > { %857 = vmatpush.bf16.msrb.mxu1 %v1261_v9  ;;  %v1362_v55 = vld [vmem:[%s1705_s22 + $0x1b8] sm:$0xf0]  ;;  %v1290_v58 = vld [vmem:[%s1705_s22 + $0x128] sm:$0xf0]  ;;  %v1433_v61 = vld [vmem:[%s1705_s22 + $0xa4] sm:$0xf]  ;;  %v1173_v3 = vor.u32 %v1419_v50, %v1170_v51 }
  0x5f   : > { %876 = vmatpush.bf16.msrb.mxu2 %v1325_v5  ;;  %v1226_v0 = vld [vmem:[%s1705_s22 + $0xa8] sm:$0xf0]  ;;  %v1365_v4 = vor.u32 %v1467_v52, %v1362_v55  ;;  %v1293_v5 = vor.u32 %v1449_v56, %v1290_v58  ;;  %v1417_v6 = vld [vmem:[%s1705_s22 + $0x24] sm:$0xf]  ;;  %v1447_v11 = vld [vmem:[%s1705_s22 + $0x114] sm:$0xf] }
  0x60   : > { %895 = vmatpush.bf16.msrb.mxu3 %v1389_v16  ;;  %v1162_v7 = vld [vmem:[%s1705_s22 + $0x28] sm:$0xf0]  ;;  %v1465_v8 = vld [vmem:[%s1705_s22 + $0x1a4] sm:$0xf]  ;;  %v1229_v9 = vor.u32 %v1433_v61, %v1226_v0  ;;  %v1282_v12 = vld [vmem:[%s1705_s22 + $0x118] sm:$0xf0] }
  0x61   : > { %839 = vmatpush.bf16.msrb.mxu0 %v1189_v27  ;;  %v1354_v10 = vld [vmem:[%s1705_s22 + $0x1a8] sm:$0xf0]  ;;  %v1431_v13 = vld [vmem:[%s1705_s22 + $0x94] sm:$0xf]  ;;  %v1218_v14 = vld [vmem:[%s1705_s22 + $0x98] sm:$0xf0]  ;;  %v1165_v15 = vor.u32 %v1417_v6, %v1162_v7 }
  0x62   : > { %858 = vmatpush.bf16.msrb.mxu1 %v1253_v21  ;;  %v1357_v16 = vor.u32 %v1465_v8, %v1354_v10  ;;  %v1415_v18 = vld [vmem:[%s1705_s22 + $0x14] sm:$0xf]  ;;  %v1154_v19 = vld [vmem:[%s1705_s22 + $0x18] sm:$0xf0]  ;;  %v1221_v21 = vor.u32 %v1431_v13, %v1218_v14  ;;  %v1445_v23 = vld [vmem:[%s1705_s22 + $0x104] sm:$0xf] }
  0x63   : > { %877 = vmatpush.bf16.msrb.mxu2 %v1317_v17  ;;  %v1285_v17 = vor.u32 %v1447_v11, %v1282_v12  ;;  %v1463_v20 = vld [vmem:[%s1705_s22 + $0x194] sm:$0xf]  ;;  %v1346_v22 = vld [vmem:[%s1705_s22 + $0x198] sm:$0xf0]  ;;  %v1274_v24 = vld [vmem:[%s1705_s22 + $0x108] sm:$0xf0]  ;;  %v1157_v27 = vor.u32 %v1415_v18, %v1154_v19 }
  0x64   : > { %896 = vmatpush.bf16.msrb.mxu3 %v1381_v31  ;;  %v1429_v25 = vld [vmem:[%s1705_s22 + $0x84] sm:$0xf]  ;;  %v1210_v26 = vld [vmem:[%s1705_s22 + $0x88] sm:$0xf0]  ;;  %v1349_v28 = vor.u32 %v1463_v20, %v1346_v22  ;;  %v1277_v29 = vor.u32 %v1445_v23, %v1274_v24  ;;  %v321_v43 = vld [vmem:[#allocation2 + $0x30] sm:$0xff]  ;;  %p1398_p0 = scmp.ne.s32.totalorder %s1593_s14, 1 }
  0x65   : > { %840 = vmatpush.bf16.msrb.mxu0 %v1181_v44  ;;  %v1413_v30 = vld [vmem:[%s1705_s22 + $0x4] sm:$0xf]  ;;  %v1146_v31 = vld [vmem:[%s1705_s22 + $0x8] sm:$0xf0]  ;;  %v324_v24 = vld [vmem:[#allocation2 + $0x10] sm:$0xff] }
  0x66   : > { %859 = vmatpush.bf16.msrb.mxu1 %v1245_v36  ;;  %v1461_v33 = vld [vmem:[%s1705_s22 + $0x184] sm:$0xf]  ;;  %v1338_v34 = vld [vmem:[%s1705_s22 + $0x188] sm:$0xf0]  ;;  %v1149_v35 = vor.u32 %v1413_v30, %v1146_v31 }
  0x67   : > { %878 = vmatpush.bf16.msrb.mxu2 %v1309_v32  ;;  %v1213_v32 = vor.u32 %v1429_v25, %v1210_v26  ;;  %v1341_v36 = vor.u32 %v1461_v33, %v1338_v34  ;;  %v327_v6 = vld [vmem:[#allocation2 + $0x28] sm:$0xff]  ;;  %v326_v33 = vld [vmem:[#allocation2 + $0x20] sm:$0xff] }
  0x68   : > { %897 = vmatpush.bf16.msrb.mxu3 %v1373_v48  ;;  %774 = vmatmul.bf16.gmra.mxu0 %v1839_v53 }
  0x69   : > { %793 = vmatmul.bf16.gmra.mxu1 %v1844_v59  ;;  %841 = vmatpush.bf16.msrb.mxu0 %v1173_v3 }
  0x6a   : > { %860 = vmatpush.bf16.msrb.mxu1 %v1237_v54  ;;  %812 = vmatmul.bf16.gmra.mxu2 %v1846_v60 }
  0x6b   : > { %879 = vmatpush.bf16.msrb.mxu2 %v1301_v49  ;;  %831 = vmatmul.bf16.gmra.mxu3 %v1141_v1  ;;  %v323_v49 = vld [vmem:[#allocation2 + $0x18] sm:$0xff] }
  0x6c   : > { %898 = vmatpush.bf16.msrb.mxu3 %v1365_v4 }
  0x6d   : > { %842 = vmatpush.bf16.msrb.mxu0 %v1165_v15 }
  0x6e   : > { %861 = vmatpush.bf16.msrb.mxu1 %v1229_v9 }
  0x6f   : > { %880 = vmatpush.bf16.msrb.mxu2 %v1293_v5 }
  0x70   : > { %899 = vmatpush.bf16.msrb.mxu3 %v1357_v16 }
  0x71   : > { %843 = vmatpush.bf16.msrb.mxu0 %v1157_v27 }
  0x72   : > { %862 = vmatpush.bf16.msrb.mxu1 %v1221_v21 }
  0x73   : > { %881 = vmatpush.bf16.msrb.mxu2 %v1285_v17  ;;  %v322_v17 = vld [vmem:[#allocation2] sm:$0xff] }
  0x74   : > { %900 = vmatpush.bf16.msrb.mxu3 %v1349_v28 }
  0x75   : > { %844 = vmatpush.bf16.msrb.mxu0 %v1149_v35 }
  0x76   : > { %863 = vmatpush.bf16.msrb.mxu1 %v1213_v32 }
  0x77   : > { %882 = vmatpush.bf16.msrb.mxu2 %v1277_v29 }
  0x78   : > { %901 = vmatpush.bf16.msrb.mxu3 %v1341_v36  ;;  %845 = vmatmul.bf16.vlgmr.msrb.gmra.mxu0 %v1787_v57 }
  0x79   : > { %864 = vmatmul.bf16.vlgmr.msrb.gmra.mxu1 %v1792_v62 }
  0x7a   : > { %883 = vmatmul.bf16.vlgmr.msrb.gmra.mxu2 %v1794_v63 }
  0x7b   : > { %902 = vmatmul.bf16.vlgmr.msrb.gmra.mxu3 %v1798_v2 }
  0x88   : > { %850 = vmatmul.bf16.gmra.mxu0 %v1839_v53 }
  0x89   : > { %869 = vmatmul.bf16.gmra.mxu1 %v1844_v59  ;;  %v325_v59 = vld [vmem:[#allocation2 + $0x8] sm:$0xff] }
  0x8a   : > { %888 = vmatmul.bf16.gmra.mxu2 %v1846_v60 }
  0x8b   : > { %907 = vmatmul.bf16.gmra.mxu3 %v1141_v1 }
  0xd5   : > { %v770_v37 = vpop.f32.mrf.mxu0 }
  0xd6   : > { %v789_v38 = vpop.f32.mrf.mxu1 }
  0xd7   : > { %v790_v39 = vadd.f32 %v789_v38, %v770_v37 }
  0xdd   : > { %v808_v40 = vpop.f32.mrf.mxu2  ;;  %v772_v57 = vpop.f32.mrf.mxu0 }
  0xde   : > { %v809_v41 = vadd.f32 %v808_v40, %v790_v39  ;;  %v827_v42 = vpop.f32.mrf.mxu3  ;;  %v791_v62 = vpop.f32.mrf.mxu1 }
  0xdf   : > { %v792_v2 = vadd.f32 %v791_v62, %v772_v57 }
  0xe0   : > { %v828_v44 = vadd.f32 %v827_v42, %v809_v41  ;;  %v328_v41 = vld [vmem:[#allocation2 + $0x38] sm:$0xff] }
  0xe2   : > { %v913_v63 = vadd.f32 %v828_v44, %v321_v43 }
  0xe4   : > { %921 = vst [vmem:[#allocation2 + $0x30] sm:$0xff] %v913_v63 }
  0xe5   : > { %v810_v45 = vpop.f32.mrf.mxu2  ;;  %v775_v48 = vpop.f32.mrf.mxu0 }
  0xe6   : > { %v811_v46 = vadd.f32 %v810_v45, %v792_v2  ;;  %v829_v47 = vpop.f32.mrf.mxu3  ;;  %v794_v50 = vpop.f32.mrf.mxu1 }
  0xe7   : > { %v795_v53 = vadd.f32 %v794_v50, %v775_v48 }
  0xe8   : > { %v830_v51 = vadd.f32 %v829_v47, %v811_v46 }
  0xea   : > { %v915_v52 = vadd.f32 %v830_v51, %v323_v49 }
  0xec   : > { %923 = vst [vmem:[#allocation2 + $0x18] sm:$0xff] %v915_v52 }
  0xed   : > { %v813_v54 = vpop.f32.mrf.mxu2  ;;  %v777_v58 = vpop.f32.mrf.mxu0 }
  0xee   : > { %v814_v55 = vadd.f32 %v813_v54, %v795_v53  ;;  %v832_v56 = vpop.f32.mrf.mxu3  ;;  %v796_v60 = vpop.f32.mrf.mxu1 }
  0xef   : > { %v797_v1 = vadd.f32 %v796_v60, %v777_v58 }
  0xf0   : > { %v833_v61 = vadd.f32 %v832_v56, %v814_v55 }
  0xf2   : > { %v917_v0 = vadd.f32 %v833_v61, %v325_v59 }
  0xf4   : > { %925 = vst [vmem:[#allocation2 + $0x8] sm:$0xff] %v917_v0 }
  0xf5   : > { %v815_v3 = vpop.f32.mrf.mxu2  ;;  %v846_v7 = vpop.f32.mrf.mxu0 }
  0xf6   : > { %v816_v4 = vadd.f32 %v815_v3, %v797_v1  ;;  %v834_v5 = vpop.f32.mrf.mxu3  ;;  %v865_v8 = vpop.f32.mrf.mxu1 }
  0xf7   : > { %v866_v11 = vadd.f32 %v865_v8, %v846_v7 }
  0xf8   : > { %v835_v9 = vadd.f32 %v834_v5, %v816_v4 }
  0xfa   : > { %v919_v10 = vadd.f32 %v835_v9, %v327_v6 }
  0xfc   : > { %927 = vst [vmem:[#allocation2 + $0x28] sm:$0xff] %v919_v10 }
  0xfd   : > { %v884_v12 = vpop.f32.mrf.mxu2  ;;  %v848_v15 = vpop.f32.mrf.mxu0 }
  0xfe   : > { %v903_v13 = vpop.f32.mrf.mxu3  ;;  %v885_v14 = vadd.f32 %v884_v12, %v866_v11  ;;  %v867_v16 = vpop.f32.mrf.mxu1 }
  0xff   : > { %v868_v20 = vadd.f32 %v867_v16, %v848_v15 }
 0x100   : > { %v904_v18 = vadd.f32 %v903_v13, %v885_v14 }
 0x102   : > { %v914_v19 = vadd.f32 %v904_v18, %v322_v17 }
 0x104   : > { %922 = vst [vmem:[#allocation2] sm:$0xff] %v914_v19 }
 0x105   : > { %v886_v21 = vpop.f32.mrf.mxu2  ;;  %v851_v25 = vpop.f32.mrf.mxu0 }
 0x106   : > { %v905_v22 = vpop.f32.mrf.mxu3  ;;  %v887_v23 = vadd.f32 %v886_v21, %v868_v20  ;;  %v870_v26 = vpop.f32.mrf.mxu1 }
 0x107   : > { %v871_v29 = vadd.f32 %v870_v26, %v851_v25 }
 0x108   : > { %v906_v27 = vadd.f32 %v905_v22, %v887_v23 }
 0x10a   : > { %v916_v28 = vadd.f32 %v906_v27, %v324_v24 }
 0x10c   : > { %924 = vst [vmem:[#allocation2 + $0x10] sm:$0xff] %v916_v28 }
 0x10d   : > { %v889_v30 = vpop.f32.mrf.mxu2  ;;  %v853_v35 = vpop.f32.mrf.mxu0 }
 0x10e   : > { %v908_v31 = vpop.f32.mrf.mxu3  ;;  %v890_v32 = vadd.f32 %v889_v30, %v871_v29  ;;  %v872_v36 = vpop.f32.mrf.mxu1 }
 0x10f   : > { %v873_v38 = vadd.f32 %v872_v36, %v853_v35 }
 0x110   : > { %v909_v34 = vadd.f32 %v908_v31, %v890_v32 }
 0x112   : > { %v918_v37 = vadd.f32 %v909_v34, %v326_v33 }
 0x114   : > { %926 = vst [vmem:[#allocation2 + $0x20] sm:$0xff] %v918_v37 }
 0x115   : > { %v891_v39 = vpop.f32.mrf.mxu2 }
 0x116   : > { %v892_v40 = vadd.f32 %v891_v39, %v873_v38  ;;  %v910_v42 = vpop.f32.mrf.mxu3 }
 0x118   : > { %v911_v57 = vadd.f32 %v910_v42, %v892_v40  ;;  %932 = sbr.rel (%p1398_p0) target bundleno = 299 (0x12b), region = 67 }
 0x11a   : > { %v920_v43 = vadd.f32 %v911_v57, %v328_v41 }
 0x11c   : > { %928 = vst [vmem:[#allocation2 + $0x38] sm:$0xff] %v920_v43 }
 0x11d   : > { %v933_v62 = vld [vmem:[#allocation2 + $0x30] sm:$0xff]  ;;  %v934_v44 = vld [vmem:[#allocation2] sm:$0xff]  ;;  %v935_v46 = vld [vmem:[#allocation2 + $0x18] sm:$0xff] }
 0x11e   : > { %v941_v63 = vld [vmem:[#allocation4] sm:$0x3]  ;;  %v936_v47 = vld [vmem:[#allocation2 + $0x10] sm:$0xff]  ;;  %v937_v48 = vld [vmem:[#allocation2 + $0x8] sm:$0xff] }
 0x11f   : > { %v943_v2 = vperm.slane %v941_v63, 0  ;;  %v944_v45 = vperm.slane %v941_v63, 1  ;;  %v938_v49 = vld [vmem:[#allocation2 + $0x20] sm:$0xff]  ;;  %v939_v50 = vld [vmem:[#allocation2 + $0x28] sm:$0xff] }
 0x121   : > { %v947_v52 = vadd.f32 %v943_v2, %v933_v62  ;;  %v948_v53 = vadd.f32 %v944_v45, %v934_v44  ;;  %v949_v54 = vadd.f32 %v943_v2, %v935_v46  ;;  %v950_v55 = vadd.f32 %v944_v45, %v936_v47 }
 0x122   : > { %v951_v56 = vadd.f32 %v943_v2, %v937_v48  ;;  %v952_v58 = vadd.f32 %v944_v45, %v938_v49  ;;  %v953_v59 = vadd.f32 %v943_v2, %v939_v50 }
 0x123   : > { %v940_v51 = vld [vmem:[#allocation2 + $0x38] sm:$0xff]  ;;  %v955_v61 = vmax.f32 %v947_v52, 0.0  ;;  %v956_v0 = vmax.f32 %v948_v53, 0.0  ;;  %v957_v1 = vmax.f32 %v949_v54, 0.0  ;;  %v958_v3 = vmax.f32 %v950_v55, 0.0 }
 0x124   : > { %v954_v60 = vadd.f32 %v944_v45, %v940_v51  ;;  %v959_v4 = vmax.f32 %v951_v56, 0.0  ;;  %v960_v5 = vmax.f32 %v952_v58, 0.0  ;;  %v961_v6 = vmax.f32 %v953_v59, 0.0 }
 0x125   : > { %v963_v8 = vpack.c.bf16 %v956_v0, %v955_v61  ;;  %v964_v9 = vpack.c.bf16 %v958_v3, %v957_v1 }
 0x126   : > { %v962_v7 = vmax.f32 %v954_v60, 0.0  ;;  %v965_v10 = vpack.c.bf16 %v960_v5, %v959_v4 }
 0x127   : > { %967 = vst [vmem:[%s1911_s3] sm:$0xff] %v963_v8 }
 0x128   : > { %v966_v11 = vpack.c.bf16 %v962_v7, %v961_v6  ;;  %968 = vst [vmem:[%s1911_s3 + $0x8] sm:$0xff] %v964_v9 }
 0x129   : > { %969 = vst [vmem:[%s1911_s3 + $0x10] sm:$0xff] %v965_v10 }
 0x12a   : > { %970 = vst [vmem:[%s1911_s3 + $0x18] sm:$0xff] %v966_v11 }
 0x12b PF: > { %s14_s16 = sadd.s32 1, %s1601_s16   ;;  %s1915_s12 = smov %s1589_s13 }
 0x12c   : > { %p11_p1 = scmp.ge.s32.totalorder %s14_s16, 4   ;;  %s1916_s13 = smov %s1675_s24 }
 0x12d   : > { %s1917_s14 = smov %s1597_s15  ;;  %s1918_s15 = smov %s1920_s18 }
 0x12e   :  { %13 = sbr.rel (!%p11_p1) target bundleno = 3 (0x3), region = 107 }
 0x133   :  { %1004 = vsyncpa [#allocation5], 1 }
 0x134   :  { %1006 = vsyncpa [#allocation5 + $0x1], 1 }

// kernel: resnet_forward.74
= control target key start
LH: loop header
LB: loop body
LE: loop exit
PB: predicated region body
PF: predicated region fallthrough
CT: control target
= control target key end

     0   :  { %s1572_s12 = smov 0   ;;  %s1574_s13 = smov 0   ;;  %s1830_s0 = inlined_call_operand.vmem [shape: bf16[32,1024], index: 0, kind: input, shape index: {}]   ;;  %s1831_s1 = inlined_call_operand.vmem [shape: bf16[1024,256], index: 1, kind: input, shape index: {}]   ;;  %s1832_s2 = inlined_call_operand.vmem [shape: f32[1,256], index: 2, kind: input, shape index: {}]   ;;  %s1833_s3 = inlined_call_operand.vmem [shape: bf16[32,256], index: 3, kind: output, shape index: {}]  }
   0x1   :  { %s1576_s14 = smov 0   ;;  %s1578_s15 = smov 0  }
   0x2   :  { %s1580_s16 = smov 0  }
   0x3 LB: > { %s25_s17 = sadd.s32 1, %s1545_s15  ;;  %p48_p1 = scmp.ne.s32.totalorder %s1537_s13, %s1533_s12  ;;  %s1549_s16 = sphi %s1580_s16, %s13_s16   ;;  %s1545_s15 = sphi %s1578_s15, %s1837_s15   ;;  %s1541_s14 = sphi %s1576_s14, %s1836_s14   ;;  %s1537_s13 = sphi %s1574_s13, %s1835_s13   ;;  %s1533_s12 = sphi %s1572_s12, %s1834_s12  }
   0x4   : > { %p26_p0 = scmp.ge.s32.totalorder %s25_s17, 2  ;;  %p49_p2 = scmp.eq.s32.totalorder %s1549_s16, 0 }
   0x5   : > { %s41_s19 = sadd.s32 1, %s1537_s13  ;;  %p1093_p5 = scmp.ge.s32.totalorder %s1549_s16, 2 }
   0x6   : > { %s1839_s17 = smov (%p26_p0, %s25_s17), 0  ;;  %p50_p3 = por %p49_p2, %p48_p1 }
   0x7   : > { %s37_s18 = ssub.s32 %s1545_s15, %s1839_s17  ;;  %164 = sbr.rel (%p1093_p5) target bundleno = 24 (0x18), region = 20 }
   0x8   : > { %p39_p4 = scmp.eq.s32.totalorder %s37_s18, 0 }
   0xa   : > { %s1607_s20 = scalar_select %p39_p4, %s1537_s13, %s41_s19  }
   0xc   : > { %167 = sbr.rel (!%p50_p3) target bundleno = 24 (0x18), region = 24  ;;  %s169_s21 = sand.u32 (%p50_p3), 1, %s1537_s13  }
   0xd   : > { %s1396_s22 = sshll.u32 (%p50_p3), %s1545_s15, 4  ;;  %s1094_s23 = sshll.u32 (%p50_p3), %s169_s21, 6 }
   0xe   : > { %s177_s26 = scalar_lea.vmem (%p50_p3), %s1830_s0, %s1396_s22  ;;  %s171_s27 = scalar_lea.vmem (%p50_p3), [#allocation3], %s1094_s23 }
   0xf   : > { %v190_v0 = vld [vmem:[%s177_s26] sm:$0xff] (%p50_p3)  ;;  %v192_v1 = vld [vmem:[%s177_s26 + $0x8] sm:$0xff] (%p50_p3) }
  0x10   : > { %v194_v2 = vld [vmem:[%s177_s26 + $0x20] sm:$0xff] (%p50_p3)  ;;  %191 = vst [vmem:[%s171_s27] sm:$0xff] (%p50_p3), %v190_v0  ;;  %v196_v3 = vld [vmem:[%s177_s26 + $0x28] sm:$0xff] (%p50_p3) }
  0x11   : > { %193 = vst [vmem:[%s171_s27 + $0x8] sm:$0xff] %v192_v1  ;;  %v198_v4 = vld [vmem:[%s177_s26 + $0x40] sm:$0xff]  ;;  %v200_v5 = vld [vmem:[%s177_s26 + $0x48] sm:$0xff] }
  0x12   : > { %195 = vst [vmem:[%s171_s27 + $0x10] sm:$0xff] %v194_v2  ;;  %v202_v6 = vld [vmem:[%s177_s26 + $0x60] sm:$0xff]  ;;  %v204_v7 = vld [vmem:[%s177_s26 + $0x68] sm:$0xff] }
  0x13   : > { %197 = vst [vmem:[%s171_s27 + $0x18] sm:$0xff] %v196_v3 }
  0x14   : > { %199 = vst [vmem:[%s171_s27 + $0x20] sm:$0xff] %v198_v4 }
  0x15   : > { %201 = vst [vmem:[%s171_s27 + $0x28] sm:$0xff] %v200_v5 }
  0x16   : > { %203 = vst [vmem:[%s171_s27 + $0x30] sm:$0xff] %v202_v6 }
  0x17   : > { %205 = vst [vmem:[%s171_s27 + $0x38] sm:$0xff] %v204_v7 }
  0x18 PF: > { %p1097_p6 = scmp.ge.s32.totalorder %s1549_s16, 1  ;;  %p225_p7 = scmp.lt.s32.totalorder %s1549_s16, 3 }
  0x1a   : > { %p226_p8 = pnand %p1097_p6, %p225_p7 }
  0x1b   : > { %s232_s28 = sand.u32 (!%p226_p8), 1, %s1533_s12   ;;  %s1099_s29 = sshll.u32 (!%p226_p8), %s1541_s14, 6 }
  0x1c   : > { %229 = sbr.rel (%p226_p8) target bundleno = 292 (0x124), region = 51  ;;  %s1098_s30 = sshll.u32 (!%p226_p8), %s232_s28, 6 }
  0x1d   : > { %p278_p9 = scmp.lt.s32.totalorder (!%p226_p8), %s1099_s29, 127  ;;  %s1624_s8 = scalar_lea.vmem (!%p226_p8), [#allocation3], %s1098_s30 }
  0x1e   : > { %p1102_p10 = scmp.ne.s32.totalorder (!%p226_p8), %s1541_s14, 0 }
  0x21   : > { %s1841_s29 = smov (!%p278_p9, %s1099_s29), 127  ;;  %308 = sbr.rel (%p1102_p10) target bundleno = 47 (0x2f), region = 59 }
  0x22   : > { %s1397_s4 = sshll.u32 %s1841_s29, 3 }
  0x23   : > { %s1622_s7 = scalar_lea.vmem %s1831_s1, %s1397_s4 }
  0x26   : > { %v1551_v8 = vmov 0.0  }
  0x27   : > { %309 = vst [vmem:[#allocation2 + $0x30] sm:$0xff] %v1551_v8 }
  0x28   : > { %310 = vst [vmem:[#allocation2] sm:$0xff] %v1551_v8 }
  0x29   : > { %311 = vst [vmem:[#allocation2 + $0x18] sm:$0xff] %v1551_v8 }
  0x2a   : > { %312 = vst [vmem:[#allocation2 + $0x10] sm:$0xff] %v1551_v8 }
  0x2b   : > { %313 = vst [vmem:[#allocation2 + $0x8] sm:$0xff] %v1551_v8 }
  0x2c   : > { %314 = vst [vmem:[#allocation2 + $0x20] sm:$0xff] %v1551_v8 }
  0x2d   : > { %315 = vst [vmem:[#allocation2 + $0x28] sm:$0xff] %v1551_v8 }
  0x2e   : > { %316 = vst [vmem:[#allocation2 + $0x38] sm:$0xff] %v1551_v8 }
  0x2f PF: > { %v1193_v9 = vld [vmem:[%s1622_s7 + $0x70] sm:$0xf]  ;;  %v1421_v10 = vld [vmem:[%s1622_s7 + $0x74] sm:$0xf0]  ;;  %v1185_v20 = vld [vmem:[%s1622_s7 + $0x60] sm:$0xf] }
  0x30   : > { %v1257_v11 = vld [vmem:[%s1622_s7 + $0xf0] sm:$0xf]  ;;  %v1194_v12 = vor.u32 %v1421_v10, %v1193_v9  ;;  %v1437_v13 = vld [vmem:[%s1622_s7 + $0xf4] sm:$0xf0]  ;;  %v1419_v22 = vld [vmem:[%s1622_s7 + $0x64] sm:$0xf0] }
  0x31   : > { %v1321_v14 = vld [vmem:[%s1622_s7 + $0x170] sm:$0xf]  ;;  %v1453_v15 = vld [vmem:[%s1622_s7 + $0x174] sm:$0xf0]  ;;  %v1258_v16 = vor.u32 %v1437_v13, %v1257_v11  ;;  %v1249_v23 = vld [vmem:[%s1622_s7 + $0xe0] sm:$0xf]  ;;  %v1186_v25 = vor.u32 %v1419_v22, %v1185_v20 }
  0x32   : > { %v1322_v17 = vor.u32 %v1453_v15, %v1321_v14  ;;  %v1385_v18 = vld [vmem:[%s1622_s7 + $0x1f0] sm:$0xf]  ;;  %v1469_v19 = vld [vmem:[%s1622_s7 + $0x1f4] sm:$0xf0]  ;;  %757 = vmatpush.bf16.msra.mxu0 %v1194_v12  ;;  %v1435_v24 = vld [vmem:[%s1622_s7 + $0xe4] sm:$0xf0] }
  0x33   : > { %v1386_v21 = vor.u32 %v1469_v19, %v1385_v18  ;;  %776 = vmatpush.bf16.msra.mxu1 %v1258_v16  ;;  %v1250_v26 = vor.u32 %v1435_v24, %v1249_v23  ;;  %v1313_v27 = vld [vmem:[%s1622_s7 + $0x160] sm:$0xf]  ;;  %v1451_v28 = vld [vmem:[%s1622_s7 + $0x164] sm:$0xf0]  ;;  %v1177_v32 = vld [vmem:[%s1622_s7 + $0x50] sm:$0xf] }
  0x34   : > { %795 = vmatpush.bf16.msra.mxu2 %v1322_v17  ;;  %v1377_v29 = vld [vmem:[%s1622_s7 + $0x1e0] sm:$0xf]  ;;  %v1314_v30 = vor.u32 %v1451_v28, %v1313_v27  ;;  %v1467_v31 = vld [vmem:[%s1622_s7 + $0x1e4] sm:$0xf0]  ;;  %v1417_v33 = vld [vmem:[%s1622_s7 + $0x54] sm:$0xf0] }
  0x35   : > { %814 = vmatpush.bf16.msra.mxu3 %v1386_v21  ;;  %v1378_v34 = vor.u32 %v1467_v31, %v1377_v29  ;;  %v1241_v35 = vld [vmem:[%s1622_s7 + $0xd0] sm:$0xf]  ;;  %v1433_v36 = vld [vmem:[%s1622_s7 + $0xd4] sm:$0xf0]  ;;  %v1178_v38 = vor.u32 %v1417_v33, %v1177_v32  ;;  %v1169_v44 = vld [vmem:[%s1622_s7 + $0x40] sm:$0xf] }
  0x36   : > { %v1305_v37 = vld [vmem:[%s1622_s7 + $0x150] sm:$0xf]  ;;  %758 = vmatpush.bf16.msra.mxu0 %v1186_v25  ;;  %v1449_v39 = vld [vmem:[%s1622_s7 + $0x154] sm:$0xf0]  ;;  %v1242_v42 = vor.u32 %v1433_v36, %v1241_v35  ;;  %v1415_v45 = vld [vmem:[%s1622_s7 + $0x44] sm:$0xf0] }
  0x37   : > { %v1369_v40 = vld [vmem:[%s1622_s7 + $0x1d0] sm:$0xf]  ;;  %v1465_v41 = vld [vmem:[%s1622_s7 + $0x1d4] sm:$0xf0]  ;;  %777 = vmatpush.bf16.msra.mxu1 %v1250_v26  ;;  %v1306_v43 = vor.u32 %v1449_v39, %v1305_v37  ;;  %v1233_v46 = vld [vmem:[%s1622_s7 + $0xc0] sm:$0xf]  ;;  %v1170_v53 = vor.u32 %v1415_v45, %v1169_v44 }
  0x38   : > { %796 = vmatpush.bf16.msra.mxu2 %v1314_v30  ;;  %v1370_v47 = vor.u32 %v1465_v41, %v1369_v40  ;;  %v1431_v48 = vld [vmem:[%s1622_s7 + $0xc4] sm:$0xf0]  ;;  %v1297_v49 = vld [vmem:[%s1622_s7 + $0x140] sm:$0xf]  ;;  %v1161_v56 = vld [vmem:[%s1622_s7 + $0x30] sm:$0xf] }
  0x39   : > { %815 = vmatpush.bf16.msra.mxu3 %v1378_v34  ;;  %v1447_v50 = vld [vmem:[%s1622_s7 + $0x144] sm:$0xf0]  ;;  %v1361_v51 = vld [vmem:[%s1622_s7 + $0x1c0] sm:$0xf]  ;;  %v1234_v54 = vor.u32 %v1431_v48, %v1233_v46  ;;  %v1413_v57 = vld [vmem:[%s1622_s7 + $0x34] sm:$0xf0] }
  0x3a   : > { %v1463_v52 = vld [vmem:[%s1622_s7 + $0x1c4] sm:$0xf0]  ;;  %759 = vmatpush.bf16.msra.mxu0 %v1178_v38  ;;  %v1298_v55 = vor.u32 %v1447_v50, %v1297_v49  ;;  %v1225_v58 = vld [vmem:[%s1622_s7 + $0xb0] sm:$0xf]  ;;  %v1429_v60 = vld [vmem:[%s1622_s7 + $0xb4] sm:$0xf0]  ;;  %v1162_v1 = vor.u32 %v1413_v57, %v1161_v56 }
  0x3b   : > { %778 = vmatpush.bf16.msra.mxu1 %v1242_v42  ;;  %v1362_v59 = vor.u32 %v1463_v52, %v1361_v51  ;;  %v1289_v61 = vld [vmem:[%s1622_s7 + $0x130] sm:$0xf]  ;;  %v1445_v62 = vld [vmem:[%s1622_s7 + $0x134] sm:$0xf0]  ;;  %v1226_v2 = vor.u32 %v1429_v60, %v1225_v58  ;;  %v1153_v4 = vld [vmem:[%s1622_s7 + $0x20] sm:$0xf] }
  0x3c   : > { %797 = vmatpush.bf16.msra.mxu2 %v1306_v43  ;;  %v1353_v63 = vld [vmem:[%s1622_s7 + $0x1b0] sm:$0xf]  ;;  %v1461_v0 = vld [vmem:[%s1622_s7 + $0x1b4] sm:$0xf0]  ;;  %v1290_v3 = vor.u32 %v1445_v62, %v1289_v61  ;;  %v1411_v5 = vld [vmem:[%s1622_s7 + $0x24] sm:$0xf0] }
  0x3d   : > { %816 = vmatpush.bf16.msra.mxu3 %v1370_v47  ;;  %v1217_v6 = vld [vmem:[%s1622_s7 + $0xa0] sm:$0xf]  ;;  %v1354_v7 = vor.u32 %v1461_v0, %v1353_v63  ;;  %v1427_v8 = vld [vmem:[%s1622_s7 + $0xa4] sm:$0xf0]  ;;  %v1154_v13 = vor.u32 %v1411_v5, %v1153_v4  ;;  %v1145_v16 = vld [vmem:[%s1622_s7 + $0x10] sm:$0xf] }
  0x3e   : > { %760 = vmatpush.bf16.msra.mxu0 %v1170_v53  ;;  %v1281_v9 = vld [vmem:[%s1622_s7 + $0x120] sm:$0xf]  ;;  %v1443_v10 = vld [vmem:[%s1622_s7 + $0x124] sm:$0xf0]  ;;  %v1218_v14 = vor.u32 %v1427_v8, %v1217_v6  ;;  %v1409_v17 = vld [vmem:[%s1622_s7 + $0x14] sm:$0xf0] }
  0x3f   : > { %779 = vmatpush.bf16.msra.mxu1 %v1234_v54  ;;  %v1345_v11 = vld [vmem:[%s1622_s7 + $0x1a0] sm:$0xf]  ;;  %v1459_v12 = vld [vmem:[%s1622_s7 + $0x1a4] sm:$0xf0]  ;;  %v1282_v15 = vor.u32 %v1443_v10, %v1281_v9  ;;  %v1209_v18 = vld [vmem:[%s1622_s7 + $0x90] sm:$0xf]  ;;  %v1146_v26 = vor.u32 %v1409_v17, %v1145_v16 }
  0x40   : > { %798 = vmatpush.bf16.msra.mxu2 %v1298_v55  ;;  %v1346_v19 = vor.u32 %v1459_v12, %v1345_v11  ;;  %v1425_v20 = vld [vmem:[%s1622_s7 + $0x94] sm:$0xf0]  ;;  %v1273_v21 = vld [vmem:[%s1622_s7 + $0x110] sm:$0xf]  ;;  %v1137_v25 = vld [vmem:[%s1622_s7] sm:$0xf] }
  0x41   : > { %817 = vmatpush.bf16.msra.mxu3 %v1362_v59  ;;  %v1441_v22 = vld [vmem:[%s1622_s7 + $0x114] sm:$0xf0]  ;;  %v1337_v23 = vld [vmem:[%s1622_s7 + $0x190] sm:$0xf]  ;;  %v1407_v27 = vld [vmem:[%s1622_s7 + $0x4] sm:$0xf0]  ;;  %v1210_v30 = vor.u32 %v1425_v20, %v1209_v18 }
  0x42   : > { %761 = vmatpush.bf16.msra.mxu0 %v1162_v1  ;;  %v1457_v24 = vld [vmem:[%s1622_s7 + $0x194] sm:$0xf0]  ;;  %v1201_v28 = vld [vmem:[%s1622_s7 + $0x80] sm:$0xf]  ;;  %v1423_v29 = vld [vmem:[%s1622_s7 + $0x84] sm:$0xf0]  ;;  %v1274_v31 = vor.u32 %v1441_v22, %v1273_v21  ;;  %v1138_v43 = vor.u32 %v1407_v27, %v1137_v25 }
  0x43   : > { %780 = vmatpush.bf16.msra.mxu1 %v1226_v2  ;;  %v1265_v32 = vld [vmem:[%s1622_s7 + $0x100] sm:$0xf]  ;;  %v1439_v33 = vld [vmem:[%s1622_s7 + $0x104] sm:$0xf0]  ;;  %v1338_v35 = vor.u32 %v1457_v24, %v1337_v23  ;;  %v1400_v38 = vld [vmem:[%s1624_s8 + $0xc] sm:$0xf0]  ;;  %v1202_v47 = vor.u32 %v1423_v29, %v1201_v28 }
  0x44   : > { %799 = vmatpush.bf16.msra.mxu2 %v1290_v3  ;;  %v1329_v34 = vld [vmem:[%s1622_s7 + $0x180] sm:$0xf]  ;;  %v1455_v36 = vld [vmem:[%s1622_s7 + $0x184] sm:$0xf0]  ;;  %v1398_v39 = vld [vmem:[%s1624_s8 + $0x4] sm:$0xf]  ;;  %v1266_v48 = vor.u32 %v1439_v33, %v1265_v32 }
  0x45   : > { %818 = vmatpush.bf16.msra.mxu3 %v1354_v7  ;;  %v1105_v37 = vld [vmem:[%s1624_s8] sm:$0xf]  ;;  %v1107_v40 = vld [vmem:[%s1624_s8 + $0x10] sm:$0xf0]  ;;  %v1323_v42 = vld [vmem:[%s1622_s7 + $0x178] sm:$0xf0]  ;;  %v1330_v52 = vor.u32 %v1455_v36, %v1329_v34 }
  0x46   : > { %762 = vmatpush.bf16.msra.mxu0 %v1154_v13  ;;  %v1452_v41 = vld [vmem:[%s1622_s7 + $0x174] sm:$0xf]  ;;  %v1113_v44 = vld [vmem:[%s1624_s8 + $0x8] sm:$0xf]  ;;  %v1259_v46 = vld [vmem:[%s1622_s7 + $0xf8] sm:$0xf0]  ;;  %v1706_v57 = vor.u32 %v1400_v38, %v1105_v37  ;;  %v1711_v62 = vor.u32 %v1398_v39, %v1107_v40 }
  0x47   : > { %781 = vmatpush.bf16.msra.mxu1 %v1218_v14  ;;  %v1436_v45 = vld [vmem:[%s1622_s7 + $0xf4] sm:$0xf]  ;;  %v1401_v49 = vld [vmem:[%s1624_s8 + $0x14] sm:$0xf0]  ;;  %v1399_v50 = vld [vmem:[%s1624_s8 + $0xc] sm:$0xf]  ;;  %v1326_v53 = vor.u32 %v1452_v41, %v1323_v42 }
  0x48   : > { %800 = vmatpush.bf16.msra.mxu2 %v1282_v15  ;;  %v1115_v51 = vld [vmem:[%s1624_s8 + $0x18] sm:$0xf0]  ;;  %v1420_v54 = vld [vmem:[%s1622_s7 + $0x74] sm:$0xf]  ;;  %v1262_v58 = vor.u32 %v1436_v45, %v1259_v46  ;;  %v1450_v60 = vld [vmem:[%s1622_s7 + $0x164] sm:$0xf]  ;;  %v1713_v63 = vor.u32 %v1401_v49, %v1113_v44 }
  0x49   : > { %819 = vmatpush.bf16.msra.mxu3 %v1346_v19  ;;  %v1195_v55 = vld [vmem:[%s1622_s7 + $0x78] sm:$0xf0]  ;;  %v1468_v56 = vld [vmem:[%s1622_s7 + $0x1f4] sm:$0xf]  ;;  %v1315_v61 = vld [vmem:[%s1622_s7 + $0x168] sm:$0xf0]  ;;  %v1717_v2 = vor.u32 %v1399_v50, %v1115_v51 }
  0x4a   : > { %763 = vmatpush.bf16.msra.mxu0 %v1146_v26  ;;  %v1387_v59 = vld [vmem:[%s1622_s7 + $0x1f8] sm:$0xf0]  ;;  %v1434_v0 = vld [vmem:[%s1622_s7 + $0xe4] sm:$0xf]  ;;  %v1251_v1 = vld [vmem:[%s1622_s7 + $0xe8] sm:$0xf0]  ;;  %v1198_v3 = vor.u32 %v1420_v54, %v1195_v55  ;;  %v1318_v5 = vor.u32 %v1450_v60, %v1315_v61 }
  0x4b   : > { %782 = vmatpush.bf16.msra.mxu1 %v1210_v30  ;;  %v1390_v4 = vor.u32 %v1468_v56, %v1387_v59  ;;  %v1418_v6 = vld [vmem:[%s1622_s7 + $0x64] sm:$0xf]  ;;  %v1187_v7 = vld [vmem:[%s1622_s7 + $0x68] sm:$0xf0]  ;;  %v1254_v9 = vor.u32 %v1434_v0, %v1251_v1  ;;  %v1448_v11 = vld [vmem:[%s1622_s7 + $0x154] sm:$0xf] }
  0x4c   : > { %801 = vmatpush.bf16.msra.mxu2 %v1274_v31  ;;  %v1466_v8 = vld [vmem:[%s1622_s7 + $0x1e4] sm:$0xf]  ;;  %v1379_v10 = vld [vmem:[%s1622_s7 + $0x1e8] sm:$0xf0]  ;;  %v1307_v12 = vld [vmem:[%s1622_s7 + $0x158] sm:$0xf0]  ;;  %v1190_v15 = vor.u32 %v1418_v6, %v1187_v7 }
  0x4d   : > { %820 = vmatpush.bf16.msra.mxu3 %v1338_v35  ;;  %v1432_v13 = vld [vmem:[%s1622_s7 + $0xd4] sm:$0xf]  ;;  %v1243_v14 = vld [vmem:[%s1622_s7 + $0xd8] sm:$0xf0]  ;;  %v1382_v16 = vor.u32 %v1466_v8, %v1379_v10  ;;  %v1310_v17 = vor.u32 %v1448_v11, %v1307_v12  ;;  %v1446_v23 = vld [vmem:[%s1622_s7 + $0x144] sm:$0xf] }
  0x4e   : > { %764 = vmatpush.bf16.msra.mxu0 %v1138_v43  ;;  %v1416_v18 = vld [vmem:[%s1622_s7 + $0x54] sm:$0xf]  ;;  %v1179_v19 = vld [vmem:[%s1622_s7 + $0x58] sm:$0xf0]  ;;  %v1246_v21 = vor.u32 %v1432_v13, %v1243_v14  ;;  %v1299_v24 = vld [vmem:[%s1622_s7 + $0x148] sm:$0xf0] }
  0x4f   : > { %783 = vmatpush.bf16.msra.mxu1 %v1202_v47  ;;  %v1464_v20 = vld [vmem:[%s1622_s7 + $0x1d4] sm:$0xf]  ;;  %v1371_v22 = vld [vmem:[%s1622_s7 + $0x1d8] sm:$0xf0]  ;;  %v1430_v25 = vld [vmem:[%s1622_s7 + $0xc4] sm:$0xf]  ;;  %v1182_v27 = vor.u32 %v1416_v18, %v1179_v19  ;;  %v1302_v32 = vor.u32 %v1446_v23, %v1299_v24 }
  0x50   : > { %802 = vmatpush.bf16.msra.mxu2 %v1266_v48  ;;  %v1235_v26 = vld [vmem:[%s1622_s7 + $0xc8] sm:$0xf0]  ;;  %v1414_v28 = vld [vmem:[%s1622_s7 + $0x44] sm:$0xf]  ;;  %v1374_v31 = vor.u32 %v1464_v20, %v1371_v22  ;;  %v1121_v34 = vld [vmem:[%s1624_s8 + $0x20] sm:$0xf] }
  0x51   : > { %821 = vmatpush.bf16.msra.mxu3 %v1330_v52  ;;  %765 = vmatmul.bf16.vlgmr.msra.gmra.mxu0 %v1706_v57  ;;  %v1171_v29 = vld [vmem:[%s1622_s7 + $0x48] sm:$0xf0]  ;;  %v1462_v30 = vld [vmem:[%s1622_s7 + $0x1c4] sm:$0xf]  ;;  %v1404_v35 = vld [vmem:[%s1624_s8 + $0x2c] sm:$0xf0]  ;;  %v1238_v36 = vor.u32 %v1430_v25, %v1235_v26 }
  0x52   : > { %784 = vmatmul.bf16.vlgmr.msra.gmra.mxu1 %v1711_v62  ;;  %833 = vmatpush.bf16.msrb.mxu0 %v1198_v3  ;;  %v1363_v33 = vld [vmem:[%s1622_s7 + $0x1c8] sm:$0xf0]  ;;  %v1402_v37 = vld [vmem:[%s1624_s8 + $0x24] sm:$0xf]  ;;  %v1123_v38 = vld [vmem:[%s1624_s8 + $0x30] sm:$0xf0]  ;;  %v1174_v44 = vor.u32 %v1414_v28, %v1171_v29 }
  0x53   : > { %852 = vmatpush.bf16.msrb.mxu1 %v1262_v58  ;;  %803 = vmatmul.bf16.vlgmr.msra.gmra.mxu2 %v1713_v63  ;;  %v1444_v39 = vld [vmem:[%s1622_s7 + $0x134] sm:$0xf]  ;;  %v1291_v40 = vld [vmem:[%s1622_s7 + $0x138] sm:$0xf0]  ;;  %v1129_v41 = vld [vmem:[%s1624_s8 + $0x28] sm:$0xf]  ;;  %v1366_v48 = vor.u32 %v1462_v30, %v1363_v33  ;;  %v1763_v59 = vor.u32 %v1402_v37, %v1123_v38 }
  0x54   : > { %871 = vmatpush.bf16.msrb.mxu2 %v1326_v53  ;;  %822 = vmatmul.bf16.vlgmr.msra.gmra.mxu3 %v1717_v2  ;;  %v1428_v42 = vld [vmem:[%s1622_s7 + $0xb4] sm:$0xf]  ;;  %v1227_v43 = vld [vmem:[%s1622_s7 + $0xb8] sm:$0xf0]  ;;  %v1405_v45 = vld [vmem:[%s1624_s8 + $0x34] sm:$0xf0]  ;;  %v1294_v49 = vor.u32 %v1444_v39, %v1291_v40  ;;  %v1758_v53 = vor.u32 %v1404_v35, %v1121_v34 }
  0x55   : > { %890 = vmatpush.bf16.msrb.mxu3 %v1390_v4  ;;  %v1403_v46 = vld [vmem:[%s1624_s8 + $0x2c] sm:$0xf]  ;;  %v1131_v47 = vld [vmem:[%s1624_s8 + $0x38] sm:$0xf0]  ;;  %v1412_v50 = vld [vmem:[%s1622_s7 + $0x34] sm:$0xf]  ;;  %v1230_v54 = vor.u32 %v1428_v42, %v1227_v43  ;;  %v1765_v60 = vor.u32 %v1405_v45, %v1129_v41 }
  0x56   : > { %834 = vmatpush.bf16.msrb.mxu0 %v1190_v15  ;;  %v1163_v51 = vld [vmem:[%s1622_s7 + $0x38] sm:$0xf0]  ;;  %v1460_v52 = vld [vmem:[%s1622_s7 + $0x1b4] sm:$0xf]  ;;  %v1442_v56 = vld [vmem:[%s1622_s7 + $0x124] sm:$0xf]  ;;  %v1134_v1 = vor.u32 %v1403_v46, %v1131_v47 }
  0x57   : > { %853 = vmatpush.bf16.msrb.mxu1 %v1254_v9  ;;  %v1355_v55 = vld [vmem:[%s1622_s7 + $0x1b8] sm:$0xf0]  ;;  %v1283_v58 = vld [vmem:[%s1622_s7 + $0x128] sm:$0xf0]  ;;  %v1426_v61 = vld [vmem:[%s1622_s7 + $0xa4] sm:$0xf]  ;;  %v1166_v3 = vor.u32 %v1412_v50, %v1163_v51 }
  0x58   : > { %872 = vmatpush.bf16.msrb.mxu2 %v1318_v5  ;;  %v1219_v0 = vld [vmem:[%s1622_s7 + $0xa8] sm:$0xf0]  ;;  %v1358_v4 = vor.u32 %v1460_v52, %v1355_v55  ;;  %v1286_v5 = vor.u32 %v1442_v56, %v1283_v58  ;;  %v1410_v6 = vld [vmem:[%s1622_s7 + $0x24] sm:$0xf]  ;;  %v1440_v11 = vld [vmem:[%s1622_s7 + $0x114] sm:$0xf] }
  0x59   : > { %891 = vmatpush.bf16.msrb.mxu3 %v1382_v16  ;;  %v1155_v7 = vld [vmem:[%s1622_s7 + $0x28] sm:$0xf0]  ;;  %v1458_v8 = vld [vmem:[%s1622_s7 + $0x1a4] sm:$0xf]  ;;  %v1222_v9 = vor.u32 %v1426_v61, %v1219_v0  ;;  %v1275_v12 = vld [vmem:[%s1622_s7 + $0x118] sm:$0xf0] }
  0x5a   : > { %835 = vmatpush.bf16.msrb.mxu0 %v1182_v27  ;;  %v1347_v10 = vld [vmem:[%s1622_s7 + $0x1a8] sm:$0xf0]  ;;  %v1424_v13 = vld [vmem:[%s1622_s7 + $0x94] sm:$0xf]  ;;  %v1211_v14 = vld [vmem:[%s1622_s7 + $0x98] sm:$0xf0]  ;;  %v1158_v15 = vor.u32 %v1410_v6, %v1155_v7 }
  0x5b   : > { %854 = vmatpush.bf16.msrb.mxu1 %v1246_v21  ;;  %v1350_v16 = vor.u32 %v1458_v8, %v1347_v10  ;;  %v1408_v18 = vld [vmem:[%s1622_s7 + $0x14] sm:$0xf]  ;;  %v1147_v19 = vld [vmem:[%s1622_s7 + $0x18] sm:$0xf0]  ;;  %v1214_v21 = vor.u32 %v1424_v13, %v1211_v14  ;;  %v1438_v23 = vld [vmem:[%s1622_s7 + $0x104] sm:$0xf] }
  0x5c   : > { %873 = vmatpush.bf16.msrb.mxu2 %v1310_v17  ;;  %v1278_v17 = vor.u32 %v1440_v11, %v1275_v12  ;;  %v1456_v20 = vld [vmem:[%s1622_s7 + $0x194] sm:$0xf]  ;;  %v1339_v22 = vld [vmem:[%s1622_s7 + $0x198] sm:$0xf0]  ;;  %v1267_v24 = vld [vmem:[%s1622_s7 + $0x108] sm:$0xf0]  ;;  %v1150_v27 = vor.u32 %v1408_v18, %v1147_v19 }
  0x5d   : > { %892 = vmatpush.bf16.msrb.mxu3 %v1374_v31  ;;  %v1422_v25 = vld [vmem:[%s1622_s7 + $0x84] sm:$0xf]  ;;  %v1203_v26 = vld [vmem:[%s1622_s7 + $0x88] sm:$0xf0]  ;;  %v1342_v28 = vor.u32 %v1456_v20, %v1339_v22  ;;  %v1270_v29 = vor.u32 %v1438_v23, %v1267_v24  ;;  %v317_v43 = vld [vmem:[#allocation2 + $0x30] sm:$0xff]  ;;  %p1391_p11 = scmp.ne.s32.totalorder %s1541_s14, 1 }
  0x5e   : > { %836 = vmatpush.bf16.msrb.mxu0 %v1174_v44  ;;  %v1406_v30 = vld [vmem:[%s1622_s7 + $0x4] sm:$0xf]  ;;  %v1139_v31 = vld [vmem:[%s1622_s7 + $0x8] sm:$0xf0]  ;;  %v320_v24 = vld [vmem:[#allocation2 + $0x10] sm:$0xff] }
  0x5f   : > { %855 = vmatpush.bf16.msrb.mxu1 %v1238_v36  ;;  %v1454_v33 = vld [vmem:[%s1622_s7 + $0x184] sm:$0xf]  ;;  %v1331_v34 = vld [vmem:[%s1622_s7 + $0x188] sm:$0xf0]  ;;  %v1142_v35 = vor.u32 %v1406_v30, %v1139_v31 }
  0x60   : > { %874 = vmatpush.bf16.msrb.mxu2 %v1302_v32  ;;  %v1206_v32 = vor.u32 %v1422_v25, %v1203_v26  ;;  %v1334_v36 = vor.u32 %v1454_v33, %v1331_v34  ;;  %v323_v6 = vld [vmem:[#allocation2 + $0x28] sm:$0xff]  ;;  %v322_v33 = vld [vmem:[#allocation2 + $0x20] sm:$0xff] }
  0x61   : > { %893 = vmatpush.bf16.msrb.mxu3 %v1366_v48  ;;  %770 = vmatmul.bf16.gmra.mxu0 %v1758_v53 }
  0x62   : > { %789 = vmatmul.bf16.gmra.mxu1 %v1763_v59  ;;  %837 = vmatpush.bf16.msrb.mxu0 %v1166_v3 }
  0x63   : > { %856 = vmatpush.bf16.msrb.mxu1 %v1230_v54  ;;  %808 = vmatmul.bf16.gmra.mxu2 %v1765_v60 }
  0x64   : > { %875 = vmatpush.bf16.msrb.mxu2 %v1294_v49  ;;  %827 = vmatmul.bf16.gmra.mxu3 %v1134_v1  ;;  %v319_v49 = vld [vmem:[#allocation2 + $0x18] sm:$0xff] }
  0x65   : > { %894 = vmatpush.bf16.msrb.mxu3 %v1358_v4 }
  0x66   : > { %838 = vmatpush.bf16.msrb.mxu0 %v1158_v15 }
  0x67   : > { %857 = vmatpush.bf16.msrb.mxu1 %v1222_v9 }
  0x68   : > { %876 = vmatpush.bf16.msrb.mxu2 %v1286_v5 }
  0x69   : > { %895 = vmatpush.bf16.msrb.mxu3 %v1350_v16 }
  0x6a   : > { %839 = vmatpush.bf16.msrb.mxu0 %v1150_v27 }
  0x6b   : > { %858 = vmatpush.bf16.msrb.mxu1 %v1214_v21 }
  0x6c   : > { %877 = vmatpush.bf16.msrb.mxu2 %v1278_v17  ;;  %v318_v17 = vld [vmem:[#allocation2] sm:$0xff] }
  0x6d   : > { %896 = vmatpush.bf16.msrb.mxu3 %v1342_v28 }
  0x6e   : > { %840 = vmatpush.bf16.msrb.mxu0 %v1142_v35 }
  0x6f   : > { %859 = vmatpush.bf16.msrb.mxu1 %v1206_v32 }
  0x70   : > { %878 = vmatpush.bf16.msrb.mxu2 %v1270_v29 }
  0x71   : > { %897 = vmatpush.bf16.msrb.mxu3 %v1334_v36  ;;  %841 = vmatmul.bf16.vlgmr.msrb.gmra.mxu0 %v1706_v57 }
  0x72   : > { %860 = vmatmul.bf16.vlgmr.msrb.gmra.mxu1 %v1711_v62 }
  0x73   : > { %879 = vmatmul.bf16.vlgmr.msrb.gmra.mxu2 %v1713_v63 }
  0x74   : > { %898 = vmatmul.bf16.vlgmr.msrb.gmra.mxu3 %v1717_v2 }
  0x81   : > { %846 = vmatmul.bf16.gmra.mxu0 %v1758_v53 }
  0x82   : > { %865 = vmatmul.bf16.gmra.mxu1 %v1763_v59  ;;  %v321_v59 = vld [vmem:[#allocation2 + $0x8] sm:$0xff] }
  0x83   : > { %884 = vmatmul.bf16.gmra.mxu2 %v1765_v60 }
  0x84   : > { %903 = vmatmul.bf16.gmra.mxu3 %v1134_v1 }
  0xce   : > { %v766_v37 = vpop.f32.mrf.mxu0 }
  0xcf   : > { %v785_v38 = vpop.f32.mrf.mxu1 }
  0xd0   : > { %v786_v39 = vadd.f32 %v785_v38, %v766_v37 }
  0xd6   : > { %v804_v40 = vpop.f32.mrf.mxu2  ;;  %v768_v57 = vpop.f32.mrf.mxu0 }
  0xd7   : > { %v805_v41 = vadd.f32 %v804_v40, %v786_v39  ;;  %v823_v42 = vpop.f32.mrf.mxu3  ;;  %v787_v62 = vpop.f32.mrf.mxu1 }
  0xd8   : > { %v788_v2 = vadd.f32 %v787_v62, %v768_v57 }
  0xd9   : > { %v824_v44 = vadd.f32 %v823_v42, %v805_v41  ;;  %v324_v41 = vld [vmem:[#allocation2 + $0x38] sm:$0xff] }
  0xdb   : > { %v909_v63 = vadd.f32 %v824_v44, %v317_v43 }
  0xdd   : > { %917 = vst [vmem:[#allocation2 + $0x30] sm:$0xff] %v909_v63 }
  0xde   : > { %v806_v45 = vpop.f32.mrf.mxu2  ;;  %v771_v48 = vpop.f32.mrf.mxu0 }
  0xdf   : > { %v807_v46 = vadd.f32 %v806_v45, %v788_v2  ;;  %v825_v47 = vpop.f32.mrf.mxu3  ;;  %v790_v50 = vpop.f32.mrf.mxu1 }
  0xe0   : > { %v791_v53 = vadd.f32 %v790_v50, %v771_v48 }
  0xe1   : > { %v826_v51 = vadd.f32 %v825_v47, %v807_v46 }
  0xe3   : > { %v911_v52 = vadd.f32 %v826_v51, %v319_v49 }
  0xe5   : > { %919 = vst [vmem:[#allocation2 + $0x18] sm:$0xff] %v911_v52 }
  0xe6   : > { %v809_v54 = vpop.f32.mrf.mxu2  ;;  %v773_v58 = vpop.f32.mrf.mxu0 }
  0xe7   : > { %v810_v55 = vadd.f32 %v809_v54, %v791_v53  ;;  %v828_v56 = vpop.f32.mrf.mxu3  ;;  %v792_v60 = vpop.f32.mrf.mxu1 }
  0xe8   : > { %v793_v1 = vadd.f32 %v792_v60, %v773_v58 }
  0xe9   : > { %v829_v61 = vadd.f32 %v828_v56, %v810_v55 }
  0xeb   : > { %v913_v0 = vadd.f32 %v829_v61, %v321_v59 }
  0xed   : > { %921 = vst [vmem:[#allocation2 + $0x8] sm:$0xff] %v913_v0 }
  0xee   : > { %v811_v3 = vpop.f32.mrf.mxu2  ;;  %v842_v7 = vpop.f32.mrf.mxu0 }
  0xef   : > { %v812_v4 = vadd.f32 %v811_v3, %v793_v1  ;;  %v830_v5 = vpop.f32.mrf.mxu3  ;;  %v861_v8 = vpop.f32.mrf.mxu1 }
  0xf0   : > { %v862_v11 = vadd.f32 %v861_v8, %v842_v7 }
  0xf1   : > { %v831_v9 = vadd.f32 %v830_v5, %v812_v4 }
  0xf3   : > { %v915_v10 = vadd.f32 %v831_v9, %v323_v6 }
  0xf5   : > { %923 = vst [vmem:[#allocation2 + $0x28] sm:$0xff] %v915_v10 }
  0xf6   : > { %v880_v12 = vpop.f32.mrf.mxu2  ;;  %v844_v15 = vpop.f32.mrf.mxu0 }
  0xf7   : > { %v899_v13 = vpop.f32.mrf.mxu3  ;;  %v881_v14 = vadd.f32 %v880_v12, %v862_v11  ;;  %v863_v16 = vpop.f32.mrf.mxu1 }
  0xf8   : > { %v864_v20 = vadd.f32 %v863_v16, %v844_v15 }
  0xf9   : > { %v900_v18 = vadd.f32 %v899_v13, %v881_v14 }
  0xfb   : > { %v910_v19 = vadd.f32 %v900_v18, %v318_v17 }
  0xfd   : > { %918 = vst [vmem:[#allocation2] sm:$0xff] %v910_v19 }
  0xfe   : > { %v882_v21 = vpop.f32.mrf.mxu2  ;;  %v847_v25 = vpop.f32.mrf.mxu0 }
  0xff   : > { %v901_v22 = vpop.f32.mrf.mxu3  ;;  %v883_v23 = vadd.f32 %v882_v21, %v864_v20  ;;  %v866_v26 = vpop.f32.mrf.mxu1 }
 0x100   : > { %v867_v29 = vadd.f32 %v866_v26, %v847_v25 }
 0x101   : > { %v902_v27 = vadd.f32 %v901_v22, %v883_v23 }
 0x103   : > { %v912_v28 = vadd.f32 %v902_v27, %v320_v24 }
 0x105   : > { %920 = vst [vmem:[#allocation2 + $0x10] sm:$0xff] %v912_v28 }
 0x106   : > { %v885_v30 = vpop.f32.mrf.mxu2  ;;  %v849_v35 = vpop.f32.mrf.mxu0 }
 0x107   : > { %v904_v31 = vpop.f32.mrf.mxu3  ;;  %v886_v32 = vadd.f32 %v885_v30, %v867_v29  ;;  %v868_v36 = vpop.f32.mrf.mxu1 }
 0x108   : > { %v869_v38 = vadd.f32 %v868_v36, %v849_v35 }
 0x109   : > { %v905_v34 = vadd.f32 %v904_v31, %v886_v32 }
 0x10b   : > { %v914_v37 = vadd.f32 %v905_v34, %v322_v33 }
 0x10d   : > { %922 = vst [vmem:[#allocation2 + $0x20] sm:$0xff] %v914_v37 }
 0x10e   : > { %v887_v39 = vpop.f32.mrf.mxu2 }
 0x10f   : > { %v888_v40 = vadd.f32 %v887_v39, %v869_v38  ;;  %v906_v42 = vpop.f32.mrf.mxu3 }
 0x111   : > { %v907_v57 = vadd.f32 %v906_v42, %v888_v40  ;;  %928 = sbr.rel (%p1391_p11) target bundleno = 292 (0x124), region = 63 }
 0x113   : > { %v916_v43 = vadd.f32 %v907_v57, %v324_v41 }
 0x115   : > { %924 = vst [vmem:[#allocation2 + $0x38] sm:$0xff] %v916_v43 }
 0x116   : > { %v929_v62 = vld [vmem:[#allocation2 + $0x30] sm:$0xff]  ;;  %v930_v44 = vld [vmem:[#allocation2] sm:$0xff]  ;;  %v931_v46 = vld [vmem:[#allocation2 + $0x18] sm:$0xff] }
 0x117   : > { %v937_v63 = vld [vmem:[%s1832_s2] sm:$0x3]  ;;  %v932_v47 = vld [vmem:[#allocation2 + $0x10] sm:$0xff]  ;;  %v933_v48 = vld [vmem:[#allocation2 + $0x8] sm:$0xff] }
 0x118   : > { %v939_v2 = vperm.slane %v937_v63, 0  ;;  %v940_v45 = vperm.slane %v937_v63, 1  ;;  %v934_v49 = vld [vmem:[#allocation2 + $0x20] sm:$0xff]  ;;  %v935_v50 = vld [vmem:[#allocation2 + $0x28] sm:$0xff] }
 0x11a   : > { %v943_v52 = vadd.f32 %v939_v2, %v929_v62  ;;  %v944_v53 = vadd.f32 %v940_v45, %v930_v44  ;;  %v945_v54 = vadd.f32 %v939_v2, %v931_v46  ;;  %v946_v55 = vadd.f32 %v940_v45, %v932_v47 }
 0x11b   : > { %v947_v56 = vadd.f32 %v939_v2, %v933_v48  ;;  %v948_v58 = vadd.f32 %v940_v45, %v934_v49  ;;  %v949_v59 = vadd.f32 %v939_v2, %v935_v50 }
 0x11c   : > { %v936_v51 = vld [vmem:[#allocation2 + $0x38] sm:$0xff]  ;;  %v951_v61 = vmax.f32 %v943_v52, 0.0  ;;  %v952_v0 = vmax.f32 %v944_v53, 0.0  ;;  %v953_v1 = vmax.f32 %v945_v54, 0.0  ;;  %v954_v3 = vmax.f32 %v946_v55, 0.0 }
 0x11d   : > { %v950_v60 = vadd.f32 %v940_v45, %v936_v51  ;;  %v955_v4 = vmax.f32 %v947_v56, 0.0  ;;  %v956_v5 = vmax.f32 %v948_v58, 0.0  ;;  %v957_v6 = vmax.f32 %v949_v59, 0.0 }
 0x11e   : > { %v959_v8 = vpack.c.bf16 %v952_v0, %v951_v61  ;;  %v960_v9 = vpack.c.bf16 %v954_v3, %v953_v1 }
 0x11f   : > { %v958_v7 = vmax.f32 %v950_v60, 0.0  ;;  %v961_v10 = vpack.c.bf16 %v956_v5, %v955_v4 }
 0x120   : > { %963 = vst [vmem:[%s1833_s3] sm:$0xff] %v959_v8 }
 0x121   : > { %v962_v11 = vpack.c.bf16 %v958_v7, %v957_v6  ;;  %964 = vst [vmem:[%s1833_s3 + $0x8] sm:$0xff] %v960_v9 }
 0x122   : > { %965 = vst [vmem:[%s1833_s3 + $0x10] sm:$0xff] %v961_v10 }
 0x123   : > { %966 = vst [vmem:[%s1833_s3 + $0x18] sm:$0xff] %v962_v11 }
 0x124 PF: > { %s13_s16 = sadd.s32 1, %s1549_s16   ;;  %s1834_s12 = smov %s1537_s13 }
 0x125   : > { %p10_p12 = scmp.ge.s32.totalorder %s13_s16, 4   ;;  %s1835_s13 = smov %s1607_s20 }
 0x126   : > { %s1836_s14 = smov %s1545_s15  ;;  %s1837_s15 = smov %s1839_s17 }
 0x127   :  { %12 = sbr.rel (!%p10_p12) target bundleno = 3 (0x3), region = 104 }

</bundles_post_ra>
